<compile_context>
chip_gen: v7x
topology: tpu7x:2x2x1
jax: 0.10.0
libtpu: 0.0.40
codegen_flags: <defaults>
</compile_context>

<pallas_src>
import functools

import jax
import jax.numpy as jnp
from jax.experimental import pallas as pl
from jax.experimental.pallas import tpu as pltpu

_LANE = 128


def _round_up(x, m):
    return ((x + m - 1) // m) * m


def _pad2(a, rows, cols):
    return jnp.pad(a, ((0, rows - a.shape[0]), (0, cols - a.shape[1])))


def _plan_tiles(num_nodes, tile_m, tile_k):
    """Clamp tiles to the lane-padded node count; pad rows/cols independently.

    tile_k is kept a multiple of tile_m so n_cols_p >= n_rows_p, which
    guarantees the in-kernel root slice of the VMEM-resident feature matrix
    stays in bounds.
    """
    assert tile_m % _LANE == 0 and tile_k % _LANE == 0, "tiles must be multiples of 128"
    n_lane = _round_up(num_nodes, _LANE)
    tile_m = min(tile_m, n_lane)
    tile_k = min(tile_k, n_lane)
    tile_k = max(tile_k, tile_m)
    tile_k = (tile_k // tile_m) * tile_m            # tile_k % tile_m == 0
    n_rows_p = _round_up(num_nodes, tile_m)          # adjacency rows / output rows
    n_cols_p = _round_up(num_nodes, tile_k)          # adjacency cols / feature rows
    return tile_m, tile_k, n_rows_p, n_cols_p


def build_graph_operands(edge_index, num_nodes, n_rows_p, n_cols_p):
    """One-time dense graph operands (build once, reuse across forward calls).

    adj_i8[i, j]  = multiplicity of edge (j -> i), as int8 counts (0/1 for a
                    simple graph). Half the HBM bytes of a bf16 adjacency.
    inv_deg[i, 0] = 1 / max(in_degree(i), 1), f32 (exact mean normalization,
                    applied to the f32 accumulator in the kernel epilogue).
    Padded rows/cols stay zero, so padded nodes never pollute real rows.
    """
    del num_nodes
    src = edge_index[0].astype(jnp.int32)
    dst = edge_index[1].astype(jnp.int32)
    counts = jnp.zeros((n_rows_p, n_cols_p), jnp.int32).at[dst, src].add(1)
    deg = jnp.sum(counts, axis=1, keepdims=True).astype(jnp.float32)
    inv_deg = 1.0 / jnp.maximum(deg, 1.0)
    return counts.astype(jnp.int8), inv_deg


def _vmem_limit_bytes(tile_m, tile_k, n_cols_p, fin_p, fout_p):
    bf16, f32, i8 = 2, 4, 1
    need = (2 * tile_m * tile_k * i8            # A tile, double-buffered
            + 2 * n_cols_p * fin_p * bf16       # VMEM-resident x (budget 2 buffers)
            + 2 * tile_m * _LANE * f32          # inv_deg tile (lane-padded)
            + 2 * 2 * fin_p * fout_p * bf16     # W_l, W_r
            + 2 * 8 * fout_p * f32              # bias (sublane-padded)
            + 2 * tile_m * fout_p * f32         # output tile (f32 worst case)
            + tile_m * fin_p * f32)             # accumulator scratch
    # 2x headroom, capped at 56 MiB so the same tiles also fit v7x's 64 MiB VMEM.
    return int(min(max(2 * need, 32 * 1024 * 1024), 56 * 1024 * 1024))


def _sage_layer_kernel(a_ref, x_ref, invdeg_ref, wl_ref, wr_ref, b_ref,
                       o_ref, acc_ref, *, tile_m, tile_k, apply_relu):
    """One SAGEConv layer tile.

    Main loop (per k):   acc += A[i, k] @ x[k]     (bf16 MXU, f32 accumulate)
    Epilogue (k == last): out = (acc * 1/deg) @ W_l + x[i] @ W_r + b  [+ relu]
    """
    i = pl.program_id(0)
    k = pl.program_id(1)

    @pl.when(k == 0)
    def _():
        acc_ref[...] = jnp.zeros_like(acc_ref)

    # Neighbor-feature slice from the VMEM-resident feature matrix.
    col0 = pl.multiple_of(k * tile_k, tile_k)
    xk = x_ref[pl.ds(col0, tile_k), :]
    # int8 0/1 adjacency -> bf16 for the MXU (cast is VPU work, hidden under DMA).
    a = a_ref[...].astype(jnp.bfloat16)
    acc_ref[...] += jnp.dot(a, xk, preferred_element_type=jnp.float32)

    @pl.when(k == pl.num_programs(1) - 1)
    def _():
        # Root features for this row tile (in bounds because n_cols_p >= n_rows_p).
        row0 = pl.multiple_of(i * tile_m, tile_m)
        xr = x_ref[pl.ds(row0, tile_m), :]
        # Exact mean normalization in f32, then bf16 epilogue matmuls.
        agg = (acc_ref[...] * invdeg_ref[...]).astype(jnp.bfloat16)
        out = jnp.dot(agg, wl_ref[...], preferred_element_type=jnp.float32)
        out += jnp.dot(xr, wr_ref[...], preferred_element_type=jnp.float32)
        out += b_ref[...]                               # (1, Fout_p) f32 broadcast
        if apply_relu:
            out = jnp.maximum(out, 0.0)
        o_ref[...] = out.astype(o_ref.dtype)


def sage_layer(adj_i8, x_bf16, inv_deg, w_l, w_r, b_l, *,
               tile_m, tile_k, apply_relu, out_dtype):
    """Tiled Pallas call for one SAGEConv layer.

    adj_i8:  (n_rows_p, n_cols_p) int8 edge counts (0/1).
    x_bf16:  (n_cols_p, Fin_p) bf16 node features (lane-padded, VMEM-resident).
    inv_deg: (n_rows_p, 1) f32 inverse in-degrees.
    w_l/w_r: (Fin_p, Fout_p) bf16 (already transposed: out = x @ W).
    b_l:     (1, Fout_p) f32.
    """
    n_rows_p, n_cols_p = adj_i8.shape
    fin_p = x_bf16.shape[1]
    fout_p = w_l.shape[1]
    assert x_bf16.shape[0] == n_cols_p
    assert n_rows_p % tile_m == 0 and n_cols_p % tile_k == 0
    assert tile_m % _LANE == 0 and tile_k % _LANE == 0
    # Resident-feature budget; see TODO(synk) at top for the large-graph path.
    assert n_cols_p * fin_p * 2 <= 24 * 1024 * 1024, "feature matrix too large for resident-x path"

    grid = (n_rows_p // tile_m, n_cols_p // tile_k)
    kernel = functools.partial(_sage_layer_kernel, tile_m=tile_m, tile_k=tile_k,
                               apply_relu=apply_relu)

    return pl.pallas_call(
        kernel,
        out_shape=jax.ShapeDtypeStruct((n_rows_p, fout_p), out_dtype),
        grid_spec=pltpu.PrefetchScalarGridSpec(
            num_scalar_prefetch=0,
            grid=grid,
            in_specs=[
                pl.BlockSpec((tile_m, tile_k), lambda i, k: (i, k)),    # A (int8)
                pl.BlockSpec((n_cols_p, fin_p), lambda i, k: (0, 0)),   # x, VMEM-resident
                pl.BlockSpec((tile_m, 1), lambda i, k: (i, 0)),         # 1/deg
                pl.BlockSpec((fin_p, fout_p), lambda i, k: (0, 0)),     # W_l (bf16)
                pl.BlockSpec((fin_p, fout_p), lambda i, k: (0, 0)),     # W_r (bf16)
                pl.BlockSpec((1, fout_p), lambda i, k: (0, 0)),         # b_l (f32)
            ],
            out_specs=pl.BlockSpec((tile_m, fout_p), lambda i, k: (i, 0)),
            scratch_shapes=[pltpu.VMEM((tile_m, fin_p), jnp.float32)],
        ),
        compiler_params=pltpu.CompilerParams(
            dimension_semantics=("parallel", "arbitrary"),
            vmem_limit_bytes=_vmem_limit_bytes(tile_m, tile_k, n_cols_p, fin_p, fout_p),
        ),
    )(adj_i8, x_bf16, inv_deg, w_l, w_r, b_l)


def graphsage_forward(params, x, adj_i8, inv_deg, *, tile_m=512, tile_k=1024):
    """Full GraphSAGE forward: SAGEConv -> relu -> SAGEConv.

    adj_i8 / inv_deg must have been built with build_graph_operands using the
    same (tile_m, tile_k) plan (see _plan_tiles).
    """
    n, fin = x.shape
    n_rows_p, n_cols_p = adj_i8.shape
    hid = params["w1_l"].shape[1]
    fout = params["w2_l"].shape[1]

    fin_p = _round_up(fin, _LANE)
    hid_p = _round_up(hid, _LANE)
    fout_p = _round_up(fout, _LANE)

    # bf16 activations / weights for the MXU; bias stays f32 (added in the f32 epilogue).
    x_p = _pad2(x, n_cols_p, fin_p).astype(jnp.bfloat16)
    w1_l = _pad2(params["w1_l"], fin_p, hid_p).astype(jnp.bfloat16)
    w1_r = _pad2(params["w1_r"], fin_p, hid_p).astype(jnp.bfloat16)
    b1 = _pad2(params["b1_l"], 1, hid_p)
    w2_l = _pad2(params["w2_l"], hid_p, fout_p).astype(jnp.bfloat16)
    w2_r = _pad2(params["w2_r"], hid_p, fout_p).astype(jnp.bfloat16)
    b2 = _pad2(params["b2_l"], 1, fout_p)

    # Layer 1 emits bf16 directly (no extra HBM cast pass).
    h = sage_layer(adj_i8, x_p, inv_deg, w1_l, w1_r, b1,
                   tile_m=tile_m, tile_k=tile_k, apply_relu=True,
                   out_dtype=jnp.bfloat16)
    # Padded rows of h (>= n) hold relu(b1) junk, but the corresponding adjacency
    # columns are zero and the rows are sliced off, so real outputs are unaffected.
    h = jnp.pad(h, ((0, n_cols_p - n_rows_p), (0, 0)))

    out = sage_layer(adj_i8, h, inv_deg, w2_l, w2_r, b2,
                     tile_m=tile_m, tile_k=tile_k, apply_relu=False,
                     out_dtype=jnp.float32)
    return out[:n, :fout]


def init_params(key, in_channels, hidden_channels, out_channels):
    ks = jax.random.split(key, 4)
    scale1 = 1.0 / jnp.sqrt(jnp.float32(in_channels))
    scale2 = 1.0 / jnp.sqrt(jnp.float32(hidden_channels))
    return {
        # stored already transposed: (Fin, Fout)
        "w1_l": scale1 * jax.random.normal(ks[0], (in_channels, hidden_channels), jnp.float32),
        "w1_r": scale1 * jax.random.normal(ks[1], (in_channels, hidden_channels), jnp.float32),
        "b1_l": jnp.zeros((1, hidden_channels), jnp.float32),
        "w2_l": scale2 * jax.random.normal(ks[2], (hidden_channels, out_channels), jnp.float32),
        "w2_r": scale2 * jax.random.normal(ks[3], (hidden_channels, out_channels), jnp.float32),
        "b2_l": jnp.zeros((1, out_channels), jnp.float32),
    }


def _reference_forward(params, x, edge_index):
    """Pure-JAX reference mirroring the kernel's bf16 rounding of activations/weights."""
    n = x.shape[0]
    counts = jnp.zeros((n, n), jnp.float32).at[edge_index[1], edge_index[0]].add(1.0)
    deg = counts.sum(axis=1, keepdims=True)
    inv_deg = 1.0 / jnp.maximum(deg, 1.0)
    hi = jax.lax.Precision.HIGHEST

    def r(v):
        return v.astype(jnp.bfloat16).astype(jnp.float32)

    def layer(h, wl, wr, b):
        agg = jnp.dot(counts, h, precision=hi) * inv_deg
        return (jnp.dot(r(agg), r(wl), precision=hi)
                + jnp.dot(h, r(wr), precision=hi) + b)

    xb = r(x)
    h = jnp.maximum(layer(xb, params["w1_l"], params["w1_r"], params["b1_l"]), 0.0)
    h = r(h)   # layer-1 output is stored as bf16 by the kernel
    return layer(h, params["w2_l"], params["w2_r"], params["b2_l"])


if __name__ == "__main__":
    # Small deterministic problem: 1200 nodes, in=8, hidden=32, out=16.
    # With the default tiles (512, 1024) the adjacency pads to (1536, 2048),
    # giving a (3, 2) grid that exercises both the parallel row axis and the
    # reduction (k) axis, including the in-kernel resident-x slicing.
    num_nodes = 1200
    in_channels, hidden_channels, out_channels = 8, 32, 16
    req_tile_m, req_tile_k = 512, 1024

    key = jax.random.PRNGKey(0)
    k_x, k_e, k_p = jax.random.split(key, 3)

    x = jax.random.normal(k_x, (num_nodes, in_channels), jnp.float32)

    # Deterministic edge_index: ring graph (both directions) + random extra edges.
    ring_src = jnp.arange(num_nodes, dtype=jnp.int32)
    ring_dst = (ring_src + 1) % num_nodes
    extra = jax.random.randint(k_e, (2, 512), 0, num_nodes, dtype=jnp.int32)
    edge_index = jnp.concatenate(
        [jnp.stack([ring_src, ring_dst]),
         jnp.stack([ring_dst, ring_src]),
         extra], axis=1)  # (2, E)

    params = init_params(k_p, in_channels, hidden_channels, out_channels)

    # Build the compact adjacency + inverse degrees ONCE (reused across forwards).
    tile_m, tile_k, n_rows_p, n_cols_p = _plan_tiles(num_nodes, req_tile_m, req_tile_k)
    adj_i8, inv_deg = build_graph_operands(edge_index, num_nodes, n_rows_p, n_cols_p)

    fwd = jax.jit(graphsage_forward, static_argnames=("tile_m", "tile_k"))
    out = jax.block_until_ready(
        fwd(params, x, adj_i8, inv_deg, tile_m=tile_m, tile_k=tile_k))

    ref = _reference_forward(params, x, edge_index)
    assert out.shape == (num_nodes, out_channels)
    max_err = float(jnp.max(jnp.abs(out - ref)))
    assert jnp.allclose(out, ref, atol=2e-2, rtol=2e-2), max_err

    print("KERNEL_OK")
</pallas_src>

<mosaic_0001>
module attributes {stable_mosaic.version = 11 : i64} {
  func.func @_sage_layer_kernel(%arg0: i32, %arg1: i32, %arg2: memref<512x1024xi8, #tpu.memory_space<vmem>>, %arg3: memref<2048x128xbf16, #tpu.memory_space<vmem>>, %arg4: memref<512x1xf32, #tpu.memory_space<vmem>>, %arg5: memref<128x128xbf16, #tpu.memory_space<vmem>>, %arg6: memref<128x128xbf16, #tpu.memory_space<vmem>>, %arg7: memref<1x128xf32, #tpu.memory_space<vmem>>, %arg8: memref<512x128xbf16, #tpu.memory_space<vmem>>, %arg9: memref<512x128xf32, #tpu.memory_space<vmem>>) attributes {dimension_semantics = [#tpu.dimension_semantics<parallel>, #tpu.dimension_semantics<arbitrary>], iteration_bounds = array<i64: 3, 2>, scalar_prefetch = 0 : i64, scratch_operands = 1 : i64, tpu.core_type = #tpu.core_type<tc>, window_params = [{transform_indices = @transform_0, window_bounds = array<i64: 512, 1024>}, {pipeline_mode = #tpu.pipeline_mode<synchronous>, transform_indices = @transform_1, window_bounds = array<i64: 2048, 128>}, {transform_indices = @transform_2, window_bounds = array<i64: 512, 1>}, {pipeline_mode = #tpu.pipeline_mode<synchronous>, transform_indices = @transform_3, window_bounds = array<i64: 128, 128>}, {pipeline_mode = #tpu.pipeline_mode<synchronous>, transform_indices = @transform_4, window_bounds = array<i64: 128, 128>}, {pipeline_mode = #tpu.pipeline_mode<synchronous>, transform_indices = @transform_5, window_bounds = array<i64: 1, 128>}, {transform_indices = @transform_6, window_bounds = array<i64: 512, 128>}]} {
    %c0_i32 = arith.constant 0 : i32
    %0 = arith.cmpi eq, %arg1, %c0_i32 : i32
    %1 = arith.extui %0 : i1 to i32
    %c0_i32_0 = arith.constant 0 : i32
    %2 = arith.cmpi ne, %1, %c0_i32_0 : i32
    scf.if %2 {
      %cst_8 = arith.constant 0.000000e+00 : f32
      %16 = vector.broadcast %cst_8 : f32 to vector<512x128xf32>
      %c0_9 = arith.constant 0 : index
      %c0_10 = arith.constant 0 : index
      %17 = vector.load %arg9[%c0_9, %c0_10] : memref<512x128xf32, #tpu.memory_space<vmem>>, vector<512x128xf32>
      tpu.vector_store %arg9[%c0_9, %c0_10], %16 {strides = array<i32>} : memref<512x128xf32, #tpu.memory_space<vmem>>, vector<512x128xf32>,
    } else {
    }
    %c1024_i32 = arith.constant 1024 : i32
    %3 = arith.muli %arg1, %c1024_i32 : i32
    %4 = tpu.assume_multiple %3, 1024 : i32
    %5 = arith.index_cast %4 : i32 to index
    %c0 = arith.constant 0 : index
    %6 = vector.load %arg3[%5, %c0] : memref<2048x128xbf16, #tpu.memory_space<vmem>>, vector<1024x128xbf16>
    %c0_1 = arith.constant 0 : index
    %c0_2 = arith.constant 0 : index
    %7 = vector.load %arg2[%c0_1, %c0_2] : memref<512x1024xi8, #tpu.memory_space<vmem>>, vector<512x1024xi8>
    %8 = arith.sitofp %7 : vector<512x1024xi8> to vector<512x1024xbf16>
    %c0_3 = arith.constant 0 : index
    %c0_4 = arith.constant 0 : index
    %9 = vector.load %arg9[%c0_3, %c0_4] : memref<512x128xf32, #tpu.memory_space<vmem>>, vector<512x128xf32>
    %cst = arith.constant dense<0.000000e+00> : vector<512x128xf32>
    %10 = tpu.matmul %8, %6, %cst {dimension_numbers = #tpu.dot_dimension_numbers<[1], [0], [0], [1], [0, 0, 1, 1], [], []>} : vector<512x1024xbf16>, vector<1024x128xbf16>, vector<512x128xf32> -> vector<512x128xf32>
    %11 = arith.addf %9, %10 : vector<512x128xf32>
    %c0_5 = arith.constant 0 : index
    %c0_6 = arith.constant 0 : index
    %12 = vector.load %arg9[%c0_5, %c0_6] : memref<512x128xf32, #tpu.memory_space<vmem>>, vector<512x128xf32>
    tpu.vector_store %arg9[%c0_5, %c0_6], %11 {strides = array<i32>} : memref<512x128xf32, #tpu.memory_space<vmem>>, vector<512x128xf32>,
    %c1_i32 = arith.constant 1 : i32
    %13 = arith.cmpi eq, %arg1, %c1_i32 : i32
    %14 = arith.extui %13 : i1 to i32
    %c0_i32_7 = arith.constant 0 : i32
    %15 = arith.cmpi ne, %14, %c0_i32_7 : i32
    scf.if %15 {
      %c512_i32 = arith.constant 512 : i32
      %16 = arith.muli %arg0, %c512_i32 : i32
      %17 = tpu.assume_multiple %16, 512 : i32
      %18 = arith.index_cast %17 : i32 to index
      %c0_8 = arith.constant 0 : index
      %19 = vector.load %arg3[%18, %c0_8] : memref<2048x128xbf16, #tpu.memory_space<vmem>>, vector<512x128xbf16>
      %c0_9 = arith.constant 0 : index
      %c0_10 = arith.constant 0 : index
      %20 = vector.load %arg9[%c0_9, %c0_10] : memref<512x128xf32, #tpu.memory_space<vmem>>, vector<512x128xf32>
      %c0_11 = arith.constant 0 : index
      %c0_12 = arith.constant 0 : index
      %21 = vector.load %arg4[%c0_11, %c0_12] : memref<512x1xf32, #tpu.memory_space<vmem>>, vector<512x1xf32>
      %22 = vector.broadcast %21 : vector<512x1xf32> to vector<512x128xf32>
      %23 = arith.mulf %20, %22 : vector<512x128xf32>
      %24 = arith.truncf %23 : vector<512x128xf32> to vector<512x128xbf16>
      %c0_13 = arith.constant 0 : index
      %c0_14 = arith.constant 0 : index
      %25 = vector.load %arg5[%c0_13, %c0_14] : memref<128x128xbf16, #tpu.memory_space<vmem>>, vector<128x128xbf16>
      %cst_15 = arith.constant dense<0.000000e+00> : vector<512x128xf32>
      %26 = tpu.matmul %24, %25, %cst_15 {dimension_numbers = #tpu.dot_dimension_numbers<[1], [0], [0], [1], [0, 0, 1, 1], [], []>} : vector<512x128xbf16>, vector<128x128xbf16>, vector<512x128xf32> -> vector<512x128xf32>
      %c0_16 = arith.constant 0 : index
      %c0_17 = arith.constant 0 : index
      %27 = vector.load %arg6[%c0_16, %c0_17] : memref<128x128xbf16, #tpu.memory_space<vmem>>, vector<128x128xbf16>
      %cst_18 = arith.constant dense<0.000000e+00> : vector<512x128xf32>
      %28 = tpu.matmul %19, %27, %cst_18 {dimension_numbers = #tpu.dot_dimension_numbers<[1], [0], [0], [1], [0, 0, 1, 1], [], []>} : vector<512x128xbf16>, vector<128x128xbf16>, vector<512x128xf32> -> vector<512x128xf32>
      %29 = arith.addf %26, %28 : vector<512x128xf32>
      %c0_19 = arith.constant 0 : index
      %c0_20 = arith.constant 0 : index
      %30 = vector.load %arg7[%c0_19, %c0_20] : memref<1x128xf32, #tpu.memory_space<vmem>>, vector<1x128xf32>
      %31 = vector.broadcast %30 : vector<1x128xf32> to vector<512x128xf32>
      %32 = arith.addf %29, %31 : vector<512x128xf32>
      %cst_21 = arith.constant 0.000000e+00 : f32
      %33 = vector.broadcast %cst_21 : f32 to vector<512x128xf32>
      %34 = arith.maximumf %32, %33 : vector<512x128xf32>
      %35 = arith.truncf %34 : vector<512x128xf32> to vector<512x128xbf16>
      %c0_22 = arith.constant 0 : index
      %c0_23 = arith.constant 0 : index
      %36 = vector.load %arg8[%c0_22, %c0_23] : memref<512x128xbf16, #tpu.memory_space<vmem>>, vector<512x128xbf16>
      tpu.vector_store %arg8[%c0_22, %c0_23], %35 {strides = array<i32>} : memref<512x128xbf16, #tpu.memory_space<vmem>>, vector<512x128xbf16>,
    } else {
    }
    return
  }
  func.func @transform_0(%arg0: i32, %arg1: i32) -> (i32, i32) {
    %c0_i32 = arith.constant 0 : i32
    return %arg0, %arg1 : i32, i32
  }
  func.func @transform_1(%arg0: i32, %arg1: i32) -> (i32, i32) {
    %c0_i32 = arith.constant 0 : i32
    %c0_i32_0 = arith.constant 0 : i32
    %c0_i32_1 = arith.constant 0 : i32
    return %c0_i32, %c0_i32_0 : i32, i32
  }
  func.func @transform_2(%arg0: i32, %arg1: i32) -> (i32, i32) {
    %c0_i32 = arith.constant 0 : i32
    %c0_i32_0 = arith.constant 0 : i32
    return %arg0, %c0_i32 : i32, i32
  }
  func.func @transform_3(%arg0: i32, %arg1: i32) -> (i32, i32) {
    %c0_i32 = arith.constant 0 : i32
    %c0_i32_0 = arith.constant 0 : i32
    %c0_i32_1 = arith.constant 0 : i32
    return %c0_i32, %c0_i32_0 : i32, i32
  }
  func.func @transform_4(%arg0: i32, %arg1: i32) -> (i32, i32) {
    %c0_i32 = arith.constant 0 : i32
    %c0_i32_0 = arith.constant 0 : i32
    %c0_i32_1 = arith.constant 0 : i32
    return %c0_i32, %c0_i32_0 : i32, i32
  }
  func.func @transform_5(%arg0: i32, %arg1: i32) -> (i32, i32) {
    %c0_i32 = arith.constant 0 : i32
    %c0_i32_0 = arith.constant 0 : i32
    %c0_i32_1 = arith.constant 0 : i32
    return %c0_i32, %c0_i32_0 : i32, i32
  }
  func.func @transform_6(%arg0: i32, %arg1: i32) -> (i32, i32) {
    %c0_i32 = arith.constant 0 : i32
    %c0_i32_0 = arith.constant 0 : i32
    return %arg0, %c0_i32 : i32, i32
  }
}

module attributes {stable_mosaic.version = 11 : i64} {
  func.func @_sage_layer_kernel(%arg0: i32, %arg1: i32, %arg2: memref<512x1024xi8, #tpu.memory_space<vmem>>, %arg3: memref<2048x128xbf16, #tpu.memory_space<vmem>>, %arg4: memref<512x1xf32, #tpu.memory_space<vmem>>, %arg5: memref<128x128xbf16, #tpu.memory_space<vmem>>, %arg6: memref<128x128xbf16, #tpu.memory_space<vmem>>, %arg7: memref<1x128xf32, #tpu.memory_space<vmem>>, %arg8: memref<512x128xf32, #tpu.memory_space<vmem>>, %arg9: memref<512x128xf32, #tpu.memory_space<vmem>>) attributes {dimension_semantics = [#tpu.dimension_semantics<parallel>, #tpu.dimension_semantics<arbitrary>], iteration_bounds = array<i64: 3, 2>, scalar_prefetch = 0 : i64, scratch_operands = 1 : i64, tpu.core_type = #tpu.core_type<tc>, window_params = [{transform_indices = @transform_0, window_bounds = array<i64: 512, 1024>}, {pipeline_mode = #tpu.pipeline_mode<synchronous>, transform_indices = @transform_1, window_bounds = array<i64: 2048, 128>}, {transform_indices = @transform_2, window_bounds = array<i64: 512, 1>}, {pipeline_mode = #tpu.pipeline_mode<synchronous>, transform_indices = @transform_3, window_bounds = array<i64: 128, 128>}, {pipeline_mode = #tpu.pipeline_mode<synchronous>, transform_indices = @transform_4, window_bounds = array<i64: 128, 128>}, {pipeline_mode = #tpu.pipeline_mode<synchronous>, transform_indices = @transform_5, window_bounds = array<i64: 1, 128>}, {transform_indices = @transform_6, window_bounds = array<i64: 512, 128>}]} {
    %c0_i32 = arith.constant 0 : i32
    %0 = arith.cmpi eq, %arg1, %c0_i32 : i32
    %1 = arith.extui %0 : i1 to i32
    %c0_i32_0 = arith.constant 0 : i32
    %2 = arith.cmpi ne, %1, %c0_i32_0 : i32
    scf.if %2 {
      %cst_8 = arith.constant 0.000000e+00 : f32
      %16 = vector.broadcast %cst_8 : f32 to vector<512x128xf32>
      %c0_9 = arith.constant 0 : index
      %c0_10 = arith.constant 0 : index
      %17 = vector.load %arg9[%c0_9, %c0_10] : memref<512x128xf32, #tpu.memory_space<vmem>>, vector<512x128xf32>
      tpu.vector_store %arg9[%c0_9, %c0_10], %16 {strides = array<i32>} : memref<512x128xf32, #tpu.memory_space<vmem>>, vector<512x128xf32>,
    } else {
    }
    %c1024_i32 = arith.constant 1024 : i32
    %3 = arith.muli %arg1, %c1024_i32 : i32
    %4 = tpu.assume_multiple %3, 1024 : i32
    %5 = arith.index_cast %4 : i32 to index
    %c0 = arith.constant 0 : index
    %6 = vector.load %arg3[%5, %c0] : memref<2048x128xbf16, #tpu.memory_space<vmem>>, vector<1024x128xbf16>
    %c0_1 = arith.constant 0 : index
    %c0_2 = arith.constant 0 : index
    %7 = vector.load %arg2[%c0_1, %c0_2] : memref<512x1024xi8, #tpu.memory_space<vmem>>, vector<512x1024xi8>
    %8 = arith.sitofp %7 : vector<512x1024xi8> to vector<512x1024xbf16>
    %c0_3 = arith.constant 0 : index
    %c0_4 = arith.constant 0 : index
    %9 = vector.load %arg9[%c0_3, %c0_4] : memref<512x128xf32, #tpu.memory_space<vmem>>, vector<512x128xf32>
    %cst = arith.constant dense<0.000000e+00> : vector<512x128xf32>
    %10 = tpu.matmul %8, %6, %cst {dimension_numbers = #tpu.dot_dimension_numbers<[1], [0], [0], [1], [0, 0, 1, 1], [], []>} : vector<512x1024xbf16>, vector<1024x128xbf16>, vector<512x128xf32> -> vector<512x128xf32>
    %11 = arith.addf %9, %10 : vector<512x128xf32>
    %c0_5 = arith.constant 0 : index
    %c0_6 = arith.constant 0 : index
    %12 = vector.load %arg9[%c0_5, %c0_6] : memref<512x128xf32, #tpu.memory_space<vmem>>, vector<512x128xf32>
    tpu.vector_store %arg9[%c0_5, %c0_6], %11 {strides = array<i32>} : memref<512x128xf32, #tpu.memory_space<vmem>>, vector<512x128xf32>,
    %c1_i32 = arith.constant 1 : i32
    %13 = arith.cmpi eq, %arg1, %c1_i32 : i32
    %14 = arith.extui %13 : i1 to i32
    %c0_i32_7 = arith.constant 0 : i32
    %15 = arith.cmpi ne, %14, %c0_i32_7 : i32
    scf.if %15 {
      %c512_i32 = arith.constant 512 : i32
      %16 = arith.muli %arg0, %c512_i32 : i32
      %17 = tpu.assume_multiple %16, 512 : i32
      %18 = arith.index_cast %17 : i32 to index
      %c0_8 = arith.constant 0 : index
      %19 = vector.load %arg3[%18, %c0_8] : memref<2048x128xbf16, #tpu.memory_space<vmem>>, vector<512x128xbf16>
      %c0_9 = arith.constant 0 : index
      %c0_10 = arith.constant 0 : index
      %20 = vector.load %arg9[%c0_9, %c0_10] : memref<512x128xf32, #tpu.memory_space<vmem>>, vector<512x128xf32>
      %c0_11 = arith.constant 0 : index
      %c0_12 = arith.constant 0 : index
      %21 = vector.load %arg4[%c0_11, %c0_12] : memref<512x1xf32, #tpu.memory_space<vmem>>, vector<512x1xf32>
      %22 = vector.broadcast %21 : vector<512x1xf32> to vector<512x128xf32>
      %23 = arith.mulf %20, %22 : vector<512x128xf32>
      %24 = arith.truncf %23 : vector<512x128xf32> to vector<512x128xbf16>
      %c0_13 = arith.constant 0 : index
      %c0_14 = arith.constant 0 : index
      %25 = vector.load %arg5[%c0_13, %c0_14] : memref<128x128xbf16, #tpu.memory_space<vmem>>, vector<128x128xbf16>
      %cst_15 = arith.constant dense<0.000000e+00> : vector<512x128xf32>
      %26 = tpu.matmul %24, %25, %cst_15 {dimension_numbers = #tpu.dot_dimension_numbers<[1], [0], [0], [1], [0, 0, 1, 1], [], []>} : vector<512x128xbf16>, vector<128x128xbf16>, vector<512x128xf32> -> vector<512x128xf32>
      %c0_16 = arith.constant 0 : index
      %c0_17 = arith.constant 0 : index
      %27 = vector.load %arg6[%c0_16, %c0_17] : memref<128x128xbf16, #tpu.memory_space<vmem>>, vector<128x128xbf16>
      %cst_18 = arith.constant dense<0.000000e+00> : vector<512x128xf32>
      %28 = tpu.matmul %19, %27, %cst_18 {dimension_numbers = #tpu.dot_dimension_numbers<[1], [0], [0], [1], [0, 0, 1, 1], [], []>} : vector<512x128xbf16>, vector<128x128xbf16>, vector<512x128xf32> -> vector<512x128xf32>
      %29 = arith.addf %26, %28 : vector<512x128xf32>
      %c0_19 = arith.constant 0 : index
      %c0_20 = arith.constant 0 : index
      %30 = vector.load %arg7[%c0_19, %c0_20] : memref<1x128xf32, #tpu.memory_space<vmem>>, vector<1x128xf32>
      %31 = vector.broadcast %30 : vector<1x128xf32> to vector<512x128xf32>
      %32 = arith.addf %29, %31 : vector<512x128xf32>
      %c0_21 = arith.constant 0 : index
      %c0_22 = arith.constant 0 : index
      %33 = vector.load %arg8[%c0_21, %c0_22] : memref<512x128xf32, #tpu.memory_space<vmem>>, vector<512x128xf32>
      tpu.vector_store %arg8[%c0_21, %c0_22], %32 {strides = array<i32>} : memref<512x128xf32, #tpu.memory_space<vmem>>, vector<512x128xf32>,
    } else {
    }
    return
  }
  func.func @transform_0(%arg0: i32, %arg1: i32) -> (i32, i32) {
    %c0_i32 = arith.constant 0 : i32
    return %arg0, %arg1 : i32, i32
  }
  func.func @transform_1(%arg0: i32, %arg1: i32) -> (i32, i32) {
    %c0_i32 = arith.constant 0 : i32
    %c0_i32_0 = arith.constant 0 : i32
    %c0_i32_1 = arith.constant 0 : i32
    return %c0_i32, %c0_i32_0 : i32, i32
  }
  func.func @transform_2(%arg0: i32, %arg1: i32) -> (i32, i32) {
    %c0_i32 = arith.constant 0 : i32
    %c0_i32_0 = arith.constant 0 : i32
    return %arg0, %c0_i32 : i32, i32
  }
  func.func @transform_3(%arg0: i32, %arg1: i32) -> (i32, i32) {
    %c0_i32 = arith.constant 0 : i32
    %c0_i32_0 = arith.constant 0 : i32
    %c0_i32_1 = arith.constant 0 : i32
    return %c0_i32, %c0_i32_0 : i32, i32
  }
  func.func @transform_4(%arg0: i32, %arg1: i32) -> (i32, i32) {
    %c0_i32 = arith.constant 0 : i32
    %c0_i32_0 = arith.constant 0 : i32
    %c0_i32_1 = arith.constant 0 : i32
    return %c0_i32, %c0_i32_0 : i32, i32
  }
  func.func @transform_5(%arg0: i32, %arg1: i32) -> (i32, i32) {
    %c0_i32 = arith.constant 0 : i32
    %c0_i32_0 = arith.constant 0 : i32
    %c0_i32_1 = arith.constant 0 : i32
    return %c0_i32, %c0_i32_0 : i32, i32
  }
  func.func @transform_6(%arg0: i32, %arg1: i32) -> (i32, i32) {
    %c0_i32 = arith.constant 0 : i32
    %c0_i32_0 = arith.constant 0 : i32
    return %arg0, %c0_i32 : i32, i32
  }
}

</mosaic_0001>

<bundles_post_ra>
// kernel: graphsage_forward.3
= control target key start
LH: loop header
LB: loop body
LE: loop exit
PB: predicated region body
PF: predicated region fallthrough
CT: control target
= control target key end

     0   :  { %s5337_s21 = smov 0   ;;  %s5339_s22 = smov 0   ;;  %s6682_s0 = inlined_call_operand.vmem [shape: s8[1536,2048], index: 0, kind: input, shape index: {}]   ;;  %s6683_s1 = inlined_call_operand.vmem [shape: bf16[2048,128], index: 1, kind: input, shape index: {}]   ;;  %s6684_s2 = inlined_call_operand.vmem [shape: f32[1536,1], index: 2, kind: input, shape index: {}]   ;;  %s6685_s3 = inlined_call_operand.vmem [shape: bf16[128,128], index: 3, kind: input, shape index: {}]   ;;  %s6686_s4 = inlined_call_operand.vmem [shape: bf16[128,128], index: 4, kind: input, shape index: {}]   ;;  %s6687_s5 = inlined_call_operand.vmem [shape: f32[1,128], index: 5, kind: input, shape index: {}]   ;;  %s6688_s6 = inlined_call_operand.vmem [shape: f32[1536,128], index: 6, kind: output, shape index: {}]  }
   0x1   :  { %s5341_s23 = smov 0   ;;  %s5343_s24 = smov 0  }
   0x2   :  { %s5345_s25 = smov 0   ;;  %s5347_s26 = smov 0  }
   0x3   :  { %s5349_s27 = smov 0  }
   0x4 LB: > { %s25_s28 = sadd.s32 1, %s5289_s25  ;;  %s28_s29 = sadd.s32 1, %s5293_s26  ;;  %s5297_s27 = sphi %s5349_s27, %s16_s27   ;;  %s5293_s26 = sphi %s5347_s26, %s6738_s26   ;;  %s5289_s25 = sphi %s5345_s25, %s6737_s25   ;;  %s5285_s24 = sphi %s5343_s24, %s6736_s24   ;;  %s5281_s23 = sphi %s5341_s23, %s6735_s23   ;;  %s5277_s22 = sphi %s5339_s22, %s6734_s22   ;;  %s5273_s21 = sphi %s5337_s21, %s6733_s21  }
   0x5   : > { %p26_p0 = scmp.ge.s32.totalorder %s25_s28, 2  ;;  %p44_p1 = scmp.ne.s32.totalorder %s5277_s22, %s5273_s21 }
   0x6   : > { %p45_p2 = scmp.eq.s32.totalorder %s5297_s27, 0  ;;  %s37_s9 = sadd.s32 1, %s5277_s22 }
   0x7   : > { %s6740_s28 = smov (%p26_p0, %s25_s28), 0  ;;  %s6742_s29 = smov (!%p26_p0, %s28_s29), %s5293_s26 }
   0x8   : > { %p46_p3 = por %p45_p2, %p44_p1  ;;  %p30_p4 = scmp.ge.s32.totalorder %s6742_s29, 3 }
   0x9   : > { %s33_s30 = ssub.s32 %s5289_s25, %s6740_s28  ;;  %p4632_p6 = scmp.ge.s32.totalorder %s5297_s27, 6 }
   0xa   : > { %s6744_s29 = smov (%p30_p4, %s6742_s29), 0 }
   0xb   : > { %s32_s7 = ssub.s32 %s5293_s26, %s6744_s29  ;;  %218 = sbr.rel (%p4632_p6) target bundleno = 89 (0x59), region = 32 }
   0xc   : > { %s34_s8 = sor.u32 %s33_s30, %s32_s7 }
   0xd   : > { %p35_p5 = scmp.eq.s32.totalorder %s34_s8, 0 }
   0xf   : > { %s5388_s10 = scalar_select %p35_p5, %s5277_s22, %s37_s9  }
  0x12   : > { %221 = sbr.rel (!%p46_p3) target bundleno = 89 (0x59), region = 36  ;;  %s223_s11 = sand.u32 (%p46_p3), 1, %s5277_s22  }
  0x13   : > { %s4635_s12 = sshll.u32 (%p46_p3), %s5289_s25, 3  ;;  %s4633_s13 = sshll.u32 (%p46_p3), %s223_s11, 10 }
  0x14   : > { %s4765_s14 = sshll.u32 (%p46_p3), %s5293_s26, 8  ;;  %s5402_s20 = scalar_lea.vmem (%p46_p3), [#allocation3], %s4633_s13 }
  0x15   : > { %s229_s15 = sadd.s32 (%p46_p3), %s4765_s14, %s4635_s12 }
  0x16   : > { %s4637_s16 = sshll.u32 (%p46_p3), %s229_s15, 3 }
  0x17   : > { %s5397_s19 = scalar_lea.vmem (%p46_p3), %s6682_s0, %s4637_s16 }
  0x18   : > { %v244_v0 = vld [vmem:[%s5397_s19] sm:$0xff] (%p46_p3)  ;;  %v246_v1 = vld [vmem:[%s5397_s19 + $0x8] sm:$0xff] (%p46_p3)  ;;  %v248_v2 = vld [vmem:[%s5397_s19 + $0x10] sm:$0xff] (%p46_p3) }
  0x19   : > { %245 = vst [vmem:[%s5402_s20] sm:$0xff] %v244_v0  ;;  %247 = vst [vmem:[%s5402_s20 + $0x8] sm:$0xff] %v246_v1  ;;  %v250_v3 = vld [vmem:[%s5397_s19 + $0x18] sm:$0xff]  ;;  %v252_v4 = vld [vmem:[%s5397_s19 + $0x20] sm:$0xff] }
  0x1a   : > { %249 = vst [vmem:[%s5402_s20 + $0x10] sm:$0xff] %v248_v2  ;;  %v254_v5 = vld [vmem:[%s5397_s19 + $0x28] sm:$0xff]  ;;  %251 = vst [vmem:[%s5402_s20 + $0x18] sm:$0xff] %v250_v3  ;;  %v256_v6 = vld [vmem:[%s5397_s19 + $0x30] sm:$0xff] }
  0x1b   : > { %253 = vst [vmem:[%s5402_s20 + $0x20] sm:$0xff] %v252_v4  ;;  %255 = vst [vmem:[%s5402_s20 + $0x28] sm:$0xff] %v254_v5  ;;  %v258_v7 = vld [vmem:[%s5397_s19 + $0x38] sm:$0xff]  ;;  %v260_v8 = vld [vmem:[%s5397_s19 + $0x80] sm:$0xff] }
  0x1c   : > { %257 = vst [vmem:[%s5402_s20 + $0x30] sm:$0xff] %v256_v6  ;;  %259 = vst [vmem:[%s5402_s20 + $0x38] sm:$0xff] %v258_v7  ;;  %v262_v9 = vld [vmem:[%s5397_s19 + $0x88] sm:$0xff]  ;;  %v264_v10 = vld [vmem:[%s5397_s19 + $0x90] sm:$0xff] }
  0x1d   : > { %261 = vst [vmem:[%s5402_s20 + $0x40] sm:$0xff] %v260_v8  ;;  %v266_v11 = vld [vmem:[%s5397_s19 + $0x98] sm:$0xff]  ;;  %263 = vst [vmem:[%s5402_s20 + $0x48] sm:$0xff] %v262_v9  ;;  %v268_v12 = vld [vmem:[%s5397_s19 + $0xa0] sm:$0xff] }
  0x1e   : > { %265 = vst [vmem:[%s5402_s20 + $0x50] sm:$0xff] %v264_v10  ;;  %267 = vst [vmem:[%s5402_s20 + $0x58] sm:$0xff] %v266_v11  ;;  %v270_v13 = vld [vmem:[%s5397_s19 + $0xa8] sm:$0xff]  ;;  %v272_v14 = vld [vmem:[%s5397_s19 + $0xb0] sm:$0xff] }
  0x1f   : > { %269 = vst [vmem:[%s5402_s20 + $0x60] sm:$0xff] %v268_v12  ;;  %271 = vst [vmem:[%s5402_s20 + $0x68] sm:$0xff] %v270_v13  ;;  %v274_v15 = vld [vmem:[%s5397_s19 + $0xb8] sm:$0xff]  ;;  %v276_v16 = vld [vmem:[%s5397_s19 + $0x100] sm:$0xff] }
  0x20   : > { %273 = vst [vmem:[%s5402_s20 + $0x70] sm:$0xff] %v272_v14  ;;  %v278_v17 = vld [vmem:[%s5397_s19 + $0x108] sm:$0xff]  ;;  %275 = vst [vmem:[%s5402_s20 + $0x78] sm:$0xff] %v274_v15  ;;  %v280_v18 = vld [vmem:[%s5397_s19 + $0x110] sm:$0xff] }
  0x21   : > { %277 = vst [vmem:[%s5402_s20 + $0x80] sm:$0xff] %v276_v16  ;;  %279 = vst [vmem:[%s5402_s20 + $0x88] sm:$0xff] %v278_v17  ;;  %v282_v19 = vld [vmem:[%s5397_s19 + $0x118] sm:$0xff]  ;;  %v284_v20 = vld [vmem:[%s5397_s19 + $0x120] sm:$0xff] }
  0x22   : > { %281 = vst [vmem:[%s5402_s20 + $0x90] sm:$0xff] %v280_v18  ;;  %283 = vst [vmem:[%s5402_s20 + $0x98] sm:$0xff] %v282_v19  ;;  %v286_v21 = vld [vmem:[%s5397_s19 + $0x128] sm:$0xff]  ;;  %v288_v22 = vld [vmem:[%s5397_s19 + $0x130] sm:$0xff] }
  0x23   : > { %285 = vst [vmem:[%s5402_s20 + $0xa0] sm:$0xff] %v284_v20  ;;  %v290_v23 = vld [vmem:[%s5397_s19 + $0x138] sm:$0xff]  ;;  %287 = vst [vmem:[%s5402_s20 + $0xa8] sm:$0xff] %v286_v21  ;;  %v292_v24 = vld [vmem:[%s5397_s19 + $0x180] sm:$0xff] }
  0x24   : > { %289 = vst [vmem:[%s5402_s20 + $0xb0] sm:$0xff] %v288_v22  ;;  %291 = vst [vmem:[%s5402_s20 + $0xb8] sm:$0xff] %v290_v23  ;;  %v294_v25 = vld [vmem:[%s5397_s19 + $0x188] sm:$0xff]  ;;  %v296_v26 = vld [vmem:[%s5397_s19 + $0x190] sm:$0xff] }
  0x25   : > { %293 = vst [vmem:[%s5402_s20 + $0xc0] sm:$0xff] %v292_v24  ;;  %295 = vst [vmem:[%s5402_s20 + $0xc8] sm:$0xff] %v294_v25  ;;  %v298_v27 = vld [vmem:[%s5397_s19 + $0x198] sm:$0xff]  ;;  %v300_v28 = vld [vmem:[%s5397_s19 + $0x1a0] sm:$0xff] }
  0x26   : > { %297 = vst [vmem:[%s5402_s20 + $0xd0] sm:$0xff] %v296_v26  ;;  %v302_v29 = vld [vmem:[%s5397_s19 + $0x1a8] sm:$0xff]  ;;  %299 = vst [vmem:[%s5402_s20 + $0xd8] sm:$0xff] %v298_v27  ;;  %v304_v30 = vld [vmem:[%s5397_s19 + $0x1b0] sm:$0xff] }
  0x27   : > { %301 = vst [vmem:[%s5402_s20 + $0xe0] sm:$0xff] %v300_v28  ;;  %303 = vst [vmem:[%s5402_s20 + $0xe8] sm:$0xff] %v302_v29  ;;  %v306_v31 = vld [vmem:[%s5397_s19 + $0x1b8] sm:$0xff]  ;;  %v308_v32 = vld [vmem:[%s5397_s19 + $0x200] sm:$0xff] }
  0x28   : > { %305 = vst [vmem:[%s5402_s20 + $0xf0] sm:$0xff] %v304_v30  ;;  %307 = vst [vmem:[%s5402_s20 + $0xf8] sm:$0xff] %v306_v31  ;;  %v310_v33 = vld [vmem:[%s5397_s19 + $0x208] sm:$0xff]  ;;  %v312_v34 = vld [vmem:[%s5397_s19 + $0x210] sm:$0xff] }
  0x29   : > { %309 = vst [vmem:[%s5402_s20 + $0x100] sm:$0xff] %v308_v32  ;;  %v314_v35 = vld [vmem:[%s5397_s19 + $0x218] sm:$0xff]  ;;  %311 = vst [vmem:[%s5402_s20 + $0x108] sm:$0xff] %v310_v33  ;;  %v316_v36 = vld [vmem:[%s5397_s19 + $0x220] sm:$0xff] }
  0x2a   : > { %313 = vst [vmem:[%s5402_s20 + $0x110] sm:$0xff] %v312_v34  ;;  %315 = vst [vmem:[%s5402_s20 + $0x118] sm:$0xff] %v314_v35  ;;  %v318_v37 = vld [vmem:[%s5397_s19 + $0x228] sm:$0xff]  ;;  %v320_v38 = vld [vmem:[%s5397_s19 + $0x230] sm:$0xff] }
  0x2b   : > { %317 = vst [vmem:[%s5402_s20 + $0x120] sm:$0xff] %v316_v36  ;;  %319 = vst [vmem:[%s5402_s20 + $0x128] sm:$0xff] %v318_v37  ;;  %v322_v39 = vld [vmem:[%s5397_s19 + $0x238] sm:$0xff]  ;;  %v324_v40 = vld [vmem:[%s5397_s19 + $0x280] sm:$0xff] }
  0x2c   : > { %321 = vst [vmem:[%s5402_s20 + $0x130] sm:$0xff] %v320_v38  ;;  %v326_v41 = vld [vmem:[%s5397_s19 + $0x288] sm:$0xff]  ;;  %323 = vst [vmem:[%s5402_s20 + $0x138] sm:$0xff] %v322_v39  ;;  %v328_v42 = vld [vmem:[%s5397_s19 + $0x290] sm:$0xff] }
  0x2d   : > { %325 = vst [vmem:[%s5402_s20 + $0x140] sm:$0xff] %v324_v40  ;;  %327 = vst [vmem:[%s5402_s20 + $0x148] sm:$0xff] %v326_v41  ;;  %v330_v43 = vld [vmem:[%s5397_s19 + $0x298] sm:$0xff]  ;;  %v332_v44 = vld [vmem:[%s5397_s19 + $0x2a0] sm:$0xff] }
  0x2e   : > { %329 = vst [vmem:[%s5402_s20 + $0x150] sm:$0xff] %v328_v42  ;;  %331 = vst [vmem:[%s5402_s20 + $0x158] sm:$0xff] %v330_v43  ;;  %v334_v45 = vld [vmem:[%s5397_s19 + $0x2a8] sm:$0xff]  ;;  %v336_v46 = vld [vmem:[%s5397_s19 + $0x2b0] sm:$0xff] }
  0x2f   : > { %333 = vst [vmem:[%s5402_s20 + $0x160] sm:$0xff] %v332_v44  ;;  %v338_v47 = vld [vmem:[%s5397_s19 + $0x2b8] sm:$0xff]  ;;  %335 = vst [vmem:[%s5402_s20 + $0x168] sm:$0xff] %v334_v45  ;;  %v340_v48 = vld [vmem:[%s5397_s19 + $0x300] sm:$0xff] }
  0x30   : > { %337 = vst [vmem:[%s5402_s20 + $0x170] sm:$0xff] %v336_v46  ;;  %339 = vst [vmem:[%s5402_s20 + $0x178] sm:$0xff] %v338_v47  ;;  %v342_v49 = vld [vmem:[%s5397_s19 + $0x308] sm:$0xff]  ;;  %v344_v50 = vld [vmem:[%s5397_s19 + $0x310] sm:$0xff] }
  0x31   : > { %341 = vst [vmem:[%s5402_s20 + $0x180] sm:$0xff] %v340_v48  ;;  %343 = vst [vmem:[%s5402_s20 + $0x188] sm:$0xff] %v342_v49  ;;  %v346_v51 = vld [vmem:[%s5397_s19 + $0x318] sm:$0xff]  ;;  %v348_v52 = vld [vmem:[%s5397_s19 + $0x320] sm:$0xff] }
  0x32   : > { %345 = vst [vmem:[%s5402_s20 + $0x190] sm:$0xff] %v344_v50  ;;  %v350_v53 = vld [vmem:[%s5397_s19 + $0x328] sm:$0xff]  ;;  %347 = vst [vmem:[%s5402_s20 + $0x198] sm:$0xff] %v346_v51  ;;  %v352_v54 = vld [vmem:[%s5397_s19 + $0x330] sm:$0xff] }
  0x33   : > { %349 = vst [vmem:[%s5402_s20 + $0x1a0] sm:$0xff] %v348_v52  ;;  %351 = vst [vmem:[%s5402_s20 + $0x1a8] sm:$0xff] %v350_v53  ;;  %v354_v55 = vld [vmem:[%s5397_s19 + $0x338] sm:$0xff]  ;;  %v356_v56 = vld [vmem:[%s5397_s19 + $0x380] sm:$0xff] }
  0x34   : > { %353 = vst [vmem:[%s5402_s20 + $0x1b0] sm:$0xff] %v352_v54  ;;  %355 = vst [vmem:[%s5402_s20 + $0x1b8] sm:$0xff] %v354_v55  ;;  %v358_v57 = vld [vmem:[%s5397_s19 + $0x388] sm:$0xff]  ;;  %v360_v58 = vld [vmem:[%s5397_s19 + $0x390] sm:$0xff] }
  0x35   : > { %357 = vst [vmem:[%s5402_s20 + $0x1c0] sm:$0xff] %v356_v56  ;;  %v362_v59 = vld [vmem:[%s5397_s19 + $0x398] sm:$0xff]  ;;  %359 = vst [vmem:[%s5402_s20 + $0x1c8] sm:$0xff] %v358_v57  ;;  %v364_v60 = vld [vmem:[%s5397_s19 + $0x3a0] sm:$0xff] }
  0x36   : > { %361 = vst [vmem:[%s5402_s20 + $0x1d0] sm:$0xff] %v360_v58  ;;  %363 = vst [vmem:[%s5402_s20 + $0x1d8] sm:$0xff] %v362_v59  ;;  %v366_v61 = vld [vmem:[%s5397_s19 + $0x3a8] sm:$0xff]  ;;  %v368_v62 = vld [vmem:[%s5397_s19 + $0x3b0] sm:$0xff] }
  0x37   : > { %365 = vst [vmem:[%s5402_s20 + $0x1e0] sm:$0xff] %v364_v60  ;;  %367 = vst [vmem:[%s5402_s20 + $0x1e8] sm:$0xff] %v366_v61  ;;  %v370_v63 = vld [vmem:[%s5397_s19 + $0x3b8] sm:$0xff]  ;;  %v372_v0 = vld [vmem:[%s5397_s19 + $0x400] sm:$0xff] }
  0x38   : > { %369 = vst [vmem:[%s5402_s20 + $0x1f0] sm:$0xff] %v368_v62  ;;  %v374_v1 = vld [vmem:[%s5397_s19 + $0x408] sm:$0xff]  ;;  %371 = vst [vmem:[%s5402_s20 + $0x1f8] sm:$0xff] %v370_v63  ;;  %v376_v2 = vld [vmem:[%s5397_s19 + $0x410] sm:$0xff] }
  0x39   : > { %373 = vst [vmem:[%s5402_s20 + $0x200] sm:$0xff] %v372_v0  ;;  %375 = vst [vmem:[%s5402_s20 + $0x208] sm:$0xff] %v374_v1  ;;  %v378_v3 = vld [vmem:[%s5397_s19 + $0x418] sm:$0xff]  ;;  %v380_v4 = vld [vmem:[%s5397_s19 + $0x420] sm:$0xff] }
  0x3a   : > { %377 = vst [vmem:[%s5402_s20 + $0x210] sm:$0xff] %v376_v2  ;;  %379 = vst [vmem:[%s5402_s20 + $0x218] sm:$0xff] %v378_v3  ;;  %v382_v5 = vld [vmem:[%s5397_s19 + $0x428] sm:$0xff]  ;;  %v384_v6 = vld [vmem:[%s5397_s19 + $0x430] sm:$0xff] }
  0x3b   : > { %381 = vst [vmem:[%s5402_s20 + $0x220] sm:$0xff] %v380_v4  ;;  %v386_v7 = vld [vmem:[%s5397_s19 + $0x438] sm:$0xff]  ;;  %383 = vst [vmem:[%s5402_s20 + $0x228] sm:$0xff] %v382_v5  ;;  %v388_v8 = vld [vmem:[%s5397_s19 + $0x480] sm:$0xff] }
  0x3c   : > { %385 = vst [vmem:[%s5402_s20 + $0x230] sm:$0xff] %v384_v6  ;;  %387 = vst [vmem:[%s5402_s20 + $0x238] sm:$0xff] %v386_v7  ;;  %v390_v9 = vld [vmem:[%s5397_s19 + $0x488] sm:$0xff]  ;;  %v392_v10 = vld [vmem:[%s5397_s19 + $0x490] sm:$0xff] }
  0x3d   : > { %389 = vst [vmem:[%s5402_s20 + $0x240] sm:$0xff] %v388_v8  ;;  %391 = vst [vmem:[%s5402_s20 + $0x248] sm:$0xff] %v390_v9  ;;  %v394_v11 = vld [vmem:[%s5397_s19 + $0x498] sm:$0xff]  ;;  %v396_v12 = vld [vmem:[%s5397_s19 + $0x4a0] sm:$0xff] }
  0x3e   : > { %393 = vst [vmem:[%s5402_s20 + $0x250] sm:$0xff] %v392_v10  ;;  %v398_v13 = vld [vmem:[%s5397_s19 + $0x4a8] sm:$0xff]  ;;  %395 = vst [vmem:[%s5402_s20 + $0x258] sm:$0xff] %v394_v11  ;;  %v400_v14 = vld [vmem:[%s5397_s19 + $0x4b0] sm:$0xff] }
  0x3f   : > { %397 = vst [vmem:[%s5402_s20 + $0x260] sm:$0xff] %v396_v12  ;;  %399 = vst [vmem:[%s5402_s20 + $0x268] sm:$0xff] %v398_v13  ;;  %v402_v15 = vld [vmem:[%s5397_s19 + $0x4b8] sm:$0xff]  ;;  %v404_v16 = vld [vmem:[%s5397_s19 + $0x500] sm:$0xff] }
  0x40   : > { %401 = vst [vmem:[%s5402_s20 + $0x270] sm:$0xff] %v400_v14  ;;  %403 = vst [vmem:[%s5402_s20 + $0x278] sm:$0xff] %v402_v15  ;;  %v406_v17 = vld [vmem:[%s5397_s19 + $0x508] sm:$0xff]  ;;  %v408_v18 = vld [vmem:[%s5397_s19 + $0x510] sm:$0xff] }
  0x41   : > { %405 = vst [vmem:[%s5402_s20 + $0x280] sm:$0xff] %v404_v16  ;;  %v410_v19 = vld [vmem:[%s5397_s19 + $0x518] sm:$0xff]  ;;  %407 = vst [vmem:[%s5402_s20 + $0x288] sm:$0xff] %v406_v17  ;;  %v412_v20 = vld [vmem:[%s5397_s19 + $0x520] sm:$0xff] }
  0x42   : > { %409 = vst [vmem:[%s5402_s20 + $0x290] sm:$0xff] %v408_v18  ;;  %411 = vst [vmem:[%s5402_s20 + $0x298] sm:$0xff] %v410_v19  ;;  %v414_v21 = vld [vmem:[%s5397_s19 + $0x528] sm:$0xff]  ;;  %v416_v22 = vld [vmem:[%s5397_s19 + $0x530] sm:$0xff] }
  0x43   : > { %413 = vst [vmem:[%s5402_s20 + $0x2a0] sm:$0xff] %v412_v20  ;;  %415 = vst [vmem:[%s5402_s20 + $0x2a8] sm:$0xff] %v414_v21  ;;  %v418_v23 = vld [vmem:[%s5397_s19 + $0x538] sm:$0xff]  ;;  %v420_v24 = vld [vmem:[%s5397_s19 + $0x580] sm:$0xff] }
  0x44   : > { %417 = vst [vmem:[%s5402_s20 + $0x2b0] sm:$0xff] %v416_v22  ;;  %v422_v25 = vld [vmem:[%s5397_s19 + $0x588] sm:$0xff]  ;;  %419 = vst [vmem:[%s5402_s20 + $0x2b8] sm:$0xff] %v418_v23  ;;  %v424_v26 = vld [vmem:[%s5397_s19 + $0x590] sm:$0xff] }
  0x45   : > { %421 = vst [vmem:[%s5402_s20 + $0x2c0] sm:$0xff] %v420_v24  ;;  %423 = vst [vmem:[%s5402_s20 + $0x2c8] sm:$0xff] %v422_v25  ;;  %v426_v27 = vld [vmem:[%s5397_s19 + $0x598] sm:$0xff]  ;;  %v428_v28 = vld [vmem:[%s5397_s19 + $0x5a0] sm:$0xff] }
  0x46   : > { %425 = vst [vmem:[%s5402_s20 + $0x2d0] sm:$0xff] %v424_v26  ;;  %427 = vst [vmem:[%s5402_s20 + $0x2d8] sm:$0xff] %v426_v27  ;;  %v430_v29 = vld [vmem:[%s5397_s19 + $0x5a8] sm:$0xff]  ;;  %v432_v30 = vld [vmem:[%s5397_s19 + $0x5b0] sm:$0xff] }
  0x47   : > { %429 = vst [vmem:[%s5402_s20 + $0x2e0] sm:$0xff] %v428_v28  ;;  %v434_v31 = vld [vmem:[%s5397_s19 + $0x5b8] sm:$0xff]  ;;  %431 = vst [vmem:[%s5402_s20 + $0x2e8] sm:$0xff] %v430_v29  ;;  %v436_v32 = vld [vmem:[%s5397_s19 + $0x600] sm:$0xff] }
  0x48   : > { %433 = vst [vmem:[%s5402_s20 + $0x2f0] sm:$0xff] %v432_v30  ;;  %435 = vst [vmem:[%s5402_s20 + $0x2f8] sm:$0xff] %v434_v31  ;;  %v438_v33 = vld [vmem:[%s5397_s19 + $0x608] sm:$0xff]  ;;  %v440_v34 = vld [vmem:[%s5397_s19 + $0x610] sm:$0xff] }
  0x49   : > { %437 = vst [vmem:[%s5402_s20 + $0x300] sm:$0xff] %v436_v32  ;;  %439 = vst [vmem:[%s5402_s20 + $0x308] sm:$0xff] %v438_v33  ;;  %v442_v35 = vld [vmem:[%s5397_s19 + $0x618] sm:$0xff]  ;;  %v444_v36 = vld [vmem:[%s5397_s19 + $0x620] sm:$0xff] }
  0x4a   : > { %441 = vst [vmem:[%s5402_s20 + $0x310] sm:$0xff] %v440_v34  ;;  %v446_v37 = vld [vmem:[%s5397_s19 + $0x628] sm:$0xff]  ;;  %443 = vst [vmem:[%s5402_s20 + $0x318] sm:$0xff] %v442_v35  ;;  %v448_v38 = vld [vmem:[%s5397_s19 + $0x630] sm:$0xff] }
  0x4b   : > { %445 = vst [vmem:[%s5402_s20 + $0x320] sm:$0xff] %v444_v36  ;;  %447 = vst [vmem:[%s5402_s20 + $0x328] sm:$0xff] %v446_v37  ;;  %v450_v39 = vld [vmem:[%s5397_s19 + $0x638] sm:$0xff]  ;;  %v452_v40 = vld [vmem:[%s5397_s19 + $0x680] sm:$0xff] }
  0x4c   : > { %449 = vst [vmem:[%s5402_s20 + $0x330] sm:$0xff] %v448_v38  ;;  %451 = vst [vmem:[%s5402_s20 + $0x338] sm:$0xff] %v450_v39  ;;  %v454_v41 = vld [vmem:[%s5397_s19 + $0x688] sm:$0xff]  ;;  %v456_v42 = vld [vmem:[%s5397_s19 + $0x690] sm:$0xff] }
  0x4d   : > { %453 = vst [vmem:[%s5402_s20 + $0x340] sm:$0xff] %v452_v40  ;;  %v458_v43 = vld [vmem:[%s5397_s19 + $0x698] sm:$0xff]  ;;  %455 = vst [vmem:[%s5402_s20 + $0x348] sm:$0xff] %v454_v41  ;;  %v460_v44 = vld [vmem:[%s5397_s19 + $0x6a0] sm:$0xff] }
  0x4e   : > { %457 = vst [vmem:[%s5402_s20 + $0x350] sm:$0xff] %v456_v42  ;;  %459 = vst [vmem:[%s5402_s20 + $0x358] sm:$0xff] %v458_v43  ;;  %v462_v45 = vld [vmem:[%s5397_s19 + $0x6a8] sm:$0xff]  ;;  %v464_v46 = vld [vmem:[%s5397_s19 + $0x6b0] sm:$0xff] }
  0x4f   : > { %461 = vst [vmem:[%s5402_s20 + $0x360] sm:$0xff] %v460_v44  ;;  %463 = vst [vmem:[%s5402_s20 + $0x368] sm:$0xff] %v462_v45  ;;  %v466_v47 = vld [vmem:[%s5397_s19 + $0x6b8] sm:$0xff]  ;;  %v468_v48 = vld [vmem:[%s5397_s19 + $0x700] sm:$0xff] }
  0x50   : > { %465 = vst [vmem:[%s5402_s20 + $0x370] sm:$0xff] %v464_v46  ;;  %v470_v49 = vld [vmem:[%s5397_s19 + $0x708] sm:$0xff]  ;;  %467 = vst [vmem:[%s5402_s20 + $0x378] sm:$0xff] %v466_v47  ;;  %v472_v50 = vld [vmem:[%s5397_s19 + $0x710] sm:$0xff] }
  0x51   : > { %469 = vst [vmem:[%s5402_s20 + $0x380] sm:$0xff] %v468_v48  ;;  %471 = vst [vmem:[%s5402_s20 + $0x388] sm:$0xff] %v470_v49  ;;  %v474_v51 = vld [vmem:[%s5397_s19 + $0x718] sm:$0xff]  ;;  %v476_v52 = vld [vmem:[%s5397_s19 + $0x720] sm:$0xff] }
  0x52   : > { %473 = vst [vmem:[%s5402_s20 + $0x390] sm:$0xff] %v472_v50  ;;  %475 = vst [vmem:[%s5402_s20 + $0x398] sm:$0xff] %v474_v51  ;;  %v478_v53 = vld [vmem:[%s5397_s19 + $0x728] sm:$0xff]  ;;  %v480_v54 = vld [vmem:[%s5397_s19 + $0x730] sm:$0xff] }
  0x53   : > { %477 = vst [vmem:[%s5402_s20 + $0x3a0] sm:$0xff] %v476_v52  ;;  %v482_v55 = vld [vmem:[%s5397_s19 + $0x738] sm:$0xff]  ;;  %479 = vst [vmem:[%s5402_s20 + $0x3a8] sm:$0xff] %v478_v53  ;;  %v484_v56 = vld [vmem:[%s5397_s19 + $0x780] sm:$0xff] }
  0x54   : > { %481 = vst [vmem:[%s5402_s20 + $0x3b0] sm:$0xff] %v480_v54  ;;  %483 = vst [vmem:[%s5402_s20 + $0x3b8] sm:$0xff] %v482_v55  ;;  %v486_v57 = vld [vmem:[%s5397_s19 + $0x788] sm:$0xff]  ;;  %v488_v58 = vld [vmem:[%s5397_s19 + $0x790] sm:$0xff] }
  0x55   : > { %485 = vst [vmem:[%s5402_s20 + $0x3c0] sm:$0xff] %v484_v56  ;;  %487 = vst [vmem:[%s5402_s20 + $0x3c8] sm:$0xff] %v486_v57  ;;  %v490_v59 = vld [vmem:[%s5397_s19 + $0x798] sm:$0xff]  ;;  %v492_v60 = vld [vmem:[%s5397_s19 + $0x7a0] sm:$0xff] }
  0x56   : > { %489 = vst [vmem:[%s5402_s20 + $0x3d0] sm:$0xff] %v488_v58  ;;  %v494_v61 = vld [vmem:[%s5397_s19 + $0x7a8] sm:$0xff]  ;;  %491 = vst [vmem:[%s5402_s20 + $0x3d8] sm:$0xff] %v490_v59  ;;  %v496_v62 = vld [vmem:[%s5397_s19 + $0x7b0] sm:$0xff] }
  0x57   : > { %493 = vst [vmem:[%s5402_s20 + $0x3e0] sm:$0xff] %v492_v60  ;;  %495 = vst [vmem:[%s5402_s20 + $0x3e8] sm:$0xff] %v494_v61  ;;  %v498_v63 = vld [vmem:[%s5397_s19 + $0x7b8] sm:$0xff] }
  0x58   : > { %497 = vst [vmem:[%s5402_s20 + $0x3f0] sm:$0xff] %v496_v62  ;;  %499 = vst [vmem:[%s5402_s20 + $0x3f8] sm:$0xff] %v498_v63 }
  0x59 PF: > { %p4638_p7 = scmp.ge.s32.totalorder %s5297_s27, 1  ;;  %p513_p8 = scmp.lt.s32.totalorder %s5297_s27, 7 }
  0x5b   : > { %p514_p9 = pnand %p4638_p7, %p513_p8 }
  0x5d   : > { %517 = sbr.rel (%p514_p9) target bundleno = 1379 (0x563), region = 63 }
  0x64   : > { %s520_s30 = sand.u32 1, %s5273_s21   ;;  %s4640_s7 = sshll.u32 %s5285_s24, 6 }
  0x65   : > { %s4639_s8 = sshll.u32 %s520_s30, 10  ;;  %p557_p10 = scmp.lt.s32.totalorder %s4640_s7, 191 }
  0x66   : > { %s5671_s17 = scalar_lea.vmem [#allocation3], %s4639_s8  ;;  %p4644_p11 = scmp.ne.s32.totalorder %s5281_s23, 0 }
  0x67   : > { %s6746_s7 = smov (!%p557_p10, %s4640_s7), 191  ;;  %v5299_v0 = vmov (!%p4644_p11), 0.0  }
  0x68   : > { %s4641_s9 = sshll.u32 %s6746_s7, 3  ;;  %572 = sbr.rel (%p4644_p11) target bundleno = 136 (0x88), region = 71  ;;  %573 = vst [vmem:[#allocation2] sm:$0xff] (!%p4644_p11), %v5299_v0  ;;  %574 = vst [vmem:[#allocation2 + $0x8] sm:$0xff] (!%p4644_p11), %v5299_v0 }
  0x69   : > { %s5664_s13 = scalar_lea.vmem %s6684_s2, %s4641_s9  ;;  %s5669_s16 = scalar_lea.vmem %s6688_s6, %s4641_s9  ;;  %575 = vst [vmem:[#allocation2 + $0x10] sm:$0xff] (!%p4644_p11), %v5299_v0  ;;  %576 = vst [vmem:[#allocation2 + $0x18] sm:$0xff] (!%p4644_p11), %v5299_v0 }
  0x6a   : > { %577 = vst [vmem:[#allocation2 + $0x20] sm:$0xff] (!%p4644_p11), %v5299_v0  ;;  %578 = vst [vmem:[#allocation2 + $0x28] sm:$0xff] (!%p4644_p11), %v5299_v0 }
  0x6b   : > { %579 = vst [vmem:[#allocation2 + $0x30] sm:$0xff] (!%p4644_p11), %v5299_v0  ;;  %580 = vst [vmem:[#allocation2 + $0x38] sm:$0xff] (!%p4644_p11), %v5299_v0 }
  0x6c   : > { %581 = vst [vmem:[#allocation2 + $0x40] sm:$0xff] (!%p4644_p11), %v5299_v0  ;;  %582 = vst [vmem:[#allocation2 + $0x48] sm:$0xff] (!%p4644_p11), %v5299_v0 }
  0x6d   : > { %583 = vst [vmem:[#allocation2 + $0x50] sm:$0xff] (!%p4644_p11), %v5299_v0  ;;  %584 = vst [vmem:[#allocation2 + $0x58] sm:$0xff] (!%p4644_p11), %v5299_v0 }
  0x6e   : > { %585 = vst [vmem:[#allocation2 + $0x60] sm:$0xff] (!%p4644_p11), %v5299_v0  ;;  %586 = vst [vmem:[#allocation2 + $0x68] sm:$0xff] (!%p4644_p11), %v5299_v0 }
  0x6f   : > { %587 = vst [vmem:[#allocation2 + $0x70] sm:$0xff] %v5299_v0  ;;  %588 = vst [vmem:[#allocation2 + $0x78] sm:$0xff] %v5299_v0 }
  0x70   : > { %589 = vst [vmem:[#allocation2 + $0x80] sm:$0xff] %v5299_v0  ;;  %590 = vst [vmem:[#allocation2 + $0x88] sm:$0xff] %v5299_v0 }
  0x71   : > { %591 = vst [vmem:[#allocation2 + $0x90] sm:$0xff] %v5299_v0  ;;  %592 = vst [vmem:[#allocation2 + $0x98] sm:$0xff] %v5299_v0 }
  0x72   : > { %593 = vst [vmem:[#allocation2 + $0xa0] sm:$0xff] %v5299_v0  ;;  %594 = vst [vmem:[#allocation2 + $0xa8] sm:$0xff] %v5299_v0 }
  0x73   : > { %595 = vst [vmem:[#allocation2 + $0xb0] sm:$0xff] %v5299_v0  ;;  %596 = vst [vmem:[#allocation2 + $0xb8] sm:$0xff] %v5299_v0 }
  0x74   : > { %597 = vst [vmem:[#allocation2 + $0xc0] sm:$0xff] %v5299_v0  ;;  %598 = vst [vmem:[#allocation2 + $0xc8] sm:$0xff] %v5299_v0 }
  0x75   : > { %599 = vst [vmem:[#allocation2 + $0xd0] sm:$0xff] %v5299_v0  ;;  %600 = vst [vmem:[#allocation2 + $0xd8] sm:$0xff] %v5299_v0 }
  0x76   : > { %601 = vst [vmem:[#allocation2 + $0xe0] sm:$0xff] %v5299_v0  ;;  %602 = vst [vmem:[#allocation2 + $0xe8] sm:$0xff] %v5299_v0 }
  0x77   : > { %603 = vst [vmem:[#allocation2 + $0xf0] sm:$0xff] %v5299_v0  ;;  %604 = vst [vmem:[#allocation2 + $0xf8] sm:$0xff] %v5299_v0 }
  0x78   : > { %605 = vst [vmem:[#allocation2 + $0x100] sm:$0xff] %v5299_v0  ;;  %606 = vst [vmem:[#allocation2 + $0x108] sm:$0xff] %v5299_v0 }
  0x79   : > { %607 = vst [vmem:[#allocation2 + $0x110] sm:$0xff] %v5299_v0  ;;  %608 = vst [vmem:[#allocation2 + $0x118] sm:$0xff] %v5299_v0 }
  0x7a   : > { %609 = vst [vmem:[#allocation2 + $0x120] sm:$0xff] %v5299_v0  ;;  %610 = vst [vmem:[#allocation2 + $0x128] sm:$0xff] %v5299_v0 }
  0x7b   : > { %611 = vst [vmem:[#allocation2 + $0x130] sm:$0xff] %v5299_v0  ;;  %612 = vst [vmem:[#allocation2 + $0x138] sm:$0xff] %v5299_v0 }
  0x7c   : > { %613 = vst [vmem:[#allocation2 + $0x140] sm:$0xff] %v5299_v0  ;;  %614 = vst [vmem:[#allocation2 + $0x148] sm:$0xff] %v5299_v0 }
  0x7d   : > { %615 = vst [vmem:[#allocation2 + $0x150] sm:$0xff] %v5299_v0  ;;  %616 = vst [vmem:[#allocation2 + $0x158] sm:$0xff] %v5299_v0 }
  0x7e   : > { %617 = vst [vmem:[#allocation2 + $0x160] sm:$0xff] %v5299_v0  ;;  %618 = vst [vmem:[#allocation2 + $0x168] sm:$0xff] %v5299_v0 }
  0x7f   : > { %619 = vst [vmem:[#allocation2 + $0x170] sm:$0xff] %v5299_v0  ;;  %620 = vst [vmem:[#allocation2 + $0x178] sm:$0xff] %v5299_v0 }
  0x80   : > { %621 = vst [vmem:[#allocation2 + $0x180] sm:$0xff] %v5299_v0  ;;  %622 = vst [vmem:[#allocation2 + $0x188] sm:$0xff] %v5299_v0 }
  0x81   : > { %623 = vst [vmem:[#allocation2 + $0x190] sm:$0xff] %v5299_v0  ;;  %624 = vst [vmem:[#allocation2 + $0x198] sm:$0xff] %v5299_v0 }
  0x82   : > { %625 = vst [vmem:[#allocation2 + $0x1a0] sm:$0xff] %v5299_v0  ;;  %626 = vst [vmem:[#allocation2 + $0x1a8] sm:$0xff] %v5299_v0 }
  0x83   : > { %627 = vst [vmem:[#allocation2 + $0x1b0] sm:$0xff] %v5299_v0  ;;  %628 = vst [vmem:[#allocation2 + $0x1b8] sm:$0xff] %v5299_v0 }
  0x84   : > { %629 = vst [vmem:[#allocation2 + $0x1c0] sm:$0xff] %v5299_v0  ;;  %630 = vst [vmem:[#allocation2 + $0x1c8] sm:$0xff] %v5299_v0 }
  0x85   : > { %631 = vst [vmem:[#allocation2 + $0x1d0] sm:$0xff] %v5299_v0  ;;  %632 = vst [vmem:[#allocation2 + $0x1d8] sm:$0xff] %v5299_v0 }
  0x86   : > { %633 = vst [vmem:[#allocation2 + $0x1e0] sm:$0xff] %v5299_v0  ;;  %634 = vst [vmem:[#allocation2 + $0x1e8] sm:$0xff] %v5299_v0 }
  0x87   : > { %635 = vst [vmem:[#allocation2 + $0x1f0] sm:$0xff] %v5299_v0  ;;  %636 = vst [vmem:[#allocation2 + $0x1f8] sm:$0xff] %v5299_v0 }
  0x88 PF: > { %s4645_s21 = sshll.u32 %s5281_s23, 10  ;;  %v5740_v1 = vld [vmem:[%s5671_s17 + $0x8] sm:$0xff]  ;;  %v5743_v2 = vld [vmem:[%s5671_s17 + $0x18] sm:$0xff]  ;;  %v5300_v3 = vmov 0   ;;  %v770_v36 = vld [vmem:[%s5671_s17] sm:$0xff]  ;;  %p4711_p12 = scmp.ne.s32.totalorder %s5281_s23, 1 }
  0x89   : > { %1602 = vmatprep.subr.bf16.mxu0 %v5300_v3  ;;  %1891 = vmatprep.subr.bf16.mxu1 %v5300_v3  ;;  %s638_s18 = sshra.s32 %s4645_s21, 3  ;;  %v899_v4 = vunpack.c.l.s8.bf16 %v5740_v1  ;;  %v901_v5 = vunpack.c.l.s8.bf16 %v5743_v2  ;;  %v772_v38 = vld [vmem:[%s5671_s17 + $0x10] sm:$0xff]  ;;  %v898_v41 = vunpack.c.l.s8.bf16 %v770_v36  ;;  %v907_v43 = vunpack.c.h.s8.bf16 %v5740_v1  ;;  %v779_v47 = vld [vmem:[%s5671_s17 + $0x48] sm:$0xff]  ;;  %v781_v49 = vld [vmem:[%s5671_s17 + $0x58] sm:$0xff]  ;;  %s4712_s30 = sshll.u32 (!%p4711_p12), %s5285_s24, 9 }
  0x8a   : > { %s4646_s19 = sshll.u32 %s638_s18, 2  ;;  %v900_v42 = vunpack.c.l.s8.bf16 %v772_v38  ;;  %v909_v45 = vunpack.c.h.s8.bf16 %v5743_v2  ;;  %v906_v50 = vunpack.c.h.s8.bf16 %v770_v36  ;;  %v908_v51 = vunpack.c.h.s8.bf16 %v772_v38  ;;  %v778_v56 = vld [vmem:[%s5671_s17 + $0x40] sm:$0xff]  ;;  %v780_v57 = vld [vmem:[%s5671_s17 + $0x50] sm:$0xff]  ;;  %v787_v2 = vld [vmem:[%s5671_s17 + $0x88] sm:$0xff]  ;;  %s2891_s11 = sshra.s32 (!%p4711_p12), %s4712_s30, 3 }
  0x8b   : > { %s5752_s7 = scalar_lea.vmem %s6683_s1, %s4646_s19  ;;  %1634 = vmatprep.mubr.bf16.mxu0 %v899_v4  ;;  %1923 = vmatprep.mubr.bf16.mxu1 %v901_v5  ;;  %v915_v52 = vunpack.c.l.s8.bf16 %v779_v47  ;;  %v917_v53 = vunpack.c.l.s8.bf16 %v781_v49  ;;  %v914_v60 = vunpack.c.l.s8.bf16 %v778_v56  ;;  %v916_v61 = vunpack.c.l.s8.bf16 %v780_v57  ;;  %v789_v5 = vld [vmem:[%s5671_s17 + $0x98] sm:$0xff] }
  0x8c   : > { %v5129_v6 = vld [vmem:[%s5752_s7] sm:$0xff]   ;;  %v5131_v8 = vld [vmem:[%s5752_s7 + $0x8] sm:$0xff]   ;;  %v5133_v10 = vld [vmem:[%s5752_s7 + $0x10] sm:$0xff]   ;;  %v923_v62 = vunpack.c.h.s8.bf16 %v779_v47  ;;  %v925_v63 = vunpack.c.h.s8.bf16 %v781_v49 }
  0x8d   : > { %v5130_v7 = vld [vmem:[%s5752_s7 + $0x80] sm:$0xff]   ;;  %1603 = vmatpush1.bf16.msra.mxu0 %v5129_v6  ;;  %v5132_v9 = vld [vmem:[%s5752_s7 + $0x88] sm:$0xff]   ;;  %v5134_v11 = vld [vmem:[%s5752_s7 + $0x90] sm:$0xff]  }
  0x8e   : > { %1892 = vmatpush1.bf16.msra.mxu1 %v5130_v7  ;;  %1604 = vmatprep.subr.bf16.mxu0 %v5300_v3  ;;  %v5135_v12 = vld [vmem:[%s5752_s7 + $0x18] sm:$0xff]   ;;  %v5137_v14 = vld [vmem:[%s5752_s7 + $0x20] sm:$0xff]   ;;  %v5139_v16 = vld [vmem:[%s5752_s7 + $0x28] sm:$0xff]   ;;  %v922_v7 = vunpack.c.h.s8.bf16 %v778_v56 }
  0x8f   : > { %1893 = vmatprep.subr.bf16.mxu1 %v5300_v3  ;;  %v5136_v13 = vld [vmem:[%s5752_s7 + $0x98] sm:$0xff]   ;;  %v5138_v15 = vld [vmem:[%s5752_s7 + $0xa0] sm:$0xff]   ;;  %v5140_v17 = vld [vmem:[%s5752_s7 + $0xa8] sm:$0xff]  }
  0x90   : > { %v5141_v18 = vld [vmem:[%s5752_s7 + $0x30] sm:$0xff]   ;;  %v5143_v20 = vld [vmem:[%s5752_s7 + $0x38] sm:$0xff]   ;;  %v5145_v22 = vld [vmem:[%s5752_s7 + $0x40] sm:$0xff]  }
  0x91   : > { %1605 = vmatpush1.bf16.msra.mxu0 %v5131_v8  ;;  %v5142_v19 = vld [vmem:[%s5752_s7 + $0xb0] sm:$0xff]   ;;  %v5144_v21 = vld [vmem:[%s5752_s7 + $0xb8] sm:$0xff]   ;;  %v5146_v23 = vld [vmem:[%s5752_s7 + $0xc0] sm:$0xff]   ;;  %v924_v8 = vunpack.c.h.s8.bf16 %v780_v57 }
  0x92   : > { %1894 = vmatpush1.bf16.msra.mxu1 %v5132_v9  ;;  %1606 = vmatprep.subr.bf16.mxu0 %v5300_v3  ;;  %v5147_v24 = vld [vmem:[%s5752_s7 + $0x48] sm:$0xff]   ;;  %v5149_v26 = vld [vmem:[%s5752_s7 + $0x50] sm:$0xff]   ;;  %v5151_v28 = vld [vmem:[%s5752_s7 + $0x58] sm:$0xff]   ;;  %v931_v9 = vunpack.c.l.s8.bf16 %v787_v2 }
  0x93   : > { %1895 = vmatprep.subr.bf16.mxu1 %v5300_v3  ;;  %v5148_v25 = vld [vmem:[%s5752_s7 + $0xc8] sm:$0xff]   ;;  %v5150_v27 = vld [vmem:[%s5752_s7 + $0xd0] sm:$0xff]   ;;  %v5152_v29 = vld [vmem:[%s5752_s7 + $0xd8] sm:$0xff]  }
  0x94   : > { %v5153_v30 = vld [vmem:[%s5752_s7 + $0x60] sm:$0xff]   ;;  %v5155_v32 = vld [vmem:[%s5752_s7 + $0x68] sm:$0xff]   ;;  %v5157_v34 = vld [vmem:[%s5752_s7 + $0x70] sm:$0xff]  }
  0x95   : > { %1607 = vmatpush1.bf16.msra.mxu0 %v5133_v10  ;;  %v5154_v31 = vld [vmem:[%s5752_s7 + $0xe0] sm:$0xff]   ;;  %v5156_v33 = vld [vmem:[%s5752_s7 + $0xe8] sm:$0xff]   ;;  %v5158_v35 = vld [vmem:[%s5752_s7 + $0xf0] sm:$0xff]   ;;  %v933_v10 = vunpack.c.l.s8.bf16 %v789_v5 }
  0x96   : > { %1896 = vmatpush1.bf16.msra.mxu1 %v5134_v11  ;;  %1608 = vmatprep.subr.bf16.mxu0 %v5300_v3  ;;  %v5159_v37 = vld [vmem:[%s5752_s7 + $0x78] sm:$0xff]   ;;  %v5161_v40 = vld [vmem:[%s5752_s7 + $0x100] sm:$0xff]   ;;  %v5163_v46 = vld [vmem:[%s5752_s7 + $0x108] sm:$0xff]  }
  0x97   : > { %1897 = vmatprep.subr.bf16.mxu1 %v5300_v3  ;;  %v5160_v39 = vld [vmem:[%s5752_s7 + $0xf8] sm:$0xff]   ;;  %v5162_v44 = vld [vmem:[%s5752_s7 + $0x180] sm:$0xff]   ;;  %v5164_v48 = vld [vmem:[%s5752_s7 + $0x188] sm:$0xff]  }
  0x98   : > { %v5165_v54 = vld [vmem:[%s5752_s7 + $0x110] sm:$0xff]   ;;  %v5167_v58 = vld [vmem:[%s5752_s7 + $0x118] sm:$0xff]   ;;  %v5169_v0 = vld [vmem:[%s5752_s7 + $0x120] sm:$0xff]  }
  0x99   : > { %1609 = vmatpush1.bf16.msra.mxu0 %v5135_v12  ;;  %v5166_v55 = vld [vmem:[%s5752_s7 + $0x190] sm:$0xff]   ;;  %v5168_v59 = vld [vmem:[%s5752_s7 + $0x198] sm:$0xff]   ;;  %v5170_v1 = vld [vmem:[%s5752_s7 + $0x1a0] sm:$0xff]  }
  0x9a   : > { %1898 = vmatpush1.bf16.msra.mxu1 %v5136_v13  ;;  %1610 = vmatprep.subr.bf16.mxu0 %v5300_v3  ;;  %v5171_v4 = vld [vmem:[%s5752_s7 + $0x128] sm:$0xff]   ;;  %v5173_v11 = vld [vmem:[%s5752_s7 + $0x130] sm:$0xff]  }
  0x9b   : > { %1899 = vmatprep.subr.bf16.mxu1 %v5300_v3  ;;  %v5172_v6 = vld [vmem:[%s5752_s7 + $0x1a8] sm:$0xff]   ;;  %v5174_v12 = vld [vmem:[%s5752_s7 + $0x1b0] sm:$0xff]  }
  0x9c   : > { %v786_v13 = vld [vmem:[%s5671_s17 + $0x80] sm:$0xff]  ;;  %v813_v56 = vld [vmem:[%s5671_s17 + $0x158] sm:$0xff] }
  0x9d   : > { %1611 = vmatpush1.bf16.msra.mxu0 %v5137_v14  ;;  %v788_v14 = vld [vmem:[%s5671_s17 + $0x90] sm:$0xff]  ;;  %v802_v47 = vld [vmem:[%s5671_s17 + $0x100] sm:$0xff] }
  0x9e   : > { %1900 = vmatpush1.bf16.msra.mxu1 %v5138_v15  ;;  %1612 = vmatprep.subr.bf16.mxu0 %v5300_v3  ;;  %v5175_v15 = vld [vmem:[%s5752_s7 + $0x138] sm:$0xff]   ;;  %v962_v49 = vunpack.c.l.s8.bf16 %v802_v47  ;;  %v970_v57 = vunpack.c.h.s8.bf16 %v802_v47 }
  0x9f   : > { %1901 = vmatprep.subr.bf16.mxu1 %v5300_v3 }
  0xa1   : > { %1613 = vmatpush1.bf16.msra.mxu0 %v5139_v16  ;;  %v5176_v16 = vld [vmem:[%s5752_s7 + $0x1b8] sm:$0xff]  }
  0xa2   : > { %1902 = vmatpush1.bf16.msra.mxu1 %v5140_v17  ;;  %1614 = vmatprep.subr.bf16.mxu0 %v5300_v3  ;;  %v930_v17 = vunpack.c.l.s8.bf16 %v786_v13 }
  0xa3   : > { %1903 = vmatprep.subr.bf16.mxu1 %v5300_v3 }
  0xa5   : > { %1615 = vmatpush1.bf16.msra.mxu0 %v5141_v18  ;;  %v932_v18 = vunpack.c.l.s8.bf16 %v788_v14 }
  0xa6   : > { %1904 = vmatpush1.bf16.msra.mxu1 %v5142_v19  ;;  %1616 = vmatprep.subr.bf16.mxu0 %v5300_v3  ;;  %v939_v19 = vunpack.c.h.s8.bf16 %v787_v2  ;;  %v989_v2 = vunpack.c.h.s8.bf16 %v813_v56 }
  0xa7   : > { %1905 = vmatprep.subr.bf16.mxu1 %v5300_v3 }
  0xa9   : > { %1617 = vmatpush1.bf16.msra.mxu0 %v5143_v20  ;;  %v941_v20 = vunpack.c.h.s8.bf16 %v789_v5  ;;  %v819_v5 = vld [vmem:[%s5671_s17 + $0x188] sm:$0xff] }
  0xaa   : > { %1906 = vmatpush1.bf16.msra.mxu1 %v5144_v21  ;;  %1618 = vmatprep.subr.bf16.mxu0 %v5300_v3  ;;  %v5177_v21 = vld [vmem:[%s5752_s7 + $0x140] sm:$0xff]  }
  0xab   : > { %1907 = vmatprep.subr.bf16.mxu1 %v5300_v3 }
  0xad   : > { %1619 = vmatpush1.bf16.msra.mxu0 %v5145_v22  ;;  %v5178_v22 = vld [vmem:[%s5752_s7 + $0x1c0] sm:$0xff]  }
  0xae   : > { %1908 = vmatpush1.bf16.msra.mxu1 %v5146_v23  ;;  %1620 = vmatprep.subr.bf16.mxu0 %v5300_v3  ;;  %v795_v23 = vld [vmem:[%s5671_s17 + $0xc8] sm:$0xff] }
  0xaf   : > { %1909 = vmatprep.subr.bf16.mxu1 %v5300_v3 }
  0xb1   : > { %1621 = vmatpush1.bf16.msra.mxu0 %v5147_v24  ;;  %v5179_v24 = vld [vmem:[%s5752_s7 + $0x148] sm:$0xff]  }
  0xb2   : > { %1910 = vmatpush1.bf16.msra.mxu1 %v5148_v25  ;;  %1622 = vmatprep.subr.bf16.mxu0 %v5300_v3  ;;  %v797_v25 = vld [vmem:[%s5671_s17 + $0xd8] sm:$0xff] }
  0xb3   : > { %1911 = vmatprep.subr.bf16.mxu1 %v5300_v3  ;;  %v957_v38 = vunpack.c.h.s8.bf16 %v797_v25 }
  0xb5   : > { %1623 = vmatpush1.bf16.msra.mxu0 %v5149_v26  ;;  %v5180_v26 = vld [vmem:[%s5752_s7 + $0x1c8] sm:$0xff]  }
  0xb6   : > { %1912 = vmatpush1.bf16.msra.mxu1 %v5150_v27  ;;  %1624 = vmatprep.subr.bf16.mxu0 %v5300_v3  ;;  %v938_v27 = vunpack.c.h.s8.bf16 %v786_v13  ;;  %v820_v13 = vld [vmem:[%s5671_s17 + $0x190] sm:$0xff] }
  0xb7   : > { %1913 = vmatprep.subr.bf16.mxu1 %v5300_v3 }
  0xb9   : > { %1625 = vmatpush1.bf16.msra.mxu0 %v5151_v28  ;;  %v940_v28 = vunpack.c.h.s8.bf16 %v788_v14 }
  0xba   : > { %1914 = vmatpush1.bf16.msra.mxu1 %v5152_v29  ;;  %1626 = vmatprep.subr.bf16.mxu0 %v5300_v3  ;;  %v947_v29 = vunpack.c.l.s8.bf16 %v795_v23 }
  0xbb   : > { %1915 = vmatprep.subr.bf16.mxu1 %v5300_v3 }
  0xbd   : > { %1627 = vmatpush1.bf16.msra.mxu0 %v5153_v30  ;;  %v949_v30 = vunpack.c.l.s8.bf16 %v797_v25 }
  0xbe   : > { %1916 = vmatpush1.bf16.msra.mxu1 %v5154_v31  ;;  %1628 = vmatprep.subr.bf16.mxu0 %v5300_v3  ;;  %v5181_v31 = vld [vmem:[%s5752_s7 + $0x150] sm:$0xff]  }
  0xbf   : > { %1917 = vmatprep.subr.bf16.mxu1 %v5300_v3 }
  0xc1   : > { %1629 = vmatpush1.bf16.msra.mxu0 %v5155_v32  ;;  %v5182_v32 = vld [vmem:[%s5752_s7 + $0x1d0] sm:$0xff]  }
  0xc2   : > { %1918 = vmatpush1.bf16.msra.mxu1 %v5156_v33  ;;  %1630 = vmatprep.subr.bf16.mxu0 %v5300_v3  ;;  %v794_v33 = vld [vmem:[%s5671_s17 + $0xc0] sm:$0xff] }
  0xc3   : > { %1919 = vmatprep.subr.bf16.mxu1 %v5300_v3 }
  0xc5   : > { %1631 = vmatpush1.bf16.msra.mxu0 %v5157_v34  ;;  %v796_v34 = vld [vmem:[%s5671_s17 + $0xd0] sm:$0xff] }
  0xc6   : > { %1920 = vmatpush1.bf16.msra.mxu1 %v5158_v35  ;;  %1632 = vmatprep.subr.bf16.mxu0 %v5300_v3  ;;  %v946_v35 = vunpack.c.l.s8.bf16 %v794_v33  ;;  %v948_v36 = vunpack.c.l.s8.bf16 %v796_v34 }
  0xc7   : > { %1921 = vmatprep.subr.bf16.mxu1 %v5300_v3 }
  0xc9   : > { %1633 = vmatpush1.bf16.msra.mxu0 %v5159_v37  ;;  %v955_v37 = vunpack.c.h.s8.bf16 %v795_v23 }
  0xca   : > { %1922 = vmatpush1.bf16.msra.mxu1 %v5160_v39  ;;  %2180 = vmatprep.subr.bf16.mxu0 %v5300_v3  ;;  %v5183_v39 = vld [vmem:[%s5752_s7 + $0x158] sm:$0xff]  }
  0xcb   : > { %2469 = vmatprep.subr.bf16.mxu1 %v5300_v3 }
  0xcc   : > { %1635 = vmatmul.mubr.bf16.vlgmr.msra.gmra.mrb[0].mxu0 %v898_v41  ;;  %v803_v41 = vld [vmem:[%s5671_s17 + $0x108] sm:$0xff] }
  0xcd   : > { %1924 = vmatmul.mubr.bf16.vlgmr.msra.gmra.mrb[0].mxu1 %v900_v42  ;;  %2181 = vmatpush1.bf16.msra.mxu0 %v5161_v40  ;;  %v5184_v40 = vld [vmem:[%s5752_s7 + $0x1d8] sm:$0xff]   ;;  %v805_v42 = vld [vmem:[%s5671_s17 + $0x118] sm:$0xff] }
  0xce   : > { %2470 = vmatpush1.bf16.msra.mxu1 %v5162_v44  ;;  %1642 = vmatprep.mubr.bf16.mxu0 %v907_v43  ;;  %v954_v43 = vunpack.c.h.s8.bf16 %v794_v33  ;;  %v956_v44 = vunpack.c.h.s8.bf16 %v796_v34  ;;  %v835_v33 = vld [vmem:[%s5671_s17 + $0x208] sm:$0xff] }
  0xcf   : > { %1931 = vmatprep.mubr.bf16.mxu1 %v909_v45  ;;  %2182 = vmatprep.subr.bf16.mxu0 %v5300_v3  ;;  %v963_v45 = vunpack.c.l.s8.bf16 %v803_v41 }
  0xd0   : > { %2471 = vmatprep.subr.bf16.mxu1 %v5300_v3 }
  0xd1   : > { %2183 = vmatpush1.bf16.msra.mxu0 %v5163_v46  ;;  %v965_v46 = vunpack.c.l.s8.bf16 %v805_v42 }
  0xd2   : > { %2472 = vmatpush1.bf16.msra.mxu1 %v5164_v48  ;;  %2184 = vmatprep.subr.bf16.mxu0 %v5300_v3  ;;  %v804_v48 = vld [vmem:[%s5671_s17 + $0x110] sm:$0xff] }
  0xd3   : > { %2473 = vmatprep.subr.bf16.mxu1 %v5300_v3 }
  0xd4   : > { %1643 = vmatmul.mubr.bf16.gmra.mrb[4].mxu0 %v906_v50  ;;  %v964_v50 = vunpack.c.l.s8.bf16 %v804_v48 }
  0xd5   : > { %1932 = vmatmul.mubr.bf16.gmra.mrb[4].mxu1 %v908_v51  ;;  %1650 = vmatprep.mubr.bf16.mxu0 %v915_v52  ;;  %v971_v51 = vunpack.c.h.s8.bf16 %v803_v41  ;;  %v973_v52 = vunpack.c.h.s8.bf16 %v805_v42 }
  0xd6   : > { %1939 = vmatprep.mubr.bf16.mxu1 %v917_v53  ;;  %2185 = vmatpush1.bf16.msra.mxu0 %v5165_v54  ;;  %v5185_v53 = vld [vmem:[%s5752_s7 + $0x160] sm:$0xff]  }
  0xd7   : > { %2474 = vmatpush1.bf16.msra.mxu1 %v5166_v55  ;;  %2186 = vmatprep.subr.bf16.mxu0 %v5300_v3  ;;  %v5186_v54 = vld [vmem:[%s5752_s7 + $0x1e0] sm:$0xff]   ;;  %v811_v55 = vld [vmem:[%s5671_s17 + $0x148] sm:$0xff] }
  0xd8   : > { %2475 = vmatprep.subr.bf16.mxu1 %v5300_v3 }
  0xda   : > { %2187 = vmatpush1.bf16.msra.mxu0 %v5167_v58  ;;  %v972_v58 = vunpack.c.h.s8.bf16 %v804_v48 }
  0xdb   : > { %2476 = vmatpush1.bf16.msra.mxu1 %v5168_v59  ;;  %2188 = vmatprep.subr.bf16.mxu0 %v5300_v3  ;;  %v979_v59 = vunpack.c.l.s8.bf16 %v811_v55 }
  0xdc   : > { %1651 = vmatmul.mubr.bf16.gmra.mrb[8].mxu0 %v914_v60  ;;  %2477 = vmatprep.subr.bf16.mxu1 %v5300_v3  ;;  %v981_v60 = vunpack.c.l.s8.bf16 %v813_v56 }
  0xdd   : > { %1940 = vmatmul.mubr.bf16.gmra.mrb[8].mxu1 %v916_v61  ;;  %1658 = vmatprep.mubr.bf16.mxu0 %v923_v62  ;;  %v810_v61 = vld [vmem:[%s5671_s17 + $0x140] sm:$0xff]  ;;  %v812_v62 = vld [vmem:[%s5671_s17 + $0x150] sm:$0xff] }
  0xde   : > { %1947 = vmatprep.mubr.bf16.mxu1 %v925_v63  ;;  %2189 = vmatpush1.bf16.msra.mxu0 %v5169_v0  ;;  %v978_v63 = vunpack.c.l.s8.bf16 %v810_v61  ;;  %v980_v0 = vunpack.c.l.s8.bf16 %v812_v62 }
  0xdf   : > { %2478 = vmatpush1.bf16.msra.mxu1 %v5170_v1  ;;  %2190 = vmatprep.subr.bf16.mxu0 %v5300_v3  ;;  %v987_v1 = vunpack.c.h.s8.bf16 %v811_v55 }
  0xe0   : > { %2479 = vmatprep.subr.bf16.mxu1 %v5300_v3 }
  0xe2   : > { %2191 = vmatpush1.bf16.msra.mxu0 %v5171_v4  ;;  %v5187_v4 = vld [vmem:[%s5752_s7 + $0x168] sm:$0xff]  }
  0xe3   : > { %2480 = vmatpush1.bf16.msra.mxu1 %v5172_v6  ;;  %2192 = vmatprep.subr.bf16.mxu0 %v5300_v3  ;;  %v821_v6 = vld [vmem:[%s5671_s17 + $0x198] sm:$0xff] }
  0xe4   : > { %1659 = vmatmul.mubr.bf16.gmra.mrb[12].mxu0 %v922_v7  ;;  %2481 = vmatprep.subr.bf16.mxu1 %v5300_v3  ;;  %v986_v7 = vunpack.c.h.s8.bf16 %v810_v61 }
  0xe5   : > { %1948 = vmatmul.mubr.bf16.gmra.mrb[12].mxu1 %v924_v8  ;;  %1666 = vmatprep.mubr.bf16.mxu0 %v931_v9  ;;  %v988_v8 = vunpack.c.h.s8.bf16 %v812_v62  ;;  %v995_v9 = vunpack.c.l.s8.bf16 %v819_v5 }
  0xe6   : > { %1955 = vmatprep.mubr.bf16.mxu1 %v933_v10  ;;  %2193 = vmatpush1.bf16.msra.mxu0 %v5173_v11  ;;  %v5188_v10 = vld [vmem:[%s5752_s7 + $0x1e8] sm:$0xff]   ;;  %v997_v11 = vunpack.c.l.s8.bf16 %v821_v6 }
  0xe7   : > { %2482 = vmatpush1.bf16.msra.mxu1 %v5174_v12  ;;  %2194 = vmatprep.subr.bf16.mxu0 %v5300_v3  ;;  %v818_v12 = vld [vmem:[%s5671_s17 + $0x180] sm:$0xff] }
  0xe8   : > { %2483 = vmatprep.subr.bf16.mxu1 %v5300_v3  ;;  %v994_v14 = vunpack.c.l.s8.bf16 %v818_v12 }
  0xea   : > { %2195 = vmatpush1.bf16.msra.mxu0 %v5175_v15  ;;  %v996_v15 = vunpack.c.l.s8.bf16 %v820_v13 }
  0xeb   : > { %2484 = vmatpush1.bf16.msra.mxu1 %v5176_v16  ;;  %2196 = vmatprep.subr.bf16.mxu0 %v5300_v3  ;;  %v1003_v16 = vunpack.c.h.s8.bf16 %v819_v5 }
  0xec   : > { %1667 = vmatmul.mubr.bf16.gmra.mrb[16].mxu0 %v930_v17  ;;  %2485 = vmatprep.subr.bf16.mxu1 %v5300_v3  ;;  %v1005_v17 = vunpack.c.h.s8.bf16 %v821_v6  ;;  %v859_v6 = vld [vmem:[%s5671_s17 + $0x2c8] sm:$0xff] }
  0xed   : > { %1956 = vmatmul.mubr.bf16.gmra.mrb[16].mxu1 %v932_v18  ;;  %1674 = vmatprep.mubr.bf16.mxu0 %v939_v19  ;;  %v5189_v18 = vld [vmem:[%s5752_s7 + $0x170] sm:$0xff]   ;;  %v827_v19 = vld [vmem:[%s5671_s17 + $0x1c8] sm:$0xff] }
  0xee   : > { %1963 = vmatprep.mubr.bf16.mxu1 %v941_v20  ;;  %2197 = vmatpush1.bf16.msra.mxu0 %v5177_v21  ;;  %v829_v20 = vld [vmem:[%s5671_s17 + $0x1d8] sm:$0xff]  ;;  %v1002_v21 = vunpack.c.h.s8.bf16 %v818_v12  ;;  %v1011_v23 = vunpack.c.l.s8.bf16 %v827_v19  ;;  %v858_v12 = vld [vmem:[%s5671_s17 + $0x2c0] sm:$0xff] }
  0xef   : > { %2486 = vmatpush1.bf16.msra.mxu1 %v5178_v22  ;;  %2198 = vmatprep.subr.bf16.mxu0 %v5300_v3  ;;  %v1004_v22 = vunpack.c.h.s8.bf16 %v820_v13  ;;  %v1013_v25 = vunpack.c.l.s8.bf16 %v829_v20  ;;  %v860_v13 = vld [vmem:[%s5671_s17 + $0x2d0] sm:$0xff] }
  0xf0   : > { %2487 = vmatprep.subr.bf16.mxu1 %v5300_v3 }
  0xf2   : > { %2199 = vmatpush1.bf16.msra.mxu0 %v5179_v24  ;;  %v5190_v24 = vld [vmem:[%s5752_s7 + $0x1f0] sm:$0xff]  }
  0xf3   : > { %2488 = vmatpush1.bf16.msra.mxu1 %v5180_v26  ;;  %2200 = vmatprep.subr.bf16.mxu0 %v5300_v3  ;;  %v826_v26 = vld [vmem:[%s5671_s17 + $0x1c0] sm:$0xff] }
  0xf4   : > { %1675 = vmatmul.mubr.bf16.gmra.mrb[20].mxu0 %v938_v27  ;;  %2489 = vmatprep.subr.bf16.mxu1 %v5300_v3  ;;  %v828_v27 = vld [vmem:[%s5671_s17 + $0x1d0] sm:$0xff]  ;;  %v1018_v34 = vunpack.c.h.s8.bf16 %v826_v26 }
  0xf5   : > { %1964 = vmatmul.mubr.bf16.gmra.mrb[20].mxu1 %v940_v28  ;;  %1682 = vmatprep.mubr.bf16.mxu0 %v947_v29  ;;  %v1010_v28 = vunpack.c.l.s8.bf16 %v826_v26  ;;  %v1012_v29 = vunpack.c.l.s8.bf16 %v828_v27 }
  0xf6   : > { %1971 = vmatprep.mubr.bf16.mxu1 %v949_v30  ;;  %2201 = vmatpush1.bf16.msra.mxu0 %v5181_v31  ;;  %v1019_v30 = vunpack.c.h.s8.bf16 %v827_v19  ;;  %v1021_v31 = vunpack.c.h.s8.bf16 %v829_v20  ;;  %v869_v19 = vld [vmem:[%s5671_s17 + $0x318] sm:$0xff]  ;;  %v1082_v20 = vunpack.c.h.s8.bf16 %v858_v12 }
  0xf7   : > { %2490 = vmatpush1.bf16.msra.mxu1 %v5182_v32  ;;  %2202 = vmatprep.subr.bf16.mxu0 %v5300_v3  ;;  %v5191_v32 = vld [vmem:[%s5752_s7 + $0x178] sm:$0xff]  }
  0xf8   : > { %2491 = vmatprep.subr.bf16.mxu1 %v5300_v3 }
  0xfa   : > { %2203 = vmatpush1.bf16.msra.mxu0 %v5183_v39  ;;  %v834_v39 = vld [vmem:[%s5671_s17 + $0x200] sm:$0xff] }
  0xfb   : > { %2492 = vmatpush1.bf16.msra.mxu1 %v5184_v40  ;;  %2204 = vmatprep.subr.bf16.mxu0 %v5300_v3  ;;  %v836_v40 = vld [vmem:[%s5671_s17 + $0x210] sm:$0xff]  ;;  %v1026_v41 = vunpack.c.l.s8.bf16 %v834_v39  ;;  %v1034_v47 = vunpack.c.h.s8.bf16 %v834_v39 }
  0xfc   : > { %1683 = vmatmul.mubr.bf16.gmra.mrb[24].mxu0 %v946_v35  ;;  %2493 = vmatprep.subr.bf16.mxu1 %v5300_v3  ;;  %v1020_v35 = vunpack.c.h.s8.bf16 %v828_v27  ;;  %v1028_v42 = vunpack.c.l.s8.bf16 %v836_v40  ;;  %v1036_v48 = vunpack.c.h.s8.bf16 %v836_v40 }
  0xfd   : > { %1972 = vmatmul.mubr.bf16.gmra.mrb[24].mxu1 %v948_v36  ;;  %1690 = vmatprep.mubr.bf16.mxu0 %v955_v37  ;;  %v1027_v36 = vunpack.c.l.s8.bf16 %v835_v33  ;;  %v5192_v37 = vld [vmem:[%s5752_s7 + $0x1f8] sm:$0xff]  }
  0xfe   : > { %1979 = vmatprep.mubr.bf16.mxu1 %v957_v38  ;;  %2205 = vmatpush1.bf16.msra.mxu0 %v5185_v53 }
  0xff   : > { %2494 = vmatpush1.bf16.msra.mxu1 %v5186_v54  ;;  %2206 = vmatprep.subr.bf16.mxu0 %v5300_v3 }
 0x100   : > { %2495 = vmatprep.subr.bf16.mxu1 %v5300_v3 }
 0x102   : > { %2207 = vmatpush1.bf16.msra.mxu0 %v5187_v4 }
 0x103   : > { %2208 = vmatprep.subr.bf16.mxu0 %v5300_v3  ;;  %2496 = vmatpush1.bf16.msra.mxu1 %v5188_v10  ;;  %v1075_v10 = vunpack.c.l.s8.bf16 %v859_v6 }
 0x104   : > { %1691 = vmatmul.mubr.bf16.gmra.mrb[28].mxu0 %v954_v43  ;;  %2497 = vmatprep.subr.bf16.mxu1 %v5300_v3  ;;  %v1035_v43 = vunpack.c.h.s8.bf16 %v835_v33 }
 0x105   : > { %1980 = vmatmul.mubr.bf16.gmra.mrb[28].mxu1 %v956_v44  ;;  %1698 = vmatprep.mubr.bf16.mxu0 %v963_v45  ;;  %v843_v45 = vld [vmem:[%s5671_s17 + $0x248] sm:$0xff] }
 0x106   : > { %1987 = vmatprep.mubr.bf16.mxu1 %v965_v46  ;;  %2209 = vmatpush1.bf16.msra.mxu0 %v5189_v18  ;;  %v845_v46 = vld [vmem:[%s5671_s17 + $0x258] sm:$0xff]  ;;  %v1051_v55 = vunpack.c.h.s8.bf16 %v843_v45  ;;  %v867_v18 = vld [vmem:[%s5671_s17 + $0x308] sm:$0xff] }
 0x107   : > { %2210 = vmatprep.subr.bf16.mxu0 %v5300_v3  ;;  %2498 = vmatpush1.bf16.msra.mxu1 %v5190_v24  ;;  %v1053_v56 = vunpack.c.h.s8.bf16 %v845_v46  ;;  %v866_v24 = vld [vmem:[%s5671_s17 + $0x300] sm:$0xff] }
 0x108   : > { %2499 = vmatprep.subr.bf16.mxu1 %v5300_v3  ;;  %v837_v3 = vld [vmem:[%s5671_s17 + $0x218] sm:$0xff]  ;;  %v1090_v26 = vunpack.c.l.s8.bf16 %v866_v24 }
 0x109   : > { %v1029_v38 = vunpack.c.l.s8.bf16 %v837_v3  ;;  %v1037_v44 = vunpack.c.h.s8.bf16 %v837_v3 }
 0x10a   : > { %2211 = vmatpush1.bf16.msra.mxu0 %v5191_v32  ;;  %v1098_v32 = vunpack.c.h.s8.bf16 %v866_v24 }
 0x10b   : > { %2500 = vmatpush1.bf16.msra.mxu1 %v5192_v37 }
 0x10c   : > { %1699 = vmatmul.mubr.bf16.gmra.mrb[32].mxu0 %v962_v49  ;;  %v1043_v49 = vunpack.c.l.s8.bf16 %v843_v45 }
 0x10d   : > { %1988 = vmatmul.mubr.bf16.gmra.mrb[32].mxu1 %v964_v50  ;;  %1706 = vmatprep.mubr.bf16.mxu0 %v971_v51  ;;  %v1045_v50 = vunpack.c.l.s8.bf16 %v845_v46  ;;  %v842_v51 = vld [vmem:[%s5671_s17 + $0x240] sm:$0xff] }
 0x10e   : > { %1995 = vmatprep.mubr.bf16.mxu1 %v973_v52  ;;  %v844_v52 = vld [vmem:[%s5671_s17 + $0x250] sm:$0xff]  ;;  %v1042_v53 = vunpack.c.l.s8.bf16 %v842_v51 }
 0x10f   : > { %v1044_v54 = vunpack.c.l.s8.bf16 %v844_v52 }
 0x114   : > { %1707 = vmatmul.mubr.bf16.gmra.mrb[36].mxu0 %v970_v57  ;;  %v851_v57 = vld [vmem:[%s5671_s17 + $0x288] sm:$0xff] }
 0x115   : > { %1996 = vmatmul.mubr.bf16.gmra.mrb[36].mxu1 %v972_v58  ;;  %1714 = vmatprep.mubr.bf16.mxu0 %v979_v59  ;;  %v853_v58 = vld [vmem:[%s5671_s17 + $0x298] sm:$0xff]  ;;  %v1050_v59 = vunpack.c.h.s8.bf16 %v842_v51  ;;  %v1059_v61 = vunpack.c.l.s8.bf16 %v851_v57  ;;  %v1067_v4 = vunpack.c.h.s8.bf16 %v851_v57  ;;  %v882_v57 = vld [vmem:[%s5671_s17 + $0x380] sm:$0xff] }
 0x116   : > { %2003 = vmatprep.mubr.bf16.mxu1 %v981_v60  ;;  %v1052_v60 = vunpack.c.h.s8.bf16 %v844_v52  ;;  %v1061_v62 = vunpack.c.l.s8.bf16 %v853_v58  ;;  %v1069_v5 = vunpack.c.h.s8.bf16 %v853_v58  ;;  %v884_v58 = vld [vmem:[%s5671_s17 + $0x390] sm:$0xff] }
 0x11c   : > { %1715 = vmatmul.mubr.bf16.gmra.mrb[40].mxu0 %v978_v63  ;;  %v850_v63 = vld [vmem:[%s5671_s17 + $0x280] sm:$0xff] }
 0x11d   : > { %2004 = vmatmul.mubr.bf16.gmra.mrb[40].mxu1 %v980_v0  ;;  %1722 = vmatprep.mubr.bf16.mxu0 %v987_v1  ;;  %v852_v0 = vld [vmem:[%s5671_s17 + $0x290] sm:$0xff]  ;;  %v1058_v1 = vunpack.c.l.s8.bf16 %v850_v63 }
 0x11e   : > { %2011 = vmatprep.mubr.bf16.mxu1 %v989_v2  ;;  %v1060_v2 = vunpack.c.l.s8.bf16 %v852_v0 }
 0x124   : > { %1723 = vmatmul.mubr.bf16.gmra.mrb[44].mxu0 %v986_v7  ;;  %v861_v7 = vld [vmem:[%s5671_s17 + $0x2d8] sm:$0xff] }
 0x125   : > { %2012 = vmatmul.mubr.bf16.gmra.mrb[44].mxu1 %v988_v8  ;;  %1730 = vmatprep.mubr.bf16.mxu0 %v995_v9  ;;  %v1066_v8 = vunpack.c.h.s8.bf16 %v850_v63  ;;  %v1068_v9 = vunpack.c.h.s8.bf16 %v852_v0 }
 0x126   : > { %2019 = vmatprep.mubr.bf16.mxu1 %v997_v11  ;;  %v1077_v11 = vunpack.c.l.s8.bf16 %v861_v7 }
 0x12c   : > { %1731 = vmatmul.mubr.bf16.gmra.mrb[48].mxu0 %v994_v14  ;;  %v1074_v14 = vunpack.c.l.s8.bf16 %v858_v12  ;;  %v893_v12 = vld [vmem:[%s5671_s17 + $0x3d8] sm:$0xff] }
 0x12d   : > { %2020 = vmatmul.mubr.bf16.gmra.mrb[48].mxu1 %v996_v15  ;;  %1738 = vmatprep.mubr.bf16.mxu0 %v1003_v16  ;;  %v1076_v15 = vunpack.c.l.s8.bf16 %v860_v13  ;;  %v1083_v16 = vunpack.c.h.s8.bf16 %v859_v6 }
 0x12e   : > { %2027 = vmatprep.mubr.bf16.mxu1 %v1005_v17  ;;  %v1085_v17 = vunpack.c.h.s8.bf16 %v861_v7 }
 0x134   : > { %1739 = vmatmul.mubr.bf16.gmra.mrb[52].mxu0 %v1002_v21  ;;  %v1084_v21 = vunpack.c.h.s8.bf16 %v860_v13 }
 0x135   : > { %2028 = vmatmul.mubr.bf16.gmra.mrb[52].mxu1 %v1004_v22  ;;  %1746 = vmatprep.mubr.bf16.mxu0 %v1011_v23  ;;  %v1091_v22 = vunpack.c.l.s8.bf16 %v867_v18  ;;  %v1093_v23 = vunpack.c.l.s8.bf16 %v869_v19 }
 0x136   : > { %2035 = vmatprep.mubr.bf16.mxu1 %v1013_v25  ;;  %v868_v25 = vld [vmem:[%s5671_s17 + $0x310] sm:$0xff] }
 0x137   : > { %v1092_v27 = vunpack.c.l.s8.bf16 %v868_v25  ;;  %v1100_v33 = vunpack.c.h.s8.bf16 %v868_v25 }
 0x13c   : > { %1747 = vmatmul.mubr.bf16.gmra.mrb[56].mxu0 %v1010_v28  ;;  %v1099_v28 = vunpack.c.h.s8.bf16 %v867_v18 }
 0x13d   : > { %2036 = vmatmul.mubr.bf16.gmra.mrb[56].mxu1 %v1012_v29  ;;  %1754 = vmatprep.mubr.bf16.mxu0 %v1019_v30  ;;  %v1101_v29 = vunpack.c.h.s8.bf16 %v869_v19  ;;  %v875_v30 = vld [vmem:[%s5671_s17 + $0x348] sm:$0xff]  ;;  %v1132_v19 = vunpack.c.h.s8.bf16 %v884_v58 }
 0x13e   : > { %2043 = vmatprep.mubr.bf16.mxu1 %v1021_v31  ;;  %v877_v31 = vld [vmem:[%s5671_s17 + $0x358] sm:$0xff]  ;;  %v1107_v3 = vunpack.c.l.s8.bf16 %v875_v30  ;;  %v1115_v39 = vunpack.c.h.s8.bf16 %v875_v30 }
 0x13f   : > { %v1117_v40 = vunpack.c.h.s8.bf16 %v877_v31 }
 0x144   : > { %1755 = vmatmul.mubr.bf16.gmra.mrb[60].mxu0 %v1018_v34  ;;  %v1109_v34 = vunpack.c.l.s8.bf16 %v877_v31 }
 0x145   : > { %2044 = vmatmul.mubr.bf16.gmra.mrb[60].mxu1 %v1020_v35  ;;  %1762 = vmatprep.mubr.bf16.mxu0 %v1027_v36  ;;  %v874_v35 = vld [vmem:[%s5671_s17 + $0x340] sm:$0xff]  ;;  %v876_v36 = vld [vmem:[%s5671_s17 + $0x350] sm:$0xff] }
 0x146   : > { %2051 = vmatprep.mubr.bf16.mxu1 %v1029_v38  ;;  %v1106_v37 = vunpack.c.l.s8.bf16 %v874_v35  ;;  %v1108_v38 = vunpack.c.l.s8.bf16 %v876_v36  ;;  %v1114_v46 = vunpack.c.h.s8.bf16 %v874_v35 }
 0x14c   : > { %1763 = vmatmul.mubr.bf16.gmra.mrb[64].mxu0 %v1026_v41  ;;  %v883_v41 = vld [vmem:[%s5671_s17 + $0x388] sm:$0xff] }
 0x14d   : > { %2052 = vmatmul.mubr.bf16.gmra.mrb[64].mxu1 %v1028_v42  ;;  %1770 = vmatprep.mubr.bf16.mxu0 %v1035_v43  ;;  %v885_v43 = vld [vmem:[%s5671_s17 + $0x398] sm:$0xff]  ;;  %v1123_v51 = vunpack.c.l.s8.bf16 %v883_v41 }
 0x14e   : > { %2059 = vmatprep.mubr.bf16.mxu1 %v1037_v44  ;;  %v1133_v7 = vunpack.c.h.s8.bf16 %v885_v43 }
 0x154   : > { %1771 = vmatmul.mubr.bf16.gmra.mrb[68].mxu0 %v1034_v47 }
 0x155   : > { %2060 = vmatmul.mubr.bf16.gmra.mrb[68].mxu1 %v1036_v48  ;;  %1778 = vmatprep.mubr.bf16.mxu0 %v1043_v49 }
 0x156   : > { %2067 = vmatprep.mubr.bf16.mxu1 %v1045_v50  ;;  %v1116_v50 = vunpack.c.h.s8.bf16 %v876_v36 }
 0x15c   : > { %1779 = vmatmul.mubr.bf16.gmra.mrb[72].mxu0 %v1042_v53 }
 0x15d   : > { %2068 = vmatmul.mubr.bf16.gmra.mrb[72].mxu1 %v1044_v54  ;;  %1786 = vmatprep.mubr.bf16.mxu0 %v1051_v55  ;;  %v1125_v54 = vunpack.c.l.s8.bf16 %v885_v43  ;;  %v777_v43 = vld [vmem:[%s5671_s17 + $0x38] sm:$0xff] }
 0x15e   : > { %2075 = vmatprep.mubr.bf16.mxu1 %v1053_v56 }
 0x164   : > { %1787 = vmatmul.mubr.bf16.gmra.mrb[76].mxu0 %v1050_v59 }
 0x165   : > { %2076 = vmatmul.mubr.bf16.gmra.mrb[76].mxu1 %v1052_v60  ;;  %1794 = vmatprep.mubr.bf16.mxu0 %v1059_v61 }
 0x166   : > { %2083 = vmatprep.mubr.bf16.mxu1 %v1061_v62  ;;  %v1122_v62 = vunpack.c.l.s8.bf16 %v882_v57 }
 0x16c   : > { %1795 = vmatmul.mubr.bf16.gmra.mrb[80].mxu0 %v1058_v1 }
 0x16d   : > { %2084 = vmatmul.mubr.bf16.gmra.mrb[80].mxu1 %v1060_v2  ;;  %1802 = vmatprep.mubr.bf16.mxu0 %v1067_v4  ;;  %v1124_v2 = vunpack.c.l.s8.bf16 %v884_v58  ;;  %v1131_v4 = vunpack.c.h.s8.bf16 %v883_v41  ;;  %v775_v41 = vld [vmem:[%s5671_s17 + $0x28] sm:$0xff] }
 0x16e   : > { %2091 = vmatprep.mubr.bf16.mxu1 %v1069_v5 }
 0x174   : > { %1803 = vmatmul.mubr.bf16.gmra.mrb[84].mxu0 %v1066_v8 }
 0x175   : > { %2092 = vmatmul.mubr.bf16.gmra.mrb[84].mxu1 %v1068_v9  ;;  %1810 = vmatprep.mubr.bf16.mxu0 %v1075_v10  ;;  %v891_v10 = vld [vmem:[%s5671_s17 + $0x3c8] sm:$0xff] }
 0x176   : > { %2099 = vmatprep.mubr.bf16.mxu1 %v1077_v11  ;;  %v1147_v35 = vunpack.c.h.s8.bf16 %v891_v10 }
 0x17c   : > { %1811 = vmatmul.mubr.bf16.gmra.mrb[88].mxu0 %v1074_v14 }
 0x17d   : > { %2100 = vmatmul.mubr.bf16.gmra.mrb[88].mxu1 %v1076_v15  ;;  %1818 = vmatprep.mubr.bf16.mxu0 %v1083_v16  ;;  %v1130_v15 = vunpack.c.h.s8.bf16 %v882_v57 }
 0x17e   : > { %2107 = vmatprep.mubr.bf16.mxu1 %v1085_v17 }
 0x184   : > { %1819 = vmatmul.mubr.bf16.gmra.mrb[92].mxu0 %v1082_v20  ;;  %v1139_v20 = vunpack.c.l.s8.bf16 %v891_v10 }
 0x185   : > { %2108 = vmatmul.mubr.bf16.gmra.mrb[92].mxu1 %v1084_v21  ;;  %1826 = vmatprep.mubr.bf16.mxu0 %v1091_v22 }
 0x186   : > { %2115 = vmatprep.mubr.bf16.mxu1 %v1093_v23  ;;  %v1141_v23 = vunpack.c.l.s8.bf16 %v893_v12 }
 0x18c   : > { %1827 = vmatmul.mubr.bf16.gmra.mrb[96].mxu0 %v1090_v26  ;;  %v890_v26 = vld [vmem:[%s5671_s17 + $0x3c0] sm:$0xff] }
 0x18d   : > { %2116 = vmatmul.mubr.bf16.gmra.mrb[96].mxu1 %v1092_v27  ;;  %1834 = vmatprep.mubr.bf16.mxu0 %v1099_v28  ;;  %v892_v27 = vld [vmem:[%s5671_s17 + $0x3d0] sm:$0xff]  ;;  %v1138_v31 = vunpack.c.l.s8.bf16 %v890_v26 }
 0x18e   : > { %2123 = vmatprep.mubr.bf16.mxu1 %v1101_v29 }
 0x194   : > { %1835 = vmatmul.mubr.bf16.gmra.mrb[100].mxu0 %v1098_v32 }
 0x195   : > { %2124 = vmatmul.mubr.bf16.gmra.mrb[100].mxu1 %v1100_v33  ;;  %1842 = vmatprep.mubr.bf16.mxu0 %v1107_v3 }
 0x196   : > { %2131 = vmatprep.mubr.bf16.mxu1 %v1109_v34  ;;  %v1140_v34 = vunpack.c.l.s8.bf16 %v892_v27 }
 0x19c   : > { %1843 = vmatmul.mubr.bf16.gmra.mrb[104].mxu0 %v1106_v37 }
 0x19d   : > { %2132 = vmatmul.mubr.bf16.gmra.mrb[104].mxu1 %v1108_v38  ;;  %1850 = vmatprep.mubr.bf16.mxu0 %v1115_v39  ;;  %v1149_v38 = vunpack.c.h.s8.bf16 %v893_v12 }
 0x19e   : > { %2139 = vmatprep.mubr.bf16.mxu1 %v1117_v40 }
 0x19f   : > { %v1636_v42 = vpop.f32.mrb[0].mxu0 }
 0x1a0   : > { %v1925_v44 = vpop.f32.mrb[0].mxu1  ;;  %v1638_v45 = vpop.f32.mrb[1].mxu0 }
 0x1a1   : > { %v5938_v47 = vadd.f32 %v1925_v44, %v1636_v42  ;;  %v1927_v48 = vpop.f32.mrb[1].mxu1  ;;  %v1639_v49 = vpop.f32.mrb[2].mxu0 }
 0x1a2   : > { %v1928_v52 = vpop.f32.mrb[2].mxu1  ;;  %v1641_v53 = vpop.f32.mrb[3].mxu0 }
 0x1a3   : > { %v5940_v55 = vadd.f32 %v1928_v52, %v1639_v49  ;;  %v1930_v56 = vpop.f32.mrb[3].mxu1  ;;  %v903_v52 = vunpack.c.l.s8.bf16 %v775_v41 }
 0x1a4   : > { %1851 = vmatmul.mubr.bf16.gmra.mrb[108].mxu0 %v1114_v46  ;;  %v1146_v46 = vunpack.c.h.s8.bf16 %v890_v26  ;;  %v905_v56 = vunpack.c.l.s8.bf16 %v777_v43 }
 0x1a5   : > { %2140 = vmatmul.mubr.bf16.gmra.mrb[108].mxu1 %v1116_v50  ;;  %1858 = vmatprep.mubr.bf16.mxu0 %v1123_v51  ;;  %v1148_v51 = vunpack.c.h.s8.bf16 %v892_v27 }
 0x1a6   : > { %2147 = vmatprep.mubr.bf16.mxu1 %v1125_v54 }
 0x1a7   : > { %v1644_v59 = vpop.f32.mrb[4].mxu0 }
 0x1a8   : > { %v1933_v60 = vpop.f32.mrb[4].mxu1  ;;  %v1646_v61 = vpop.f32.mrb[5].mxu0 }
 0x1a9   : > { %v5944_v63 = vadd.f32 %v1933_v60, %v1644_v59  ;;  %v1935_v0 = vpop.f32.mrb[5].mxu1  ;;  %v1647_v1 = vpop.f32.mrb[6].mxu0  ;;  %v774_v59 = vld [vmem:[%s5671_s17 + $0x20] sm:$0xff]  ;;  %v776_v60 = vld [vmem:[%s5671_s17 + $0x30] sm:$0xff] }
 0x1aa   : > { %v1936_v5 = vpop.f32.mrb[6].mxu1  ;;  %v1649_v6 = vpop.f32.mrb[7].mxu0 }
 0x1ab   : > { %v5946_v8 = vadd.f32 %v1936_v5, %v1647_v1  ;;  %v1938_v9 = vpop.f32.mrb[7].mxu1  ;;  %v902_v1 = vunpack.c.l.s8.bf16 %v774_v59  ;;  %v904_v6 = vunpack.c.l.s8.bf16 %v776_v60 }
 0x1ac   : > { %1859 = vmatmul.mubr.bf16.gmra.mrb[112].mxu0 %v1122_v62 }
 0x1ad   : > { %2148 = vmatmul.mubr.bf16.gmra.mrb[112].mxu1 %v1124_v2  ;;  %1866 = vmatprep.mubr.bf16.mxu0 %v1131_v4 }
 0x1ae   : > { %2155 = vmatprep.mubr.bf16.mxu1 %v1133_v7  ;;  %v911_v7 = vunpack.c.h.s8.bf16 %v775_v41 }
 0x1af   : > { %v1652_v11 = vpop.f32.mrb[8].mxu0 }
 0x1b0   : > { %v1941_v13 = vpop.f32.mrb[8].mxu1  ;;  %v1654_v14 = vpop.f32.mrb[9].mxu0 }
 0x1b1   : > { %v5950_v16 = vadd.f32 %v1941_v13, %v1652_v11  ;;  %v1943_v17 = vpop.f32.mrb[9].mxu1  ;;  %v1655_v18 = vpop.f32.mrb[10].mxu0  ;;  %v913_v11 = vunpack.c.h.s8.bf16 %v777_v43  ;;  %v783_v14 = vld [vmem:[%s5671_s17 + $0x68] sm:$0xff] }
 0x1b2   : > { %v1944_v21 = vpop.f32.mrb[10].mxu1  ;;  %v1657_v22 = vpop.f32.mrb[11].mxu0  ;;  %v785_v17 = vld [vmem:[%s5671_s17 + $0x78] sm:$0xff]  ;;  %v919_v26 = vunpack.c.l.s8.bf16 %v783_v14  ;;  %v927_v43 = vunpack.c.h.s8.bf16 %v783_v14 }
 0x1b3   : > { %v5952_v24 = vadd.f32 %v1944_v21, %v1655_v18  ;;  %v1946_v25 = vpop.f32.mrb[11].mxu1 }
 0x1b4   : > { %1867 = vmatmul.mubr.bf16.gmra.mrb[116].mxu0 %v1130_v15  ;;  %v912_v25 = vunpack.c.h.s8.bf16 %v776_v60 }
 0x1b5   : > { %2156 = vmatmul.mubr.bf16.gmra.mrb[116].mxu1 %v1132_v19  ;;  %1874 = vmatprep.mubr.bf16.mxu0 %v1139_v20  ;;  %v910_v20 = vunpack.c.h.s8.bf16 %v774_v59 }
 0x1b6   : > { %2163 = vmatprep.mubr.bf16.mxu1 %v1141_v23 }
 0x1b7   : > { %v1660_v28 = vpop.f32.mrb[12].mxu0 }
 0x1b8   : > { %v1949_v29 = vpop.f32.mrb[12].mxu1  ;;  %v1662_v30 = vpop.f32.mrb[13].mxu0 }
 0x1b9   : > { %v5956_v32 = vadd.f32 %v1949_v29, %v1660_v28  ;;  %v1951_v33 = vpop.f32.mrb[13].mxu1  ;;  %v1663_v3 = vpop.f32.mrb[14].mxu0  ;;  %v921_v29 = vunpack.c.l.s8.bf16 %v785_v17 }
 0x1ba   : > { %v1952_v36 = vpop.f32.mrb[14].mxu1  ;;  %v1665_v37 = vpop.f32.mrb[15].mxu0  ;;  %v782_v33 = vld [vmem:[%s5671_s17 + $0x60] sm:$0xff] }
 0x1bb   : > { %v5958_v39 = vadd.f32 %v1952_v36, %v1663_v3  ;;  %v1954_v40 = vpop.f32.mrb[15].mxu1  ;;  %v784_v3 = vld [vmem:[%s5671_s17 + $0x70] sm:$0xff]  ;;  %v918_v37 = vunpack.c.l.s8.bf16 %v782_v33 }
 0x1bc   : > { %1875 = vmatmul.mubr.bf16.gmra.mrb[120].mxu0 %v1138_v31 }
 0x1bd   : > { %2164 = vmatmul.mubr.bf16.gmra.mrb[120].mxu1 %v1140_v34  ;;  %1882 = vmatprep.mubr.bf16.mxu0 %v1147_v35 }
 0x1be   : > { %2171 = vmatprep.mubr.bf16.mxu1 %v1149_v38 }
 0x1bf   : > { %v1668_v42 = vpop.f32.mrb[16].mxu0 }
 0x1c0   : > { %v1957_v44 = vpop.f32.mrb[16].mxu1  ;;  %v1670_v45 = vpop.f32.mrb[17].mxu0 }
 0x1c1   : > { %v5962_v48 = vadd.f32 %v1957_v44, %v1668_v42  ;;  %v1959_v49 = vpop.f32.mrb[17].mxu1  ;;  %v1671_v50 = vpop.f32.mrb[18].mxu0  ;;  %v920_v42 = vunpack.c.l.s8.bf16 %v784_v3 }
 0x1c2   : > { %v1960_v53 = vpop.f32.mrb[18].mxu1  ;;  %v1673_v54 = vpop.f32.mrb[19].mxu0 }
 0x1c3   : > { %v5964_v57 = vadd.f32 %v1960_v53, %v1671_v50  ;;  %v1962_v58 = vpop.f32.mrb[19].mxu1  ;;  %v793_v53 = vld [vmem:[%s5671_s17 + $0xb8] sm:$0xff] }
 0x1c4   : > { %1883 = vmatmul.mubr.bf16.gmra.mrb[124].mxu0 %v1146_v46  ;;  %v929_v46 = vunpack.c.h.s8.bf16 %v785_v17  ;;  %v926_v58 = vunpack.c.h.s8.bf16 %v782_v33  ;;  %v801_v33 = vld [vmem:[%s5671_s17 + $0xf8] sm:$0xff] }
 0x1c5   : > { %2172 = vmatmul.mubr.bf16.gmra.mrb[124].mxu1 %v1148_v51  ;;  %2212 = vmatprep.mubr.bf16.mxu0 %v903_v52  ;;  %v791_v51 = vld [vmem:[%s5671_s17 + $0xa8] sm:$0xff] }
 0x1c6   : > { %2501 = vmatprep.mubr.bf16.mxu1 %v905_v56 }
 0x1c7   : > { %v1676_v61 = vpop.f32.mrb[20].mxu0 }
 0x1c8   : > { %v1965_v62 = vpop.f32.mrb[20].mxu1  ;;  %v1678_v0 = vpop.f32.mrb[21].mxu0 }
 0x1c9   : > { %v5968_v2 = vadd.f32 %v1965_v62, %v1676_v61  ;;  %v1967_v4 = vpop.f32.mrb[21].mxu1  ;;  %v1679_v5 = vpop.f32.mrb[22].mxu0  ;;  %v928_v62 = vunpack.c.h.s8.bf16 %v784_v3  ;;  %v935_v0 = vunpack.c.l.s8.bf16 %v791_v51 }
 0x1ca   : > { %v1968_v9 = vpop.f32.mrb[22].mxu1  ;;  %v1681_v10 = vpop.f32.mrb[23].mxu0 }
 0x1cb   : > { %v5970_v12 = vadd.f32 %v1968_v9, %v1679_v5  ;;  %v1970_v13 = vpop.f32.mrb[23].mxu1  ;;  %v937_v5 = vunpack.c.l.s8.bf16 %v793_v53  ;;  %v790_v9 = vld [vmem:[%s5671_s17 + $0xa0] sm:$0xff]  ;;  %v792_v10 = vld [vmem:[%s5671_s17 + $0xb0] sm:$0xff] }
 0x1cc   : > { %2213 = vmatmul.mubr.bf16.vlgmr.msra.gmra.mrb[128].mxu0 %v902_v1 }
 0x1cd   : > { %2502 = vmatmul.mubr.bf16.vlgmr.msra.gmra.mrb[128].mxu1 %v904_v6  ;;  %2220 = vmatprep.mubr.bf16.mxu0 %v911_v7 }
 0x1ce   : > { %2509 = vmatprep.mubr.bf16.mxu1 %v913_v11 }
 0x1cf   : > { %v1684_v15 = vpop.f32.mrb[24].mxu0 }
 0x1d0   : > { %v1973_v18 = vpop.f32.mrb[24].mxu1  ;;  %v1686_v19 = vpop.f32.mrb[25].mxu0 }
 0x1d1   : > { %v5974_v21 = vadd.f32 %v1973_v18, %v1684_v15  ;;  %v1975_v22 = vpop.f32.mrb[25].mxu1  ;;  %v1687_v23 = vpop.f32.mrb[26].mxu0  ;;  %v934_v15 = vunpack.c.l.s8.bf16 %v790_v9 }
 0x1d2   : > { %v1976_v27 = vpop.f32.mrb[26].mxu1  ;;  %v1689_v28 = vpop.f32.mrb[27].mxu0  ;;  %v943_v22 = vunpack.c.h.s8.bf16 %v791_v51  ;;  %v798_v51 = vld [vmem:[%s5671_s17 + $0xe0] sm:$0xff] }
 0x1d3   : > { %v5976_v30 = vadd.f32 %v1976_v27, %v1687_v23  ;;  %v1978_v31 = vpop.f32.mrb[27].mxu1 }
 0x1d4   : > { %2221 = vmatmul.mubr.bf16.gmra.mrb[132].mxu0 %v910_v20  ;;  %v936_v20 = vunpack.c.l.s8.bf16 %v792_v10 }
 0x1d5   : > { %2510 = vmatmul.mubr.bf16.gmra.mrb[132].mxu1 %v912_v25  ;;  %2228 = vmatprep.mubr.bf16.mxu0 %v919_v26  ;;  %v945_v26 = vunpack.c.h.s8.bf16 %v793_v53 }
 0x1d6   : > { %2517 = vmatprep.mubr.bf16.mxu1 %v921_v29  ;;  %v799_v29 = vld [vmem:[%s5671_s17 + $0xe8] sm:$0xff] }
 0x1d7   : > { %v1692_v34 = vpop.f32.mrb[28].mxu0 }
 0x1d8   : > { %v1981_v35 = vpop.f32.mrb[28].mxu1  ;;  %v1694_v36 = vpop.f32.mrb[29].mxu0 }
 0x1d9   : > { %v5980_v38 = vadd.f32 %v1981_v35, %v1692_v34  ;;  %v1983_v40 = vpop.f32.mrb[29].mxu1  ;;  %v1695_v41 = vpop.f32.mrb[30].mxu0  ;;  %v942_v35 = vunpack.c.h.s8.bf16 %v790_v9 }
 0x1da   : > { %v1984_v44 = vpop.f32.mrb[30].mxu1  ;;  %v1697_v45 = vpop.f32.mrb[31].mxu0 }
 0x1db   : > { %v5982_v49 = vadd.f32 %v1984_v44, %v1695_v41  ;;  %v1986_v50 = vpop.f32.mrb[31].mxu1  ;;  %v944_v41 = vunpack.c.h.s8.bf16 %v792_v10  ;;  %v953_v45 = vunpack.c.l.s8.bf16 %v801_v33 }
 0x1dc   : > { %2229 = vmatmul.mubr.bf16.gmra.mrb[136].mxu0 %v918_v37 }
 0x1dd   : > { %2518 = vmatmul.mubr.bf16.gmra.mrb[136].mxu1 %v920_v42  ;;  %2236 = vmatprep.mubr.bf16.mxu0 %v927_v43  ;;  %v951_v42 = vunpack.c.l.s8.bf16 %v799_v29 }
 0x1de   : > { %2525 = vmatprep.mubr.bf16.mxu1 %v929_v46 }
 0x1df   : > { %v1700_v52 = vpop.f32.mrb[32].mxu0 }
 0x1e0   : > { %v1989_v54 = vpop.f32.mrb[32].mxu1  ;;  %v1702_v56 = vpop.f32.mrb[33].mxu0 }
 0x1e1   : > { %v5986_v59 = vadd.f32 %v1989_v54, %v1700_v52  ;;  %v1991_v60 = vpop.f32.mrb[33].mxu1  ;;  %v1703_v61 = vpop.f32.mrb[34].mxu0  ;;  %v800_v52 = vld [vmem:[%s5671_s17 + $0xf0] sm:$0xff] }
 0x1e2   : > { %v1992_v1 = vpop.f32.mrb[34].mxu1  ;;  %v1705_v4 = vpop.f32.mrb[35].mxu0 }
 0x1e3   : > { %v5988_v6 = vadd.f32 %v1992_v1, %v1703_v61  ;;  %v1994_v7 = vpop.f32.mrb[35].mxu1  ;;  %v959_v1 = vunpack.c.h.s8.bf16 %v799_v29 }
 0x1e4   : > { %2237 = vmatmul.mubr.bf16.gmra.mrb[140].mxu0 %v926_v58  ;;  %v950_v58 = vunpack.c.l.s8.bf16 %v798_v51  ;;  %v961_v7 = vunpack.c.h.s8.bf16 %v801_v33 }
 0x1e5   : > { %2526 = vmatmul.mubr.bf16.gmra.mrb[140].mxu1 %v928_v62  ;;  %2244 = vmatprep.mubr.bf16.mxu0 %v935_v0  ;;  %v952_v0 = vunpack.c.l.s8.bf16 %v800_v52 }
 0x1e6   : > { %2533 = vmatprep.mubr.bf16.mxu1 %v937_v5 }
 0x1e7   : > { %v1708_v11 = vpop.f32.mrb[36].mxu0 }
 0x1e8   : > { %v1997_v13 = vpop.f32.mrb[36].mxu1  ;;  %v1710_v14 = vpop.f32.mrb[37].mxu0 }
 0x1e9   : > { %v5992_v17 = vadd.f32 %v1997_v13, %v1708_v11  ;;  %v1999_v18 = vpop.f32.mrb[37].mxu1  ;;  %v1711_v19 = vpop.f32.mrb[38].mxu0  ;;  %v807_v11 = vld [vmem:[%s5671_s17 + $0x128] sm:$0xff]  ;;  %v809_v14 = vld [vmem:[%s5671_s17 + $0x138] sm:$0xff] }
 0x1ea   : > { %v2000_v23 = vpop.f32.mrb[38].mxu1  ;;  %v1713_v25 = vpop.f32.mrb[39].mxu0 }
 0x1eb   : > { %v5994_v27 = vadd.f32 %v2000_v23, %v1711_v19  ;;  %v2002_v28 = vpop.f32.mrb[39].mxu1  ;;  %v958_v19 = vunpack.c.h.s8.bf16 %v798_v51  ;;  %v960_v25 = vunpack.c.h.s8.bf16 %v800_v52  ;;  %v975_v51 = vunpack.c.h.s8.bf16 %v807_v11 }
 0x1ec   : > { %2245 = vmatmul.mubr.bf16.gmra.mrb[144].mxu0 %v934_v15 }
 0x1ed   : > { %2534 = vmatmul.mubr.bf16.gmra.mrb[144].mxu1 %v936_v20  ;;  %2252 = vmatprep.mubr.bf16.mxu0 %v943_v22 }
 0x1ee   : > { %2541 = vmatprep.mubr.bf16.mxu1 %v945_v26  ;;  %v967_v26 = vunpack.c.l.s8.bf16 %v807_v11 }
 0x1ef   : > { %v1716_v31 = vpop.f32.mrb[40].mxu0 }
 0x1f0   : > { %v2005_v3 = vpop.f32.mrb[40].mxu1  ;;  %v1718_v34 = vpop.f32.mrb[41].mxu0 }
 0x1f1   : > { %v5998_v36 = vadd.f32 %v2005_v3, %v1716_v31  ;;  %v2007_v37 = vpop.f32.mrb[41].mxu1  ;;  %v1719_v40 = vpop.f32.mrb[42].mxu0  ;;  %v969_v31 = vunpack.c.l.s8.bf16 %v809_v14  ;;  %v806_v34 = vld [vmem:[%s5671_s17 + $0x120] sm:$0xff] }
 0x1f2   : > { %v2008_v43 = vpop.f32.mrb[42].mxu1  ;;  %v1721_v44 = vpop.f32.mrb[43].mxu0 }
 0x1f3   : > { %v6000_v46 = vadd.f32 %v2008_v43, %v1719_v40  ;;  %v2010_v50 = vpop.f32.mrb[43].mxu1 }
 0x1f4   : > { %2253 = vmatmul.mubr.bf16.gmra.mrb[148].mxu0 %v942_v35  ;;  %v808_v35 = vld [vmem:[%s5671_s17 + $0x130] sm:$0xff] }
 0x1f5   : > { %2542 = vmatmul.mubr.bf16.gmra.mrb[148].mxu1 %v944_v41  ;;  %2260 = vmatprep.mubr.bf16.mxu0 %v951_v42  ;;  %v966_v42 = vunpack.c.l.s8.bf16 %v806_v34  ;;  %v968_v50 = vunpack.c.l.s8.bf16 %v808_v35 }
 0x1f6   : > { %2549 = vmatprep.mubr.bf16.mxu1 %v953_v45 }
 0x1f7   : > { %v1724_v53 = vpop.f32.mrb[44].mxu0 }
 0x1f8   : > { %v2013_v54 = vpop.f32.mrb[44].mxu1  ;;  %v1726_v56 = vpop.f32.mrb[45].mxu0 }
 0x1f9   : > { %v6004_v60 = vadd.f32 %v2013_v54, %v1724_v53  ;;  %v2015_v61 = vpop.f32.mrb[45].mxu1  ;;  %v1727_v62 = vpop.f32.mrb[46].mxu0  ;;  %v977_v54 = vunpack.c.h.s8.bf16 %v809_v14 }
 0x1fa   : > { %v2016_v4 = vpop.f32.mrb[46].mxu1  ;;  %v1729_v5 = vpop.f32.mrb[47].mxu0  ;;  %v815_v61 = vld [vmem:[%s5671_s17 + $0x168] sm:$0xff] }
 0x1fb   : > { %v6006_v9 = vadd.f32 %v2016_v4, %v1727_v62  ;;  %v2018_v10 = vpop.f32.mrb[47].mxu1  ;;  %v974_v5 = vunpack.c.h.s8.bf16 %v806_v34  ;;  %v983_v14 = vunpack.c.l.s8.bf16 %v815_v61 }
 0x1fc   : > { %2261 = vmatmul.mubr.bf16.gmra.mrb[152].mxu0 %v950_v58 }
 0x1fd   : > { %2550 = vmatmul.mubr.bf16.gmra.mrb[152].mxu1 %v952_v0  ;;  %2268 = vmatprep.mubr.bf16.mxu0 %v959_v1  ;;  %v817_v0 = vld [vmem:[%s5671_s17 + $0x178] sm:$0xff] }
 0x1fe   : > { %2557 = vmatprep.mubr.bf16.mxu1 %v961_v7 }
 0x1ff   : > { %v1732_v13 = vpop.f32.mrb[48].mxu0 }
 0x200   : > { %v2021_v15 = vpop.f32.mrb[48].mxu1  ;;  %v1734_v18 = vpop.f32.mrb[49].mxu0 }
 0x201   : > { %v6010_v20 = vadd.f32 %v2021_v15, %v1732_v13  ;;  %v2023_v22 = vpop.f32.mrb[49].mxu1  ;;  %v1735_v23 = vpop.f32.mrb[50].mxu0  ;;  %v976_v13 = vunpack.c.h.s8.bf16 %v808_v35 }
 0x202   : > { %v2024_v28 = vpop.f32.mrb[50].mxu1  ;;  %v1737_v29 = vpop.f32.mrb[51].mxu0 }
 0x203   : > { %v6012_v33 = vadd.f32 %v2024_v28, %v1735_v23  ;;  %v2026_v3 = vpop.f32.mrb[51].mxu1 }
 0x204   : > { %2269 = vmatmul.mubr.bf16.gmra.mrb[156].mxu0 %v958_v19  ;;  %v985_v19 = vunpack.c.l.s8.bf16 %v817_v0 }
 0x205   : > { %2558 = vmatmul.mubr.bf16.gmra.mrb[156].mxu1 %v960_v25  ;;  %2276 = vmatprep.mubr.bf16.mxu0 %v967_v26  ;;  %v814_v25 = vld [vmem:[%s5671_s17 + $0x160] sm:$0xff]  ;;  %v816_v26 = vld [vmem:[%s5671_s17 + $0x170] sm:$0xff] }
 0x206   : > { %2565 = vmatprep.mubr.bf16.mxu1 %v969_v31  ;;  %v982_v3 = vunpack.c.l.s8.bf16 %v814_v25 }
 0x207   : > { %v1740_v37 = vpop.f32.mrb[52].mxu0 }
 0x208   : > { %v2029_v40 = vpop.f32.mrb[52].mxu1  ;;  %v1742_v41 = vpop.f32.mrb[53].mxu0 }
 0x209   : > { %v6016_v43 = vadd.f32 %v2029_v40, %v1740_v37  ;;  %v2031_v44 = vpop.f32.mrb[53].mxu1  ;;  %v1743_v45 = vpop.f32.mrb[54].mxu0  ;;  %v984_v40 = vunpack.c.l.s8.bf16 %v816_v26  ;;  %v991_v41 = vunpack.c.h.s8.bf16 %v815_v61 }
 0x20a   : > { %v2032_v52 = vpop.f32.mrb[54].mxu1  ;;  %v1745_v53 = vpop.f32.mrb[55].mxu0 }
 0x20b   : > { %v6018_v56 = vadd.f32 %v2032_v52, %v1743_v45  ;;  %v2034_v58 = vpop.f32.mrb[55].mxu1  ;;  %v993_v45 = vunpack.c.h.s8.bf16 %v817_v0  ;;  %v823_v52 = vld [vmem:[%s5671_s17 + $0x1a8] sm:$0xff]  ;;  %v992_v0 = vunpack.c.h.s8.bf16 %v816_v26 }
 0x20c   : > { %2277 = vmatmul.mubr.bf16.gmra.mrb[160].mxu0 %v966_v42 }
 0x20d   : > { %2566 = vmatmul.mubr.bf16.gmra.mrb[160].mxu1 %v968_v50  ;;  %2284 = vmatprep.mubr.bf16.mxu0 %v975_v51 }
 0x20e   : > { %2573 = vmatprep.mubr.bf16.mxu1 %v977_v54  ;;  %v825_v54 = vld [vmem:[%s5671_s17 + $0x1b8] sm:$0xff] }
 0x20f   : > { %v1748_v62 = vpop.f32.mrb[56].mxu0 }
 0x210   : > { %v2037_v1 = vpop.f32.mrb[56].mxu1  ;;  %v1750_v4 = vpop.f32.mrb[57].mxu0 }
 0x211   : > { %v6022_v7 = vadd.f32 %v2037_v1, %v1748_v62  ;;  %v2039_v10 = vpop.f32.mrb[57].mxu1  ;;  %v1751_v11 = vpop.f32.mrb[58].mxu0  ;;  %v990_v1 = vunpack.c.h.s8.bf16 %v814_v25 }
 0x212   : > { %v2040_v15 = vpop.f32.mrb[58].mxu1  ;;  %v1753_v18 = vpop.f32.mrb[59].mxu0  ;;  %v999_v10 = vunpack.c.l.s8.bf16 %v823_v52 }
 0x213   : > { %v6024_v22 = vadd.f32 %v2040_v15, %v1751_v11  ;;  %v2042_v23 = vpop.f32.mrb[59].mxu1 }
 0x214   : > { %2285 = vmatmul.mubr.bf16.gmra.mrb[164].mxu0 %v974_v5  ;;  %v824_v23 = vld [vmem:[%s5671_s17 + $0x1b0] sm:$0xff] }
 0x215   : > { %2574 = vmatmul.mubr.bf16.gmra.mrb[164].mxu1 %v976_v13  ;;  %2292 = vmatprep.mubr.bf16.mxu0 %v983_v14  ;;  %v1001_v14 = vunpack.c.l.s8.bf16 %v825_v54 }
 0x216   : > { %2581 = vmatprep.mubr.bf16.mxu1 %v985_v19  ;;  %v822_v19 = vld [vmem:[%s5671_s17 + $0x1a0] sm:$0xff] }
 0x217   : > { %v1756_v28 = vpop.f32.mrb[60].mxu0 }
 0x218   : > { %v2045_v29 = vpop.f32.mrb[60].mxu1  ;;  %v1758_v31 = vpop.f32.mrb[61].mxu0 }
 0x219   : > { %v6028_v34 = vadd.f32 %v2045_v29, %v1756_v28  ;;  %v2047_v35 = vpop.f32.mrb[61].mxu1  ;;  %v1759_v37 = vpop.f32.mrb[62].mxu0  ;;  %v998_v31 = vunpack.c.l.s8.bf16 %v822_v19 }
 0x21a   : > { %v2048_v42 = vpop.f32.mrb[62].mxu1  ;;  %v1761_v44 = vpop.f32.mrb[63].mxu0 }
 0x21b   : > { %v6030_v50 = vadd.f32 %v2048_v42, %v1759_v37  ;;  %v2050_v51 = vpop.f32.mrb[63].mxu1  ;;  %v1000_v37 = vunpack.c.l.s8.bf16 %v824_v23  ;;  %v1009_v44 = vunpack.c.h.s8.bf16 %v825_v54  ;;  %v1008_v54 = vunpack.c.h.s8.bf16 %v824_v23 }
 0x21c   : > { %2293 = vmatmul.mubr.bf16.gmra.mrb[168].mxu0 %v982_v3 }
 0x21d   : > { %2582 = vmatmul.mubr.bf16.gmra.mrb[168].mxu1 %v984_v40  ;;  %2300 = vmatprep.mubr.bf16.mxu0 %v991_v41  ;;  %v1007_v40 = vunpack.c.h.s8.bf16 %v823_v52 }
 0x21e   : > { %2589 = vmatprep.mubr.bf16.mxu1 %v993_v45 }
 0x21f   : > { %v1764_v53 = vpop.f32.mrb[64].mxu0 }
 0x220   : > { %v2053_v58 = vpop.f32.mrb[64].mxu1  ;;  %v1766_v62 = vpop.f32.mrb[65].mxu0 }
 0x221   : > { %v6034_v4 = vadd.f32 %v2053_v58, %v1764_v53  ;;  %v2055_v61 = vpop.f32.mrb[65].mxu1  ;;  %v1767_v5 = vpop.f32.mrb[66].mxu0  ;;  %v831_v53 = vld [vmem:[%s5671_s17 + $0x1e8] sm:$0xff]  ;;  %v833_v62 = vld [vmem:[%s5671_s17 + $0x1f8] sm:$0xff] }
 0x222   : > { %v2056_v11 = vpop.f32.mrb[66].mxu1  ;;  %v1769_v13 = vpop.f32.mrb[67].mxu0 }
 0x223   : > { %v6036_v15 = vadd.f32 %v2056_v11, %v1767_v5  ;;  %v2058_v18 = vpop.f32.mrb[67].mxu1  ;;  %v1006_v5 = vunpack.c.h.s8.bf16 %v822_v19  ;;  %v1015_v11 = vunpack.c.l.s8.bf16 %v831_v53 }
 0x224   : > { %2301 = vmatmul.mubr.bf16.gmra.mrb[172].mxu0 %v990_v1  ;;  %v1017_v18 = vunpack.c.l.s8.bf16 %v833_v62 }
 0x225   : > { %2590 = vmatmul.mubr.bf16.gmra.mrb[172].mxu1 %v992_v0  ;;  %2308 = vmatprep.mubr.bf16.mxu0 %v999_v10 }
 0x226   : > { %2597 = vmatprep.mubr.bf16.mxu1 %v1001_v14 }
 0x227   : > { %v1772_v25 = vpop.f32.mrb[68].mxu0 }
 0x228   : > { %v2061_v28 = vpop.f32.mrb[68].mxu1  ;;  %v1774_v29 = vpop.f32.mrb[69].mxu0 }
 0x229   : > { %v6040_v3 = vadd.f32 %v2061_v28, %v1772_v25  ;;  %v2063_v26 = vpop.f32.mrb[69].mxu1  ;;  %v1775_v35 = vpop.f32.mrb[70].mxu0  ;;  %v830_v29 = vld [vmem:[%s5671_s17 + $0x1e0] sm:$0xff] }
 0x22a   : > { %v2064_v41 = vpop.f32.mrb[70].mxu1  ;;  %v1777_v42 = vpop.f32.mrb[71].mxu0 }
 0x22b   : > { %v6042_v45 = vadd.f32 %v2064_v41, %v1775_v35  ;;  %v2066_v51 = vpop.f32.mrb[71].mxu1 }
 0x22c   : > { %2309 = vmatmul.mubr.bf16.gmra.mrb[176].mxu0 %v998_v31  ;;  %v832_v31 = vld [vmem:[%s5671_s17 + $0x1f0] sm:$0xff] }
 0x22d   : > { %2598 = vmatmul.mubr.bf16.gmra.mrb[176].mxu1 %v1000_v37  ;;  %2316 = vmatprep.mubr.bf16.mxu0 %v1007_v40  ;;  %v1014_v37 = vunpack.c.l.s8.bf16 %v830_v29  ;;  %v1016_v42 = vunpack.c.l.s8.bf16 %v832_v31 }
 0x22e   : > { %2605 = vmatprep.mubr.bf16.mxu1 %v1009_v44  ;;  %v1023_v44 = vunpack.c.h.s8.bf16 %v831_v53 }
 0x22f   : > { %v1780_v58 = vpop.f32.mrb[72].mxu0 }
 0x230   : > { %v2069_v1 = vpop.f32.mrb[72].mxu1  ;;  %v1782_v61 = vpop.f32.mrb[73].mxu0 }
 0x231   : > { %v6046_v0 = vadd.f32 %v2069_v1, %v1780_v58  ;;  %v2071_v52 = vpop.f32.mrb[73].mxu1  ;;  %v1783_v10 = vpop.f32.mrb[74].mxu0  ;;  %v1025_v1 = vunpack.c.h.s8.bf16 %v833_v62  ;;  %v1024_v62 = vunpack.c.h.s8.bf16 %v832_v31 }
 0x232   : > { %v2072_v13 = vpop.f32.mrb[74].mxu1  ;;  %v1785_v14 = vpop.f32.mrb[75].mxu0  ;;  %v839_v52 = vld [vmem:[%s5671_s17 + $0x228] sm:$0xff] }
 0x233   : > { %v6048_v25 = vadd.f32 %v2072_v13, %v1783_v10  ;;  %v2074_v28 = vpop.f32.mrb[75].mxu1  ;;  %v1022_v14 = vunpack.c.h.s8.bf16 %v830_v29 }
 0x234   : > { %2317 = vmatmul.mubr.bf16.gmra.mrb[180].mxu0 %v1006_v5 }
 0x235   : > { %2606 = vmatmul.mubr.bf16.gmra.mrb[180].mxu1 %v1008_v54  ;;  %2324 = vmatprep.mubr.bf16.mxu0 %v1015_v11  ;;  %v841_v54 = vld [vmem:[%s5671_s17 + $0x238] sm:$0xff] }
 0x236   : > { %2613 = vmatprep.mubr.bf16.mxu1 %v1017_v18 }
 0x237   : > { %v1788_v19 = vpop.f32.mrb[76].mxu0 }
 0x238   : > { %v2077_v26 = vpop.f32.mrb[76].mxu1  ;;  %v1790_v35 = vpop.f32.mrb[77].mxu0 }
 0x239   : > { %v6052_v40 = vadd.f32 %v2077_v26, %v1788_v19  ;;  %v2079_v23 = vpop.f32.mrb[77].mxu1  ;;  %v1791_v41 = vpop.f32.mrb[78].mxu0  ;;  %v1031_v19 = vunpack.c.l.s8.bf16 %v839_v52 }
 0x23a   : > { %v2080_v51 = vpop.f32.mrb[78].mxu1  ;;  %v1793_v58 = vpop.f32.mrb[79].mxu0 }
 0x23b   : > { %v6054_v61 = vadd.f32 %v2080_v51, %v1791_v41  ;;  %v2082_v5 = vpop.f32.mrb[79].mxu1 }
 0x23c   : > { %2325 = vmatmul.mubr.bf16.gmra.mrb[184].mxu0 %v1014_v37  ;;  %v1033_v37 = vunpack.c.l.s8.bf16 %v841_v54 }
 0x23d   : > { %2614 = vmatmul.mubr.bf16.gmra.mrb[184].mxu1 %v1016_v42  ;;  %2332 = vmatprep.mubr.bf16.mxu0 %v1023_v44  ;;  %v838_v42 = vld [vmem:[%s5671_s17 + $0x220] sm:$0xff]  ;;  %v840_v44 = vld [vmem:[%s5671_s17 + $0x230] sm:$0xff] }
 0x23e   : > { %2621 = vmatprep.mubr.bf16.mxu1 %v1025_v1  ;;  %v1030_v1 = vunpack.c.l.s8.bf16 %v838_v42 }
 0x23f   : > { %v1796_v10 = vpop.f32.mrb[80].mxu0 }
 0x240   : > { %v2085_v11 = vpop.f32.mrb[80].mxu1  ;;  %v1798_v13 = vpop.f32.mrb[81].mxu0 }
 0x241   : > { %v6058_v18 = vadd.f32 %v2085_v11, %v1796_v10  ;;  %v2087_v53 = vpop.f32.mrb[81].mxu1  ;;  %v1799_v28 = vpop.f32.mrb[82].mxu0  ;;  %v1032_v11 = vunpack.c.l.s8.bf16 %v840_v44  ;;  %v1039_v13 = vunpack.c.h.s8.bf16 %v839_v52 }
 0x242   : > { %v2088_v26 = vpop.f32.mrb[82].mxu1  ;;  %v1801_v35 = vpop.f32.mrb[83].mxu0 }
 0x243   : > { %v6060_v23 = vadd.f32 %v2088_v26, %v1799_v28  ;;  %v2090_v41 = vpop.f32.mrb[83].mxu1  ;;  %v847_v26 = vld [vmem:[%s5671_s17 + $0x268] sm:$0xff] }
 0x244   : > { %2333 = vmatmul.mubr.bf16.gmra.mrb[188].mxu0 %v1022_v14  ;;  %v1041_v14 = vunpack.c.h.s8.bf16 %v841_v54  ;;  %v1040_v54 = vunpack.c.h.s8.bf16 %v840_v44 }
 0x245   : > { %2622 = vmatmul.mubr.bf16.gmra.mrb[188].mxu1 %v1024_v62  ;;  %2340 = vmatprep.mubr.bf16.mxu0 %v1031_v19 }
 0x246   : > { %2629 = vmatprep.mubr.bf16.mxu1 %v1033_v37  ;;  %v849_v37 = vld [vmem:[%s5671_s17 + $0x278] sm:$0xff] }
 0x247   : > { %v1804_v29 = vpop.f32.mrb[84].mxu0 }
 0x248   : > { %v2093_v51 = vpop.f32.mrb[84].mxu1  ;;  %v1806_v58 = vpop.f32.mrb[85].mxu0 }
 0x249   : > { %v6064_v5 = vadd.f32 %v2093_v51, %v1804_v29  ;;  %v2095_v31 = vpop.f32.mrb[85].mxu1  ;;  %v1807_v10 = vpop.f32.mrb[86].mxu0  ;;  %v1038_v51 = vunpack.c.h.s8.bf16 %v838_v42 }
 0x24a   : > { %v2096_v53 = vpop.f32.mrb[86].mxu1  ;;  %v1809_v28 = vpop.f32.mrb[87].mxu0 }
 0x24b   : > { %6689 = vst [vmem:[#allocation4_spill] sm:$0xff] %v6064_v5  ;;  %v6066_v62 = vadd.f32 %v2096_v53, %v1807_v10  ;;  %v2098_v19 = vpop.f32.mrb[87].mxu1  ;;  %v1047_v10 = vunpack.c.l.s8.bf16 %v847_v26 }
 0x24c   : > { %2341 = vmatmul.mubr.bf16.gmra.mrb[192].mxu0 %v1030_v1  ;;  %v1049_v1 = vunpack.c.l.s8.bf16 %v849_v37  ;;  %v848_v19 = vld [vmem:[%s5671_s17 + $0x270] sm:$0xff] }
 0x24d   : > { %6690 = vst [vmem:[#allocation5_spill] sm:$0xff] %v6066_v62  ;;  %2630 = vmatmul.mubr.bf16.gmra.mrb[192].mxu1 %v1032_v11  ;;  %2348 = vmatprep.mubr.bf16.mxu0 %v1039_v13  ;;  %v1154_v62 = vld [vmem:[#allocation2] sm:$0xff] }
 0x24e   : > { %2637 = vmatprep.mubr.bf16.mxu1 %v1041_v14  ;;  %v846_v14 = vld [vmem:[%s5671_s17 + $0x260] sm:$0xff] }
 0x24f   : > { %v1812_v35 = vpop.f32.mrb[88].mxu0 }
 0x250   : > { %v2101_v41 = vpop.f32.mrb[88].mxu1  ;;  %v1814_v29 = vpop.f32.mrb[89].mxu0 }
 0x251   : > { %v6070_v58 = vadd.f32 %v2101_v41, %v1812_v35  ;;  %v2103_v52 = vpop.f32.mrb[89].mxu1  ;;  %v1815_v31 = vpop.f32.mrb[90].mxu0  ;;  %v1046_v41 = vunpack.c.l.s8.bf16 %v846_v14 }
 0x252   : > { %v2104_v53 = vpop.f32.mrb[90].mxu1  ;;  %v1817_v28 = vpop.f32.mrb[91].mxu0 }
 0x253   : > { %6691 = vst [vmem:[#allocation6_spill] sm:$0xff] %v6070_v58  ;;  %v6072_v11 = vadd.f32 %v2104_v53, %v1815_v31  ;;  %v2106_v13 = vpop.f32.mrb[91].mxu1  ;;  %v1048_v58 = vunpack.c.l.s8.bf16 %v848_v19  ;;  %v1055_v31 = vunpack.c.h.s8.bf16 %v847_v26 }
 0x254   : > { %2349 = vmatmul.mubr.bf16.gmra.mrb[196].mxu0 %v1038_v51  ;;  %v1057_v51 = vunpack.c.h.s8.bf16 %v849_v37  ;;  %v1056_v37 = vunpack.c.h.s8.bf16 %v848_v19 }
 0x255   : > { %6692 = vst [vmem:[#allocation7_spill] sm:$0xff] %v6072_v11  ;;  %2638 = vmatmul.mubr.bf16.gmra.mrb[196].mxu1 %v1040_v54  ;;  %2356 = vmatprep.mubr.bf16.mxu0 %v1047_v10  ;;  %v857_v11 = vld [vmem:[%s5671_s17 + $0x2b8] sm:$0xff] }
 0x256   : > { %2645 = vmatprep.mubr.bf16.mxu1 %v1049_v1  ;;  %v855_v1 = vld [vmem:[%s5671_s17 + $0x2a8] sm:$0xff] }
 0x257   : > { %v1820_v42 = vpop.f32.mrb[92].mxu0 }
 0x258   : > { %v2109_v29 = vpop.f32.mrb[92].mxu1  ;;  %v1822_v35 = vpop.f32.mrb[93].mxu0 }
 0x259   : > { %v6076_v52 = vadd.f32 %v2109_v29, %v1820_v42  ;;  %v2111_v44 = vpop.f32.mrb[93].mxu1  ;;  %v1823_v28 = vpop.f32.mrb[94].mxu0 }
 0x25a   : > { %v2112_v53 = vpop.f32.mrb[94].mxu1  ;;  %v1825_v13 = vpop.f32.mrb[95].mxu0  ;;  %v1054_v44 = vunpack.c.h.s8.bf16 %v846_v14 }
 0x25b   : > { %6693 = vst [vmem:[#allocation8_spill] sm:$0xff] %v6076_v52  ;;  %v6078_v54 = vadd.f32 %v2112_v53, %v1823_v28  ;;  %v2114_v10 = vpop.f32.mrb[95].mxu1  ;;  %v1063_v28 = vunpack.c.l.s8.bf16 %v855_v1 }
 0x25c   : > { %2357 = vmatmul.mubr.bf16.gmra.mrb[200].mxu0 %v1046_v41  ;;  %v1065_v41 = vunpack.c.l.s8.bf16 %v857_v11 }
 0x25d   : > { %6694 = vst [vmem:[#allocation9_spill] sm:$0xff] %v6078_v54  ;;  %2646 = vmatmul.mubr.bf16.gmra.mrb[200].mxu1 %v1048_v58  ;;  %2364 = vmatprep.mubr.bf16.mxu0 %v1055_v31 }
 0x25e   : > { %2653 = vmatprep.mubr.bf16.mxu1 %v1057_v51  ;;  %v854_v51 = vld [vmem:[%s5671_s17 + $0x2a0] sm:$0xff] }
 0x25f   : > { %v1828_v35 = vpop.f32.mrb[96].mxu0 }
 0x260   : > { %v2117_v42 = vpop.f32.mrb[96].mxu1  ;;  %v1830_v29 = vpop.f32.mrb[97].mxu0 }
 0x261   : > { %v6082_v52 = vadd.f32 %v2117_v42, %v1828_v35  ;;  %v2119_v26 = vpop.f32.mrb[97].mxu1  ;;  %v1831_v13 = vpop.f32.mrb[98].mxu0  ;;  %v856_v29 = vld [vmem:[%s5671_s17 + $0x2b0] sm:$0xff]  ;;  %v1062_v42 = vunpack.c.l.s8.bf16 %v854_v51 }
 0x262   : > { %v2120_v53 = vpop.f32.mrb[98].mxu1  ;;  %v1833_v10 = vpop.f32.mrb[99].mxu0 }
 0x263   : > { %6695 = vst [vmem:[#allocation10_spill] sm:$0xff] %v6082_v52  ;;  %v6084_v58 = vadd.f32 %v2120_v53, %v1831_v13  ;;  %v2122_v31 = vpop.f32.mrb[99].mxu1  ;;  %v1064_v52 = vunpack.c.l.s8.bf16 %v856_v29  ;;  %v1071_v13 = vunpack.c.h.s8.bf16 %v855_v1 }
 0x264   : > { %2365 = vmatmul.mubr.bf16.gmra.mrb[204].mxu0 %v1054_v44  ;;  %v1073_v44 = vunpack.c.h.s8.bf16 %v857_v11  ;;  %v1072_v11 = vunpack.c.h.s8.bf16 %v856_v29 }
 0x265   : > { %6696 = vst [vmem:[#allocation11_spill] sm:$0xff] %v6084_v58  ;;  %2654 = vmatmul.mubr.bf16.gmra.mrb[204].mxu1 %v1056_v37  ;;  %2372 = vmatprep.mubr.bf16.mxu0 %v1063_v28  ;;  %v865_v58 = vld [vmem:[%s5671_s17 + $0x2f8] sm:$0xff] }
 0x266   : > { %2661 = vmatprep.mubr.bf16.mxu1 %v1065_v41  ;;  %v863_v41 = vld [vmem:[%s5671_s17 + $0x2e8] sm:$0xff] }
 0x267   : > { %v1836_v14 = vpop.f32.mrb[100].mxu0 }
 0x268   : > { %v2125_v54 = vpop.f32.mrb[100].mxu1  ;;  %v1838_v35 = vpop.f32.mrb[101].mxu0 }
 0x269   : > { %v6088_v26 = vadd.f32 %v2125_v54, %v1836_v14  ;;  %v2127_v19 = vpop.f32.mrb[101].mxu1  ;;  %v1839_v10 = vpop.f32.mrb[102].mxu0 }
 0x26a   : > { %v2128_v53 = vpop.f32.mrb[102].mxu1  ;;  %v1841_v31 = vpop.f32.mrb[103].mxu0  ;;  %v1070_v19 = vunpack.c.h.s8.bf16 %v854_v51 }
 0x26b   : > { %6697 = vst [vmem:[#allocation12_spill] sm:$0xff] %v6088_v26  ;;  %v6090_v37 = vadd.f32 %v2128_v53, %v1839_v10  ;;  %v2130_v28 = vpop.f32.mrb[103].mxu1  ;;  %v1079_v10 = vunpack.c.l.s8.bf16 %v863_v41 }
 0x26c   : > { %2373 = vmatmul.mubr.bf16.gmra.mrb[208].mxu0 %v1062_v42  ;;  %v1081_v42 = vunpack.c.l.s8.bf16 %v865_v58 }
 0x26d   : > { %6698 = vst [vmem:[#allocation13_spill] sm:$0xff] %v6090_v37  ;;  %2662 = vmatmul.mubr.bf16.gmra.mrb[208].mxu1 %v1064_v52  ;;  %2380 = vmatprep.mubr.bf16.mxu0 %v1071_v13 }
 0x26e   : > { %2669 = vmatprep.mubr.bf16.mxu1 %v1073_v44  ;;  %v862_v44 = vld [vmem:[%s5671_s17 + $0x2e0] sm:$0xff] }
 0x26f   : > { %v1844_v35 = vpop.f32.mrb[104].mxu0 }
 0x270   : > { %v2133_v54 = vpop.f32.mrb[104].mxu1  ;;  %v1846_v14 = vpop.f32.mrb[105].mxu0 }
 0x271   : > { %v6094_v26 = vadd.f32 %v2133_v54, %v1844_v35  ;;  %v2135_v1 = vpop.f32.mrb[105].mxu1  ;;  %v1847_v31 = vpop.f32.mrb[106].mxu0  ;;  %v864_v14 = vld [vmem:[%s5671_s17 + $0x2f0] sm:$0xff]  ;;  %v1078_v54 = vunpack.c.l.s8.bf16 %v862_v44 }
 0x272   : > { %v2136_v53 = vpop.f32.mrb[106].mxu1  ;;  %v1849_v28 = vpop.f32.mrb[107].mxu0 }
 0x273   : > { %6699 = vst [vmem:[#allocation14_spill] sm:$0xff] %v6094_v26  ;;  %v6096_v52 = vadd.f32 %v2136_v53, %v1847_v31  ;;  %v2138_v13 = vpop.f32.mrb[107].mxu1  ;;  %v1080_v26 = vunpack.c.l.s8.bf16 %v864_v14  ;;  %v1087_v31 = vunpack.c.h.s8.bf16 %v863_v41 }
 0x274   : > { %2381 = vmatmul.mubr.bf16.gmra.mrb[212].mxu0 %v1070_v19  ;;  %v1089_v19 = vunpack.c.h.s8.bf16 %v865_v58  ;;  %v1088_v58 = vunpack.c.h.s8.bf16 %v864_v14 }
 0x275   : > { %6700 = vst [vmem:[#allocation15_spill] sm:$0xff] %v6096_v52  ;;  %2670 = vmatmul.mubr.bf16.gmra.mrb[212].mxu1 %v1072_v11  ;;  %2388 = vmatprep.mubr.bf16.mxu0 %v1079_v10  ;;  %v873_v52 = vld [vmem:[%s5671_s17 + $0x338] sm:$0xff] }
 0x276   : > { %2677 = vmatprep.mubr.bf16.mxu1 %v1081_v42  ;;  %v871_v42 = vld [vmem:[%s5671_s17 + $0x328] sm:$0xff] }
 0x277   : > { %v1852_v51 = vpop.f32.mrb[108].mxu0 }
 0x278   : > { %v2141_v37 = vpop.f32.mrb[108].mxu1  ;;  %v1854_v35 = vpop.f32.mrb[109].mxu0 }
 0x279   : > { %v6100_v1 = vadd.f32 %v2141_v37, %v1852_v51  ;;  %v2143_v29 = vpop.f32.mrb[109].mxu1  ;;  %v1855_v28 = vpop.f32.mrb[110].mxu0 }
 0x27a   : > { %v2144_v53 = vpop.f32.mrb[110].mxu1  ;;  %v1857_v13 = vpop.f32.mrb[111].mxu0  ;;  %v1086_v29 = vunpack.c.h.s8.bf16 %v862_v44 }
 0x27b   : > { %6701 = vst [vmem:[#allocation16_spill] sm:$0xff] %v6100_v1  ;;  %v6102_v11 = vadd.f32 %v2144_v53, %v1855_v28  ;;  %v2146_v10 = vpop.f32.mrb[111].mxu1  ;;  %v1095_v28 = vunpack.c.l.s8.bf16 %v871_v42 }
 0x27c   : > { %2389 = vmatmul.mubr.bf16.gmra.mrb[216].mxu0 %v1078_v54  ;;  %v1097_v54 = vunpack.c.l.s8.bf16 %v873_v52 }
 0x27d   : > { %6702 = vst [vmem:[#allocation17_spill] sm:$0xff] %v6102_v11  ;;  %2678 = vmatmul.mubr.bf16.gmra.mrb[216].mxu1 %v1080_v26  ;;  %2396 = vmatprep.mubr.bf16.mxu0 %v1087_v31 }
 0x27e   : > { %2685 = vmatprep.mubr.bf16.mxu1 %v1089_v19  ;;  %v870_v19 = vld [vmem:[%s5671_s17 + $0x320] sm:$0xff] }
 0x27f   : > { %v1860_v35 = vpop.f32.mrb[112].mxu0 }
 0x280   : > { %v2149_v37 = vpop.f32.mrb[112].mxu1  ;;  %v1862_v51 = vpop.f32.mrb[113].mxu0 }
 0x281   : > { %v6106_v1 = vadd.f32 %v2149_v37, %v1860_v35  ;;  %v2151_v41 = vpop.f32.mrb[113].mxu1  ;;  %v1863_v13 = vpop.f32.mrb[114].mxu0  ;;  %v872_v51 = vld [vmem:[%s5671_s17 + $0x330] sm:$0xff]  ;;  %v1094_v37 = vunpack.c.l.s8.bf16 %v870_v19 }
 0x282   : > { %v2152_v53 = vpop.f32.mrb[114].mxu1  ;;  %v1865_v10 = vpop.f32.mrb[115].mxu0 }
 0x283   : > { %6703 = vst [vmem:[#allocation18_spill] sm:$0xff] %v6106_v1  ;;  %v6108_v26 = vadd.f32 %v2152_v53, %v1863_v13  ;;  %v2154_v31 = vpop.f32.mrb[115].mxu1  ;;  %v1096_v1 = vunpack.c.l.s8.bf16 %v872_v51  ;;  %v1103_v13 = vunpack.c.h.s8.bf16 %v871_v42 }
 0x284   : > { %2397 = vmatmul.mubr.bf16.gmra.mrb[220].mxu0 %v1086_v29  ;;  %v1105_v29 = vunpack.c.h.s8.bf16 %v873_v52  ;;  %v1104_v52 = vunpack.c.h.s8.bf16 %v872_v51 }
 0x285   : > { %6704 = vst [vmem:[#allocation19_spill] sm:$0xff] %v6108_v26  ;;  %2686 = vmatmul.mubr.bf16.gmra.mrb[220].mxu1 %v1088_v58  ;;  %2404 = vmatprep.mubr.bf16.mxu0 %v1095_v28  ;;  %v881_v26 = vld [vmem:[%s5671_s17 + $0x378] sm:$0xff] }
 0x286   : > { %2693 = vmatprep.mubr.bf16.mxu1 %v1097_v54  ;;  %v879_v54 = vld [vmem:[%s5671_s17 + $0x368] sm:$0xff] }
 0x287   : > { %v1868_v44 = vpop.f32.mrb[116].mxu0 }
 0x288   : > { %v2157_v11 = vpop.f32.mrb[116].mxu1  ;;  %v1870_v35 = vpop.f32.mrb[117].mxu0 }
 0x289   : > { %v6112_v41 = vadd.f32 %v2157_v11, %v1868_v44  ;;  %v2159_v14 = vpop.f32.mrb[117].mxu1  ;;  %v1871_v10 = vpop.f32.mrb[118].mxu0 }
 0x28a   : > { %v2160_v53 = vpop.f32.mrb[118].mxu1  ;;  %v1873_v31 = vpop.f32.mrb[119].mxu0  ;;  %v1102_v14 = vunpack.c.h.s8.bf16 %v870_v19 }
 0x28b   : > { %6705 = vst [vmem:[#allocation20_spill] sm:$0xff] %v6112_v41  ;;  %v6114_v58 = vadd.f32 %v2160_v53, %v1871_v10  ;;  %v2162_v28 = vpop.f32.mrb[119].mxu1  ;;  %v1111_v10 = vunpack.c.l.s8.bf16 %v879_v54 }
 0x28c   : > { %2405 = vmatmul.mubr.bf16.gmra.mrb[224].mxu0 %v1094_v37  ;;  %v1113_v37 = vunpack.c.l.s8.bf16 %v881_v26 }
 0x28d   : > { %6706 = vst [vmem:[#allocation21_spill] sm:$0xff] %v6114_v58  ;;  %2694 = vmatmul.mubr.bf16.gmra.mrb[224].mxu1 %v1096_v1  ;;  %2412 = vmatprep.mubr.bf16.mxu0 %v1103_v13 }
 0x28e   : > { %2701 = vmatprep.mubr.bf16.mxu1 %v1105_v29  ;;  %v878_v29 = vld [vmem:[%s5671_s17 + $0x360] sm:$0xff] }
 0x28f   : > { %v1876_v35 = vpop.f32.mrb[120].mxu0 }
 0x290   : > { %v2165_v11 = vpop.f32.mrb[120].mxu1  ;;  %v1878_v44 = vpop.f32.mrb[121].mxu0 }
 0x291   : > { %v6118_v41 = vadd.f32 %v2165_v11, %v1876_v35  ;;  %v2167_v42 = vpop.f32.mrb[121].mxu1  ;;  %v1879_v31 = vpop.f32.mrb[122].mxu0  ;;  %v880_v44 = vld [vmem:[%s5671_s17 + $0x370] sm:$0xff]  ;;  %v1110_v11 = vunpack.c.l.s8.bf16 %v878_v29 }
 0x292   : > { %v2168_v53 = vpop.f32.mrb[122].mxu1  ;;  %v1881_v28 = vpop.f32.mrb[123].mxu0 }
 0x293   : > { %6707 = vst [vmem:[#allocation22_spill] sm:$0xff] %v6118_v41  ;;  %v6120_v1 = vadd.f32 %v2168_v53, %v1879_v31  ;;  %v2170_v13 = vpop.f32.mrb[123].mxu1  ;;  %v1112_v41 = vunpack.c.l.s8.bf16 %v880_v44  ;;  %v1119_v31 = vunpack.c.h.s8.bf16 %v879_v54 }
 0x294   : > { %2413 = vmatmul.mubr.bf16.gmra.mrb[228].mxu0 %v1102_v14  ;;  %v1121_v14 = vunpack.c.h.s8.bf16 %v881_v26  ;;  %v1120_v26 = vunpack.c.h.s8.bf16 %v880_v44  ;;  %v888_v44 = vld [vmem:[%s5671_s17 + $0x3b0] sm:$0xff] }
 0x295   : > { %6708 = vst [vmem:[#allocation23_spill] sm:$0xff] %v6120_v1  ;;  %2702 = vmatmul.mubr.bf16.gmra.mrb[228].mxu1 %v1104_v52  ;;  %2420 = vmatprep.mubr.bf16.mxu0 %v1111_v10  ;;  %v889_v1 = vld [vmem:[%s5671_s17 + $0x3b8] sm:$0xff] }
 0x296   : > { %2709 = vmatprep.mubr.bf16.mxu1 %v1113_v37  ;;  %v887_v37 = vld [vmem:[%s5671_s17 + $0x3a8] sm:$0xff] }
 0x297   : > { %v1884_v19 = vpop.f32.mrb[124].mxu0 }
 0x298   : > { %v2173_v58 = vpop.f32.mrb[124].mxu1  ;;  %v1886_v35 = vpop.f32.mrb[125].mxu0 }
 0x299   : > { %v6124_v42 = vadd.f32 %v2173_v58, %v1884_v19  ;;  %v2175_v51 = vpop.f32.mrb[125].mxu1  ;;  %v1887_v28 = vpop.f32.mrb[126].mxu0 }
 0x29a   : > { %v2176_v53 = vpop.f32.mrb[126].mxu1  ;;  %v1889_v13 = vpop.f32.mrb[127].mxu0 }
 0x29b   : > { %6709 = vst [vmem:[#allocation24_spill] sm:$0xff] %v6124_v42  ;;  %v6126_v52 = vadd.f32 %v2176_v53, %v1887_v28  ;;  %v2178_v10 = vpop.f32.mrb[127].mxu1  ;;  %v1118_v42 = vunpack.c.h.s8.bf16 %v878_v29  ;;  %v1127_v28 = vunpack.c.l.s8.bf16 %v887_v37  ;;  %v886_v29 = vld [vmem:[%s5671_s17 + $0x3a0] sm:$0xff] }
 0x29c   : > { %2421 = vmatmul.mubr.bf16.gmra.mrb[232].mxu0 %v1110_v11  ;;  %v1155_v10 = vld [vmem:[#allocation2 + $0x8] sm:$0xff] }
 0x29d   : > { %6710 = vst [vmem:[#allocation25_spill] sm:$0xff] %v6126_v52  ;;  %2710 = vmatmul.mubr.bf16.gmra.mrb[232].mxu1 %v1112_v41  ;;  %2428 = vmatprep.mubr.bf16.mxu0 %v1119_v31 }
 0x29e   : > { %2717 = vmatprep.mubr.bf16.mxu1 %v1121_v14  ;;  %v1129_v14 = vunpack.c.l.s8.bf16 %v889_v1 }
 0x29f   : > { %v2214_v35 = vpop.f32.mrb[128].mxu0 }
 0x2a0   : > { %v2215_v58 = vadd.f32 %v2214_v35, %v5938_v47  ;;  %v2503_v19 = vpop.f32.mrb[128].mxu1  ;;  %v2216_v51 = vpop.f32.mrb[129].mxu0 }
 0x2a1   : > { %v2505_v54 = vpop.f32.mrb[129].mxu1  ;;  %v2217_v13 = vpop.f32.mrb[130].mxu0 }
 0x2a2   : > { %v2504_v53 = vadd.f32 %v2503_v19, %v2215_v58  ;;  %v2218_v41 = vadd.f32 %v2217_v13, %v5940_v55  ;;  %v2506_v11 = vpop.f32.mrb[130].mxu1  ;;  %v2219_v31 = vpop.f32.mrb[131].mxu0  ;;  %v1126_v54 = vunpack.c.l.s8.bf16 %v886_v29  ;;  %v1156_v13 = vld [vmem:[#allocation2 + $0x10] sm:$0xff] }
 0x2a3   : > { %v2508_v52 = vpop.f32.mrb[131].mxu1 }
 0x2a4   : > { %v2758_v5 = vadd.f32 %v2504_v53, %v1154_v62  ;;  %v2507_v47 = vadd.f32 %v2506_v11, %v2218_v41  ;;  %2429 = vmatmul.mubr.bf16.gmra.mrb[236].mxu0 %v1118_v42  ;;  %v1128_v62 = vunpack.c.l.s8.bf16 %v888_v44  ;;  %v1135_v53 = vunpack.c.h.s8.bf16 %v887_v37  ;;  %v1157_v11 = vld [vmem:[#allocation2 + $0x18] sm:$0xff] }
 0x2a5   : > { %2718 = vmatmul.mubr.bf16.gmra.mrb[236].mxu1 %v1120_v26  ;;  %2436 = vmatprep.mubr.bf16.mxu0 %v1127_v28  ;;  %v1137_v41 = vunpack.c.h.s8.bf16 %v889_v1  ;;  %v1158_v1 = vld [vmem:[#allocation2 + $0x20] sm:$0xff] }
 0x2a6   : > { %2822 = vst [vmem:[#allocation2] sm:$0xff] %v2758_v5  ;;  %v2759_v35 = vadd.f32 %v2507_v47, %v1155_v10  ;;  %2725 = vmatprep.mubr.bf16.mxu1 %v1129_v14 }
 0x2a7   : > { %v2222_v51 = vpop.f32.mrb[132].mxu0 }
 0x2a8   : > { %2823 = vst [vmem:[#allocation2 + $0x8] sm:$0xff] %v2759_v35  ;;  %v2223_v58 = vadd.f32 %v2222_v51, %v5944_v63  ;;  %v2511_v55 = vpop.f32.mrb[132].mxu1  ;;  %v2224_v19 = vpop.f32.mrb[133].mxu0  ;;  %v895_v35 = vld [vmem:[%s5671_s17 + $0x3e8] sm:$0xff]  ;;  %v897_v51 = vld [vmem:[%s5671_s17 + $0x3f8] sm:$0xff] }
 0x2a9   : > { %v2513_v31 = vpop.f32.mrb[133].mxu1  ;;  %v2225_v52 = vpop.f32.mrb[134].mxu0  ;;  %v1134_v19 = vunpack.c.h.s8.bf16 %v886_v29  ;;  %v894_v29 = vld [vmem:[%s5671_s17 + $0x3e0] sm:$0xff] }
 0x2aa   : > { %v2512_v42 = vadd.f32 %v2511_v55, %v2223_v58  ;;  %v2226_v26 = vadd.f32 %v2225_v52, %v5946_v8  ;;  %v2514_v5 = vpop.f32.mrb[134].mxu1  ;;  %v2227_v28 = vpop.f32.mrb[135].mxu0  ;;  %v1136_v52 = vunpack.c.h.s8.bf16 %v888_v44  ;;  %v896_v44 = vld [vmem:[%s5671_s17 + $0x3f0] sm:$0xff]  ;;  %s4713_s17 = sshll.u32 (!%p4711_p12), %s2891_s11, 2 }
 0x2ab   : > { %v2516_v14 = vpop.f32.mrb[135].mxu1  ;;  %v1159_v28 = vld [vmem:[#allocation2 + $0x28] sm:$0xff]  ;;  %s6258_s30 = scalar_lea.vmem (!%p4711_p12), %s6683_s1, %s4713_s17 }
 0x2ac   : > { %v2760_v10 = vadd.f32 %v2512_v42, %v1156_v13  ;;  %v2515_v63 = vadd.f32 %v2514_v5, %v2226_v26  ;;  %2437 = vmatmul.mubr.bf16.gmra.mrb[240].mxu0 %v1126_v54  ;;  %v1143_v54 = vunpack.c.l.s8.bf16 %v895_v35  ;;  %v1145_v5 = vunpack.c.l.s8.bf16 %v897_v51 }
 0x2ad   : > { %2726 = vmatmul.mubr.bf16.gmra.mrb[240].mxu1 %v1128_v62  ;;  %2444 = vmatprep.mubr.bf16.mxu0 %v1135_v53 }
 0x2ae   : > { %2824 = vst [vmem:[#allocation2 + $0x10] sm:$0xff] %v2760_v10  ;;  %v2761_v47 = vadd.f32 %v2515_v63, %v1157_v11  ;;  %2733 = vmatprep.mubr.bf16.mxu1 %v1137_v41 }
 0x2af   : > { %v2230_v37 = vpop.f32.mrb[136].mxu0 }
 0x2b0   : > { %2825 = vst [vmem:[#allocation2 + $0x18] sm:$0xff] %v2761_v47  ;;  %v2231_v8 = vadd.f32 %v2230_v37, %v5950_v16  ;;  %v2519_v58 = vpop.f32.mrb[136].mxu1  ;;  %v2232_v55 = vpop.f32.mrb[137].mxu0  ;;  %v1142_v37 = vunpack.c.l.s8.bf16 %v894_v29 }
 0x2b1   : > { %v2521_v31 = vpop.f32.mrb[137].mxu1  ;;  %v2233_v13 = vpop.f32.mrb[138].mxu0 }
 0x2b2   : > { %v2520_v62 = vadd.f32 %v2519_v58, %v2231_v8  ;;  %v2234_v53 = vadd.f32 %v2233_v13, %v5952_v24  ;;  %v2522_v42 = vpop.f32.mrb[138].mxu1  ;;  %v2235_v26 = vpop.f32.mrb[139].mxu0  ;;  %v1160_v8 = vld [vmem:[#allocation2 + $0x30] sm:$0xff]  ;;  %v1151_v31 = vunpack.c.h.s8.bf16 %v895_v35 }
 0x2b3   : > { %v2524_v41 = vpop.f32.mrb[139].mxu1 }
 0x2b4   : > { %v2762_v11 = vadd.f32 %v2520_v62, %v1158_v1  ;;  %v2523_v16 = vadd.f32 %v2522_v42, %v2234_v53  ;;  %2445 = vmatmul.mubr.bf16.gmra.mrb[244].mxu0 %v1134_v19  ;;  %v1144_v1 = vunpack.c.l.s8.bf16 %v896_v44  ;;  %v1153_v62 = vunpack.c.h.s8.bf16 %v897_v51  ;;  %v1161_v53 = vld [vmem:[#allocation2 + $0x38] sm:$0xff] }
 0x2b5   : > { %2734 = vmatmul.mubr.bf16.gmra.mrb[244].mxu1 %v1136_v52  ;;  %2452 = vmatprep.mubr.bf16.mxu0 %v1143_v54 }
 0x2b6   : > { %2826 = vst [vmem:[#allocation2 + $0x20] sm:$0xff] %v2762_v11  ;;  %v2763_v14 = vadd.f32 %v2523_v16, %v1159_v28  ;;  %2741 = vmatprep.mubr.bf16.mxu1 %v1145_v5  ;;  %v1162_v16 = vld [vmem:[#allocation2 + $0x40] sm:$0xff] }
 0x2b7   : > { %v2238_v10 = vpop.f32.mrb[140].mxu0 }
 0x2b8   : > { %2827 = vst [vmem:[#allocation2 + $0x28] sm:$0xff] %v2763_v14  ;;  %v2239_v63 = vadd.f32 %v2238_v10, %v5956_v32  ;;  %v2527_v24 = vpop.f32.mrb[140].mxu1  ;;  %v2240_v47 = vpop.f32.mrb[141].mxu0  ;;  %v1152_v10 = vunpack.c.h.s8.bf16 %v896_v44  ;;  %v1164_v44 = vld [vmem:[#allocation2 + $0x50] sm:$0xff] }
 0x2b9   : > { %v2529_v58 = vpop.f32.mrb[141].mxu1  ;;  %v2241_v55 = vpop.f32.mrb[142].mxu0 }
 0x2ba   : > { %v2528_v19 = vadd.f32 %v2527_v24, %v2239_v63  ;;  %v2242_v13 = vadd.f32 %v2241_v55, %v5958_v39  ;;  %v2530_v52 = vpop.f32.mrb[142].mxu1  ;;  %v2243_v54 = vpop.f32.mrb[143].mxu0  ;;  %v1150_v39 = vunpack.c.h.s8.bf16 %v894_v29 }
 0x2bb   : > { %v2532_v42 = vpop.f32.mrb[143].mxu1 }
 0x2bc   : > { %v2764_v26 = vadd.f32 %v2528_v19, %v1160_v8  ;;  %v2531_v5 = vadd.f32 %v2530_v52, %v2242_v13  ;;  %2453 = vmatmul.mubr.bf16.gmra.mrb[248].mxu0 %v1142_v37  ;;  %v1163_v8 = vld [vmem:[#allocation2 + $0x48] sm:$0xff] }
 0x2bd   : > { %2742 = vmatmul.mubr.bf16.gmra.mrb[248].mxu1 %v1144_v1  ;;  %2460 = vmatprep.mubr.bf16.mxu0 %v1151_v31 }
 0x2be   : > { %2828 = vst [vmem:[#allocation2 + $0x30] sm:$0xff] %v2764_v26  ;;  %v2765_v32 = vadd.f32 %v2531_v5, %v1161_v53  ;;  %2749 = vmatprep.mubr.bf16.mxu1 %v1153_v62  ;;  %v1165_v26 = vld [vmem:[#allocation2 + $0x58] sm:$0xff] }
 0x2bf   : > { %v2246_v28 = vpop.f32.mrb[144].mxu0 }
 0x2c0   : > { %2829 = vst [vmem:[#allocation2 + $0x38] sm:$0xff] %v2765_v32  ;;  %v2247_v35 = vadd.f32 %v2246_v28, %v5962_v48  ;;  %v2535_v41 = vpop.f32.mrb[144].mxu1  ;;  %v2248_v11 = vpop.f32.mrb[145].mxu0 }
 0x2c1   : > { %v2537_v14 = vpop.f32.mrb[145].mxu1  ;;  %v2249_v51 = vpop.f32.mrb[146].mxu0 }
 0x2c2   : > { %v2536_v63 = vadd.f32 %v2535_v41, %v2247_v35  ;;  %v2250_v24 = vadd.f32 %v2249_v51, %v5964_v57  ;;  %v2538_v47 = vpop.f32.mrb[146].mxu1  ;;  %v2251_v37 = vpop.f32.mrb[147].mxu0 }
 0x2c3   : > { %v2540_v58 = vpop.f32.mrb[147].mxu1 }
 0x2c4   : > { %v2766_v55 = vadd.f32 %v2536_v63, %v1162_v16  ;;  %v2539_v1 = vadd.f32 %v2538_v47, %v2250_v24  ;;  %2461 = vmatmul.mubr.bf16.gmra.mrb[252].mxu0 %v1150_v39  ;;  %v1166_v16 = vld [vmem:[#allocation2 + $0x60] sm:$0xff]  ;;  %v1167_v47 = vld [vmem:[#allocation2 + $0x68] sm:$0xff] }
 0x2c5   : > { %2750 = vmatmul.mubr.bf16.gmra.mrb[252].mxu1 %v1152_v10 }
 0x2c6   : > { %2830 = vst [vmem:[#allocation2 + $0x40] sm:$0xff] %v2766_v55  ;;  %v2767_v48 = vadd.f32 %v2539_v1, %v1163_v8 }
 0x2c7   : > { %v2254_v31 = vpop.f32.mrb[148].mxu0 }
 0x2c8   : > { %2831 = vst [vmem:[#allocation2 + $0x48] sm:$0xff] %v2767_v48  ;;  %v2255_v29 = vadd.f32 %v2254_v31, %v5968_v2  ;;  %v2543_v19 = vpop.f32.mrb[148].mxu1  ;;  %v2256_v13 = vpop.f32.mrb[149].mxu0 }
 0x2c9   : > { %v2545_v52 = vpop.f32.mrb[149].mxu1  ;;  %v2257_v54 = vpop.f32.mrb[150].mxu0 }
 0x2ca   : > { %v2544_v57 = vadd.f32 %v2543_v19, %v2255_v29  ;;  %v2258_v62 = vadd.f32 %v2257_v54, %v5970_v12  ;;  %v2546_v53 = vpop.f32.mrb[150].mxu1  ;;  %v2259_v42 = vpop.f32.mrb[151].mxu0  ;;  %v1168_v29 = vld [vmem:[#allocation2 + $0x70] sm:$0xff] }
 0x2cb   : > { %v2548_v5 = vpop.f32.mrb[151].mxu1 }
 0x2cc   : > { %v2768_v32 = vadd.f32 %v2544_v57, %v1164_v44  ;;  %v2547_v28 = vadd.f32 %v2546_v53, %v2258_v62  ;;  %v1169_v57 = vld [vmem:[#allocation2 + $0x78] sm:$0xff] }
 0x2ce   : > { %2832 = vst [vmem:[#allocation2 + $0x50] sm:$0xff] %v2768_v32  ;;  %v2769_v35 = vadd.f32 %v2547_v28, %v1165_v26 }
 0x2cf   : > { %v2262_v41 = vpop.f32.mrb[152].mxu0 }
 0x2d0   : > { %2833 = vst [vmem:[#allocation2 + $0x58] sm:$0xff] %v2769_v35  ;;  %v2263_v2 = vadd.f32 %v2262_v41, %v5974_v21  ;;  %v2551_v11 = vpop.f32.mrb[152].mxu1  ;;  %v2264_v39 = vpop.f32.mrb[153].mxu0  ;;  %v1170_v35 = vld [vmem:[#allocation2 + $0x80] sm:$0xff] }
 0x2d1   : > { %v2553_v14 = vpop.f32.mrb[153].mxu1  ;;  %v2265_v51 = vpop.f32.mrb[154].mxu0 }
 0x2d2   : > { %v2552_v10 = vadd.f32 %v2551_v11, %v2263_v2  ;;  %v2266_v12 = vadd.f32 %v2265_v51, %v5976_v30  ;;  %v2554_v63 = vpop.f32.mrb[154].mxu1  ;;  %v2267_v24 = vpop.f32.mrb[155].mxu0  ;;  %v1171_v14 = vld [vmem:[#allocation2 + $0x88] sm:$0xff] }
 0x2d3   : > { %v2556_v37 = vpop.f32.mrb[155].mxu1 }
 0x2d4   : > { %v2770_v8 = vadd.f32 %v2552_v10, %v1166_v16  ;;  %v2555_v58 = vadd.f32 %v2554_v63, %v2266_v12 }
 0x2d6   : > { %2834 = vst [vmem:[#allocation2 + $0x60] sm:$0xff] %v2770_v8  ;;  %v2771_v55 = vadd.f32 %v2555_v58, %v1167_v47  ;;  %v1172_v8 = vld [vmem:[#allocation2 + $0x90] sm:$0xff] }
 0x2d7   : > { %v2270_v1 = vpop.f32.mrb[156].mxu0 }
 0x2d8   : > { %2835 = vst [vmem:[#allocation2 + $0x68] sm:$0xff] %v2771_v55  ;;  %v2271_v21 = vadd.f32 %v2270_v1, %v5980_v38  ;;  %v2559_v48 = vpop.f32.mrb[156].mxu1  ;;  %v2272_v31 = vpop.f32.mrb[157].mxu0 }
 0x2d9   : > { %v2561_v19 = vpop.f32.mrb[157].mxu1  ;;  %v2273_v13 = vpop.f32.mrb[158].mxu0  ;;  %v1173_v31 = vld [vmem:[#allocation2 + $0x98] sm:$0xff] }
 0x2da   : > { %v2560_v44 = vadd.f32 %v2559_v48, %v2271_v21  ;;  %v2274_v30 = vadd.f32 %v2273_v13, %v5982_v49  ;;  %v2562_v52 = vpop.f32.mrb[158].mxu1  ;;  %v2275_v54 = vpop.f32.mrb[159].mxu0 }
 0x2db   : > { %v2564_v62 = vpop.f32.mrb[159].mxu1 }
 0x2dc   : > { %v2772_v53 = vadd.f32 %v2560_v44, %v1168_v29  ;;  %v2563_v42 = vadd.f32 %v2562_v52, %v2274_v30 }
 0x2de   : > { %2836 = vst [vmem:[#allocation2 + $0x70] sm:$0xff] %v2772_v53  ;;  %v2773_v26 = vadd.f32 %v2563_v42, %v1169_v57  ;;  %v1174_v57 = vld [vmem:[#allocation2 + $0xa0] sm:$0xff] }
 0x2df   : > { %v2278_v5 = vpop.f32.mrb[160].mxu0 }
 0x2e0   : > { %2837 = vst [vmem:[#allocation2 + $0x78] sm:$0xff] %v2773_v26  ;;  %v2279_v38 = vadd.f32 %v2278_v5, %v5986_v59  ;;  %v2567_v32 = vpop.f32.mrb[160].mxu1  ;;  %v2280_v28 = vpop.f32.mrb[161].mxu0 }
 0x2e1   : > { %v2569_v41 = vpop.f32.mrb[161].mxu1  ;;  %v2281_v2 = vpop.f32.mrb[162].mxu0 }
 0x2e2   : > { %v2568_v11 = vadd.f32 %v2567_v32, %v2279_v38  ;;  %v2282_v49 = vadd.f32 %v2281_v2, %v5988_v6  ;;  %v2570_v39 = vpop.f32.mrb[162].mxu1  ;;  %v2283_v16 = vpop.f32.mrb[163].mxu0  ;;  %v1175_v38 = vld [vmem:[#allocation2 + $0xa8] sm:$0xff] }
 0x2e3   : > { %v2572_v51 = vpop.f32.mrb[163].mxu1 }
 0x2e4   : > { %v2774_v10 = vadd.f32 %v2568_v11, %v1170_v35  ;;  %v2571_v12 = vadd.f32 %v2570_v39, %v2282_v49  ;;  %v1176_v39 = vld [vmem:[#allocation2 + $0xb0] sm:$0xff] }
 0x2e6   : > { %2838 = vst [vmem:[#allocation2 + $0x80] sm:$0xff] %v2774_v10  ;;  %v2775_v63 = vadd.f32 %v2571_v12, %v1171_v14 }
 0x2e7   : > { %v2286_v24 = vpop.f32.mrb[164].mxu0 }
 0x2e8   : > { %2839 = vst [vmem:[#allocation2 + $0x88] sm:$0xff] %v2775_v63  ;;  %v2287_v59 = vadd.f32 %v2286_v24, %v5992_v17  ;;  %v2575_v47 = vpop.f32.mrb[164].mxu1  ;;  %v2288_v37 = vpop.f32.mrb[165].mxu0  ;;  %v1177_v63 = vld [vmem:[#allocation2 + $0xb8] sm:$0xff] }
 0x2e9   : > { %v2577_v58 = vpop.f32.mrb[165].mxu1  ;;  %v2289_v55 = vpop.f32.mrb[166].mxu0 }
 0x2ea   : > { %v2576_v1 = vadd.f32 %v2575_v47, %v2287_v59  ;;  %v2290_v6 = vadd.f32 %v2289_v55, %v5994_v27  ;;  %v2578_v21 = vpop.f32.mrb[166].mxu1  ;;  %v2291_v48 = vpop.f32.mrb[167].mxu0 }
 0x2eb   : > { %v2580_v29 = vpop.f32.mrb[167].mxu1 }
 0x2ec   : > { %v2776_v19 = vadd.f32 %v2576_v1, %v1172_v8  ;;  %v2579_v13 = vadd.f32 %v2578_v21, %v2290_v6  ;;  %v1178_v1 = vld [vmem:[#allocation2 + $0xc0] sm:$0xff] }
 0x2ee   : > { %2840 = vst [vmem:[#allocation2 + $0x90] sm:$0xff] %v2776_v19  ;;  %v2777_v44 = vadd.f32 %v2579_v13, %v1173_v31  ;;  %v1179_v19 = vld [vmem:[#allocation2 + $0xc8] sm:$0xff] }
 0x2ef   : > { %v2294_v30 = vpop.f32.mrb[168].mxu0 }
 0x2f0   : > { %2841 = vst [vmem:[#allocation2 + $0x98] sm:$0xff] %v2777_v44  ;;  %v2295_v17 = vadd.f32 %v2294_v30, %v5998_v36  ;;  %v2583_v52 = vpop.f32.mrb[168].mxu1  ;;  %v2296_v54 = vpop.f32.mrb[169].mxu0 }
 0x2f1   : > { %v2585_v62 = vpop.f32.mrb[169].mxu1  ;;  %v2297_v53 = vpop.f32.mrb[170].mxu0 }
 0x2f2   : > { %v2584_v42 = vadd.f32 %v2583_v52, %v2295_v17  ;;  %v2298_v27 = vadd.f32 %v2297_v53, %v6000_v46  ;;  %v2586_v26 = vpop.f32.mrb[170].mxu1  ;;  %v2299_v5 = vpop.f32.mrb[171].mxu0  ;;  %v1180_v62 = vld [vmem:[#allocation2 + $0xd0] sm:$0xff] }
 0x2f3   : > { %v2588_v32 = vpop.f32.mrb[171].mxu1 }
 0x2f4   : > { %v2778_v28 = vadd.f32 %v2584_v42, %v1174_v57  ;;  %v2587_v35 = vadd.f32 %v2586_v26, %v2298_v27 }
 0x2f6   : > { %2842 = vst [vmem:[#allocation2 + $0xa0] sm:$0xff] %v2778_v28  ;;  %v2779_v41 = vadd.f32 %v2587_v35, %v1175_v38  ;;  %v1181_v38 = vld [vmem:[#allocation2 + $0xd8] sm:$0xff] }
 0x2f7   : > { %v2302_v2 = vpop.f32.mrb[172].mxu0 }
 0x2f8   : > { %2843 = vst [vmem:[#allocation2 + $0xa8] sm:$0xff] %v2779_v41  ;;  %v2303_v36 = vadd.f32 %v2302_v2, %v6004_v60  ;;  %v2591_v11 = vpop.f32.mrb[172].mxu1  ;;  %v2304_v49 = vpop.f32.mrb[173].mxu0 }
 0x2f9   : > { %v2593_v16 = vpop.f32.mrb[173].mxu1  ;;  %v2305_v14 = vpop.f32.mrb[174].mxu0  ;;  %v1182_v49 = vld [vmem:[#allocation2 + $0xe0] sm:$0xff] }
 0x2fa   : > { %v2592_v51 = vadd.f32 %v2591_v11, %v2303_v36  ;;  %v2306_v46 = vadd.f32 %v2305_v14, %v6006_v9  ;;  %v2594_v10 = vpop.f32.mrb[174].mxu1  ;;  %v2307_v12 = vpop.f32.mrb[175].mxu0 }
 0x2fb   : > { %v2596_v24 = vpop.f32.mrb[175].mxu1 }
 0x2fc   : > { %v2780_v59 = vadd.f32 %v2592_v51, %v1176_v39  ;;  %v2595_v47 = vadd.f32 %v2594_v10, %v2306_v46  ;;  %v1183_v10 = vld [vmem:[#allocation2 + $0xe8] sm:$0xff] }
 0x2fe   : > { %2844 = vst [vmem:[#allocation2 + $0xb0] sm:$0xff] %v2780_v59  ;;  %v2781_v37 = vadd.f32 %v2595_v47, %v1177_v63 }
 0x2ff   : > { %v2310_v8 = vpop.f32.mrb[176].mxu0 }
 0x300   : > { %2845 = vst [vmem:[#allocation2 + $0xb8] sm:$0xff] %v2781_v37  ;;  %v2311_v60 = vadd.f32 %v2310_v8, %v6010_v20  ;;  %v2599_v58 = vpop.f32.mrb[176].mxu1  ;;  %v2312_v55 = vpop.f32.mrb[177].mxu0 }
 0x301   : > { %v2601_v6 = vpop.f32.mrb[177].mxu1  ;;  %v2313_v21 = vpop.f32.mrb[178].mxu0 }
 0x302   : > { %v2600_v48 = vadd.f32 %v2599_v58, %v2311_v60  ;;  %v2314_v9 = vadd.f32 %v2313_v21, %v6012_v33  ;;  %v2602_v31 = vpop.f32.mrb[178].mxu1  ;;  %v2315_v29 = vpop.f32.mrb[179].mxu0  ;;  %v1184_v60 = vld [vmem:[#allocation2 + $0xf0] sm:$0xff] }
 0x303   : > { %v2604_v13 = vpop.f32.mrb[179].mxu1 }
 0x304   : > { %v2782_v44 = vadd.f32 %v2600_v48, %v1178_v1  ;;  %v2603_v30 = vadd.f32 %v2602_v31, %v2314_v9  ;;  %v1185_v48 = vld [vmem:[#allocation2 + $0xf8] sm:$0xff] }
 0x306   : > { %2846 = vst [vmem:[#allocation2 + $0xc0] sm:$0xff] %v2782_v44  ;;  %v2783_v17 = vadd.f32 %v2603_v30, %v1179_v19 }
 0x307   : > { %v2318_v52 = vpop.f32.mrb[180].mxu0 }
 0x308   : > { %2847 = vst [vmem:[#allocation2 + $0xc8] sm:$0xff] %v2783_v17  ;;  %v2319_v20 = vadd.f32 %v2318_v52, %v6016_v43  ;;  %v2607_v54 = vpop.f32.mrb[180].mxu1  ;;  %v2320_v57 = vpop.f32.mrb[181].mxu0  ;;  %v1186_v17 = vld [vmem:[#allocation2 + $0x100] sm:$0xff] }
 0x309   : > { %v2609_v53 = vpop.f32.mrb[181].mxu1  ;;  %v2321_v42 = vpop.f32.mrb[182].mxu0 }
 0x30a   : > { %v2608_v27 = vadd.f32 %v2607_v54, %v2319_v20  ;;  %v2322_v33 = vadd.f32 %v2321_v42, %v6018_v56  ;;  %v2610_v26 = vpop.f32.mrb[182].mxu1  ;;  %v2323_v5 = vpop.f32.mrb[183].mxu0  ;;  %v1187_v53 = vld [vmem:[#allocation2 + $0x108] sm:$0xff] }
 0x30b   : > { %v2612_v32 = vpop.f32.mrb[183].mxu1 }
 0x30c   : > { %v2784_v28 = vadd.f32 %v2608_v27, %v1180_v62  ;;  %v2611_v35 = vadd.f32 %v2610_v26, %v2322_v33 }
 0x30e   : > { %2848 = vst [vmem:[#allocation2 + $0xd0] sm:$0xff] %v2784_v28  ;;  %v2785_v41 = vadd.f32 %v2611_v35, %v1181_v38  ;;  %v1188_v28 = vld [vmem:[#allocation2 + $0x110] sm:$0xff] }
 0x30f   : > { %v2326_v2 = vpop.f32.mrb[184].mxu0 }
 0x310   : > { %2849 = vst [vmem:[#allocation2 + $0xd8] sm:$0xff] %v2785_v41  ;;  %v2327_v43 = vadd.f32 %v2326_v2, %v6022_v7  ;;  %v2615_v36 = vpop.f32.mrb[184].mxu1  ;;  %v2328_v11 = vpop.f32.mrb[185].mxu0 }
 0x311   : > { %v2617_v39 = vpop.f32.mrb[185].mxu1  ;;  %v2329_v16 = vpop.f32.mrb[186].mxu0  ;;  %v1189_v11 = vld [vmem:[#allocation2 + $0x118] sm:$0xff] }
 0x312   : > { %v2616_v14 = vadd.f32 %v2615_v36, %v2327_v43  ;;  %v2330_v56 = vadd.f32 %v2329_v16, %v6024_v22  ;;  %v2618_v51 = vpop.f32.mrb[186].mxu1  ;;  %v2331_v46 = vpop.f32.mrb[187].mxu0 }
 0x313   : > { %v2620_v12 = vpop.f32.mrb[187].mxu1 }
 0x314   : > { %v2786_v63 = vadd.f32 %v2616_v14, %v1182_v49  ;;  %v2619_v24 = vadd.f32 %v2618_v51, %v2330_v56 }
 0x316   : > { %2850 = vst [vmem:[#allocation2 + $0xe0] sm:$0xff] %v2786_v63  ;;  %v2787_v59 = vadd.f32 %v2619_v24, %v1183_v10  ;;  %v1190_v10 = vld [vmem:[#allocation2 + $0x120] sm:$0xff] }
 0x317   : > { %v2334_v47 = vpop.f32.mrb[188].mxu0 }
 0x318   : > { %2851 = vst [vmem:[#allocation2 + $0xe8] sm:$0xff] %v2787_v59  ;;  %v2335_v7 = vadd.f32 %v2334_v47, %v6028_v34  ;;  %v2623_v37 = vpop.f32.mrb[188].mxu1  ;;  %v2336_v8 = vpop.f32.mrb[189].mxu0 }
 0x319   : > { %v2625_v58 = vpop.f32.mrb[189].mxu1  ;;  %v2337_v55 = vpop.f32.mrb[190].mxu0 }
 0x31a   : > { %v2624_v1 = vadd.f32 %v2623_v37, %v2335_v7  ;;  %v2338_v22 = vadd.f32 %v2337_v55, %v6030_v50  ;;  %v2626_v6 = vpop.f32.mrb[190].mxu1  ;;  %v2339_v21 = vpop.f32.mrb[191].mxu0  ;;  %v1191_v7 = vld [vmem:[#allocation2 + $0x128] sm:$0xff] }
 0x31b   : > { %v2628_v9 = vpop.f32.mrb[191].mxu1 }
 0x31c   : > { %v2788_v31 = vadd.f32 %v2624_v1, %v1184_v60  ;;  %v2627_v29 = vadd.f32 %v2626_v6, %v2338_v22  ;;  %v1192_v6 = vld [vmem:[#allocation2 + $0x130] sm:$0xff] }
 0x31e   : > { %2852 = vst [vmem:[#allocation2 + $0xf0] sm:$0xff] %v2788_v31  ;;  %v2789_v19 = vadd.f32 %v2627_v29, %v1185_v48 }
 0x31f   : > { %v2342_v13 = vpop.f32.mrb[192].mxu0 }
 0x320   : > { %2853 = vst [vmem:[#allocation2 + $0xf8] sm:$0xff] %v2789_v19  ;;  %v2343_v34 = vadd.f32 %v2342_v13, %v6034_v4  ;;  %v2631_v44 = vpop.f32.mrb[192].mxu1  ;;  %v2344_v30 = vpop.f32.mrb[193].mxu0  ;;  %v1193_v19 = vld [vmem:[#allocation2 + $0x138] sm:$0xff] }
 0x321   : > { %v2633_v52 = vpop.f32.mrb[193].mxu1  ;;  %v2345_v20 = vpop.f32.mrb[194].mxu0 }
 0x322   : > { %v2632_v54 = vadd.f32 %v2631_v44, %v2343_v34  ;;  %v2346_v50 = vadd.f32 %v2345_v20, %v6036_v15  ;;  %v2634_v57 = vpop.f32.mrb[194].mxu1  ;;  %v2347_v62 = vpop.f32.mrb[195].mxu0 }
 0x323   : > { %v2636_v42 = vpop.f32.mrb[195].mxu1 }
 0x324   : > { %v2790_v27 = vadd.f32 %v2632_v54, %v1186_v17  ;;  %v2635_v33 = vadd.f32 %v2634_v57, %v2346_v50  ;;  %v1194_v54 = vld [vmem:[#allocation2 + $0x140] sm:$0xff] }
 0x326   : > { %2854 = vst [vmem:[#allocation2 + $0x100] sm:$0xff] %v2790_v27  ;;  %v2791_v26 = vadd.f32 %v2635_v33, %v1187_v53  ;;  %v1195_v27 = vld [vmem:[#allocation2 + $0x148] sm:$0xff] }
 0x327   : > { %v2350_v5 = vpop.f32.mrb[196].mxu0 }
 0x328   : > { %2855 = vst [vmem:[#allocation2 + $0x108] sm:$0xff] %v2791_v26  ;;  %v2351_v4 = vadd.f32 %v2350_v5, %v6040_v3  ;;  %v2639_v38 = vpop.f32.mrb[196].mxu1  ;;  %v2352_v32 = vpop.f32.mrb[197].mxu0 }
 0x329   : > { %v2641_v35 = vpop.f32.mrb[197].mxu1  ;;  %v2353_v41 = vpop.f32.mrb[198].mxu0  ;;  %v6711_v32 = vld [vmem:[#allocation4_spill] sm:$0xff] }
 0x32a   : > { %v2640_v2 = vadd.f32 %v2639_v38, %v2351_v4  ;;  %v2354_v15 = vadd.f32 %v2353_v41, %v6042_v45  ;;  %v2642_v43 = vpop.f32.mrb[198].mxu1  ;;  %v2355_v36 = vpop.f32.mrb[199].mxu0  ;;  %v1196_v41 = vld [vmem:[#allocation2 + $0x150] sm:$0xff] }
 0x32b   : > { %v2644_v49 = vpop.f32.mrb[199].mxu1  ;;  %v6712_v36 = vld [vmem:[#allocation5_spill] sm:$0xff] }
 0x32c   : > { %v2792_v39 = vadd.f32 %v2640_v2, %v1188_v28  ;;  %v2643_v16 = vadd.f32 %v2642_v43, %v2354_v15 }
 0x32e   : > { %2856 = vst [vmem:[#allocation2 + $0x110] sm:$0xff] %v2792_v39  ;;  %v2793_v14 = vadd.f32 %v2643_v16, %v1189_v11  ;;  %v1197_v39 = vld [vmem:[#allocation2 + $0x158] sm:$0xff] }
 0x32f   : > { %v2358_v56 = vpop.f32.mrb[200].mxu0 }
 0x330   : > { %2857 = vst [vmem:[#allocation2 + $0x118] sm:$0xff] %v2793_v14  ;;  %v2359_v3 = vadd.f32 %v2358_v56, %v6046_v0  ;;  %v2647_v51 = vpop.f32.mrb[200].mxu1  ;;  %v2360_v46 = vpop.f32.mrb[201].mxu0 }
 0x331   : > { %v2649_v12 = vpop.f32.mrb[201].mxu1  ;;  %v2361_v63 = vpop.f32.mrb[202].mxu0  ;;  %v6713_v46 = vld [vmem:[#allocation6_spill] sm:$0xff] }
 0x332   : > { %v2648_v24 = vadd.f32 %v2647_v51, %v2359_v3  ;;  %v2362_v45 = vadd.f32 %v2361_v63, %v6048_v25  ;;  %v2650_v59 = vpop.f32.mrb[202].mxu1  ;;  %v2363_v47 = vpop.f32.mrb[203].mxu0 }
 0x333   : > { %v2652_v37 = vpop.f32.mrb[203].mxu1 }
 0x334   : > { %v2794_v8 = vadd.f32 %v2648_v24, %v1190_v10  ;;  %v2651_v60 = vadd.f32 %v2650_v59, %v2362_v45  ;;  %v1198_v24 = vld [vmem:[#allocation2 + $0x160] sm:$0xff] }
 0x336   : > { %2858 = vst [vmem:[#allocation2 + $0x120] sm:$0xff] %v2794_v8  ;;  %v2795_v58 = vadd.f32 %v2651_v60, %v1191_v7  ;;  %v6714_v7 = vld [vmem:[#allocation7_spill] sm:$0xff] }
 0x337   : > { %v2366_v55 = vpop.f32.mrb[204].mxu0 }
 0x338   : > { %2859 = vst [vmem:[#allocation2 + $0x128] sm:$0xff] %v2795_v58  ;;  %v2367_v0 = vadd.f32 %v2366_v55, %v6052_v40  ;;  %v2655_v1 = vpop.f32.mrb[204].mxu1  ;;  %v2368_v22 = vpop.f32.mrb[205].mxu0  ;;  %v1199_v58 = vld [vmem:[#allocation2 + $0x168] sm:$0xff] }
 0x339   : > { %v2657_v21 = vpop.f32.mrb[205].mxu1  ;;  %v2369_v48 = vpop.f32.mrb[206].mxu0 }
 0x33a   : > { %v2656_v9 = vadd.f32 %v2655_v1, %v2367_v0  ;;  %v2370_v25 = vadd.f32 %v2369_v48, %v6054_v61  ;;  %v2658_v31 = vpop.f32.mrb[206].mxu1  ;;  %v2371_v29 = vpop.f32.mrb[207].mxu0  ;;  %v6715_v21 = vld [vmem:[#allocation8_spill] sm:$0xff] }
 0x33b   : > { %v2660_v13 = vpop.f32.mrb[207].mxu1 }
 0x33c   : > { %v2796_v34 = vadd.f32 %v2656_v9, %v1192_v6  ;;  %v2659_v44 = vadd.f32 %v2658_v31, %v2370_v25  ;;  %v1200_v31 = vld [vmem:[#allocation2 + $0x170] sm:$0xff] }
 0x33e   : > { %2860 = vst [vmem:[#allocation2 + $0x130] sm:$0xff] %v2796_v34  ;;  %v2797_v30 = vadd.f32 %v2659_v44, %v1193_v19  ;;  %v6716_v34 = vld [vmem:[#allocation9_spill] sm:$0xff] }
 0x33f   : > { %v2374_v17 = vpop.f32.mrb[208].mxu0 }
 0x340   : > { %2861 = vst [vmem:[#allocation2 + $0x138] sm:$0xff] %v2797_v30  ;;  %v2375_v40 = vadd.f32 %v2374_v17, %v6058_v18  ;;  %v2663_v52 = vpop.f32.mrb[208].mxu1  ;;  %v2376_v20 = vpop.f32.mrb[209].mxu0 }
 0x341   : > { %v2665_v50 = vpop.f32.mrb[209].mxu1  ;;  %v2377_v57 = vpop.f32.mrb[210].mxu0 }
 0x342   : > { %v2664_v62 = vadd.f32 %v2663_v52, %v2375_v40  ;;  %v2378_v61 = vadd.f32 %v2377_v57, %v6060_v23  ;;  %v2666_v53 = vpop.f32.mrb[210].mxu1  ;;  %v2379_v42 = vpop.f32.mrb[211].mxu0  ;;  %v1201_v40 = vld [vmem:[#allocation2 + $0x178] sm:$0xff] }
 0x343   : > { %v2668_v33 = vpop.f32.mrb[211].mxu1 }
 0x344   : > { %v2798_v26 = vadd.f32 %v2664_v62, %v1194_v54  ;;  %v2667_v5 = vadd.f32 %v2666_v53, %v2378_v61  ;;  %v6717_v62 = vld [vmem:[#allocation10_spill] sm:$0xff] }
 0x346   : > { %2862 = vst [vmem:[#allocation2 + $0x140] sm:$0xff] %v2798_v26  ;;  %v2799_v4 = vadd.f32 %v2667_v5, %v1195_v27  ;;  %v1202_v27 = vld [vmem:[#allocation2 + $0x180] sm:$0xff] }
 0x347   : > { %v2382_v38 = vpop.f32.mrb[212].mxu0 }
 0x348   : > { %2863 = vst [vmem:[#allocation2 + $0x148] sm:$0xff] %v2799_v4  ;;  %v2383_v18 = vadd.f32 %v2382_v38, %v6711_v32  ;;  %v2671_v28 = vpop.f32.mrb[212].mxu1  ;;  %v2384_v35 = vpop.f32.mrb[213].mxu0  ;;  %v6718_v4 = vld [vmem:[#allocation11_spill] sm:$0xff] }
 0x349   : > { %v2673_v2 = vpop.f32.mrb[213].mxu1  ;;  %v2385_v15 = vpop.f32.mrb[214].mxu0 }
 0x34a   : > { %v2672_v43 = vadd.f32 %v2671_v28, %v2383_v18  ;;  %v2386_v23 = vadd.f32 %v2385_v15, %v6712_v36  ;;  %v2674_v11 = vpop.f32.mrb[214].mxu1  ;;  %v2387_v49 = vpop.f32.mrb[215].mxu0  ;;  %v1203_v28 = vld [vmem:[#allocation2 + $0x188] sm:$0xff]  ;;  %v6719_v36 = vld [vmem:[#allocation12_spill] sm:$0xff] }
 0x34b   : > { %v2676_v16 = vpop.f32.mrb[215].mxu1 }
 0x34c   : > { %v2800_v14 = vadd.f32 %v2672_v43, %v1196_v41  ;;  %v2675_v56 = vadd.f32 %v2674_v11, %v2386_v23 }
 0x34e   : > { %2864 = vst [vmem:[#allocation2 + $0x150] sm:$0xff] %v2800_v14  ;;  %v2801_v3 = vadd.f32 %v2675_v56, %v1197_v39  ;;  %v1204_v39 = vld [vmem:[#allocation2 + $0x190] sm:$0xff] }
 0x34f   : > { %v2390_v51 = vpop.f32.mrb[216].mxu0 }
 0x350   : > { %2865 = vst [vmem:[#allocation2 + $0x158] sm:$0xff] %v2801_v3  ;;  %v2391_v10 = vadd.f32 %v2390_v51, %v6713_v46  ;;  %v2679_v12 = vpop.f32.mrb[216].mxu1  ;;  %v2392_v63 = vpop.f32.mrb[217].mxu0  ;;  %v6720_v3 = vld [vmem:[#allocation13_spill] sm:$0xff] }
 0x351   : > { %v2681_v45 = vpop.f32.mrb[217].mxu1  ;;  %v2393_v59 = vpop.f32.mrb[218].mxu0 }
 0x352   : > { %v2680_v47 = vadd.f32 %v2679_v12, %v2391_v10  ;;  %v2394_v37 = vadd.f32 %v2393_v59, %v6714_v7  ;;  %v2682_v8 = vpop.f32.mrb[218].mxu1  ;;  %v2395_v60 = vpop.f32.mrb[219].mxu0  ;;  %v1205_v12 = vld [vmem:[#allocation2 + $0x198] sm:$0xff]  ;;  %v6721_v7 = vld [vmem:[#allocation14_spill] sm:$0xff] }
 0x353   : > { %v2684_v55 = vpop.f32.mrb[219].mxu1 }
 0x354   : > { %v2802_v0 = vadd.f32 %v2680_v47, %v1198_v24  ;;  %v2683_v1 = vadd.f32 %v2682_v8, %v2394_v37 }
 0x356   : > { %2866 = vst [vmem:[#allocation2 + $0x160] sm:$0xff] %v2802_v0  ;;  %v2803_v22 = vadd.f32 %v2683_v1, %v1199_v58  ;;  %v1206_v58 = vld [vmem:[#allocation2 + $0x1a0] sm:$0xff] }
 0x357   : > { %v2398_v6 = vpop.f32.mrb[220].mxu0 }
 0x358   : > { %2867 = vst [vmem:[#allocation2 + $0x168] sm:$0xff] %v2803_v22  ;;  %v2399_v48 = vadd.f32 %v2398_v6, %v6715_v21  ;;  %v2687_v9 = vpop.f32.mrb[220].mxu1  ;;  %v2400_v25 = vpop.f32.mrb[221].mxu0  ;;  %v6722_v22 = vld [vmem:[#allocation15_spill] sm:$0xff] }
 0x359   : > { %v2689_v29 = vpop.f32.mrb[221].mxu1  ;;  %v2401_v19 = vpop.f32.mrb[222].mxu0 }
 0x35a   : > { %v2688_v13 = vadd.f32 %v2687_v9, %v2399_v48  ;;  %v2402_v44 = vadd.f32 %v2401_v19, %v6716_v34  ;;  %v2690_v30 = vpop.f32.mrb[222].mxu1  ;;  %v2403_v17 = vpop.f32.mrb[223].mxu0  ;;  %v1207_v9 = vld [vmem:[#allocation2 + $0x1a8] sm:$0xff]  ;;  %v6723_v34 = vld [vmem:[#allocation16_spill] sm:$0xff] }
 0x35b   : > { %v2692_v52 = vpop.f32.mrb[223].mxu1 }
 0x35c   : > { %v2804_v20 = vadd.f32 %v2688_v13, %v1200_v31  ;;  %v2691_v54 = vadd.f32 %v2690_v30, %v2402_v44 }
 0x35e   : > { %2868 = vst [vmem:[#allocation2 + $0x170] sm:$0xff] %v2804_v20  ;;  %v2805_v50 = vadd.f32 %v2691_v54, %v1201_v40  ;;  %v1208_v40 = vld [vmem:[#allocation2 + $0x1b0] sm:$0xff] }
 0x35f   : > { %v2406_v57 = vpop.f32.mrb[224].mxu0 }
 0x360   : > { %2869 = vst [vmem:[#allocation2 + $0x178] sm:$0xff] %v2805_v50  ;;  %v2407_v61 = vadd.f32 %v2406_v57, %v6717_v62  ;;  %v2695_v53 = vpop.f32.mrb[224].mxu1  ;;  %v2408_v42 = vpop.f32.mrb[225].mxu0  ;;  %v6724_v50 = vld [vmem:[#allocation17_spill] sm:$0xff] }
 0x361   : > { %v2697_v33 = vpop.f32.mrb[225].mxu1  ;;  %v2409_v26 = vpop.f32.mrb[226].mxu0 }
 0x362   : > { %v2696_v5 = vadd.f32 %v2695_v53, %v2407_v61  ;;  %v2410_v38 = vadd.f32 %v2409_v26, %v6718_v4  ;;  %v2698_v32 = vpop.f32.mrb[226].mxu1  ;;  %v2411_v18 = vpop.f32.mrb[227].mxu0  ;;  %v1209_v53 = vld [vmem:[#allocation2 + $0x1b8] sm:$0xff]  ;;  %v6725_v4 = vld [vmem:[#allocation18_spill] sm:$0xff] }
 0x363   : > { %v2700_v35 = vpop.f32.mrb[227].mxu1 }
 0x364   : > { %v2806_v41 = vadd.f32 %v2696_v5, %v1202_v27  ;;  %v2699_v2 = vadd.f32 %v2698_v32, %v2410_v38 }
 0x366   : > { %2870 = vst [vmem:[#allocation2 + $0x180] sm:$0xff] %v2806_v41  ;;  %v2807_v15 = vadd.f32 %v2699_v2, %v1203_v28  ;;  %v1210_v28 = vld [vmem:[#allocation2 + $0x1c0] sm:$0xff] }
 0x367   : > { %v2414_v43 = vpop.f32.mrb[228].mxu0 }
 0x368   : > { %2871 = vst [vmem:[#allocation2 + $0x188] sm:$0xff] %v2807_v15  ;;  %v2415_v23 = vadd.f32 %v2414_v43, %v6719_v36  ;;  %v2703_v11 = vpop.f32.mrb[228].mxu1  ;;  %v2416_v49 = vpop.f32.mrb[229].mxu0  ;;  %v6726_v15 = vld [vmem:[#allocation19_spill] sm:$0xff] }
 0x369   : > { %v2705_v16 = vpop.f32.mrb[229].mxu1  ;;  %v2417_v14 = vpop.f32.mrb[230].mxu0 }
 0x36a   : > { %v2704_v56 = vadd.f32 %v2703_v11, %v2415_v23  ;;  %v2418_v51 = vadd.f32 %v2417_v14, %v6720_v3  ;;  %v2706_v46 = vpop.f32.mrb[230].mxu1  ;;  %v2419_v10 = vpop.f32.mrb[231].mxu0  ;;  %v1211_v11 = vld [vmem:[#allocation2 + $0x1c8] sm:$0xff]  ;;  %v6727_v3 = vld [vmem:[#allocation20_spill] sm:$0xff] }
 0x36b   : > { %v2708_v63 = vpop.f32.mrb[231].mxu1 }
 0x36c   : > { %v2808_v24 = vadd.f32 %v2704_v56, %v1204_v39  ;;  %v2707_v45 = vadd.f32 %v2706_v46, %v2418_v51 }
 0x36e   : > { %2872 = vst [vmem:[#allocation2 + $0x190] sm:$0xff] %v2808_v24  ;;  %v2809_v59 = vadd.f32 %v2707_v45, %v1205_v12  ;;  %v1212_v12 = vld [vmem:[#allocation2 + $0x1d0] sm:$0xff] }
 0x36f   : > { %v2422_v47 = vpop.f32.mrb[232].mxu0 }
 0x370   : > { %2873 = vst [vmem:[#allocation2 + $0x198] sm:$0xff] %v2809_v59  ;;  %v2423_v37 = vadd.f32 %v2422_v47, %v6721_v7  ;;  %v2711_v8 = vpop.f32.mrb[232].mxu1  ;;  %v2424_v60 = vpop.f32.mrb[233].mxu0  ;;  %v6728_v59 = vld [vmem:[#allocation21_spill] sm:$0xff] }
 0x371   : > { %v2713_v55 = vpop.f32.mrb[233].mxu1  ;;  %v2425_v0 = vpop.f32.mrb[234].mxu0 }
 0x372   : > { %v2712_v1 = vadd.f32 %v2711_v8, %v2423_v37  ;;  %v2426_v6 = vadd.f32 %v2425_v0, %v6722_v22  ;;  %v2714_v21 = vpop.f32.mrb[234].mxu1  ;;  %v2427_v48 = vpop.f32.mrb[235].mxu0  ;;  %v1213_v8 = vld [vmem:[#allocation2 + $0x1d8] sm:$0xff]  ;;  %v6729_v22 = vld [vmem:[#allocation22_spill] sm:$0xff] }
 0x373   : > { %v2716_v25 = vpop.f32.mrb[235].mxu1 }
 0x374   : > { %v2810_v31 = vadd.f32 %v2712_v1, %v1206_v58  ;;  %v2715_v29 = vadd.f32 %v2714_v21, %v2426_v6 }
 0x376   : > { %2874 = vst [vmem:[#allocation2 + $0x1a0] sm:$0xff] %v2810_v31  ;;  %v2811_v19 = vadd.f32 %v2715_v29, %v1207_v9  ;;  %v1214_v9 = vld [vmem:[#allocation2 + $0x1e0] sm:$0xff] }
 0x377   : > { %v2430_v13 = vpop.f32.mrb[236].mxu0 }
 0x378   : > { %2875 = vst [vmem:[#allocation2 + $0x1a8] sm:$0xff] %v2811_v19  ;;  %v2431_v44 = vadd.f32 %v2430_v13, %v6723_v34  ;;  %v2719_v30 = vpop.f32.mrb[236].mxu1  ;;  %v2432_v17 = vpop.f32.mrb[237].mxu0  ;;  %v6730_v19 = vld [vmem:[#allocation23_spill] sm:$0xff] }
 0x379   : > { %v2721_v52 = vpop.f32.mrb[237].mxu1  ;;  %v2433_v20 = vpop.f32.mrb[238].mxu0 }
 0x37a   : > { %v2720_v54 = vadd.f32 %v2719_v30, %v2431_v44  ;;  %v2434_v57 = vadd.f32 %v2433_v20, %v6724_v50  ;;  %v2722_v62 = vpop.f32.mrb[238].mxu1  ;;  %v2435_v61 = vpop.f32.mrb[239].mxu0  ;;  %v1215_v30 = vld [vmem:[#allocation2 + $0x1e8] sm:$0xff]  ;;  %v6731_v50 = vld [vmem:[#allocation24_spill] sm:$0xff] }
 0x37b   : > { %v2724_v42 = vpop.f32.mrb[239].mxu1 }
 0x37c   : > { %v2812_v27 = vadd.f32 %v2720_v54, %v1208_v40  ;;  %v2723_v33 = vadd.f32 %v2722_v62, %v2434_v57 }
 0x37e   : > { %2876 = vst [vmem:[#allocation2 + $0x1b0] sm:$0xff] %v2812_v27  ;;  %v2813_v26 = vadd.f32 %v2723_v33, %v1209_v53  ;;  %v1216_v53 = vld [vmem:[#allocation2 + $0x1f0] sm:$0xff] }
 0x37f   : > { %v2438_v5 = vpop.f32.mrb[240].mxu0 }
 0x380   : > { %2877 = vst [vmem:[#allocation2 + $0x1b8] sm:$0xff] %v2813_v26  ;;  %v2439_v38 = vadd.f32 %v2438_v5, %v6725_v4  ;;  %v2727_v32 = vpop.f32.mrb[240].mxu1  ;;  %v2440_v18 = vpop.f32.mrb[241].mxu0  ;;  %v6732_v26 = vld [vmem:[#allocation25_spill] sm:$0xff] }
 0x381   : > { %v2729_v35 = vpop.f32.mrb[241].mxu1  ;;  %v2441_v41 = vpop.f32.mrb[242].mxu0 }
 0x382   : > { %v2728_v2 = vadd.f32 %v2727_v32, %v2439_v38  ;;  %v2442_v43 = vadd.f32 %v2441_v41, %v6726_v15  ;;  %v2730_v36 = vpop.f32.mrb[242].mxu1  ;;  %v2443_v23 = vpop.f32.mrb[243].mxu0  ;;  %v1217_v32 = vld [vmem:[#allocation2 + $0x1f8] sm:$0xff]  ;;  %v3023_v15 = vld [vmem:[%s5664_s13] sm:$0xff] (!%p4711_p12) }
 0x383   : > { %v2732_v49 = vpop.f32.mrb[243].mxu1  ;;  %v3024_v23 = vld [vmem:[%s5664_s13 + $0x8] sm:$0xff] (!%p4711_p12) }
 0x384   : > { %v2814_v39 = vadd.f32 %v2728_v2, %v1210_v28  ;;  %v2731_v16 = vadd.f32 %v2730_v36, %v2442_v43  ;;  %v3025_v2 = vld [vmem:[%s5664_s13 + $0x10] sm:$0xff] (!%p4711_p12)  ;;  %v5301_v43 = vmov (!%p4711_p12), 0   ;;  %v3026_v36 = vld [vmem:[%s5664_s13 + $0x18] sm:$0xff] (!%p4711_p12)  ;;  %v3027_v49 = vld [vmem:[%s5664_s13 + $0x20] sm:$0xff] (!%p4711_p12) }
 0x385   : > { %5194 = vset.pattern.permute.xlu1 (!%p4711_p12), %v5301_v43  ;;  %5193 = vset.pattern.permute.xlu0 (!%p4711_p12), %v5301_v43  ;;  %v3064_v43 = vld [vmem:[%s5664_s13 + $0x148] sm:$0xff] (!%p4711_p12) }
 0x386   : > { %2878 = vst [vmem:[#allocation2 + $0x1c0] sm:$0xff] %v2814_v39  ;;  %v2815_v14 = vadd.f32 %v2731_v16, %v1211_v11  ;;  %3099 = vperm.xlu1 (!%p4711_p12), %5194, %v3025_v2   ;;  %3089 = vperm.xlu0 (!%p4711_p12), %5193, %v3023_v15   ;;  %v3028_v11 = vld [vmem:[%s5664_s13 + $0x28] sm:$0xff] (!%p4711_p12)  ;;  %v3030_v39 = vld [vmem:[%s5664_s13 + $0x38] sm:$0xff] (!%p4711_p12)  ;;  %v3029_v16 = vld [vmem:[%s5664_s13 + $0x30] sm:$0xff] (!%p4711_p12) }
 0x387   : > { %v2446_v56 = vpop.f32.mrb[244].mxu0  ;;  %v3061_v2 = vld [vmem:[%s5664_s13 + $0x130] sm:$0xff] (!%p4711_p12)  ;;  %v5219_v15 = vld [vmem:[%s6258_s30 + $0x40] sm:$0xff] (!%p4711_p12)  }
 0x388   : > { %2879 = vst [vmem:[#allocation2 + $0x1c8] sm:$0xff] %v2815_v14  ;;  %v2447_v51 = vadd.f32 %v2446_v56, %v6727_v3  ;;  %v2735_v46 = vpop.f32.mrb[244].mxu1  ;;  %v2448_v10 = vpop.f32.mrb[245].mxu0  ;;  %v3032_v14 = vld [vmem:[%s5664_s13 + $0x48] sm:$0xff] (!%p4711_p12)  ;;  %v3031_v56 = vld [vmem:[%s5664_s13 + $0x40] sm:$0xff] (!%p4711_p12)  ;;  %v3034_v3 = vld [vmem:[%s5664_s13 + $0x58] sm:$0xff] (!%p4711_p12) }
 0x389   : > { %v2737_v63 = vpop.f32.mrb[245].mxu1  ;;  %v2449_v24 = vpop.f32.mrb[246].mxu0  ;;  %v5196_v10 = vld [vmem:[%s6685_s3] sm:$0xff] (!%p4711_p12)  }
 0x38a   : > { %v2736_v45 = vadd.f32 %v2735_v46, %v2447_v51  ;;  %v2450_v47 = vadd.f32 %v2449_v24, %v6728_v59  ;;  %v2738_v7 = vpop.f32.mrb[246].mxu1  ;;  %v2451_v37 = vpop.f32.mrb[247].mxu0  ;;  %3104 = vperm.xlu1 (!%p4711_p12), %5194, %v3026_v36   ;;  %3094 = vperm.xlu0 (!%p4711_p12), %5193, %v3024_v23   ;;  %v3033_v51 = vld [vmem:[%s5664_s13 + $0x50] sm:$0xff] (!%p4711_p12)  ;;  %v5195_v46 = vld [vmem:[%s6686_s4] sm:$0xff] (!%p4711_p12)   ;;  %v3036_v63 = vld [vmem:[%s5664_s13 + $0x68] sm:$0xff] (!%p4711_p12) }
 0x38b   : > { %v2740_v60 = vpop.f32.mrb[247].mxu1  ;;  %4846 = vmatprep.subr.bf16.mxu1 (!%p4711_p12), %v5195_v46  ;;  %4926 = vmatprep.subr.bf16.mxu0 (!%p4711_p12), %v5196_v10  ;;  %v5198_v24 = vld [vmem:[%s6685_s3 + $0x8] sm:$0xff] (!%p4711_p12)   ;;  %v5199_v59 = vld [vmem:[%s6686_s4 + $0x10] sm:$0xff] (!%p4711_p12)   ;;  %v3063_v36 = vld [vmem:[%s5664_s13 + $0x140] sm:$0xff] (!%p4711_p12) }
 0x38c   : > { %v2816_v58 = vadd.f32 %v2736_v45, %v1212_v12  ;;  %v2739_v55 = vadd.f32 %v2738_v7, %v2450_v47  ;;  %v5197_v12 = vld [vmem:[%s6686_s4 + $0x8] sm:$0xff] (!%p4711_p12)   ;;  %4847 = vmatpush3.bf16.msra.mxu1 (!%p4711_p12), %v5195_v46  ;;  %v3035_v45 = vld [vmem:[%s5664_s13 + $0x60] sm:$0xff] (!%p4711_p12)  ;;  %4927 = vmatpush3.bf16.msra.mxu0 (!%p4711_p12), %v5196_v10  ;;  %v5200_v47 = vld [vmem:[%s6685_s3 + $0x10] sm:$0xff] (!%p4711_p12)  }
 0x38d   : > { %4848 = vmatprep.subr.bf16.mxu1 (!%p4711_p12), %v5197_v12  ;;  %4928 = vmatprep.subr.bf16.mxu0 (!%p4711_p12), %v5198_v24  ;;  %v3038_v7 = vld [vmem:[%s5664_s13 + $0x78] sm:$0xff] (!%p4711_p12)  ;;  %v3037_v37 = vld [vmem:[%s5664_s13 + $0x70] sm:$0xff] (!%p4711_p12)  ;;  %v5220_v23 = vld [vmem:[%s6258_s30 + $0x48] sm:$0xff] (!%p4711_p12)  }
 0x38e   : > { %2880 = vst [vmem:[#allocation2 + $0x1d0] sm:$0xff] %v2816_v58  ;;  %v2817_v0 = vadd.f32 %v2739_v55, %v1213_v8  ;;  %3114 = vperm.xlu1 (!%p4711_p12), %5194, %v3028_v11   ;;  %3109 = vperm.xlu0 (!%p4711_p12), %5193, %v3027_v49   ;;  %v5201_v8 = vld [vmem:[%s6686_s4 + $0x18] sm:$0xff] (!%p4711_p12)   ;;  %v3040_v58 = vld [vmem:[%s5664_s13 + $0x88] sm:$0xff] (!%p4711_p12)  ;;  %v3039_v55 = vld [vmem:[%s5664_s13 + $0x80] sm:$0xff] (!%p4711_p12) }
 0x38f   : > { %v2454_v1 = vpop.f32.mrb[248].mxu0  ;;  %v5202_v60 = vld [vmem:[%s6685_s3 + $0x18] sm:$0xff] (!%p4711_p12)   ;;  %v5221_v11 = vld [vmem:[%s6258_s30 + $0x50] sm:$0xff] (!%p4711_p12)   ;;  %v3072_v10 = vld [vmem:[%s5664_s13 + $0x188] sm:$0xff] (!%p4711_p12) }
 0x390   : > { %2881 = vst [vmem:[#allocation2 + $0x1d8] sm:$0xff] %v2817_v0  ;;  %v2455_v6 = vadd.f32 %v2454_v1, %v6729_v22  ;;  %v2743_v21 = vpop.f32.mrb[248].mxu1  ;;  %v2456_v48 = vpop.f32.mrb[249].mxu0  ;;  %4849 = vmatpush3.bf16.msra.mxu1 (!%p4711_p12), %v5197_v12  ;;  %4929 = vmatpush3.bf16.msra.mxu0 (!%p4711_p12), %v5198_v24  ;;  %v5203_v0 = vld [vmem:[%s6686_s4 + $0x20] sm:$0xff] (!%p4711_p12)   ;;  %v3042_v22 = vld [vmem:[%s5664_s13 + $0x98] sm:$0xff] (!%p4711_p12)  ;;  %v3069_v46 = vld [vmem:[%s5664_s13 + $0x170] sm:$0xff] (!%p4711_p12) }
 0x391   : > { %v2745_v25 = vpop.f32.mrb[249].mxu1  ;;  %v2457_v31 = vpop.f32.mrb[250].mxu0  ;;  %4850 = vmatprep.subr.bf16.mxu1 (!%p4711_p12), %v5199_v59  ;;  %4930 = vmatprep.subr.bf16.mxu0 (!%p4711_p12), %v5200_v47  ;;  %v5204_v1 = vld [vmem:[%s6685_s3 + $0x20] sm:$0xff] (!%p4711_p12)   ;;  %v5206_v48 = vld [vmem:[%s6685_s3 + $0x28] sm:$0xff] (!%p4711_p12)   ;;  %v3066_v49 = vld [vmem:[%s5664_s13 + $0x158] sm:$0xff] (!%p4711_p12) }
 0x392   : > { %v2744_v29 = vadd.f32 %v2743_v21, %v2455_v6  ;;  %v2458_v13 = vadd.f32 %v2457_v31, %v6730_v19  ;;  %v2746_v34 = vpop.f32.mrb[250].mxu1  ;;  %v2459_v44 = vpop.f32.mrb[251].mxu0  ;;  %3124 = vperm.xlu1 (!%p4711_p12), %5194, %v3030_v39   ;;  %3119 = vperm.xlu0 (!%p4711_p12), %5193, %v3029_v16   ;;  %v3041_v6 = vld [vmem:[%s5664_s13 + $0x90] sm:$0xff] (!%p4711_p12)  ;;  %v5205_v21 = vld [vmem:[%s6686_s4 + $0x28] sm:$0xff] (!%p4711_p12)   ;;  %v3043_v25 = vld [vmem:[%s5664_s13 + $0xa0] sm:$0xff] (!%p4711_p12) }
 0x393   : > { %v2748_v17 = vpop.f32.mrb[251].mxu1  ;;  %v5210_v31 = vld [vmem:[%s6258_s30] sm:$0xff] (!%p4711_p12)   ;;  %v5208_v19 = vld [vmem:[%s6685_s3 + $0x30] sm:$0xff] (!%p4711_p12)   ;;  %v5209_v44 = vld [vmem:[%s6686_s4 + $0x38] sm:$0xff] (!%p4711_p12)  }
 0x394   : > { %v2818_v40 = vadd.f32 %v2744_v29, %v1214_v9  ;;  %v2747_v52 = vadd.f32 %v2746_v34, %v2458_v13  ;;  %4851 = vmatpush3.bf16.msra.mxu1 (!%p4711_p12), %v5199_v59  ;;  %4931 = vmatpush3.bf16.msra.mxu0 (!%p4711_p12), %v5200_v47  ;;  %v3044_v9 = vld [vmem:[%s5664_s13 + $0xa8] sm:$0xff] (!%p4711_p12)  ;;  %v5207_v29 = vld [vmem:[%s6686_s4 + $0x30] sm:$0xff] (!%p4711_p12)   ;;  %v3046_v13 = vld [vmem:[%s5664_s13 + $0xb8] sm:$0xff] (!%p4711_p12) }
 0x395   : > { %4852 = vmatprep.subr.bf16.mxu1 (!%p4711_p12), %v5201_v8  ;;  %4932 = vmatprep.subr.bf16.mxu0 (!%p4711_p12), %v5202_v60  ;;  %v3045_v34 = vld [vmem:[%s5664_s13 + $0xb0] sm:$0xff] (!%p4711_p12)  ;;  %v3048_v17 = vld [vmem:[%s5664_s13 + $0xc8] sm:$0xff] (!%p4711_p12)  ;;  %v3071_v12 = vld [vmem:[%s5664_s13 + $0x180] sm:$0xff] (!%p4711_p12) }
 0x396   : > { %2882 = vst [vmem:[#allocation2 + $0x1e0] sm:$0xff] %v2818_v40  ;;  %v2819_v20 = vadd.f32 %v2747_v52, %v1215_v30  ;;  %3134 = vperm.xlu1 (!%p4711_p12), %5194, %v3032_v14   ;;  %3129 = vperm.xlu0 (!%p4711_p12), %5193, %v3031_v56   ;;  %v5211_v30 = vld [vmem:[%s6685_s3 + $0x38] sm:$0xff] (!%p4711_p12)   ;;  %v3047_v40 = vld [vmem:[%s5664_s13 + $0xc0] sm:$0xff] (!%p4711_p12)  ;;  %v5212_v52 = vld [vmem:[%s6258_s30 + $0x8] sm:$0xff] (!%p4711_p12)  }
 0x397   : > { %v2462_v54 = vpop.f32.mrb[252].mxu0  ;;  %4862 = vmatprep.mubr.bf16.mxu1 (!%p4711_p12), %v5210_v31  ;;  %v3065_v39 = vld [vmem:[%s5664_s13 + $0x150] sm:$0xff] (!%p4711_p12)  ;;  %v3068_v16 = vld [vmem:[%s5664_s13 + $0x168] sm:$0xff] (!%p4711_p12)  ;;  %v3067_v14 = vld [vmem:[%s5664_s13 + $0x160] sm:$0xff] (!%p4711_p12) }
 0x398   : > { %2883 = vst [vmem:[#allocation2 + $0x1e8] sm:$0xff] %v2819_v20  ;;  %v2463_v57 = vadd.f32 %v2462_v54, %v6731_v50  ;;  %v2751_v62 = vpop.f32.mrb[252].mxu1  ;;  %v2464_v61 = vpop.f32.mrb[253].mxu0  ;;  %4853 = vmatpush3.bf16.msra.mxu1 (!%p4711_p12), %v5201_v8  ;;  %4933 = vmatpush3.bf16.msra.mxu0 (!%p4711_p12), %v5202_v60  ;;  %v5213_v20 = vld [vmem:[%s6258_s30 + $0x10] sm:$0xff] (!%p4711_p12)   ;;  %v3050_v54 = vld [vmem:[%s5664_s13 + $0xd8] sm:$0xff] (!%p4711_p12)  ;;  %v3076_v47 = vld [vmem:[%s5664_s13 + $0x1a8] sm:$0xff] (!%p4711_p12) }
 0x399   : > { %v2753_v42 = vpop.f32.mrb[253].mxu1  ;;  %v2465_v27 = vpop.f32.mrb[254].mxu0  ;;  %4854 = vmatprep.subr.bf16.mxu1 (!%p4711_p12), %v5203_v0  ;;  %4934 = vmatprep.subr.bf16.mxu0 (!%p4711_p12), %v5204_v1  ;;  %v3049_v50 = vld [vmem:[%s5664_s13 + $0xd0] sm:$0xff] (!%p4711_p12)  ;;  %v5214_v61 = vld [vmem:[%s6258_s30 + $0x18] sm:$0xff] (!%p4711_p12)   ;;  %v5227_v8 = vld [vmem:[%s6258_s30 + $0x80] sm:$0xff] (!%p4711_p12)  }
 0x39a   : > { %v2752_v33 = vadd.f32 %v2751_v62, %v2463_v57  ;;  %v2466_v5 = vadd.f32 %v2465_v27, %v6732_v26  ;;  %v2754_v4 = vpop.f32.mrb[254].mxu1  ;;  %v2467_v38 = vpop.f32.mrb[255].mxu0  ;;  %2889 = sbr.rel (%p4711_p12) target bundleno = 1379 (0x563), region = 75  ;;  %3144 = vperm.xlu1 (!%p4711_p12), %5194, %v3034_v3   ;;  %3139 = vperm.xlu0 (!%p4711_p12), %5193, %v3033_v51   ;;  %v3052_v57 = vld [vmem:[%s5664_s13 + $0xe8] sm:$0xff] (!%p4711_p12)  ;;  %v3051_v62 = vld [vmem:[%s5664_s13 + $0xe0] sm:$0xff] (!%p4711_p12)  ;;  %v3054_v42 = vld [vmem:[%s5664_s13 + $0xf8] sm:$0xff] (!%p4711_p12) }
 0x39b   : > { %v2756_v18 = vpop.f32.mrb[255].mxu1  ;;  %v3053_v27 = vld [vmem:[%s5664_s13 + $0xf0] sm:$0xff] (!%p4711_p12)  ;;  %v3055_v26 = vld [vmem:[%s5664_s13 + $0x100] sm:$0xff] (!%p4711_p12)  ;;  %v5222_v56 = vld [vmem:[%s6258_s30 + $0x58] sm:$0xff] (!%p4711_p12)  }
 0x39c   : > { %v2820_v28 = vadd.f32 %v2752_v33, %v1216_v53  ;;  %v2755_v35 = vadd.f32 %v2754_v4, %v2466_v5  ;;  %4855 = vmatpush3.bf16.msra.mxu1 (!%p4711_p12), %v5203_v0  ;;  %4935 = vmatpush3.bf16.msra.mxu0 (!%p4711_p12), %v5204_v1  ;;  %v5215_v53 = vld [vmem:[%s6258_s30 + $0x20] sm:$0xff] (!%p4711_p12)   ;;  %v3056_v33 = vld [vmem:[%s5664_s13 + $0x108] sm:$0xff] (!%p4711_p12)  ;;  %v3058_v4 = vld [vmem:[%s5664_s13 + $0x118] sm:$0xff] (!%p4711_p12) }
 0x39d   : > { %4856 = vmatprep.subr.bf16.mxu1 (!%p4711_p12), %v5205_v21  ;;  %4936 = vmatprep.subr.bf16.mxu0 (!%p4711_p12), %v5206_v48  ;;  %v5216_v5 = vld [vmem:[%s6258_s30 + $0x28] sm:$0xff] (!%p4711_p12)   ;;  %v3057_v38 = vld [vmem:[%s5664_s13 + $0x110] sm:$0xff] (!%p4711_p12)  ;;  %v5223_v3 = vld [vmem:[%s6258_s30 + $0x60] sm:$0xff] (!%p4711_p12)  }
 0x39e   : > { %2884 = vst [vmem:[#allocation2 + $0x1f0] sm:$0xff] %v2820_v28  ;;  %v2821_v41 = vadd.f32 %v2755_v35, %v1217_v32  ;;  %3154 = vperm.xlu1 (!%p4711_p12), %5194, %v3036_v63   ;;  %3149 = vperm.xlu0 (!%p4711_p12), %5193, %v3035_v45   ;;  %v5217_v32 = vld [vmem:[%s6258_s30 + $0x30] sm:$0xff] (!%p4711_p12)   ;;  %v3060_v18 = vld [vmem:[%s5664_s13 + $0x128] sm:$0xff] (!%p4711_p12)  ;;  %v3059_v28 = vld [vmem:[%s5664_s13 + $0x120] sm:$0xff] (!%p4711_p12) }
 0x39f   : > { %v5218_v35 = vld [vmem:[%s6258_s30 + $0x38] sm:$0xff] (!%p4711_p12)   ;;  %v5224_v63 = vld [vmem:[%s6258_s30 + $0x68] sm:$0xff] (!%p4711_p12)   ;;  %v5225_v24 = vld [vmem:[%s6258_s30 + $0x70] sm:$0xff] (!%p4711_p12)  }
 0x3a0   : > { %2885 = vst [vmem:[#allocation2 + $0x1f8] sm:$0xff] %v2821_v41  ;;  %4857 = vmatpush3.bf16.msra.mxu1 (!%p4711_p12), %v5205_v21  ;;  %4937 = vmatpush3.bf16.msra.mxu0 (!%p4711_p12), %v5206_v48  ;;  %v3062_v41 = vld [vmem:[%s5664_s13 + $0x138] sm:$0xff] (!%p4711_p12)  ;;  %v3073_v59 = vld [vmem:[%s5664_s13 + $0x190] sm:$0xff] (!%p4711_p12)  ;;  %v3079_v0 = vld [vmem:[%s5664_s13 + $0x1c0] sm:$0xff] (!%p4711_p12) }
 0x3a1   : > { %4858 = vmatprep.subr.bf16.mxu1 %v5207_v29  ;;  %4938 = vmatprep.subr.bf16.mxu0 %v5208_v19  ;;  %v3070_v51 = vld [vmem:[%s5664_s13 + $0x178] sm:$0xff]  ;;  %v5228_v1 = vld [vmem:[%s6258_s30 + $0x88] sm:$0xff]   ;;  %v3081_v21 = vld [vmem:[%s5664_s13 + $0x1d0] sm:$0xff] }
 0x3a2   : > { %3164 = vperm.xlu1 %5194, %v3038_v7   ;;  %3159 = vperm.xlu0 %5193, %v3037_v37   ;;  %v3074_v45 = vld [vmem:[%s5664_s13 + $0x198] sm:$0xff]  ;;  %v3075_v7 = vld [vmem:[%s5664_s13 + $0x1a0] sm:$0xff]  ;;  %v3084_v48 = vld [vmem:[%s5664_s13 + $0x1e8] sm:$0xff] }
 0x3a3   : > { %v5226_v37 = vld [vmem:[%s6258_s30 + $0x78] sm:$0xff]   ;;  %v5231_v31 = vld [vmem:[%s6258_s30 + $0xa0] sm:$0xff]  }
 0x3a4   : > { %4859 = vmatpush3.bf16.msra.mxu1 %v5207_v29  ;;  %4939 = vmatpush3.bf16.msra.mxu0 %v5208_v19  ;;  %v3078_v60 = vld [vmem:[%s5664_s13 + $0x1b8] sm:$0xff]  ;;  %v3085_v19 = vld [vmem:[%s5664_s13 + $0x1f0] sm:$0xff] }
 0x3a5   : > { %4860 = vmatprep.subr.bf16.mxu1 %v5209_v44  ;;  %4940 = vmatprep.subr.bf16.mxu0 %v5211_v30  ;;  %v3086_v29 = vld [vmem:[%s5664_s13 + $0x1f8] sm:$0xff] }
 0x3a6   : > { %3174 = vperm.xlu1 %5194, %v3040_v58   ;;  %3169 = vperm.xlu0 %5193, %v3039_v55   ;;  %v3077_v58 = vld [vmem:[%s5664_s13 + $0x1b0] sm:$0xff]  ;;  %v3080_v55 = vld [vmem:[%s5664_s13 + $0x1c8] sm:$0xff] }
 0x3a8   : > { %4861 = vmatpush3.bf16.msra.mxu1 %v5209_v44  ;;  %4941 = vmatpush3.bf16.msra.mxu0 %v5211_v30  ;;  %v5233_v30 = vld [vmem:[%s6258_s30 + $0xb0] sm:$0xff]  }
 0x3aa   : > { %3184 = vperm.xlu1 %5194, %v3042_v22   ;;  %3179 = vperm.xlu0 %5193, %v3041_v6   ;;  %v5229_v22 = vld [vmem:[%s6258_s30 + $0x90] sm:$0xff]   ;;  %v3082_v6 = vld [vmem:[%s5664_s13 + $0x1d8] sm:$0xff] }
 0x3ab   : > { %4863 = vmatmul.mubr.bf16.vlgmr.msra.gmra.mrb[0].mxu1 %v5212_v52  ;;  %v2962_v52 = vld [vmem:[#allocation2 + $0x18] sm:$0xff] }
 0x3ac   : > { %4866 = vmatprep.mubr.bf16.mxu1 %v5213_v20  ;;  %v2960_v20 = vld [vmem:[#allocation2 + $0x8] sm:$0xff] }
 0x3ae   : > { %3194 = vperm.xlu1 %5194, %v3044_v9   ;;  %3189 = vperm.xlu0 %5193, %v3043_v25   ;;  %v3083_v9 = vld [vmem:[%s5664_s13 + $0x1e0] sm:$0xff]  ;;  %v5230_v25 = vld [vmem:[%s6258_s30 + $0x98] sm:$0xff]  }
 0x3b2   : > { %3204 = vperm.xlu1 %5194, %v3046_v13   ;;  %3199 = vperm.xlu0 %5193, %v3045_v34   ;;  %v5232_v13 = vld [vmem:[%s6258_s30 + $0xa8] sm:$0xff]  }
 0x3b3   : > { %4867 = vmatmul.mubr.bf16.gmra.mrb[4].mxu1 %v5214_v61 }
 0x3b4   : > { %4870 = vmatprep.mubr.bf16.mxu1 %v5215_v53 }
 0x3b6   : > { %3214 = vperm.xlu1 %5194, %v3048_v17   ;;  %3209 = vperm.xlu0 %5193, %v3047_v40   ;;  %v2961_v17 = vld [vmem:[#allocation2 + $0x10] sm:$0xff]  ;;  %v2959_v40 = vld [vmem:[#allocation2] sm:$0xff] }
 0x3ba   : > { %3224 = vperm.xlu1 %5194, %v3050_v54   ;;  %3219 = vperm.xlu0 %5193, %v3049_v50  }
 0x3bb   : > { %4871 = vmatmul.mubr.bf16.gmra.mrb[8].mxu1 %v5216_v5  ;;  %v5234_v5 = vld [vmem:[%s6258_s30 + $0xb8] sm:$0xff]  }
 0x3bc   : > { %4874 = vmatprep.mubr.bf16.mxu1 %v5217_v32  ;;  %v5235_v32 = vld [vmem:[%s6258_s30 + $0xc0] sm:$0xff]  }
 0x3be   : > { %3234 = vperm.xlu1 %5194, %v3052_v57   ;;  %3229 = vperm.xlu0 %5193, %v3051_v62  }
 0x3c2   : > { %3244 = vperm.xlu1 %5194, %v3054_v42   ;;  %3239 = vperm.xlu0 %5193, %v3053_v27   ;;  %v2964_v42 = vld [vmem:[#allocation2 + $0x28] sm:$0xff]  ;;  %v2963_v27 = vld [vmem:[#allocation2 + $0x20] sm:$0xff] }
 0x3c3   : > { %4875 = vmatmul.mubr.bf16.gmra.mrb[12].mxu1 %v5218_v35  ;;  %v2966_v35 = vld [vmem:[#allocation2 + $0x38] sm:$0xff] }
 0x3c4   : > { %4878 = vmatprep.mubr.bf16.mxu1 %v5219_v15 }
 0x3c6   : > { %3254 = vperm.xlu1 %5194, %v3056_v33   ;;  %3249 = vperm.xlu0 %5193, %v3055_v26  }
 0x3ca   : > { %3264 = vperm.xlu1 %5194, %v3058_v4   ;;  %3259 = vperm.xlu0 %5193, %v3057_v38  }
 0x3cb   : > { %4879 = vmatmul.mubr.bf16.gmra.mrb[16].mxu1 %v5220_v23 }
 0x3cc   : > { %4882 = vmatprep.mubr.bf16.mxu1 %v5221_v11  ;;  %v2968_v11 = vld [vmem:[#allocation2 + $0x48] sm:$0xff] }
 0x3ce   : > { %3274 = vperm.xlu1 %5194, %v3060_v18   ;;  %3269 = vperm.xlu0 %5193, %v3059_v28  }
 0x3d2   : > { %3284 = vperm.xlu1 %5194, %v3062_v41   ;;  %3279 = vperm.xlu0 %5193, %v3061_v2   ;;  %v2965_v41 = vld [vmem:[#allocation2 + $0x30] sm:$0xff] }
 0x3d3   : > { %4883 = vmatmul.mubr.bf16.gmra.mrb[20].mxu1 %v5222_v56 }
 0x3d4   : > { %4886 = vmatprep.mubr.bf16.mxu1 %v5223_v3  ;;  %v5237_v3 = vld [vmem:[%s6258_s30 + $0xd0] sm:$0xff]  }
 0x3d6   : > { %3294 = vperm.xlu1 %5194, %v3064_v43   ;;  %3289 = vperm.xlu0 %5193, %v3063_v36  }
 0x3da   : > { %3304 = vperm.xlu1 %5194, %v3066_v49   ;;  %3299 = vperm.xlu0 %5193, %v3065_v39   ;;  %v2967_v49 = vld [vmem:[#allocation2 + $0x40] sm:$0xff] }
 0x3db   : > { %4887 = vmatmul.mubr.bf16.gmra.mrb[24].mxu1 %v5224_v63 }
 0x3dc   : > { %4890 = vmatprep.mubr.bf16.mxu1 %v5225_v24 }
 0x3de   : > { %3314 = vperm.xlu1 %5194, %v3068_v16   ;;  %3309 = vperm.xlu0 %5193, %v3067_v14   ;;  %v5236_v16 = vld [vmem:[%s6258_s30 + $0xc8] sm:$0xff]  }
 0x3e2   : > { %3324 = vperm.xlu1 %5194, %v3070_v51   ;;  %3319 = vperm.xlu0 %5193, %v3069_v46  }
 0x3e3   : > { %4891 = vmatmul.mubr.bf16.gmra.mrb[28].mxu1 %v5226_v37  ;;  %v2971_v37 = vld [vmem:[#allocation2 + $0x60] sm:$0xff] }
 0x3e4   : > { %4894 = vmatprep.mubr.bf16.mxu1 %v5227_v8 }
 0x3e6   : > { %3334 = vperm.xlu1 %5194, %v3072_v10   ;;  %3329 = vperm.xlu0 %5193, %v3071_v12   ;;  %v2970_v10 = vld [vmem:[#allocation2 + $0x58] sm:$0xff]  ;;  %v2969_v12 = vld [vmem:[#allocation2 + $0x50] sm:$0xff] }
 0x3ea   : > { %3344 = vperm.xlu1 %5194, %v3074_v45   ;;  %3339 = vperm.xlu0 %5193, %v3073_v59  }
 0x3eb   : > { %4895 = vmatmul.mubr.bf16.gmra.mrb[32].mxu1 %v5228_v1 }
 0x3ec   : > { %4898 = vmatprep.mubr.bf16.mxu1 %v5229_v22 }
 0x3ee   : > { %3354 = vperm.xlu1 %5194, %v3076_v47   ;;  %3349 = vperm.xlu0 %5193, %v3075_v7   ;;  %v2972_v7 = vld [vmem:[#allocation2 + $0x68] sm:$0xff] }
 0x3f2   : > { %3364 = vperm.xlu1 %5194, %v3078_v60   ;;  %3359 = vperm.xlu0 %5193, %v3077_v58   ;;  %v5238_v60 = vld [vmem:[%s6258_s30 + $0xd8] sm:$0xff]  }
 0x3f3   : > { %4899 = vmatmul.mubr.bf16.gmra.mrb[36].mxu1 %v5230_v25 }
 0x3f4   : > { %4902 = vmatprep.mubr.bf16.mxu1 %v5231_v31 }
 0x3f6   : > { %3374 = vperm.xlu1 %5194, %v3080_v55   ;;  %3369 = vperm.xlu0 %5193, %v3079_v0   ;;  %v5239_v0 = vld [vmem:[%s6258_s30 + $0xe0] sm:$0xff]  }
 0x3fa   : > { %3384 = vperm.xlu1 %5194, %v3082_v6   ;;  %3379 = vperm.xlu0 %5193, %v3081_v21   ;;  %v2974_v6 = vld [vmem:[#allocation2 + $0x78] sm:$0xff]  ;;  %v2973_v21 = vld [vmem:[#allocation2 + $0x70] sm:$0xff] }
 0x3fb   : > { %4903 = vmatmul.mubr.bf16.gmra.mrb[40].mxu1 %v5232_v13  ;;  %v2975_v13 = vld [vmem:[#allocation2 + $0x80] sm:$0xff] }
 0x3fc   : > { %4906 = vmatprep.mubr.bf16.mxu1 %v5233_v30 }
 0x3fe   : > { %3394 = vperm.xlu1 %5194, %v3084_v48   ;;  %3389 = vperm.xlu0 %5193, %v3083_v9  }
 0x402   : > { %3404 = vperm.xlu1 %5194, %v3086_v29   ;;  %3399 = vperm.xlu0 %5193, %v3085_v19   ;;  %v2976_v19 = vld [vmem:[#allocation2 + $0x88] sm:$0xff] }
 0x403   : > { %4907 = vmatmul.mubr.bf16.gmra.mrb[44].mxu1 %v5234_v5  ;;  %v5242_v5 = vld [vmem:[%s6258_s30 + $0xf8] sm:$0xff]  }
 0x404   : > { %4910 = vmatprep.mubr.bf16.mxu1 %v5235_v32 }
 0x405   : > { %v3100_v34 = vpop.permute.xlu1 %3099  ;;  %v3090_v44 = vpop.permute.xlu0 %3089 }
 0x406   : > { %v3409_v57 = vmul.f32 %v3100_v34, %v2961_v17  ;;  %v3407_v62 = vmul.f32 %v3090_v44, %v2959_v40  ;;  %v5240_v44 = vld [vmem:[%s6258_s30 + $0xe8] sm:$0xff]   ;;  %v5241_v40 = vld [vmem:[%s6258_s30 + $0xf0] sm:$0xff]  }
 0x409   : > { %v3105_v54 = vpop.permute.xlu1 %3104  ;;  %v3095_v50 = vpop.permute.xlu0 %3094 }
 0x40a   : > { %v3410_v61 = vmul.f32 %v3105_v54, %v2962_v52  ;;  %v3408_v53 = vmul.f32 %v3095_v50, %v2960_v20  ;;  %v2978_v54 = vld [vmem:[#allocation2 + $0x98] sm:$0xff]  ;;  %v2977_v50 = vld [vmem:[#allocation2 + $0x90] sm:$0xff] }
 0x40b   : > { %4911 = vmatmul.mubr.bf16.gmra.mrb[48].mxu1 %v5236_v16 }
 0x40c   : > { %v3472_v33 = vpack.c.bf16 %v3410_v61, %v3409_v57  ;;  %v3471_v26 = vpack.c.bf16 %v3408_v53, %v3407_v62  ;;  %4914 = vmatprep.mubr.bf16.mxu1 %v5237_v3  ;;  %v2986_v3 = vld [vmem:[#allocation2 + $0xd8] sm:$0xff] }
 0x40d   : > { %v3115_v4 = vpop.permute.xlu1 %3114  ;;  %v3110_v38 = vpop.permute.xlu0 %3109 }
 0x40e   : > { %v3412_v18 = vmul.f32 %v3115_v4, %v2964_v42  ;;  %v3411_v28 = vmul.f32 %v3110_v38, %v2963_v27  ;;  %4942 = vmatprep.mubr.bf16.mxu0 %v3471_v26  ;;  %v2980_v27 = vld [vmem:[#allocation2 + $0xa8] sm:$0xff] }
 0x40f   : > { %4943 = vmatmul.mubr.bf16.vlgmr.msra.gmra.mrb[0].mxu0 %v3472_v33  ;;  %v2979_v33 = vld [vmem:[#allocation2 + $0xa0] sm:$0xff] }
 0x410   : > { %v3473_v2 = vpack.c.bf16 %v3412_v18, %v3411_v28  ;;  %v2982_v28 = vld [vmem:[#allocation2 + $0xb8] sm:$0xff] }
 0x411   : > { %v3125_v15 = vpop.permute.xlu1 %3124  ;;  %v3120_v43 = vpop.permute.xlu0 %3119 }
 0x412   : > { %v3414_v36 = vmul.f32 %v3125_v15, %v2966_v35  ;;  %v3413_v23 = vmul.f32 %v3120_v43, %v2965_v41  ;;  %4946 = vmatprep.mubr.bf16.mxu0 %v3473_v2  ;;  %v2981_v35 = vld [vmem:[#allocation2 + $0xb0] sm:$0xff] }
 0x413   : > { %4915 = vmatmul.mubr.bf16.gmra.mrb[52].mxu1 %v5238_v60 }
 0x414   : > { %v3474_v39 = vpack.c.bf16 %v3414_v36, %v3413_v23  ;;  %4918 = vmatprep.mubr.bf16.mxu1 %v5239_v0  ;;  %v2984_v23 = vld [vmem:[#allocation2 + $0xc8] sm:$0xff] }
 0x415   : > { %v3135_v14 = vpop.permute.xlu1 %3134  ;;  %v3130_v56 = vpop.permute.xlu0 %3129 }
 0x416   : > { %v3416_v51 = vmul.f32 %v3135_v14, %v2968_v11  ;;  %v3415_v46 = vmul.f32 %v3130_v56, %v2967_v49  ;;  %v2983_v11 = vld [vmem:[#allocation2 + $0xc0] sm:$0xff] }
 0x417   : > { %4947 = vmatmul.mubr.bf16.gmra.mrb[4].mxu0 %v3474_v39 }
 0x418   : > { %v3475_v63 = vpack.c.bf16 %v3416_v51, %v3415_v46  ;;  %v2985_v51 = vld [vmem:[#allocation2 + $0xd0] sm:$0xff] }
 0x419   : > { %v3145_v24 = vpop.permute.xlu1 %3144  ;;  %v3140_v45 = vpop.permute.xlu0 %3139 }
 0x41a   : > { %v3418_v59 = vmul.f32 %v3145_v24, %v2970_v10  ;;  %v3417_v47 = vmul.f32 %v3140_v45, %v2969_v12  ;;  %4950 = vmatprep.mubr.bf16.mxu0 %v3475_v63  ;;  %v2988_v45 = vld [vmem:[#allocation2 + $0xe8] sm:$0xff] }
 0x41b   : > { %4919 = vmatmul.mubr.bf16.gmra.mrb[56].mxu1 %v5240_v44  ;;  %v2993_v44 = vld [vmem:[#allocation2 + $0x110] sm:$0xff] }
 0x41c   : > { %v3476_v8 = vpack.c.bf16 %v3418_v59, %v3417_v47  ;;  %4922 = vmatprep.mubr.bf16.mxu1 %v5241_v40  ;;  %v2987_v59 = vld [vmem:[#allocation2 + $0xe0] sm:$0xff] }
 0x41d   : > { %v3155_v58 = vpop.permute.xlu1 %3154  ;;  %v3150_v55 = vpop.permute.xlu0 %3149 }
 0x41e   : > { %v3420_v1 = vmul.f32 %v3155_v58, %v2972_v7  ;;  %v3419_v22 = vmul.f32 %v3150_v55, %v2971_v37  ;;  %v2990_v58 = vld [vmem:[#allocation2 + $0xf8] sm:$0xff]  ;;  %v2989_v55 = vld [vmem:[#allocation2 + $0xf0] sm:$0xff] }
 0x41f   : > { %4951 = vmatmul.mubr.bf16.gmra.mrb[8].mxu0 %v3476_v8 }
 0x420   : > { %v3477_v48 = vpack.c.bf16 %v3420_v1, %v3419_v22 }
 0x421   : > { %v3165_v9 = vpop.permute.xlu1 %3164  ;;  %v3160_v25 = vpop.permute.xlu0 %3159 }
 0x422   : > { %v3422_v31 = vmul.f32 %v3165_v9, %v2974_v6  ;;  %v3421_v29 = vmul.f32 %v3160_v25, %v2973_v21  ;;  %4954 = vmatprep.mubr.bf16.mxu0 %v3477_v48  ;;  %v2992_v48 = vld [vmem:[#allocation2 + $0x108] sm:$0xff]  ;;  %v2991_v9 = vld [vmem:[#allocation2 + $0x100] sm:$0xff] }
 0x423   : > { %4923 = vmatmul.mubr.bf16.gmra.mrb[60].mxu1 %v5242_v5 }
 0x424   : > { %v3478_v34 = vpack.c.bf16 %v3422_v31, %v3421_v29 }
 0x425   : > { %v3175_v30 = vpop.permute.xlu1 %3174  ;;  %v3170_v17 = vpop.permute.xlu0 %3169 }
 0x426   : > { %v3424_v52 = vmul.f32 %v3175_v30, %v2976_v19  ;;  %v3423_v20 = vmul.f32 %v3170_v17, %v2975_v13 }
 0x427   : > { %4955 = vmatmul.mubr.bf16.gmra.mrb[12].mxu0 %v3478_v34  ;;  %v2994_v34 = vld [vmem:[#allocation2 + $0x118] sm:$0xff] }
 0x428   : > { %v3479_v57 = vpack.c.bf16 %v3424_v52, %v3423_v20 }
 0x429   : > { %v3185_v62 = vpop.permute.xlu1 %3184  ;;  %v3180_v61 = vpop.permute.xlu0 %3179 }
 0x42a   : > { %v3426_v53 = vmul.f32 %v3185_v62, %v2978_v54  ;;  %v3425_v42 = vmul.f32 %v3180_v61, %v2977_v50  ;;  %4958 = vmatprep.mubr.bf16.mxu0 %v3479_v57  ;;  %v2996_v54 = vld [vmem:[#allocation2 + $0x128] sm:$0xff]  ;;  %v2995_v50 = vld [vmem:[#allocation2 + $0x120] sm:$0xff] }
 0x42c   : > { %v3480_v26 = vpack.c.bf16 %v3426_v53, %v3425_v42 }
 0x42d   : > { %v3195_v4 = vpop.permute.xlu1 %3194  ;;  %v3190_v38 = vpop.permute.xlu0 %3189 }
 0x42e   : > { %v3428_v32 = vmul.f32 %v3195_v4, %v2980_v27  ;;  %v3427_v18 = vmul.f32 %v3190_v38, %v2979_v33  ;;  %v2998_v27 = vld [vmem:[#allocation2 + $0x138] sm:$0xff]  ;;  %v2997_v33 = vld [vmem:[#allocation2 + $0x130] sm:$0xff] }
 0x42f   : > { %4959 = vmatmul.mubr.bf16.gmra.mrb[16].mxu0 %v3480_v26 }
 0x430   : > { %v3481_v41 = vpack.c.bf16 %v3428_v32, %v3427_v18  ;;  %v3000_v18 = vld [vmem:[#allocation2 + $0x148] sm:$0xff] }
 0x431   : > { %v3205_v2 = vpop.permute.xlu1 %3204  ;;  %v3200_v15 = vpop.permute.xlu0 %3199 }
 0x432   : > { %v3430_v43 = vmul.f32 %v3205_v2, %v2982_v28  ;;  %v3429_v36 = vmul.f32 %v3200_v15, %v2981_v35  ;;  %4962 = vmatprep.mubr.bf16.mxu0 %v3481_v41  ;;  %v2999_v28 = vld [vmem:[#allocation2 + $0x140] sm:$0xff] }
 0x434   : > { %v3482_v49 = vpack.c.bf16 %v3430_v43, %v3429_v36  ;;  %v3002_v36 = vld [vmem:[#allocation2 + $0x158] sm:$0xff] }
 0x435   : > { %v3215_v39 = vpop.permute.xlu1 %3214  ;;  %v3210_v16 = vpop.permute.xlu0 %3209 }
 0x436   : > { %v3432_v14 = vmul.f32 %v3215_v39, %v2984_v23  ;;  %v3431_v56 = vmul.f32 %v3210_v16, %v2983_v11  ;;  %v3001_v23 = vld [vmem:[#allocation2 + $0x150] sm:$0xff] }
 0x437   : > { %4963 = vmatmul.mubr.bf16.gmra.mrb[20].mxu0 %v3482_v49 }
 0x438   : > { %v3483_v46 = vpack.c.bf16 %v3432_v14, %v3431_v56  ;;  %v3004_v56 = vld [vmem:[#allocation2 + $0x168] sm:$0xff] }
 0x439   : > { %v3225_v10 = vpop.permute.xlu1 %3224  ;;  %v3220_v12 = vpop.permute.xlu0 %3219 }
 0x43a   : > { %v3434_v63 = vmul.f32 %v3225_v10, %v2986_v3  ;;  %v3433_v24 = vmul.f32 %v3220_v12, %v2985_v51  ;;  %4966 = vmatprep.mubr.bf16.mxu0 %v3483_v46  ;;  %v3003_v3 = vld [vmem:[#allocation2 + $0x160] sm:$0xff] }
 0x43c   : > { %v3484_v47 = vpack.c.bf16 %v3434_v63, %v3433_v24  ;;  %v3006_v24 = vld [vmem:[#allocation2 + $0x178] sm:$0xff] }
 0x43d   : > { %v3235_v7 = vpop.permute.xlu1 %3234  ;;  %v3230_v37 = vpop.permute.xlu0 %3229 }
 0x43e   : > { %v3436_v8 = vmul.f32 %v3235_v7, %v2988_v45  ;;  %v3435_v60 = vmul.f32 %v3230_v37, %v2987_v59  ;;  %v3005_v45 = vld [vmem:[#allocation2 + $0x170] sm:$0xff] }
 0x43f   : > { %4967 = vmatmul.mubr.bf16.gmra.mrb[24].mxu0 %v3484_v47 }
 0x440   : > { %v3485_v0 = vpack.c.bf16 %v3436_v8, %v3435_v60  ;;  %v3008_v60 = vld [vmem:[#allocation2 + $0x188] sm:$0xff] }
 0x441   : > { %v3245_v1 = vpop.permute.xlu1 %3244  ;;  %v3240_v22 = vpop.permute.xlu0 %3239 }
 0x442   : > { %v3438_v6 = vmul.f32 %v3245_v1, %v2990_v58  ;;  %v3437_v21 = vmul.f32 %v3240_v22, %v2989_v55  ;;  %4970 = vmatprep.mubr.bf16.mxu0 %v3485_v0  ;;  %v3007_v58 = vld [vmem:[#allocation2 + $0x180] sm:$0xff] }
 0x444   : > { %v3486_v25 = vpack.c.bf16 %v3438_v6, %v3437_v21  ;;  %v3010_v21 = vld [vmem:[#allocation2 + $0x198] sm:$0xff] }
 0x445   : > { %v3255_v31 = vpop.permute.xlu1 %3254  ;;  %v3250_v29 = vpop.permute.xlu0 %3249 }
 0x446   : > { %v3440_v19 = vmul.f32 %v3255_v31, %v2992_v48  ;;  %v3439_v13 = vmul.f32 %v3250_v29, %v2991_v9  ;;  %v3009_v48 = vld [vmem:[#allocation2 + $0x190] sm:$0xff] }
 0x447   : > { %4971 = vmatmul.mubr.bf16.gmra.mrb[28].mxu0 %v3486_v25 }
 0x448   : > { %v3487_v30 = vpack.c.bf16 %v3440_v19, %v3439_v13  ;;  %v3012_v13 = vld [vmem:[#allocation2 + $0x1a8] sm:$0xff] }
 0x449   : > { %v3265_v17 = vpop.permute.xlu1 %3264  ;;  %v3260_v40 = vpop.permute.xlu0 %3259 }
 0x44a   : > { %v3442_v52 = vmul.f32 %v3265_v17, %v2994_v34  ;;  %v3441_v20 = vmul.f32 %v3260_v40, %v2993_v44  ;;  %4974 = vmatprep.mubr.bf16.mxu0 %v3487_v30  ;;  %v3011_v34 = vld [vmem:[#allocation2 + $0x1a0] sm:$0xff] }
 0x44c   : > { %v3488_v57 = vpack.c.bf16 %v3442_v52, %v3441_v20  ;;  %v3014_v20 = vld [vmem:[#allocation2 + $0x1b8] sm:$0xff] }
 0x44d   : > { %v3275_v62 = vpop.permute.xlu1 %3274  ;;  %v3270_v61 = vpop.permute.xlu0 %3269 }
 0x44e   : > { %v3444_v53 = vmul.f32 %v3275_v62, %v2996_v54  ;;  %v3443_v42 = vmul.f32 %v3270_v61, %v2995_v50  ;;  %v3013_v54 = vld [vmem:[#allocation2 + $0x1b0] sm:$0xff] }
 0x44f   : > { %4975 = vmatmul.mubr.bf16.gmra.mrb[32].mxu0 %v3488_v57 }
 0x450   : > { %v3489_v26 = vpack.c.bf16 %v3444_v53, %v3443_v42  ;;  %v3016_v42 = vld [vmem:[#allocation2 + $0x1c8] sm:$0xff] }
 0x451   : > { %v3285_v5 = vpop.permute.xlu1 %3284  ;;  %v3280_v4 = vpop.permute.xlu0 %3279 }
 0x452   : > { %v3446_v38 = vmul.f32 %v3285_v5, %v2998_v27  ;;  %v3445_v32 = vmul.f32 %v3280_v4, %v2997_v33  ;;  %4978 = vmatprep.mubr.bf16.mxu0 %v3489_v26  ;;  %v3015_v27 = vld [vmem:[#allocation2 + $0x1c0] sm:$0xff] }
 0x454   : > { %v3490_v35 = vpack.c.bf16 %v3446_v38, %v3445_v32  ;;  %v3018_v32 = vld [vmem:[#allocation2 + $0x1d8] sm:$0xff] }
 0x455   : > { %v3295_v41 = vpop.permute.xlu1 %3294  ;;  %v3290_v2 = vpop.permute.xlu0 %3289 }
 0x456   : > { %v3448_v15 = vmul.f32 %v3295_v41, %v3000_v18  ;;  %v3447_v43 = vmul.f32 %v3290_v2, %v2999_v28  ;;  %v3017_v18 = vld [vmem:[#allocation2 + $0x1d0] sm:$0xff] }
 0x457   : > { %4979 = vmatmul.mubr.bf16.gmra.mrb[36].mxu0 %v3490_v35 }
 0x458   : > { %v3491_v11 = vpack.c.bf16 %v3448_v15, %v3447_v43  ;;  %v3020_v43 = vld [vmem:[#allocation2 + $0x1e8] sm:$0xff] }
 0x459   : > { %v3305_v49 = vpop.permute.xlu1 %3304  ;;  %v3300_v39 = vpop.permute.xlu0 %3299 }
 0x45a   : > { %v3450_v16 = vmul.f32 %v3305_v49, %v3002_v36  ;;  %v3449_v14 = vmul.f32 %v3300_v39, %v3001_v23  ;;  %4982 = vmatprep.mubr.bf16.mxu0 %v3491_v11  ;;  %v3019_v36 = vld [vmem:[#allocation2 + $0x1e0] sm:$0xff] }
 0x45c   : > { %v3492_v51 = vpack.c.bf16 %v3450_v16, %v3449_v14  ;;  %v3022_v14 = vld [vmem:[#allocation2 + $0x1f8] sm:$0xff] }
 0x45d   : > { %v3315_v46 = vpop.permute.xlu1 %3314  ;;  %v3310_v10 = vpop.permute.xlu0 %3309 }
 0x45e   : > { %v3452_v12 = vmul.f32 %v3315_v46, %v3004_v56  ;;  %v3451_v63 = vmul.f32 %v3310_v10, %v3003_v3  ;;  %v3021_v56 = vld [vmem:[#allocation2 + $0x1f0] sm:$0xff] }
 0x45f   : > { %4983 = vmatmul.mubr.bf16.gmra.mrb[40].mxu0 %v3492_v51 }
 0x460   : > { %v3493_v59 = vpack.c.bf16 %v3452_v12, %v3451_v63 }
 0x461   : > { %v3325_v47 = vpop.permute.xlu1 %3324  ;;  %v3320_v7 = vpop.permute.xlu0 %3319 }
 0x462   : > { %v3454_v37 = vmul.f32 %v3325_v47, %v3006_v24  ;;  %v3453_v8 = vmul.f32 %v3320_v7, %v3005_v45  ;;  %4986 = vmatprep.mubr.bf16.mxu0 %v3493_v59 }
 0x464   : > { %v3494_v55 = vpack.c.bf16 %v3454_v37, %v3453_v8 }
 0x465   : > { %v3335_v0 = vpop.permute.xlu1 %3334  ;;  %v3330_v1 = vpop.permute.xlu0 %3329 }
 0x466   : > { %v3456_v22 = vmul.f32 %v3335_v0, %v3008_v60  ;;  %v3455_v6 = vmul.f32 %v3330_v1, %v3007_v58 }
 0x467   : > { %4987 = vmatmul.mubr.bf16.gmra.mrb[44].mxu0 %v3494_v55 }
 0x468   : > { %v3495_v9 = vpack.c.bf16 %v3456_v22, %v3455_v6 }
 0x469   : > { %v3345_v25 = vpop.permute.xlu1 %3344  ;;  %v3340_v31 = vpop.permute.xlu0 %3339 }
 0x46a   : > { %v3458_v29 = vmul.f32 %v3345_v25, %v3010_v21  ;;  %v3457_v19 = vmul.f32 %v3340_v31, %v3009_v48  ;;  %4990 = vmatprep.mubr.bf16.mxu0 %v3495_v9 }
 0x46c   : > { %v3496_v44 = vpack.c.bf16 %v3458_v29, %v3457_v19 }
 0x46d   : > { %v3355_v30 = vpop.permute.xlu1 %3354  ;;  %v3350_v17 = vpop.permute.xlu0 %3349 }
 0x46e   : > { %v3460_v40 = vmul.f32 %v3355_v30, %v3012_v13  ;;  %v3459_v52 = vmul.f32 %v3350_v17, %v3011_v34 }
 0x46f   : > { %4991 = vmatmul.mubr.bf16.gmra.mrb[48].mxu0 %v3496_v44 }
 0x470   : > { %v3497_v50 = vpack.c.bf16 %v3460_v40, %v3459_v52 }
 0x471   : > { %v3365_v57 = vpop.permute.xlu1 %3364  ;;  %v3360_v62 = vpop.permute.xlu0 %3359 }
 0x472   : > { %v3462_v61 = vmul.f32 %v3365_v57, %v3014_v20  ;;  %v3461_v53 = vmul.f32 %v3360_v62, %v3013_v54  ;;  %4994 = vmatprep.mubr.bf16.mxu0 %v3497_v50 }
 0x474   : > { %v3498_v33 = vpack.c.bf16 %v3462_v61, %v3461_v53 }
 0x475   : > { %v3375_v26 = vpop.permute.xlu1 %3374  ;;  %v3370_v5 = vpop.permute.xlu0 %3369 }
 0x476   : > { %v3464_v4 = vmul.f32 %v3375_v26, %v3016_v42  ;;  %v3463_v38 = vmul.f32 %v3370_v5, %v3015_v27 }
 0x477   : > { %4995 = vmatmul.mubr.bf16.gmra.mrb[52].mxu0 %v3498_v33 }
 0x478   : > { %v3499_v28 = vpack.c.bf16 %v3464_v4, %v3463_v38 }
 0x479   : > { %v3385_v35 = vpop.permute.xlu1 %3384  ;;  %v3380_v41 = vpop.permute.xlu0 %3379 }
 0x47a   : > { %v3466_v2 = vmul.f32 %v3385_v35, %v3018_v32  ;;  %v3465_v15 = vmul.f32 %v3380_v41, %v3017_v18  ;;  %4998 = vmatprep.mubr.bf16.mxu0 %v3499_v28  ;;  %v6432_v35 = vld [vmem:[%s6687_s5] ss:$0 sm:$0xff] }
 0x47c   : > { %v3500_v23 = vpack.c.bf16 %v3466_v2, %v3465_v15 }
 0x47d   : > { %v3395_v11 = vpop.permute.xlu1 %3394  ;;  %v3390_v49 = vpop.permute.xlu0 %3389 }
 0x47e   : > { %v3468_v39 = vmul.f32 %v3395_v11, %v3020_v43  ;;  %v3467_v16 = vmul.f32 %v3390_v49, %v3019_v36  ;;  %v4864_v24 = vpop.f32.mrb[0].mxu1 }
 0x47f   : > { %4999 = vmatmul.mubr.bf16.gmra.mrb[56].mxu0 %v3500_v23  ;;  %v3809_v45 = vpop.f32.mrb[1].mxu1 }
 0x480   : > { %v3501_v3 = vpack.c.bf16 %v3468_v39, %v3467_v16  ;;  %v4865_v59 = vpop.f32.mrb[2].mxu1 }
 0x481   : > { %v3405_v51 = vpop.permute.xlu1 %3404  ;;  %v3400_v46 = vpop.permute.xlu0 %3399 }
 0x482   : > { %v3470_v10 = vmul.f32 %v3405_v51, %v3022_v14  ;;  %v3469_v12 = vmul.f32 %v3400_v46, %v3021_v56  ;;  %5002 = vmatprep.mubr.bf16.mxu0 %v3501_v3  ;;  %v3812_v47 = vpop.f32.mrb[3].mxu1 }
 0x484   : > { %v3502_v63 = vpack.c.bf16 %v3470_v10, %v3469_v12 }
 0x486   : > { %v4868_v7 = vpop.f32.mrb[4].mxu1 }
 0x487   : > { %5003 = vmatmul.mubr.bf16.gmra.mrb[60].mxu0 %v3502_v63  ;;  %v6351_v37 = vpop.f32.mrb[5].mxu1 }
 0x488   : > { %v6353_v8 = vpop.f32.mrb[6].mxu1 }
 0x489   : > { %v6355_v60 = vpop.f32.mrb[7].mxu1 }
 0x48e   : > { %v6357_v58 = vpop.f32.mrb[8].mxu1 }
 0x48f   : > { %v6359_v55 = vpop.f32.mrb[9].mxu1 }
 0x490   : > { %v6361_v0 = vpop.f32.mrb[10].mxu1 }
 0x491   : > { %v6363_v1 = vpop.f32.mrb[11].mxu1 }
 0x496   : > { %v6365_v22 = vpop.f32.mrb[12].mxu1 }
 0x497   : > { %v6367_v6 = vpop.f32.mrb[13].mxu1 }
 0x498   : > { %v6369_v21 = vpop.f32.mrb[14].mxu1 }
 0x499   : > { %v6371_v48 = vpop.f32.mrb[15].mxu1 }
 0x49e   : > { %v6373_v9 = vpop.f32.mrb[16].mxu1 }
 0x49f   : > { %v6375_v25 = vpop.f32.mrb[17].mxu1 }
 0x4a0   : > { %v6377_v31 = vpop.f32.mrb[18].mxu1 }
 0x4a1   : > { %v6379_v29 = vpop.f32.mrb[19].mxu1 }
 0x4a6   : > { %v6381_v19 = vpop.f32.mrb[20].mxu1 }
 0x4a7   : > { %v6383_v13 = vpop.f32.mrb[21].mxu1 }
 0x4a8   : > { %v6385_v34 = vpop.f32.mrb[22].mxu1 }
 0x4a9   : > { %v6387_v44 = vpop.f32.mrb[23].mxu1 }
 0x4ae   : > { %v6389_v30 = vpop.f32.mrb[24].mxu1 }
 0x4af   : > { %v6391_v17 = vpop.f32.mrb[25].mxu1 }
 0x4b0   : > { %v6393_v40 = vpop.f32.mrb[26].mxu1 }
 0x4b1   : > { %v6395_v52 = vpop.f32.mrb[27].mxu1 }
 0x4b6   : > { %v6397_v20 = vpop.f32.mrb[28].mxu1 }
 0x4b7   : > { %v6399_v54 = vpop.f32.mrb[29].mxu1 }
 0x4b8   : > { %v6401_v50 = vpop.f32.mrb[30].mxu1 }
 0x4b9   : > { %v6403_v57 = vpop.f32.mrb[31].mxu1 }
 0x4be   : > { %v6405_v62 = vpop.f32.mrb[32].mxu1 }
 0x4bf   : > { %v6407_v61 = vpop.f32.mrb[33].mxu1 }
 0x4c0   : > { %v6409_v53 = vpop.f32.mrb[34].mxu1 }
 0x4c1   : > { %v6411_v42 = vpop.f32.mrb[35].mxu1 }
 0x4c6   : > { %v6413_v27 = vpop.f32.mrb[36].mxu1 }
 0x4c7   : > { %v6415_v33 = vpop.f32.mrb[37].mxu1 }
 0x4c8   : > { %v6417_v26 = vpop.f32.mrb[38].mxu1 }
 0x4c9   : > { %v6419_v5 = vpop.f32.mrb[39].mxu1 }
 0x4ce   : > { %v6421_v4 = vpop.f32.mrb[40].mxu1 }
 0x4cf   : > { %v6423_v38 = vpop.f32.mrb[41].mxu1 }
 0x4d0   : > { %v6425_v32 = vpop.f32.mrb[42].mxu1 }
 0x4d1   : > { %v6427_v18 = vpop.f32.mrb[43].mxu1 }
 0x4d6   : > { %v6434_v15 = vpop.f32.mrb[44].mxu1 }
 0x4d7   : > { %v6436_v23 = vpop.f32.mrb[45].mxu1 }
 0x4d8   : > { %v6439_v16 = vpop.f32.mrb[46].mxu1 }
 0x4d9   : > { %v6442_v3 = vpop.f32.mrb[47].mxu1 }
 0x4e2   : > { %v4944_v28 = vpop.f32.mrb[0].mxu0 }
 0x4e3   : > { %v4155_v41 = vadd.f32 %v4944_v28, %v4864_v24  ;;  %v4146_v2 = vpop.f32.mrb[1].mxu0  ;;  %v6450_v24 = vpop.f32.mrb[48].mxu1 }
 0x4e4   : > { %v4147_v43 = vadd.f32 %v4146_v2, %v3809_v45  ;;  %v4945_v36 = vpop.f32.mrb[2].mxu0 }
 0x4e5   : > { %v4410_v11 = vadd.f32 %v6432_v35, %v4155_v41  ;;  %v4158_v49 = vadd.f32 %v4945_v36, %v4865_v59  ;;  %v4149_v39 = vpop.f32.mrb[3].mxu0 }
 0x4e6   : > { %v4408_v14 = vadd.f32 %v6432_v35, %v4147_v43  ;;  %v4150_v56 = vadd.f32 %v4149_v39, %v3812_v47  ;;  %v6453_v47 = vpop.f32.mrb[49].mxu1 }
 0x4e7   : > { %4474 = vst [vmem:[%s5669_s16 + $0x10] sm:$0xff] %v4410_v11  ;;  %v4411_v51 = vadd.f32 %v6432_v35, %v4158_v49  ;;  %v6457_v43 = vpop.f32.mrb[50].mxu1 }
 0x4e8   : > { %4472 = vst [vmem:[%s5669_s16] sm:$0xff] %v4408_v14  ;;  %v4409_v46 = vadd.f32 %v6432_v35, %v4150_v56  ;;  %v6461_v11 = vpop.f32.mrb[51].mxu1 }
 0x4e9   : > { %4475 = vst [vmem:[%s5669_s16 + $0x18] sm:$0xff] %v4411_v51  ;;  %v6470_v56 = vpop.f32.mrb[52].mxu1 }
 0x4ea   : > { %4473 = vst [vmem:[%s5669_s16 + $0x8] sm:$0xff] %v4409_v46  ;;  %v4948_v10 = vpop.f32.mrb[4].mxu0  ;;  %v6473_v46 = vpop.f32.mrb[53].mxu1 }
 0x4eb   : > { %v4171_v12 = vadd.f32 %v4948_v10, %v4868_v7  ;;  %v4162_v63 = vpop.f32.mrb[5].mxu0 }
 0x4ec   : > { %v4163_v45 = vadd.f32 %v4162_v63, %v6351_v37  ;;  %v4949_v59 = vpop.f32.mrb[6].mxu0 }
 0x4ed   : > { %v4414_v28 = vadd.f32 %v6432_v35, %v4171_v12  ;;  %v4174_v41 = vadd.f32 %v4949_v59, %v6353_v8  ;;  %v4165_v2 = vpop.f32.mrb[7].mxu0 }
 0x4ee   : > { %v4412_v36 = vadd.f32 %v6432_v35, %v4163_v45  ;;  %v4166_v7 = vadd.f32 %v4165_v2, %v6355_v60  ;;  %v6477_v45 = vpop.f32.mrb[54].mxu1 }
 0x4ef   : > { %4478 = vst [vmem:[%s5669_s16 + $0x30] sm:$0xff] %v4414_v28  ;;  %v4415_v49 = vadd.f32 %v6432_v35, %v4174_v41  ;;  %v6481_v28 = vpop.f32.mrb[55].mxu1 }
 0x4f0   : > { %4476 = vst [vmem:[%s5669_s16 + $0x20] sm:$0xff] %v4412_v36  ;;  %v4413_v37 = vadd.f32 %v6432_v35, %v4166_v7  ;;  %v6490_v7 = vpop.f32.mrb[56].mxu1 }
 0x4f1   : > { %4479 = vst [vmem:[%s5669_s16 + $0x38] sm:$0xff] %v4415_v49 }
 0x4f2   : > { %4477 = vst [vmem:[%s5669_s16 + $0x28] sm:$0xff] %v4413_v37  ;;  %v4952_v39 = vpop.f32.mrb[8].mxu0  ;;  %v6493_v37 = vpop.f32.mrb[57].mxu1 }
 0x4f3   : > { %v4187_v8 = vadd.f32 %v4952_v39, %v6357_v58  ;;  %v4178_v14 = vpop.f32.mrb[9].mxu0 }
 0x4f4   : > { %v4179_v60 = vadd.f32 %v4178_v14, %v6359_v55  ;;  %v4953_v51 = vpop.f32.mrb[10].mxu0 }
 0x4f5   : > { %v4418_v10 = vadd.f32 %v6432_v35, %v4187_v8  ;;  %v4190_v12 = vadd.f32 %v4953_v51, %v6361_v0  ;;  %v4181_v63 = vpop.f32.mrb[11].mxu0 }
 0x4f6   : > { %v4416_v59 = vadd.f32 %v6432_v35, %v4179_v60  ;;  %v4182_v58 = vadd.f32 %v4181_v63, %v6363_v1  ;;  %v6497_v60 = vpop.f32.mrb[58].mxu1 }
 0x4f7   : > { %4482 = vst [vmem:[%s5669_s16 + $0x50] sm:$0xff] %v4418_v10  ;;  %v4419_v41 = vadd.f32 %v6432_v35, %v4190_v12  ;;  %v6501_v10 = vpop.f32.mrb[59].mxu1 }
 0x4f8   : > { %4480 = vst [vmem:[%s5669_s16 + $0x40] sm:$0xff] %v4416_v59  ;;  %v4417_v55 = vadd.f32 %v6432_v35, %v4182_v58  ;;  %v6510_v58 = vpop.f32.mrb[60].mxu1 }
 0x4f9   : > { %4483 = vst [vmem:[%s5669_s16 + $0x58] sm:$0xff] %v4419_v41 }
 0x4fa   : > { %4481 = vst [vmem:[%s5669_s16 + $0x48] sm:$0xff] %v4417_v55  ;;  %v4956_v2 = vpop.f32.mrb[12].mxu0  ;;  %v6513_v55 = vpop.f32.mrb[61].mxu1 }
 0x4fb   : > { %v4203_v0 = vadd.f32 %v4956_v2, %v6365_v22  ;;  %v4194_v36 = vpop.f32.mrb[13].mxu0 }
 0x4fc   : > { %v4195_v1 = vadd.f32 %v4194_v36, %v6367_v6  ;;  %v4957_v49 = vpop.f32.mrb[14].mxu0 }
 0x4fd   : > { %v4422_v39 = vadd.f32 %v6432_v35, %v4203_v0  ;;  %v4206_v8 = vadd.f32 %v4957_v49, %v6369_v21  ;;  %v4197_v14 = vpop.f32.mrb[15].mxu0 }
 0x4fe   : > { %v4420_v51 = vadd.f32 %v6432_v35, %v4195_v1  ;;  %v4198_v22 = vadd.f32 %v4197_v14, %v6371_v48  ;;  %v6517_v1 = vpop.f32.mrb[62].mxu1 }
 0x4ff   : > { %4486 = vst [vmem:[%s5669_s16 + $0x70] sm:$0xff] %v4422_v39  ;;  %v4423_v12 = vadd.f32 %v6432_v35, %v4206_v8  ;;  %v6521_v39 = vpop.f32.mrb[63].mxu1 }
 0x500   : > { %4484 = vst [vmem:[%s5669_s16 + $0x60] sm:$0xff] %v4420_v51  ;;  %v4421_v6 = vadd.f32 %v6432_v35, %v4198_v22 }
 0x501   : > { %4487 = vst [vmem:[%s5669_s16 + $0x78] sm:$0xff] %v4423_v12 }
 0x502   : > { %4485 = vst [vmem:[%s5669_s16 + $0x68] sm:$0xff] %v4421_v6  ;;  %v4960_v63 = vpop.f32.mrb[16].mxu0 }
 0x503   : > { %v4219_v21 = vadd.f32 %v4960_v63, %v6373_v9  ;;  %v4210_v59 = vpop.f32.mrb[17].mxu0 }
 0x504   : > { %v4211_v48 = vadd.f32 %v4210_v59, %v6375_v25  ;;  %v4961_v41 = vpop.f32.mrb[18].mxu0 }
 0x505   : > { %v4426_v2 = vadd.f32 %v6432_v35, %v4219_v21  ;;  %v4222_v0 = vadd.f32 %v4961_v41, %v6377_v31  ;;  %v4213_v36 = vpop.f32.mrb[19].mxu0 }
 0x506   : > { %v4424_v49 = vadd.f32 %v6432_v35, %v4211_v48  ;;  %v4214_v9 = vadd.f32 %v4213_v36, %v6379_v29 }
 0x507   : > { %4490 = vst [vmem:[%s5669_s16 + $0x90] sm:$0xff] %v4426_v2  ;;  %v4427_v25 = vadd.f32 %v6432_v35, %v4222_v0 }
 0x508   : > { %4488 = vst [vmem:[%s5669_s16 + $0x80] sm:$0xff] %v4424_v49  ;;  %v4425_v8 = vadd.f32 %v6432_v35, %v4214_v9 }
 0x509   : > { %4491 = vst [vmem:[%s5669_s16 + $0x98] sm:$0xff] %v4427_v25 }
 0x50a   : > { %4489 = vst [vmem:[%s5669_s16 + $0x88] sm:$0xff] %v4425_v8  ;;  %v4964_v31 = vpop.f32.mrb[20].mxu0 }
 0x50b   : > { %v4235_v14 = vadd.f32 %v4964_v31, %v6381_v19  ;;  %v4226_v51 = vpop.f32.mrb[21].mxu0 }
 0x50c   : > { %v4227_v29 = vadd.f32 %v4226_v51, %v6383_v13  ;;  %v4965_v22 = vpop.f32.mrb[22].mxu0 }
 0x50d   : > { %v4430_v12 = vadd.f32 %v6432_v35, %v4235_v14  ;;  %v4238_v6 = vadd.f32 %v4965_v22, %v6385_v34  ;;  %v4229_v63 = vpop.f32.mrb[23].mxu0 }
 0x50e   : > { %v4428_v21 = vadd.f32 %v6432_v35, %v4227_v29  ;;  %v4230_v59 = vadd.f32 %v4229_v63, %v6387_v44 }
 0x50f   : > { %4494 = vst [vmem:[%s5669_s16 + $0xb0] sm:$0xff] %v4430_v12  ;;  %v4431_v48 = vadd.f32 %v6432_v35, %v4238_v6 }
 0x510   : > { %4492 = vst [vmem:[%s5669_s16 + $0xa0] sm:$0xff] %v4428_v21  ;;  %v4429_v19 = vadd.f32 %v6432_v35, %v4230_v59 }
 0x511   : > { %4495 = vst [vmem:[%s5669_s16 + $0xb8] sm:$0xff] %v4431_v48 }
 0x512   : > { %4493 = vst [vmem:[%s5669_s16 + $0xa8] sm:$0xff] %v4429_v19  ;;  %v4968_v13 = vpop.f32.mrb[24].mxu0 }
 0x513   : > { %v4251_v34 = vadd.f32 %v4968_v13, %v6389_v30  ;;  %v4242_v41 = vpop.f32.mrb[25].mxu0 }
 0x514   : > { %v4243_v2 = vadd.f32 %v4242_v41, %v6391_v17  ;;  %v4969_v0 = vpop.f32.mrb[26].mxu0 }
 0x515   : > { %v4434_v44 = vadd.f32 %v6432_v35, %v4251_v34  ;;  %v4254_v36 = vadd.f32 %v4969_v0, %v6393_v40  ;;  %v4245_v49 = vpop.f32.mrb[27].mxu0 }
 0x516   : > { %v4432_v9 = vadd.f32 %v6432_v35, %v4243_v2  ;;  %v4246_v25 = vadd.f32 %v4245_v49, %v6395_v52 }
 0x517   : > { %4498 = vst [vmem:[%s5669_s16 + $0xd0] sm:$0xff] %v4434_v44  ;;  %v4435_v8 = vadd.f32 %v6432_v35, %v4254_v36 }
 0x518   : > { %4496 = vst [vmem:[%s5669_s16 + $0xc0] sm:$0xff] %v4432_v9  ;;  %v4433_v30 = vadd.f32 %v6432_v35, %v4246_v25 }
 0x519   : > { %4499 = vst [vmem:[%s5669_s16 + $0xd8] sm:$0xff] %v4435_v8 }
 0x51a   : > { %4497 = vst [vmem:[%s5669_s16 + $0xc8] sm:$0xff] %v4433_v30  ;;  %v4972_v17 = vpop.f32.mrb[28].mxu0 }
 0x51b   : > { %v4267_v40 = vadd.f32 %v4972_v17, %v6397_v20  ;;  %v4258_v31 = vpop.f32.mrb[29].mxu0 }
 0x51c   : > { %v4259_v14 = vadd.f32 %v4258_v31, %v6399_v54  ;;  %v4973_v51 = vpop.f32.mrb[30].mxu0 }
 0x51d   : > { %v4438_v52 = vadd.f32 %v6432_v35, %v4267_v40  ;;  %v4270_v29 = vadd.f32 %v4973_v51, %v6401_v50  ;;  %v4261_v22 = vpop.f32.mrb[31].mxu0 }
 0x51e   : > { %v4436_v12 = vadd.f32 %v6432_v35, %v4259_v14  ;;  %v4262_v6 = vadd.f32 %v4261_v22, %v6403_v57 }
 0x51f   : > { %4502 = vst [vmem:[%s5669_s16 + $0xf0] sm:$0xff] %v4438_v52  ;;  %v4439_v63 = vadd.f32 %v6432_v35, %v4270_v29 }
 0x520   : > { %4500 = vst [vmem:[%s5669_s16 + $0xe0] sm:$0xff] %v4436_v12  ;;  %v4437_v20 = vadd.f32 %v6432_v35, %v4262_v6 }
 0x521   : > { %4503 = vst [vmem:[%s5669_s16 + $0xf8] sm:$0xff] %v4439_v63 }
 0x522   : > { %4501 = vst [vmem:[%s5669_s16 + $0xe8] sm:$0xff] %v4437_v20  ;;  %v4976_v54 = vpop.f32.mrb[32].mxu0 }
 0x523   : > { %v4283_v50 = vadd.f32 %v4976_v54, %v6405_v62  ;;  %v4274_v21 = vpop.f32.mrb[33].mxu0 }
 0x524   : > { %v4275_v59 = vadd.f32 %v4274_v21, %v6407_v61  ;;  %v4977_v48 = vpop.f32.mrb[34].mxu0 }
 0x525   : > { %v4442_v57 = vadd.f32 %v6432_v35, %v4283_v50  ;;  %v4286_v19 = vadd.f32 %v4977_v48, %v6409_v53  ;;  %v4277_v13 = vpop.f32.mrb[35].mxu0 }
 0x526   : > { %v4440_v34 = vadd.f32 %v6432_v35, %v4275_v59  ;;  %v4278_v41 = vadd.f32 %v4277_v13, %v6411_v42 }
 0x527   : > { %4506 = vst [vmem:[%s5669_s16 + $0x110] sm:$0xff] %v4442_v57  ;;  %v4443_v2 = vadd.f32 %v6432_v35, %v4286_v19 }
 0x528   : > { %4504 = vst [vmem:[%s5669_s16 + $0x100] sm:$0xff] %v4440_v34  ;;  %v4441_v62 = vadd.f32 %v6432_v35, %v4278_v41 }
 0x529   : > { %4507 = vst [vmem:[%s5669_s16 + $0x118] sm:$0xff] %v4443_v2 }
 0x52a   : > { %4505 = vst [vmem:[%s5669_s16 + $0x108] sm:$0xff] %v4441_v62  ;;  %v4980_v61 = vpop.f32.mrb[36].mxu0 }
 0x52b   : > { %v4299_v53 = vadd.f32 %v4980_v61, %v6413_v27  ;;  %v4290_v0 = vpop.f32.mrb[37].mxu0 }
 0x52c   : > { %v4291_v44 = vadd.f32 %v4290_v0, %v6415_v33  ;;  %v4981_v36 = vpop.f32.mrb[38].mxu0 }
 0x52d   : > { %v4446_v42 = vadd.f32 %v6432_v35, %v4299_v53  ;;  %v4302_v49 = vadd.f32 %v4981_v36, %v6417_v26  ;;  %v4293_v9 = vpop.f32.mrb[39].mxu0 }
 0x52e   : > { %v4444_v25 = vadd.f32 %v6432_v35, %v4291_v44  ;;  %v4294_v8 = vadd.f32 %v4293_v9, %v6419_v5 }
 0x52f   : > { %4510 = vst [vmem:[%s5669_s16 + $0x130] sm:$0xff] %v4446_v42  ;;  %v4447_v30 = vadd.f32 %v6432_v35, %v4302_v49 }
 0x530   : > { %4508 = vst [vmem:[%s5669_s16 + $0x120] sm:$0xff] %v4444_v25  ;;  %v4445_v27 = vadd.f32 %v6432_v35, %v4294_v8 }
 0x531   : > { %4511 = vst [vmem:[%s5669_s16 + $0x138] sm:$0xff] %v4447_v30 }
 0x532   : > { %4509 = vst [vmem:[%s5669_s16 + $0x128] sm:$0xff] %v4445_v27  ;;  %v4984_v33 = vpop.f32.mrb[40].mxu0 }
 0x533   : > { %v4315_v26 = vadd.f32 %v4984_v33, %v6421_v4  ;;  %v4306_v17 = vpop.f32.mrb[41].mxu0 }
 0x534   : > { %v4307_v40 = vadd.f32 %v4306_v17, %v6423_v38  ;;  %v4985_v31 = vpop.f32.mrb[42].mxu0 }
 0x535   : > { %v4450_v5 = vadd.f32 %v6432_v35, %v4315_v26  ;;  %v4318_v14 = vadd.f32 %v4985_v31, %v6425_v32  ;;  %v4309_v51 = vpop.f32.mrb[43].mxu0 }
 0x536   : > { %v4448_v52 = vadd.f32 %v6432_v35, %v4307_v40  ;;  %v4310_v29 = vadd.f32 %v4309_v51, %v6427_v18 }
 0x537   : > { %4514 = vst [vmem:[%s5669_s16 + $0x150] sm:$0xff] %v4450_v5  ;;  %v4451_v22 = vadd.f32 %v6432_v35, %v4318_v14 }
 0x538   : > { %4512 = vst [vmem:[%s5669_s16 + $0x140] sm:$0xff] %v4448_v52  ;;  %v4449_v4 = vadd.f32 %v6432_v35, %v4310_v29 }
 0x539   : > { %4515 = vst [vmem:[%s5669_s16 + $0x158] sm:$0xff] %v4451_v22 }
 0x53a   : > { %4513 = vst [vmem:[%s5669_s16 + $0x148] sm:$0xff] %v4449_v4  ;;  %v4988_v38 = vpop.f32.mrb[44].mxu0 }
 0x53b   : > { %v4331_v32 = vadd.f32 %v4988_v38, %v6434_v15  ;;  %v4322_v12 = vpop.f32.mrb[45].mxu0 }
 0x53c   : > { %v4323_v6 = vadd.f32 %v4322_v12, %v6436_v23  ;;  %v4989_v63 = vpop.f32.mrb[46].mxu0 }
 0x53d   : > { %v4454_v18 = vadd.f32 %v6432_v35, %v4331_v32  ;;  %v4334_v20 = vadd.f32 %v4989_v63, %v6439_v16  ;;  %v4325_v54 = vpop.f32.mrb[47].mxu0 }
 0x53e   : > { %v4452_v50 = vadd.f32 %v6432_v35, %v4323_v6  ;;  %v4326_v21 = vadd.f32 %v4325_v54, %v6442_v3 }
 0x53f   : > { %4518 = vst [vmem:[%s5669_s16 + $0x170] sm:$0xff] %v4454_v18  ;;  %v4455_v59 = vadd.f32 %v6432_v35, %v4334_v20 }
 0x540   : > { %4516 = vst [vmem:[%s5669_s16 + $0x160] sm:$0xff] %v4452_v50  ;;  %v4453_v15 = vadd.f32 %v6432_v35, %v4326_v21 }
 0x541   : > { %4519 = vst [vmem:[%s5669_s16 + $0x178] sm:$0xff] %v4455_v59 }
 0x542   : > { %4517 = vst [vmem:[%s5669_s16 + $0x168] sm:$0xff] %v4453_v15  ;;  %v4992_v23 = vpop.f32.mrb[48].mxu0 }
 0x543   : > { %v4347_v16 = vadd.f32 %v4992_v23, %v6450_v24  ;;  %v4338_v48 = vpop.f32.mrb[49].mxu0 }
 0x544   : > { %v4339_v57 = vadd.f32 %v4338_v48, %v6453_v47  ;;  %v4993_v19 = vpop.f32.mrb[50].mxu0 }
 0x545   : > { %v4458_v3 = vadd.f32 %v6432_v35, %v4347_v16  ;;  %v4350_v13 = vadd.f32 %v4993_v19, %v6457_v43  ;;  %v4341_v34 = vpop.f32.mrb[51].mxu0 }
 0x546   : > { %v4456_v41 = vadd.f32 %v6432_v35, %v4339_v57  ;;  %v4342_v2 = vadd.f32 %v4341_v34, %v6461_v11 }
 0x547   : > { %4522 = vst [vmem:[%s5669_s16 + $0x190] sm:$0xff] %v4458_v3  ;;  %v4459_v62 = vadd.f32 %v6432_v35, %v4350_v13 }
 0x548   : > { %4520 = vst [vmem:[%s5669_s16 + $0x180] sm:$0xff] %v4456_v41  ;;  %v4457_v24 = vadd.f32 %v6432_v35, %v4342_v2 }
 0x549   : > { %4523 = vst [vmem:[%s5669_s16 + $0x198] sm:$0xff] %v4459_v62 }
 0x54a   : > { %4521 = vst [vmem:[%s5669_s16 + $0x188] sm:$0xff] %v4457_v24  ;;  %v4996_v47 = vpop.f32.mrb[52].mxu0 }
 0x54b   : > { %v4363_v43 = vadd.f32 %v4996_v47, %v6470_v56  ;;  %v4354_v61 = vpop.f32.mrb[53].mxu0 }
 0x54c   : > { %v4355_v53 = vadd.f32 %v4354_v61, %v6473_v46  ;;  %v4997_v0 = vpop.f32.mrb[54].mxu0 }
 0x54d   : > { %v4462_v11 = vadd.f32 %v6432_v35, %v4363_v43  ;;  %v4366_v44 = vadd.f32 %v4997_v0, %v6477_v45  ;;  %v4357_v36 = vpop.f32.mrb[55].mxu0 }
 0x54e   : > { %v4460_v42 = vadd.f32 %v6432_v35, %v4355_v53  ;;  %v4358_v49 = vadd.f32 %v4357_v36, %v6481_v28 }
 0x54f   : > { %4526 = vst [vmem:[%s5669_s16 + $0x1b0] sm:$0xff] %v4462_v11  ;;  %v4463_v9 = vadd.f32 %v6432_v35, %v4366_v44 }
 0x550   : > { %4524 = vst [vmem:[%s5669_s16 + $0x1a0] sm:$0xff] %v4460_v42  ;;  %v4461_v56 = vadd.f32 %v6432_v35, %v4358_v49 }
 0x551   : > { %4527 = vst [vmem:[%s5669_s16 + $0x1b8] sm:$0xff] %v4463_v9 }
 0x552   : > { %4525 = vst [vmem:[%s5669_s16 + $0x1a8] sm:$0xff] %v4461_v56  ;;  %v5000_v46 = vpop.f32.mrb[56].mxu0 }
 0x553   : > { %v4379_v45 = vadd.f32 %v5000_v46, %v6490_v7  ;;  %v4370_v25 = vpop.f32.mrb[57].mxu0 }
 0x554   : > { %v4371_v8 = vadd.f32 %v4370_v25, %v6493_v37  ;;  %v5001_v30 = vpop.f32.mrb[58].mxu0 }
 0x555   : > { %v4466_v28 = vadd.f32 %v6432_v35, %v4379_v45  ;;  %v4382_v27 = vadd.f32 %v5001_v30, %v6497_v60  ;;  %v4373_v33 = vpop.f32.mrb[59].mxu0 }
 0x556   : > { %v4464_v26 = vadd.f32 %v6432_v35, %v4371_v8  ;;  %v4374_v17 = vadd.f32 %v4373_v33, %v6501_v10 }
 0x557   : > { %4530 = vst [vmem:[%s5669_s16 + $0x1d0] sm:$0xff] %v4466_v28  ;;  %v4467_v40 = vadd.f32 %v6432_v35, %v4382_v27 }
 0x558   : > { %4528 = vst [vmem:[%s5669_s16 + $0x1c0] sm:$0xff] %v4464_v26  ;;  %v4465_v7 = vadd.f32 %v6432_v35, %v4374_v17 }
 0x559   : > { %4531 = vst [vmem:[%s5669_s16 + $0x1d8] sm:$0xff] %v4467_v40 }
 0x55a   : > { %4529 = vst [vmem:[%s5669_s16 + $0x1c8] sm:$0xff] %v4465_v7  ;;  %v5004_v37 = vpop.f32.mrb[60].mxu0 }
 0x55b   : > { %v4395_v60 = vadd.f32 %v5004_v37, %v6510_v58  ;;  %v4386_v31 = vpop.f32.mrb[61].mxu0 }
 0x55c   : > { %v4387_v5 = vadd.f32 %v4386_v31, %v6513_v55  ;;  %v5005_v14 = vpop.f32.mrb[62].mxu0 }
 0x55d   : > { %v4470_v10 = vadd.f32 %v6432_v35, %v4395_v60  ;;  %v4398_v51 = vadd.f32 %v5005_v14, %v6517_v1  ;;  %v4389_v52 = vpop.f32.mrb[63].mxu0 }
 0x55e   : > { %v4468_v29 = vadd.f32 %v6432_v35, %v4387_v5  ;;  %v4390_v22 = vadd.f32 %v4389_v52, %v6521_v39 }
 0x55f   : > { %4534 = vst [vmem:[%s5669_s16 + $0x1f0] sm:$0xff] %v4470_v10  ;;  %v4471_v4 = vadd.f32 %v6432_v35, %v4398_v51 }
 0x560   : > { %4532 = vst [vmem:[%s5669_s16 + $0x1e0] sm:$0xff] %v4468_v29  ;;  %v4469_v38 = vadd.f32 %v6432_v35, %v4390_v22 }
 0x561   : > { %4535 = vst [vmem:[%s5669_s16 + $0x1f8] sm:$0xff] %v4471_v4 }
 0x562   : > { %4533 = vst [vmem:[%s5669_s16 + $0x1e8] sm:$0xff] %v4469_v38 }
 0x563 PF: > { %s16_s27 = sadd.s32 1, %s5297_s27   ;;  %s6733_s21 = smov %s5277_s22 }
 0x564   : > { %p13_p13 = scmp.ge.s32.totalorder %s16_s27, 8   ;;  %s6734_s22 = smov %s5388_s10 }
 0x565   : > { %s6735_s23 = smov %s5289_s25  ;;  %s6736_s24 = smov %s5293_s26 }
 0x566   : > { %s6737_s25 = smov %s6740_s28  ;;  %s6738_s26 = smov %s6744_s29 }
 0x567   :  { %15 = sbr.rel (!%p13_p13) target bundleno = 4 (0x4), region = 115 }

// kernel: graphsage_forward.2
= control target key start
LH: loop header
LB: loop body
LE: loop exit
PB: predicated region body
PF: predicated region fallthrough
CT: control target
= control target key end

     0   :  { %s6907_s0 = inlined_call_operand.hbm [shape: s8[1536,2048], index: 0, kind: input, shape index: {}]   ;;  %s6908_s1 = inlined_call_operand.vmem [shape: bf16[2048,128], index: 1, kind: input, shape index: {}]   ;;  %s6909_s2 = inlined_call_operand.vmem [shape: f32[1536,1], index: 2, kind: input, shape index: {}]   ;;  %s6910_s3 = inlined_call_operand.vmem [shape: bf16[128,128], index: 3, kind: input, shape index: {}]   ;;  %s6911_s4 = inlined_call_operand.vmem [shape: bf16[128,128], index: 4, kind: input, shape index: {}]   ;;  %s6912_s5 = inlined_call_operand.vmem [shape: f32[1,128], index: 5, kind: input, shape index: {}]   ;;  %s6913_s6 = inlined_call_operand.vmem [shape: bf16[1536,128], index: 6, kind: output, shape index: {}]  }
   0x1   :  { %6916 = sst [smem:[#allocation29_spill]] %s6910_s3 }
   0x2   :  { %6917 = sst [smem:[#allocation30_spill]] %s6912_s5 }
   0x3   :  { %11 = vsyncpa [#allocation4], 0 }
   0x4   :  { %13 = vsyncpa [#allocation4 + $0x1], 0  ;;  %s5791_s21 = smov 0   ;;  %s5793_s22 = smov 0  }
   0x5   :  { %s5795_s23 = smov 0   ;;  %s5797_s24 = smov 0  }
   0x6   :  { %s5799_s25 = smov 0   ;;  %s5801_s26 = smov 0  }
   0x7   :  { %s5803_s27 = smov 0   ;;  %s5805_s28 = smov 0  }
   0x8 LB: > { %s4700_s29 = sadd.s32 4294967295, %s5747_s28   ;;  %s28_s30 = sadd.s32 1, %s5739_s26  ;;  %s5747_s28 = sphi %s5805_s28, %s19_s28   ;;  %s5743_s27 = sphi %s5803_s27, %s6975_s27   ;;  %s5739_s26 = sphi %s5801_s26, %s6974_s26   ;;  %s5735_s25 = sphi %s5799_s25, %s6973_s25   ;;  %s5731_s24 = sphi %s5797_s24, %s6972_s24   ;;  %s5727_s23 = sphi %s5795_s23, %s6971_s23   ;;  %s5723_s22 = sphi %s5793_s22, %s6970_s22   ;;  %s5719_s21 = sphi %s5791_s21, %s6969_s21  }
   0x9   : > { %p29_p0 = scmp.ge.s32.totalorder %s28_s30, 2  ;;  %s31_s7 = sadd.s32 1, %s5743_s27 }
   0xa   : > { %s40_s8 = sadd.s32 1, %s5727_s23  ;;  %p47_p1 = scmp.ne.s32.totalorder %s5727_s23, %s5723_s22 }
   0xb   : > { %s6977_s30 = smov (%p29_p0, %s28_s30), 0  ;;  %s6979_s7 = smov (!%p29_p0, %s31_s7), %s5743_s27 }
   0xc   : > { %6918 = sst [smem:[#allocation6_spill]] %s6977_s30  ;;  %s36_s9 = ssub.s32 %s5739_s26, %s6977_s30 }
   0xd   : > { %p48_p2 = scmp.eq.s32.totalorder %s5747_s28, 0  ;;  %p33_p3 = scmp.ge.s32.totalorder %s6979_s7, 3 }
   0xe   : > { %p53_p4 = scmp.ne.s32.totalorder %s5723_s22, %s5719_s21  ;;  %p54_p6 = scmp.eq.s32.totalorder %s4700_s29, 0 }
   0xf   : > { %p5842_p5 = por %p48_p2, %p47_p1  ;;  %s6981_s7 = smov (%p33_p3, %s6979_s7), 0 }
  0x10   : > { %p5848_p7 = por %p54_p6, %p53_p4  ;;  %s35_s12 = ssub.s32 %s5743_s27, %s6981_s7 }
  0x11   : > { %p5466_p8 = scmp.lt.s32.totalorder %s5747_s28, 6  ;;  %s37_s13 = sor.u32 %s36_s9, %s35_s12 }
  0x12   : > { %s225_s14 = sand.u32 1, %s5727_s23   ;;  %p38_p9 = scmp.eq.s32.totalorder %s37_s13, 0 }
  0x13   : > { %s4704_s15 = sshll.u32 %s225_s14, 10  ;;  %s4706_s16 = sshll.u32 %s5739_s26, 3 }
  0x14   : > { %s5858_s17 = scalar_select %p38_p9, %s5727_s23, %s40_s8  }
  0x15   : > { %s4900_s18 = sshll.u32 %s5743_s27, 8  ;;  %s229_s20 = scalar_lea.vmem [#allocation3], %s4704_s15 }
  0x16   : > { %s236_s19 = sadd.s32 %s4900_s18, %s4706_s16  ;;  %s239_s21 = sshll.u32 %s229_s20, 4  ;;  %s5861_s21 = int_to_ptr.vmem [resolvable:$true] %s239_s21 }
  0x17   : > { %s4708_s29 = sshll.u32 %s236_s19, 7  ;;  %p5872_p10 = pnand %p5466_p8, %p5842_p5 }
  0x18   : > { %s5866_s3 = scalar_lea.hbm %s6907_s0, %s4708_s29  ;;  %s5876_s9 = scalar_lea.sflag [#allocation4], %s225_s14 }
  0x19   : > { %s5651_s12 = scalar_lea.hbm %s5866_s3, 16384  ;;  %p5653_p12 = pneg %p5872_p10 }
  0x1a   : > { %p5652_p11 = scmp.ne.s32.totalorder %s5866_s3, %s5651_s12  ;;  %s5656_s10 = scalar_lea.hbm %s6907_s0, 98304 }
  0x1b   : > { %p5657_p1 = scmp.lt.u32.totalorder %s5866_s3, %s6907_s0  ;;  %p5658_p2 = scmp.lt.u32.totalorder %s5656_s10, %s5651_s12 }
  0x1c   : > { %p5654_p13 = pnand %p5653_p12, %p5652_p11  ;;  %p5660_p4 = scmp.lt.u32.totalorder %s5651_s12, %s5866_s3 }
  0x1d   : > { %p5659_p3 = por %p5658_p2, %p5657_p1 }
  0x1e   : > { %p5655_p0 = pneg %p5654_p13 }
  0x1f   : > { %p5661_p5 = por %p5660_p4, %p5659_p3 }
  0x21   : > { %p5662_p6 = pnand %p5661_p5, %p5655_p0 }
  0x23   : > { %5665 = shalt.err (!%p5662_p6)
}
  0x24   : > { %s5666_s14 = scalar_lea.vmem %s5861_s21, 16384  ;;  %s5749_s16 = smov [#allocation3]  }
  0x25   : > { %p5667_p8 = scmp.ne.s32.totalorder %s5861_s21, %s5666_s14  ;;  %s5671_s18 = sshll.u32 %s5749_s16, 4  ;;  %s5672_s18 = int_to_ptr.vmem [resolvable:$false] %s5671_s18 }
  0x26   : > { %s5673_s19 = scalar_lea.vmem %s5672_s18, 32768  ;;  %p5674_p13 = scmp.lt.s32.totalorder %s5861_s21, %s5672_s18 }
  0x27   : > { %p5669_p9 = pnand %p5667_p8, %p5653_p12  ;;  %p5675_p1 = scmp.lt.s32.totalorder %s5673_s19, %s5666_s14 }
  0x29   : > { %p5670_p11 = pneg %p5669_p9  ;;  %p5676_p2 = por %p5675_p1, %p5674_p13 }
  0x2b   : > { %p5677_p3 = pnand %p5676_p2, %p5670_p11 }
  0x2d   : > { %5680 = shalt.err (!%p5677_p3)
}
  0x2e   : > { %s5750_s20 = smov 2048   ;;  %s5751_s29 = smov 1024  }
  0x2f   : > { %s5752_s12 = smov 64   ;;  %p4709_p12 = scmp.ge.s32.totalorder %s5747_s28, 1 }
  0x30   : > { %5465 = dma.hbm_to_vmem [thread:$0]  (!%p5872_p10), %s5866_s3, 16384, %s5861_s21, %s5876_s9, %s5750_s20, %s5751_s29, %s5752_s12  }
  0x31   : > { %p256_p0 = scmp.lt.s32.totalorder %s5747_s28, 7 }
  0x33   : > { %p257_p4 = pnand %p4709_p12, %p256_p0 }
  0x35   : > { %260 = sbr.rel (%p257_p4) target bundleno = 1345 (0x541), region = 44 }
  0x3c   : > { %s262_s5 = sand.u32 1, %s5723_s22  }
  0x3d   : > { %s4710_s30 = sshll.u32 %s262_s5, 10  ;;  %s263_s10 = scalar_lea.sflag [#allocation4], %s262_s5 }
  0x3e   : > { %s5907_s13 = scalar_lea.vmem [#allocation3], %s4710_s30 }
  0x3f   : > { %5714 = dma.done.wait (%p5848_p7), %s263_s10, 16384  }
  0x40   : > { %5716 = vsyncadd (%p5848_p7), %s263_s10, 4294950912  ;;  %s4711_s15 = sshll.u32 %s5735_s25, 6  ;;  %p4715_p10 = scmp.ne.s32.totalorder %s5731_s24, 0 }
  0x41   : > { %p303_p5 = scmp.lt.s32.totalorder %s4711_s15, 191  ;;  %v5753_v0 = vmov (!%p4715_p10), 0.0  }
  0x42   : > { %318 = sbr.rel (%p4715_p10) target bundleno = 98 (0x62), region = 52  ;;  %319 = vst [vmem:[#allocation2] sm:$0xff] (!%p4715_p10), %v5753_v0  ;;  %320 = vst [vmem:[#allocation2 + $0x8] sm:$0xff] (!%p4715_p10), %v5753_v0 }
  0x43   : > { %s6983_s15 = smov (!%p303_p5, %s4711_s15), 191  ;;  %321 = vst [vmem:[#allocation2 + $0x10] sm:$0xff] (!%p4715_p10), %v5753_v0  ;;  %322 = vst [vmem:[#allocation2 + $0x18] sm:$0xff] (!%p4715_p10), %v5753_v0 }
  0x44   : > { %s4712_s3 = sshll.u32 %s6983_s15, 3  ;;  %s4714_s21 = sshll.u32 %s6983_s15, 2  ;;  %323 = vst [vmem:[#allocation2 + $0x20] sm:$0xff] (!%p4715_p10), %v5753_v0  ;;  %324 = vst [vmem:[#allocation2 + $0x28] sm:$0xff] (!%p4715_p10), %v5753_v0 }
  0x45   : > { %s5917_s14 = scalar_lea.vmem %s6909_s2, %s4712_s3  ;;  %s5922_s19 = scalar_lea.vmem %s6913_s6, %s4714_s21  ;;  %325 = vst [vmem:[#allocation2 + $0x30] sm:$0xff] (!%p4715_p10), %v5753_v0  ;;  %326 = vst [vmem:[#allocation2 + $0x38] sm:$0xff] (!%p4715_p10), %v5753_v0 }
  0x46   : > { %327 = vst [vmem:[#allocation2 + $0x40] sm:$0xff] (!%p4715_p10), %v5753_v0  ;;  %328 = vst [vmem:[#allocation2 + $0x48] sm:$0xff] (!%p4715_p10), %v5753_v0 }
  0x47   : > { %329 = vst [vmem:[#allocation2 + $0x50] sm:$0xff] (!%p4715_p10), %v5753_v0  ;;  %330 = vst [vmem:[#allocation2 + $0x58] sm:$0xff] (!%p4715_p10), %v5753_v0 }
  0x48   : > { %331 = vst [vmem:[#allocation2 + $0x60] sm:$0xff] (!%p4715_p10), %v5753_v0  ;;  %332 = vst [vmem:[#allocation2 + $0x68] sm:$0xff] (!%p4715_p10), %v5753_v0 }
  0x49   : > { %333 = vst [vmem:[#allocation2 + $0x70] sm:$0xff] %v5753_v0  ;;  %334 = vst [vmem:[#allocation2 + $0x78] sm:$0xff] %v5753_v0 }
  0x4a   : > { %335 = vst [vmem:[#allocation2 + $0x80] sm:$0xff] %v5753_v0  ;;  %336 = vst [vmem:[#allocation2 + $0x88] sm:$0xff] %v5753_v0 }
  0x4b   : > { %337 = vst [vmem:[#allocation2 + $0x90] sm:$0xff] %v5753_v0  ;;  %338 = vst [vmem:[#allocation2 + $0x98] sm:$0xff] %v5753_v0 }
  0x4c   : > { %339 = vst [vmem:[#allocation2 + $0xa0] sm:$0xff] %v5753_v0  ;;  %340 = vst [vmem:[#allocation2 + $0xa8] sm:$0xff] %v5753_v0 }
  0x4d   : > { %341 = vst [vmem:[#allocation2 + $0xb0] sm:$0xff] %v5753_v0  ;;  %342 = vst [vmem:[#allocation2 + $0xb8] sm:$0xff] %v5753_v0 }
  0x4e   : > { %343 = vst [vmem:[#allocation2 + $0xc0] sm:$0xff] %v5753_v0  ;;  %344 = vst [vmem:[#allocation2 + $0xc8] sm:$0xff] %v5753_v0 }
  0x4f   : > { %345 = vst [vmem:[#allocation2 + $0xd0] sm:$0xff] %v5753_v0  ;;  %346 = vst [vmem:[#allocation2 + $0xd8] sm:$0xff] %v5753_v0 }
  0x50   : > { %347 = vst [vmem:[#allocation2 + $0xe0] sm:$0xff] %v5753_v0  ;;  %348 = vst [vmem:[#allocation2 + $0xe8] sm:$0xff] %v5753_v0 }
  0x51   : > { %349 = vst [vmem:[#allocation2 + $0xf0] sm:$0xff] %v5753_v0  ;;  %350 = vst [vmem:[#allocation2 + $0xf8] sm:$0xff] %v5753_v0 }
  0x52   : > { %351 = vst [vmem:[#allocation2 + $0x100] sm:$0xff] %v5753_v0  ;;  %352 = vst [vmem:[#allocation2 + $0x108] sm:$0xff] %v5753_v0 }
  0x53   : > { %353 = vst [vmem:[#allocation2 + $0x110] sm:$0xff] %v5753_v0  ;;  %354 = vst [vmem:[#allocation2 + $0x118] sm:$0xff] %v5753_v0 }
  0x54   : > { %355 = vst [vmem:[#allocation2 + $0x120] sm:$0xff] %v5753_v0  ;;  %356 = vst [vmem:[#allocation2 + $0x128] sm:$0xff] %v5753_v0 }
  0x55   : > { %357 = vst [vmem:[#allocation2 + $0x130] sm:$0xff] %v5753_v0  ;;  %358 = vst [vmem:[#allocation2 + $0x138] sm:$0xff] %v5753_v0 }
  0x56   : > { %359 = vst [vmem:[#allocation2 + $0x140] sm:$0xff] %v5753_v0  ;;  %360 = vst [vmem:[#allocation2 + $0x148] sm:$0xff] %v5753_v0 }
  0x57   : > { %361 = vst [vmem:[#allocation2 + $0x150] sm:$0xff] %v5753_v0  ;;  %362 = vst [vmem:[#allocation2 + $0x158] sm:$0xff] %v5753_v0 }
  0x58   : > { %363 = vst [vmem:[#allocation2 + $0x160] sm:$0xff] %v5753_v0  ;;  %364 = vst [vmem:[#allocation2 + $0x168] sm:$0xff] %v5753_v0 }
  0x59   : > { %365 = vst [vmem:[#allocation2 + $0x170] sm:$0xff] %v5753_v0  ;;  %366 = vst [vmem:[#allocation2 + $0x178] sm:$0xff] %v5753_v0 }
  0x5a   : > { %367 = vst [vmem:[#allocation2 + $0x180] sm:$0xff] %v5753_v0  ;;  %368 = vst [vmem:[#allocation2 + $0x188] sm:$0xff] %v5753_v0 }
  0x5b   : > { %369 = vst [vmem:[#allocation2 + $0x190] sm:$0xff] %v5753_v0  ;;  %370 = vst [vmem:[#allocation2 + $0x198] sm:$0xff] %v5753_v0 }
  0x5c   : > { %371 = vst [vmem:[#allocation2 + $0x1a0] sm:$0xff] %v5753_v0  ;;  %372 = vst [vmem:[#allocation2 + $0x1a8] sm:$0xff] %v5753_v0 }
  0x5d   : > { %373 = vst [vmem:[#allocation2 + $0x1b0] sm:$0xff] %v5753_v0  ;;  %374 = vst [vmem:[#allocation2 + $0x1b8] sm:$0xff] %v5753_v0 }
  0x5e   : > { %375 = vst [vmem:[#allocation2 + $0x1c0] sm:$0xff] %v5753_v0  ;;  %376 = vst [vmem:[#allocation2 + $0x1c8] sm:$0xff] %v5753_v0 }
  0x5f   : > { %377 = vst [vmem:[#allocation2 + $0x1d0] sm:$0xff] %v5753_v0  ;;  %378 = vst [vmem:[#allocation2 + $0x1d8] sm:$0xff] %v5753_v0 }
  0x60   : > { %379 = vst [vmem:[#allocation2 + $0x1e0] sm:$0xff] %v5753_v0  ;;  %380 = vst [vmem:[#allocation2 + $0x1e8] sm:$0xff] %v5753_v0 }
  0x61   : > { %381 = vst [vmem:[#allocation2 + $0x1f0] sm:$0xff] %v5753_v0  ;;  %382 = vst [vmem:[#allocation2 + $0x1f8] sm:$0xff] %v5753_v0 }
  0x62 PF: > { %s4716_s11 = sshll.u32 %s5731_s24, 10  ;;  %v5991_v1 = vld [vmem:[%s5907_s13 + $0x8] sm:$0xff]  ;;  %v5994_v2 = vld [vmem:[%s5907_s13 + $0x18] sm:$0xff]  ;;  %v5754_v3 = vmov 0   ;;  %v516_v36 = vld [vmem:[%s5907_s13] sm:$0xff]  ;;  %p4782_p7 = scmp.ne.s32.totalorder %s5731_s24, 1 }
  0x63   : > { %1348 = vmatprep.subr.bf16.mxu0 %v5754_v3  ;;  %1637 = vmatprep.subr.bf16.mxu1 %v5754_v3  ;;  %s384_s20 = sshra.s32 %s4716_s11, 3  ;;  %v645_v4 = vunpack.c.l.s8.bf16 %v5991_v1  ;;  %v647_v5 = vunpack.c.l.s8.bf16 %v5994_v2  ;;  %v518_v38 = vld [vmem:[%s5907_s13 + $0x10] sm:$0xff]  ;;  %v644_v41 = vunpack.c.l.s8.bf16 %v516_v36  ;;  %v653_v43 = vunpack.c.h.s8.bf16 %v5991_v1  ;;  %v525_v47 = vld [vmem:[%s5907_s13 + $0x48] sm:$0xff]  ;;  %v527_v49 = vld [vmem:[%s5907_s13 + $0x58] sm:$0xff]  ;;  %s6966_s3 = sld [smem:[#allocation29_spill]] (!%p4782_p7) }
  0x64   : > { %s4717_s29 = sshll.u32 %s384_s20, 2  ;;  %v646_v42 = vunpack.c.l.s8.bf16 %v518_v38  ;;  %v655_v45 = vunpack.c.h.s8.bf16 %v5994_v2  ;;  %v652_v50 = vunpack.c.h.s8.bf16 %v516_v36  ;;  %v654_v51 = vunpack.c.h.s8.bf16 %v518_v38  ;;  %v524_v56 = vld [vmem:[%s5907_s13 + $0x40] sm:$0xff]  ;;  %v526_v57 = vld [vmem:[%s5907_s13 + $0x50] sm:$0xff]  ;;  %v533_v2 = vld [vmem:[%s5907_s13 + $0x88] sm:$0xff]  ;;  %s4783_s12 = sshll.u32 (!%p4782_p7), %s5735_s25, 9 }
  0x65   : > { %s6003_s30 = scalar_lea.vmem %s6908_s1, %s4717_s29  ;;  %1380 = vmatprep.mubr.bf16.mxu0 %v645_v4  ;;  %1669 = vmatprep.mubr.bf16.mxu1 %v647_v5  ;;  %v661_v52 = vunpack.c.l.s8.bf16 %v525_v47  ;;  %v663_v53 = vunpack.c.l.s8.bf16 %v527_v49  ;;  %v660_v60 = vunpack.c.l.s8.bf16 %v524_v56  ;;  %v662_v61 = vunpack.c.l.s8.bf16 %v526_v57  ;;  %v535_v5 = vld [vmem:[%s5907_s13 + $0x98] sm:$0xff]  ;;  %s6967_s16 = sld [smem:[#allocation30_spill]] (!%p4782_p7) }
  0x66   : > { %v5537_v6 = vld [vmem:[%s6003_s30] sm:$0xff]   ;;  %v5539_v8 = vld [vmem:[%s6003_s30 + $0x8] sm:$0xff]   ;;  %v5541_v10 = vld [vmem:[%s6003_s30 + $0x10] sm:$0xff]   ;;  %v669_v62 = vunpack.c.h.s8.bf16 %v525_v47  ;;  %v671_v63 = vunpack.c.h.s8.bf16 %v527_v49 }
  0x67   : > { %v5538_v7 = vld [vmem:[%s6003_s30 + $0x80] sm:$0xff]   ;;  %1349 = vmatpush1.bf16.msra.mxu0 %v5537_v6  ;;  %v5540_v9 = vld [vmem:[%s6003_s30 + $0x88] sm:$0xff]   ;;  %v5542_v11 = vld [vmem:[%s6003_s30 + $0x90] sm:$0xff]  }
  0x68   : > { %1638 = vmatpush1.bf16.msra.mxu1 %v5538_v7  ;;  %1350 = vmatprep.subr.bf16.mxu0 %v5754_v3  ;;  %v5543_v12 = vld [vmem:[%s6003_s30 + $0x18] sm:$0xff]   ;;  %v5545_v14 = vld [vmem:[%s6003_s30 + $0x20] sm:$0xff]   ;;  %v5547_v16 = vld [vmem:[%s6003_s30 + $0x28] sm:$0xff]   ;;  %v668_v7 = vunpack.c.h.s8.bf16 %v524_v56 }
  0x69   : > { %1639 = vmatprep.subr.bf16.mxu1 %v5754_v3  ;;  %v5544_v13 = vld [vmem:[%s6003_s30 + $0x98] sm:$0xff]   ;;  %v5546_v15 = vld [vmem:[%s6003_s30 + $0xa0] sm:$0xff]   ;;  %v5548_v17 = vld [vmem:[%s6003_s30 + $0xa8] sm:$0xff]  }
  0x6a   : > { %v5549_v18 = vld [vmem:[%s6003_s30 + $0x30] sm:$0xff]   ;;  %v5551_v20 = vld [vmem:[%s6003_s30 + $0x38] sm:$0xff]   ;;  %v5553_v22 = vld [vmem:[%s6003_s30 + $0x40] sm:$0xff]  }
  0x6b   : > { %1351 = vmatpush1.bf16.msra.mxu0 %v5539_v8  ;;  %v5550_v19 = vld [vmem:[%s6003_s30 + $0xb0] sm:$0xff]   ;;  %v5552_v21 = vld [vmem:[%s6003_s30 + $0xb8] sm:$0xff]   ;;  %v5554_v23 = vld [vmem:[%s6003_s30 + $0xc0] sm:$0xff]   ;;  %v670_v8 = vunpack.c.h.s8.bf16 %v526_v57 }
  0x6c   : > { %1640 = vmatpush1.bf16.msra.mxu1 %v5540_v9  ;;  %1352 = vmatprep.subr.bf16.mxu0 %v5754_v3  ;;  %v5555_v24 = vld [vmem:[%s6003_s30 + $0x48] sm:$0xff]   ;;  %v5557_v26 = vld [vmem:[%s6003_s30 + $0x50] sm:$0xff]   ;;  %v5559_v28 = vld [vmem:[%s6003_s30 + $0x58] sm:$0xff]   ;;  %v677_v9 = vunpack.c.l.s8.bf16 %v533_v2 }
  0x6d   : > { %1641 = vmatprep.subr.bf16.mxu1 %v5754_v3  ;;  %v5556_v25 = vld [vmem:[%s6003_s30 + $0xc8] sm:$0xff]   ;;  %v5558_v27 = vld [vmem:[%s6003_s30 + $0xd0] sm:$0xff]   ;;  %v5560_v29 = vld [vmem:[%s6003_s30 + $0xd8] sm:$0xff]  }
  0x6e   : > { %v5561_v30 = vld [vmem:[%s6003_s30 + $0x60] sm:$0xff]   ;;  %v5563_v32 = vld [vmem:[%s6003_s30 + $0x68] sm:$0xff]   ;;  %v5565_v34 = vld [vmem:[%s6003_s30 + $0x70] sm:$0xff]  }
  0x6f   : > { %1353 = vmatpush1.bf16.msra.mxu0 %v5541_v10  ;;  %v5562_v31 = vld [vmem:[%s6003_s30 + $0xe0] sm:$0xff]   ;;  %v5564_v33 = vld [vmem:[%s6003_s30 + $0xe8] sm:$0xff]   ;;  %v5566_v35 = vld [vmem:[%s6003_s30 + $0xf0] sm:$0xff]   ;;  %v679_v10 = vunpack.c.l.s8.bf16 %v535_v5 }
  0x70   : > { %1642 = vmatpush1.bf16.msra.mxu1 %v5542_v11  ;;  %1354 = vmatprep.subr.bf16.mxu0 %v5754_v3  ;;  %v5567_v37 = vld [vmem:[%s6003_s30 + $0x78] sm:$0xff]   ;;  %v5569_v40 = vld [vmem:[%s6003_s30 + $0x100] sm:$0xff]   ;;  %v5571_v46 = vld [vmem:[%s6003_s30 + $0x108] sm:$0xff]  }
  0x71   : > { %1643 = vmatprep.subr.bf16.mxu1 %v5754_v3  ;;  %v5568_v39 = vld [vmem:[%s6003_s30 + $0xf8] sm:$0xff]   ;;  %v5570_v44 = vld [vmem:[%s6003_s30 + $0x180] sm:$0xff]   ;;  %v5572_v48 = vld [vmem:[%s6003_s30 + $0x188] sm:$0xff]  }
  0x72   : > { %v5573_v54 = vld [vmem:[%s6003_s30 + $0x110] sm:$0xff]   ;;  %v5575_v58 = vld [vmem:[%s6003_s30 + $0x118] sm:$0xff]   ;;  %v5577_v0 = vld [vmem:[%s6003_s30 + $0x120] sm:$0xff]  }
  0x73   : > { %1355 = vmatpush1.bf16.msra.mxu0 %v5543_v12  ;;  %v5574_v55 = vld [vmem:[%s6003_s30 + $0x190] sm:$0xff]   ;;  %v5576_v59 = vld [vmem:[%s6003_s30 + $0x198] sm:$0xff]   ;;  %v5578_v1 = vld [vmem:[%s6003_s30 + $0x1a0] sm:$0xff]  }
  0x74   : > { %1644 = vmatpush1.bf16.msra.mxu1 %v5544_v13  ;;  %1356 = vmatprep.subr.bf16.mxu0 %v5754_v3  ;;  %v5579_v4 = vld [vmem:[%s6003_s30 + $0x128] sm:$0xff]   ;;  %v5581_v11 = vld [vmem:[%s6003_s30 + $0x130] sm:$0xff]  }
  0x75   : > { %1645 = vmatprep.subr.bf16.mxu1 %v5754_v3  ;;  %v5580_v6 = vld [vmem:[%s6003_s30 + $0x1a8] sm:$0xff]   ;;  %v5582_v12 = vld [vmem:[%s6003_s30 + $0x1b0] sm:$0xff]  }
  0x76   : > { %v532_v13 = vld [vmem:[%s5907_s13 + $0x80] sm:$0xff]  ;;  %v559_v56 = vld [vmem:[%s5907_s13 + $0x158] sm:$0xff] }
  0x77   : > { %1357 = vmatpush1.bf16.msra.mxu0 %v5545_v14  ;;  %v534_v14 = vld [vmem:[%s5907_s13 + $0x90] sm:$0xff]  ;;  %v548_v47 = vld [vmem:[%s5907_s13 + $0x100] sm:$0xff] }
  0x78   : > { %1646 = vmatpush1.bf16.msra.mxu1 %v5546_v15  ;;  %1358 = vmatprep.subr.bf16.mxu0 %v5754_v3  ;;  %v5583_v15 = vld [vmem:[%s6003_s30 + $0x138] sm:$0xff]   ;;  %v708_v49 = vunpack.c.l.s8.bf16 %v548_v47  ;;  %v716_v57 = vunpack.c.h.s8.bf16 %v548_v47 }
  0x79   : > { %1647 = vmatprep.subr.bf16.mxu1 %v5754_v3 }
  0x7b   : > { %1359 = vmatpush1.bf16.msra.mxu0 %v5547_v16  ;;  %v5584_v16 = vld [vmem:[%s6003_s30 + $0x1b8] sm:$0xff]  }
  0x7c   : > { %1648 = vmatpush1.bf16.msra.mxu1 %v5548_v17  ;;  %1360 = vmatprep.subr.bf16.mxu0 %v5754_v3  ;;  %v676_v17 = vunpack.c.l.s8.bf16 %v532_v13 }
  0x7d   : > { %1649 = vmatprep.subr.bf16.mxu1 %v5754_v3 }
  0x7f   : > { %1361 = vmatpush1.bf16.msra.mxu0 %v5549_v18  ;;  %v678_v18 = vunpack.c.l.s8.bf16 %v534_v14 }
  0x80   : > { %1650 = vmatpush1.bf16.msra.mxu1 %v5550_v19  ;;  %1362 = vmatprep.subr.bf16.mxu0 %v5754_v3  ;;  %v685_v19 = vunpack.c.h.s8.bf16 %v533_v2  ;;  %v735_v2 = vunpack.c.h.s8.bf16 %v559_v56 }
  0x81   : > { %1651 = vmatprep.subr.bf16.mxu1 %v5754_v3 }
  0x83   : > { %1363 = vmatpush1.bf16.msra.mxu0 %v5551_v20  ;;  %v687_v20 = vunpack.c.h.s8.bf16 %v535_v5  ;;  %v565_v5 = vld [vmem:[%s5907_s13 + $0x188] sm:$0xff] }
  0x84   : > { %1652 = vmatpush1.bf16.msra.mxu1 %v5552_v21  ;;  %1364 = vmatprep.subr.bf16.mxu0 %v5754_v3  ;;  %v5585_v21 = vld [vmem:[%s6003_s30 + $0x140] sm:$0xff]  }
  0x85   : > { %1653 = vmatprep.subr.bf16.mxu1 %v5754_v3 }
  0x87   : > { %1365 = vmatpush1.bf16.msra.mxu0 %v5553_v22  ;;  %v5586_v22 = vld [vmem:[%s6003_s30 + $0x1c0] sm:$0xff]  }
  0x88   : > { %1654 = vmatpush1.bf16.msra.mxu1 %v5554_v23  ;;  %1366 = vmatprep.subr.bf16.mxu0 %v5754_v3  ;;  %v541_v23 = vld [vmem:[%s5907_s13 + $0xc8] sm:$0xff] }
  0x89   : > { %1655 = vmatprep.subr.bf16.mxu1 %v5754_v3 }
  0x8b   : > { %1367 = vmatpush1.bf16.msra.mxu0 %v5555_v24  ;;  %v5587_v24 = vld [vmem:[%s6003_s30 + $0x148] sm:$0xff]  }
  0x8c   : > { %1656 = vmatpush1.bf16.msra.mxu1 %v5556_v25  ;;  %1368 = vmatprep.subr.bf16.mxu0 %v5754_v3  ;;  %v543_v25 = vld [vmem:[%s5907_s13 + $0xd8] sm:$0xff] }
  0x8d   : > { %1657 = vmatprep.subr.bf16.mxu1 %v5754_v3  ;;  %v703_v38 = vunpack.c.h.s8.bf16 %v543_v25 }
  0x8f   : > { %1369 = vmatpush1.bf16.msra.mxu0 %v5557_v26  ;;  %v5588_v26 = vld [vmem:[%s6003_s30 + $0x1c8] sm:$0xff]  }
  0x90   : > { %1658 = vmatpush1.bf16.msra.mxu1 %v5558_v27  ;;  %1370 = vmatprep.subr.bf16.mxu0 %v5754_v3  ;;  %v684_v27 = vunpack.c.h.s8.bf16 %v532_v13  ;;  %v566_v13 = vld [vmem:[%s5907_s13 + $0x190] sm:$0xff] }
  0x91   : > { %1659 = vmatprep.subr.bf16.mxu1 %v5754_v3 }
  0x93   : > { %1371 = vmatpush1.bf16.msra.mxu0 %v5559_v28  ;;  %v686_v28 = vunpack.c.h.s8.bf16 %v534_v14 }
  0x94   : > { %1660 = vmatpush1.bf16.msra.mxu1 %v5560_v29  ;;  %1372 = vmatprep.subr.bf16.mxu0 %v5754_v3  ;;  %v693_v29 = vunpack.c.l.s8.bf16 %v541_v23 }
  0x95   : > { %1661 = vmatprep.subr.bf16.mxu1 %v5754_v3 }
  0x97   : > { %1373 = vmatpush1.bf16.msra.mxu0 %v5561_v30  ;;  %v695_v30 = vunpack.c.l.s8.bf16 %v543_v25 }
  0x98   : > { %1662 = vmatpush1.bf16.msra.mxu1 %v5562_v31  ;;  %1374 = vmatprep.subr.bf16.mxu0 %v5754_v3  ;;  %v5589_v31 = vld [vmem:[%s6003_s30 + $0x150] sm:$0xff]  }
  0x99   : > { %1663 = vmatprep.subr.bf16.mxu1 %v5754_v3 }
  0x9b   : > { %1375 = vmatpush1.bf16.msra.mxu0 %v5563_v32  ;;  %v5590_v32 = vld [vmem:[%s6003_s30 + $0x1d0] sm:$0xff]  }
  0x9c   : > { %1664 = vmatpush1.bf16.msra.mxu1 %v5564_v33  ;;  %1376 = vmatprep.subr.bf16.mxu0 %v5754_v3  ;;  %v540_v33 = vld [vmem:[%s5907_s13 + $0xc0] sm:$0xff] }
  0x9d   : > { %1665 = vmatprep.subr.bf16.mxu1 %v5754_v3 }
  0x9f   : > { %1377 = vmatpush1.bf16.msra.mxu0 %v5565_v34  ;;  %v542_v34 = vld [vmem:[%s5907_s13 + $0xd0] sm:$0xff] }
  0xa0   : > { %1666 = vmatpush1.bf16.msra.mxu1 %v5566_v35  ;;  %1378 = vmatprep.subr.bf16.mxu0 %v5754_v3  ;;  %v692_v35 = vunpack.c.l.s8.bf16 %v540_v33  ;;  %v694_v36 = vunpack.c.l.s8.bf16 %v542_v34 }
  0xa1   : > { %1667 = vmatprep.subr.bf16.mxu1 %v5754_v3 }
  0xa3   : > { %1379 = vmatpush1.bf16.msra.mxu0 %v5567_v37  ;;  %v701_v37 = vunpack.c.h.s8.bf16 %v541_v23 }
  0xa4   : > { %1668 = vmatpush1.bf16.msra.mxu1 %v5568_v39  ;;  %1926 = vmatprep.subr.bf16.mxu0 %v5754_v3  ;;  %v5591_v39 = vld [vmem:[%s6003_s30 + $0x158] sm:$0xff]  }
  0xa5   : > { %2215 = vmatprep.subr.bf16.mxu1 %v5754_v3 }
  0xa6   : > { %1381 = vmatmul.mubr.bf16.vlgmr.msra.gmra.mrb[0].mxu0 %v644_v41  ;;  %v549_v41 = vld [vmem:[%s5907_s13 + $0x108] sm:$0xff] }
  0xa7   : > { %1670 = vmatmul.mubr.bf16.vlgmr.msra.gmra.mrb[0].mxu1 %v646_v42  ;;  %1927 = vmatpush1.bf16.msra.mxu0 %v5569_v40  ;;  %v5592_v40 = vld [vmem:[%s6003_s30 + $0x1d8] sm:$0xff]   ;;  %v551_v42 = vld [vmem:[%s5907_s13 + $0x118] sm:$0xff] }
  0xa8   : > { %2216 = vmatpush1.bf16.msra.mxu1 %v5570_v44  ;;  %1388 = vmatprep.mubr.bf16.mxu0 %v653_v43  ;;  %v700_v43 = vunpack.c.h.s8.bf16 %v540_v33  ;;  %v702_v44 = vunpack.c.h.s8.bf16 %v542_v34  ;;  %v581_v33 = vld [vmem:[%s5907_s13 + $0x208] sm:$0xff] }
  0xa9   : > { %1677 = vmatprep.mubr.bf16.mxu1 %v655_v45  ;;  %1928 = vmatprep.subr.bf16.mxu0 %v5754_v3  ;;  %v709_v45 = vunpack.c.l.s8.bf16 %v549_v41 }
  0xaa   : > { %2217 = vmatprep.subr.bf16.mxu1 %v5754_v3 }
  0xab   : > { %1929 = vmatpush1.bf16.msra.mxu0 %v5571_v46  ;;  %v711_v46 = vunpack.c.l.s8.bf16 %v551_v42 }
  0xac   : > { %2218 = vmatpush1.bf16.msra.mxu1 %v5572_v48  ;;  %1930 = vmatprep.subr.bf16.mxu0 %v5754_v3  ;;  %v550_v48 = vld [vmem:[%s5907_s13 + $0x110] sm:$0xff] }
  0xad   : > { %2219 = vmatprep.subr.bf16.mxu1 %v5754_v3 }
  0xae   : > { %1389 = vmatmul.mubr.bf16.gmra.mrb[4].mxu0 %v652_v50  ;;  %v710_v50 = vunpack.c.l.s8.bf16 %v550_v48 }
  0xaf   : > { %1678 = vmatmul.mubr.bf16.gmra.mrb[4].mxu1 %v654_v51  ;;  %1396 = vmatprep.mubr.bf16.mxu0 %v661_v52  ;;  %v717_v51 = vunpack.c.h.s8.bf16 %v549_v41  ;;  %v719_v52 = vunpack.c.h.s8.bf16 %v551_v42 }
  0xb0   : > { %1685 = vmatprep.mubr.bf16.mxu1 %v663_v53  ;;  %1931 = vmatpush1.bf16.msra.mxu0 %v5573_v54  ;;  %v5593_v53 = vld [vmem:[%s6003_s30 + $0x160] sm:$0xff]  }
  0xb1   : > { %2220 = vmatpush1.bf16.msra.mxu1 %v5574_v55  ;;  %1932 = vmatprep.subr.bf16.mxu0 %v5754_v3  ;;  %v5594_v54 = vld [vmem:[%s6003_s30 + $0x1e0] sm:$0xff]   ;;  %v557_v55 = vld [vmem:[%s5907_s13 + $0x148] sm:$0xff] }
  0xb2   : > { %2221 = vmatprep.subr.bf16.mxu1 %v5754_v3 }
  0xb4   : > { %1933 = vmatpush1.bf16.msra.mxu0 %v5575_v58  ;;  %v718_v58 = vunpack.c.h.s8.bf16 %v550_v48 }
  0xb5   : > { %2222 = vmatpush1.bf16.msra.mxu1 %v5576_v59  ;;  %1934 = vmatprep.subr.bf16.mxu0 %v5754_v3  ;;  %v725_v59 = vunpack.c.l.s8.bf16 %v557_v55 }
  0xb6   : > { %1397 = vmatmul.mubr.bf16.gmra.mrb[8].mxu0 %v660_v60  ;;  %2223 = vmatprep.subr.bf16.mxu1 %v5754_v3  ;;  %v727_v60 = vunpack.c.l.s8.bf16 %v559_v56 }
  0xb7   : > { %1686 = vmatmul.mubr.bf16.gmra.mrb[8].mxu1 %v662_v61  ;;  %1404 = vmatprep.mubr.bf16.mxu0 %v669_v62  ;;  %v556_v61 = vld [vmem:[%s5907_s13 + $0x140] sm:$0xff]  ;;  %v558_v62 = vld [vmem:[%s5907_s13 + $0x150] sm:$0xff] }
  0xb8   : > { %1693 = vmatprep.mubr.bf16.mxu1 %v671_v63  ;;  %1935 = vmatpush1.bf16.msra.mxu0 %v5577_v0  ;;  %v724_v63 = vunpack.c.l.s8.bf16 %v556_v61  ;;  %v726_v0 = vunpack.c.l.s8.bf16 %v558_v62 }
  0xb9   : > { %2224 = vmatpush1.bf16.msra.mxu1 %v5578_v1  ;;  %1936 = vmatprep.subr.bf16.mxu0 %v5754_v3  ;;  %v733_v1 = vunpack.c.h.s8.bf16 %v557_v55 }
  0xba   : > { %2225 = vmatprep.subr.bf16.mxu1 %v5754_v3 }
  0xbc   : > { %1937 = vmatpush1.bf16.msra.mxu0 %v5579_v4  ;;  %v5595_v4 = vld [vmem:[%s6003_s30 + $0x168] sm:$0xff]  }
  0xbd   : > { %2226 = vmatpush1.bf16.msra.mxu1 %v5580_v6  ;;  %1938 = vmatprep.subr.bf16.mxu0 %v5754_v3  ;;  %v567_v6 = vld [vmem:[%s5907_s13 + $0x198] sm:$0xff] }
  0xbe   : > { %1405 = vmatmul.mubr.bf16.gmra.mrb[12].mxu0 %v668_v7  ;;  %2227 = vmatprep.subr.bf16.mxu1 %v5754_v3  ;;  %v732_v7 = vunpack.c.h.s8.bf16 %v556_v61 }
  0xbf   : > { %1694 = vmatmul.mubr.bf16.gmra.mrb[12].mxu1 %v670_v8  ;;  %1412 = vmatprep.mubr.bf16.mxu0 %v677_v9  ;;  %v734_v8 = vunpack.c.h.s8.bf16 %v558_v62  ;;  %v741_v9 = vunpack.c.l.s8.bf16 %v565_v5 }
  0xc0   : > { %1701 = vmatprep.mubr.bf16.mxu1 %v679_v10  ;;  %1939 = vmatpush1.bf16.msra.mxu0 %v5581_v11  ;;  %v5596_v10 = vld [vmem:[%s6003_s30 + $0x1e8] sm:$0xff]   ;;  %v743_v11 = vunpack.c.l.s8.bf16 %v567_v6 }
  0xc1   : > { %2228 = vmatpush1.bf16.msra.mxu1 %v5582_v12  ;;  %1940 = vmatprep.subr.bf16.mxu0 %v5754_v3  ;;  %v564_v12 = vld [vmem:[%s5907_s13 + $0x180] sm:$0xff] }
  0xc2   : > { %2229 = vmatprep.subr.bf16.mxu1 %v5754_v3  ;;  %v740_v14 = vunpack.c.l.s8.bf16 %v564_v12 }
  0xc4   : > { %1941 = vmatpush1.bf16.msra.mxu0 %v5583_v15  ;;  %v742_v15 = vunpack.c.l.s8.bf16 %v566_v13 }
  0xc5   : > { %2230 = vmatpush1.bf16.msra.mxu1 %v5584_v16  ;;  %1942 = vmatprep.subr.bf16.mxu0 %v5754_v3  ;;  %v749_v16 = vunpack.c.h.s8.bf16 %v565_v5 }
  0xc6   : > { %1413 = vmatmul.mubr.bf16.gmra.mrb[16].mxu0 %v676_v17  ;;  %2231 = vmatprep.subr.bf16.mxu1 %v5754_v3  ;;  %v751_v17 = vunpack.c.h.s8.bf16 %v567_v6  ;;  %v605_v6 = vld [vmem:[%s5907_s13 + $0x2c8] sm:$0xff] }
  0xc7   : > { %1702 = vmatmul.mubr.bf16.gmra.mrb[16].mxu1 %v678_v18  ;;  %1420 = vmatprep.mubr.bf16.mxu0 %v685_v19  ;;  %v5597_v18 = vld [vmem:[%s6003_s30 + $0x170] sm:$0xff]   ;;  %v573_v19 = vld [vmem:[%s5907_s13 + $0x1c8] sm:$0xff] }
  0xc8   : > { %1709 = vmatprep.mubr.bf16.mxu1 %v687_v20  ;;  %1943 = vmatpush1.bf16.msra.mxu0 %v5585_v21  ;;  %v575_v20 = vld [vmem:[%s5907_s13 + $0x1d8] sm:$0xff]  ;;  %v748_v21 = vunpack.c.h.s8.bf16 %v564_v12  ;;  %v757_v23 = vunpack.c.l.s8.bf16 %v573_v19  ;;  %v604_v12 = vld [vmem:[%s5907_s13 + $0x2c0] sm:$0xff] }
  0xc9   : > { %2232 = vmatpush1.bf16.msra.mxu1 %v5586_v22  ;;  %1944 = vmatprep.subr.bf16.mxu0 %v5754_v3  ;;  %v750_v22 = vunpack.c.h.s8.bf16 %v566_v13  ;;  %v759_v25 = vunpack.c.l.s8.bf16 %v575_v20  ;;  %v606_v13 = vld [vmem:[%s5907_s13 + $0x2d0] sm:$0xff] }
  0xca   : > { %2233 = vmatprep.subr.bf16.mxu1 %v5754_v3 }
  0xcc   : > { %1945 = vmatpush1.bf16.msra.mxu0 %v5587_v24  ;;  %v5598_v24 = vld [vmem:[%s6003_s30 + $0x1f0] sm:$0xff]  }
  0xcd   : > { %2234 = vmatpush1.bf16.msra.mxu1 %v5588_v26  ;;  %1946 = vmatprep.subr.bf16.mxu0 %v5754_v3  ;;  %v572_v26 = vld [vmem:[%s5907_s13 + $0x1c0] sm:$0xff] }
  0xce   : > { %1421 = vmatmul.mubr.bf16.gmra.mrb[20].mxu0 %v684_v27  ;;  %2235 = vmatprep.subr.bf16.mxu1 %v5754_v3  ;;  %v574_v27 = vld [vmem:[%s5907_s13 + $0x1d0] sm:$0xff]  ;;  %v764_v34 = vunpack.c.h.s8.bf16 %v572_v26 }
  0xcf   : > { %1710 = vmatmul.mubr.bf16.gmra.mrb[20].mxu1 %v686_v28  ;;  %1428 = vmatprep.mubr.bf16.mxu0 %v693_v29  ;;  %v756_v28 = vunpack.c.l.s8.bf16 %v572_v26  ;;  %v758_v29 = vunpack.c.l.s8.bf16 %v574_v27 }
  0xd0   : > { %1717 = vmatprep.mubr.bf16.mxu1 %v695_v30  ;;  %1947 = vmatpush1.bf16.msra.mxu0 %v5589_v31  ;;  %v765_v30 = vunpack.c.h.s8.bf16 %v573_v19  ;;  %v767_v31 = vunpack.c.h.s8.bf16 %v575_v20  ;;  %v615_v19 = vld [vmem:[%s5907_s13 + $0x318] sm:$0xff]  ;;  %v828_v20 = vunpack.c.h.s8.bf16 %v604_v12 }
  0xd1   : > { %2236 = vmatpush1.bf16.msra.mxu1 %v5590_v32  ;;  %1948 = vmatprep.subr.bf16.mxu0 %v5754_v3  ;;  %v5599_v32 = vld [vmem:[%s6003_s30 + $0x178] sm:$0xff]  }
  0xd2   : > { %2237 = vmatprep.subr.bf16.mxu1 %v5754_v3 }
  0xd4   : > { %1949 = vmatpush1.bf16.msra.mxu0 %v5591_v39  ;;  %v580_v39 = vld [vmem:[%s5907_s13 + $0x200] sm:$0xff] }
  0xd5   : > { %2238 = vmatpush1.bf16.msra.mxu1 %v5592_v40  ;;  %1950 = vmatprep.subr.bf16.mxu0 %v5754_v3  ;;  %v582_v40 = vld [vmem:[%s5907_s13 + $0x210] sm:$0xff]  ;;  %v772_v41 = vunpack.c.l.s8.bf16 %v580_v39  ;;  %v780_v47 = vunpack.c.h.s8.bf16 %v580_v39 }
  0xd6   : > { %1429 = vmatmul.mubr.bf16.gmra.mrb[24].mxu0 %v692_v35  ;;  %2239 = vmatprep.subr.bf16.mxu1 %v5754_v3  ;;  %v766_v35 = vunpack.c.h.s8.bf16 %v574_v27  ;;  %v774_v42 = vunpack.c.l.s8.bf16 %v582_v40  ;;  %v782_v48 = vunpack.c.h.s8.bf16 %v582_v40 }
  0xd7   : > { %1718 = vmatmul.mubr.bf16.gmra.mrb[24].mxu1 %v694_v36  ;;  %1436 = vmatprep.mubr.bf16.mxu0 %v701_v37  ;;  %v773_v36 = vunpack.c.l.s8.bf16 %v581_v33  ;;  %v5600_v37 = vld [vmem:[%s6003_s30 + $0x1f8] sm:$0xff]  }
  0xd8   : > { %1725 = vmatprep.mubr.bf16.mxu1 %v703_v38  ;;  %1951 = vmatpush1.bf16.msra.mxu0 %v5593_v53 }
  0xd9   : > { %2240 = vmatpush1.bf16.msra.mxu1 %v5594_v54  ;;  %1952 = vmatprep.subr.bf16.mxu0 %v5754_v3 }
  0xda   : > { %2241 = vmatprep.subr.bf16.mxu1 %v5754_v3 }
  0xdc   : > { %1953 = vmatpush1.bf16.msra.mxu0 %v5595_v4 }
  0xdd   : > { %1954 = vmatprep.subr.bf16.mxu0 %v5754_v3  ;;  %2242 = vmatpush1.bf16.msra.mxu1 %v5596_v10  ;;  %v821_v10 = vunpack.c.l.s8.bf16 %v605_v6 }
  0xde   : > { %1437 = vmatmul.mubr.bf16.gmra.mrb[28].mxu0 %v700_v43  ;;  %2243 = vmatprep.subr.bf16.mxu1 %v5754_v3  ;;  %v781_v43 = vunpack.c.h.s8.bf16 %v581_v33 }
  0xdf   : > { %1726 = vmatmul.mubr.bf16.gmra.mrb[28].mxu1 %v702_v44  ;;  %1444 = vmatprep.mubr.bf16.mxu0 %v709_v45  ;;  %v589_v45 = vld [vmem:[%s5907_s13 + $0x248] sm:$0xff] }
  0xe0   : > { %1733 = vmatprep.mubr.bf16.mxu1 %v711_v46  ;;  %1955 = vmatpush1.bf16.msra.mxu0 %v5597_v18  ;;  %v591_v46 = vld [vmem:[%s5907_s13 + $0x258] sm:$0xff]  ;;  %v797_v55 = vunpack.c.h.s8.bf16 %v589_v45  ;;  %v613_v18 = vld [vmem:[%s5907_s13 + $0x308] sm:$0xff] }
  0xe1   : > { %1956 = vmatprep.subr.bf16.mxu0 %v5754_v3  ;;  %2244 = vmatpush1.bf16.msra.mxu1 %v5598_v24  ;;  %v799_v56 = vunpack.c.h.s8.bf16 %v591_v46  ;;  %v612_v24 = vld [vmem:[%s5907_s13 + $0x300] sm:$0xff] }
  0xe2   : > { %2245 = vmatprep.subr.bf16.mxu1 %v5754_v3  ;;  %v583_v3 = vld [vmem:[%s5907_s13 + $0x218] sm:$0xff]  ;;  %v836_v26 = vunpack.c.l.s8.bf16 %v612_v24 }
  0xe3   : > { %v775_v38 = vunpack.c.l.s8.bf16 %v583_v3  ;;  %v783_v44 = vunpack.c.h.s8.bf16 %v583_v3 }
  0xe4   : > { %1957 = vmatpush1.bf16.msra.mxu0 %v5599_v32  ;;  %v844_v32 = vunpack.c.h.s8.bf16 %v612_v24 }
  0xe5   : > { %2246 = vmatpush1.bf16.msra.mxu1 %v5600_v37 }
  0xe6   : > { %1445 = vmatmul.mubr.bf16.gmra.mrb[32].mxu0 %v708_v49  ;;  %v789_v49 = vunpack.c.l.s8.bf16 %v589_v45 }
  0xe7   : > { %1734 = vmatmul.mubr.bf16.gmra.mrb[32].mxu1 %v710_v50  ;;  %1452 = vmatprep.mubr.bf16.mxu0 %v717_v51  ;;  %v791_v50 = vunpack.c.l.s8.bf16 %v591_v46  ;;  %v588_v51 = vld [vmem:[%s5907_s13 + $0x240] sm:$0xff] }
  0xe8   : > { %1741 = vmatprep.mubr.bf16.mxu1 %v719_v52  ;;  %v590_v52 = vld [vmem:[%s5907_s13 + $0x250] sm:$0xff]  ;;  %v788_v53 = vunpack.c.l.s8.bf16 %v588_v51 }
  0xe9   : > { %v790_v54 = vunpack.c.l.s8.bf16 %v590_v52 }
  0xee   : > { %1453 = vmatmul.mubr.bf16.gmra.mrb[36].mxu0 %v716_v57  ;;  %v597_v57 = vld [vmem:[%s5907_s13 + $0x288] sm:$0xff] }
  0xef   : > { %1742 = vmatmul.mubr.bf16.gmra.mrb[36].mxu1 %v718_v58  ;;  %1460 = vmatprep.mubr.bf16.mxu0 %v725_v59  ;;  %v599_v58 = vld [vmem:[%s5907_s13 + $0x298] sm:$0xff]  ;;  %v796_v59 = vunpack.c.h.s8.bf16 %v588_v51  ;;  %v805_v61 = vunpack.c.l.s8.bf16 %v597_v57  ;;  %v813_v4 = vunpack.c.h.s8.bf16 %v597_v57  ;;  %v628_v57 = vld [vmem:[%s5907_s13 + $0x380] sm:$0xff] }
  0xf0   : > { %1749 = vmatprep.mubr.bf16.mxu1 %v727_v60  ;;  %v798_v60 = vunpack.c.h.s8.bf16 %v590_v52  ;;  %v807_v62 = vunpack.c.l.s8.bf16 %v599_v58  ;;  %v815_v5 = vunpack.c.h.s8.bf16 %v599_v58  ;;  %v630_v58 = vld [vmem:[%s5907_s13 + $0x390] sm:$0xff] }
  0xf6   : > { %1461 = vmatmul.mubr.bf16.gmra.mrb[40].mxu0 %v724_v63  ;;  %v596_v63 = vld [vmem:[%s5907_s13 + $0x280] sm:$0xff] }
  0xf7   : > { %1750 = vmatmul.mubr.bf16.gmra.mrb[40].mxu1 %v726_v0  ;;  %1468 = vmatprep.mubr.bf16.mxu0 %v733_v1  ;;  %v598_v0 = vld [vmem:[%s5907_s13 + $0x290] sm:$0xff]  ;;  %v804_v1 = vunpack.c.l.s8.bf16 %v596_v63 }
  0xf8   : > { %1757 = vmatprep.mubr.bf16.mxu1 %v735_v2  ;;  %v806_v2 = vunpack.c.l.s8.bf16 %v598_v0 }
  0xfe   : > { %1469 = vmatmul.mubr.bf16.gmra.mrb[44].mxu0 %v732_v7  ;;  %v607_v7 = vld [vmem:[%s5907_s13 + $0x2d8] sm:$0xff] }
  0xff   : > { %1758 = vmatmul.mubr.bf16.gmra.mrb[44].mxu1 %v734_v8  ;;  %1476 = vmatprep.mubr.bf16.mxu0 %v741_v9  ;;  %v812_v8 = vunpack.c.h.s8.bf16 %v596_v63  ;;  %v814_v9 = vunpack.c.h.s8.bf16 %v598_v0 }
 0x100   : > { %1765 = vmatprep.mubr.bf16.mxu1 %v743_v11  ;;  %v823_v11 = vunpack.c.l.s8.bf16 %v607_v7 }
 0x106   : > { %1477 = vmatmul.mubr.bf16.gmra.mrb[48].mxu0 %v740_v14  ;;  %v820_v14 = vunpack.c.l.s8.bf16 %v604_v12  ;;  %v639_v12 = vld [vmem:[%s5907_s13 + $0x3d8] sm:$0xff] }
 0x107   : > { %1766 = vmatmul.mubr.bf16.gmra.mrb[48].mxu1 %v742_v15  ;;  %1484 = vmatprep.mubr.bf16.mxu0 %v749_v16  ;;  %v822_v15 = vunpack.c.l.s8.bf16 %v606_v13  ;;  %v829_v16 = vunpack.c.h.s8.bf16 %v605_v6 }
 0x108   : > { %1773 = vmatprep.mubr.bf16.mxu1 %v751_v17  ;;  %v831_v17 = vunpack.c.h.s8.bf16 %v607_v7 }
 0x10e   : > { %1485 = vmatmul.mubr.bf16.gmra.mrb[52].mxu0 %v748_v21  ;;  %v830_v21 = vunpack.c.h.s8.bf16 %v606_v13 }
 0x10f   : > { %1774 = vmatmul.mubr.bf16.gmra.mrb[52].mxu1 %v750_v22  ;;  %1492 = vmatprep.mubr.bf16.mxu0 %v757_v23  ;;  %v837_v22 = vunpack.c.l.s8.bf16 %v613_v18  ;;  %v839_v23 = vunpack.c.l.s8.bf16 %v615_v19 }
 0x110   : > { %1781 = vmatprep.mubr.bf16.mxu1 %v759_v25  ;;  %v614_v25 = vld [vmem:[%s5907_s13 + $0x310] sm:$0xff] }
 0x111   : > { %v838_v27 = vunpack.c.l.s8.bf16 %v614_v25  ;;  %v846_v33 = vunpack.c.h.s8.bf16 %v614_v25 }
 0x116   : > { %1493 = vmatmul.mubr.bf16.gmra.mrb[56].mxu0 %v756_v28  ;;  %v845_v28 = vunpack.c.h.s8.bf16 %v613_v18 }
 0x117   : > { %1782 = vmatmul.mubr.bf16.gmra.mrb[56].mxu1 %v758_v29  ;;  %1500 = vmatprep.mubr.bf16.mxu0 %v765_v30  ;;  %v847_v29 = vunpack.c.h.s8.bf16 %v615_v19  ;;  %v621_v30 = vld [vmem:[%s5907_s13 + $0x348] sm:$0xff]  ;;  %v878_v19 = vunpack.c.h.s8.bf16 %v630_v58 }
 0x118   : > { %1789 = vmatprep.mubr.bf16.mxu1 %v767_v31  ;;  %v623_v31 = vld [vmem:[%s5907_s13 + $0x358] sm:$0xff]  ;;  %v853_v3 = vunpack.c.l.s8.bf16 %v621_v30  ;;  %v861_v39 = vunpack.c.h.s8.bf16 %v621_v30 }
 0x119   : > { %v863_v40 = vunpack.c.h.s8.bf16 %v623_v31 }
 0x11e   : > { %1501 = vmatmul.mubr.bf16.gmra.mrb[60].mxu0 %v764_v34  ;;  %v855_v34 = vunpack.c.l.s8.bf16 %v623_v31 }
 0x11f   : > { %1790 = vmatmul.mubr.bf16.gmra.mrb[60].mxu1 %v766_v35  ;;  %1508 = vmatprep.mubr.bf16.mxu0 %v773_v36  ;;  %v620_v35 = vld [vmem:[%s5907_s13 + $0x340] sm:$0xff]  ;;  %v622_v36 = vld [vmem:[%s5907_s13 + $0x350] sm:$0xff] }
 0x120   : > { %1797 = vmatprep.mubr.bf16.mxu1 %v775_v38  ;;  %v852_v37 = vunpack.c.l.s8.bf16 %v620_v35  ;;  %v854_v38 = vunpack.c.l.s8.bf16 %v622_v36  ;;  %v860_v46 = vunpack.c.h.s8.bf16 %v620_v35 }
 0x126   : > { %1509 = vmatmul.mubr.bf16.gmra.mrb[64].mxu0 %v772_v41  ;;  %v629_v41 = vld [vmem:[%s5907_s13 + $0x388] sm:$0xff] }
 0x127   : > { %1798 = vmatmul.mubr.bf16.gmra.mrb[64].mxu1 %v774_v42  ;;  %1516 = vmatprep.mubr.bf16.mxu0 %v781_v43  ;;  %v631_v43 = vld [vmem:[%s5907_s13 + $0x398] sm:$0xff]  ;;  %v869_v51 = vunpack.c.l.s8.bf16 %v629_v41 }
 0x128   : > { %1805 = vmatprep.mubr.bf16.mxu1 %v783_v44  ;;  %v879_v7 = vunpack.c.h.s8.bf16 %v631_v43 }
 0x12e   : > { %1517 = vmatmul.mubr.bf16.gmra.mrb[68].mxu0 %v780_v47 }
 0x12f   : > { %1806 = vmatmul.mubr.bf16.gmra.mrb[68].mxu1 %v782_v48  ;;  %1524 = vmatprep.mubr.bf16.mxu0 %v789_v49 }
 0x130   : > { %1813 = vmatprep.mubr.bf16.mxu1 %v791_v50  ;;  %v862_v50 = vunpack.c.h.s8.bf16 %v622_v36 }
 0x136   : > { %1525 = vmatmul.mubr.bf16.gmra.mrb[72].mxu0 %v788_v53 }
 0x137   : > { %1814 = vmatmul.mubr.bf16.gmra.mrb[72].mxu1 %v790_v54  ;;  %1532 = vmatprep.mubr.bf16.mxu0 %v797_v55  ;;  %v871_v54 = vunpack.c.l.s8.bf16 %v631_v43  ;;  %v523_v43 = vld [vmem:[%s5907_s13 + $0x38] sm:$0xff] }
 0x138   : > { %1821 = vmatprep.mubr.bf16.mxu1 %v799_v56 }
 0x13e   : > { %1533 = vmatmul.mubr.bf16.gmra.mrb[76].mxu0 %v796_v59 }
 0x13f   : > { %1822 = vmatmul.mubr.bf16.gmra.mrb[76].mxu1 %v798_v60  ;;  %1540 = vmatprep.mubr.bf16.mxu0 %v805_v61 }
 0x140   : > { %1829 = vmatprep.mubr.bf16.mxu1 %v807_v62  ;;  %v868_v62 = vunpack.c.l.s8.bf16 %v628_v57 }
 0x146   : > { %1541 = vmatmul.mubr.bf16.gmra.mrb[80].mxu0 %v804_v1 }
 0x147   : > { %1830 = vmatmul.mubr.bf16.gmra.mrb[80].mxu1 %v806_v2  ;;  %1548 = vmatprep.mubr.bf16.mxu0 %v813_v4  ;;  %v870_v2 = vunpack.c.l.s8.bf16 %v630_v58  ;;  %v877_v4 = vunpack.c.h.s8.bf16 %v629_v41  ;;  %v521_v41 = vld [vmem:[%s5907_s13 + $0x28] sm:$0xff] }
 0x148   : > { %1837 = vmatprep.mubr.bf16.mxu1 %v815_v5 }
 0x14e   : > { %1549 = vmatmul.mubr.bf16.gmra.mrb[84].mxu0 %v812_v8 }
 0x14f   : > { %1838 = vmatmul.mubr.bf16.gmra.mrb[84].mxu1 %v814_v9  ;;  %1556 = vmatprep.mubr.bf16.mxu0 %v821_v10  ;;  %v637_v10 = vld [vmem:[%s5907_s13 + $0x3c8] sm:$0xff] }
 0x150   : > { %1845 = vmatprep.mubr.bf16.mxu1 %v823_v11  ;;  %v893_v35 = vunpack.c.h.s8.bf16 %v637_v10 }
 0x156   : > { %1557 = vmatmul.mubr.bf16.gmra.mrb[88].mxu0 %v820_v14 }
 0x157   : > { %1846 = vmatmul.mubr.bf16.gmra.mrb[88].mxu1 %v822_v15  ;;  %1564 = vmatprep.mubr.bf16.mxu0 %v829_v16  ;;  %v876_v15 = vunpack.c.h.s8.bf16 %v628_v57 }
 0x158   : > { %1853 = vmatprep.mubr.bf16.mxu1 %v831_v17 }
 0x15e   : > { %1565 = vmatmul.mubr.bf16.gmra.mrb[92].mxu0 %v828_v20  ;;  %v885_v20 = vunpack.c.l.s8.bf16 %v637_v10 }
 0x15f   : > { %1854 = vmatmul.mubr.bf16.gmra.mrb[92].mxu1 %v830_v21  ;;  %1572 = vmatprep.mubr.bf16.mxu0 %v837_v22 }
 0x160   : > { %1861 = vmatprep.mubr.bf16.mxu1 %v839_v23  ;;  %v887_v23 = vunpack.c.l.s8.bf16 %v639_v12 }
 0x166   : > { %1573 = vmatmul.mubr.bf16.gmra.mrb[96].mxu0 %v836_v26  ;;  %v636_v26 = vld [vmem:[%s5907_s13 + $0x3c0] sm:$0xff] }
 0x167   : > { %1862 = vmatmul.mubr.bf16.gmra.mrb[96].mxu1 %v838_v27  ;;  %1580 = vmatprep.mubr.bf16.mxu0 %v845_v28  ;;  %v638_v27 = vld [vmem:[%s5907_s13 + $0x3d0] sm:$0xff]  ;;  %v884_v31 = vunpack.c.l.s8.bf16 %v636_v26 }
 0x168   : > { %1869 = vmatprep.mubr.bf16.mxu1 %v847_v29 }
 0x16e   : > { %1581 = vmatmul.mubr.bf16.gmra.mrb[100].mxu0 %v844_v32 }
 0x16f   : > { %1870 = vmatmul.mubr.bf16.gmra.mrb[100].mxu1 %v846_v33  ;;  %1588 = vmatprep.mubr.bf16.mxu0 %v853_v3 }
 0x170   : > { %1877 = vmatprep.mubr.bf16.mxu1 %v855_v34  ;;  %v886_v34 = vunpack.c.l.s8.bf16 %v638_v27 }
 0x176   : > { %1589 = vmatmul.mubr.bf16.gmra.mrb[104].mxu0 %v852_v37 }
 0x177   : > { %1878 = vmatmul.mubr.bf16.gmra.mrb[104].mxu1 %v854_v38  ;;  %1596 = vmatprep.mubr.bf16.mxu0 %v861_v39  ;;  %v895_v38 = vunpack.c.h.s8.bf16 %v639_v12 }
 0x178   : > { %1885 = vmatprep.mubr.bf16.mxu1 %v863_v40 }
 0x179   : > { %v1382_v42 = vpop.f32.mrb[0].mxu0 }
 0x17a   : > { %v1671_v44 = vpop.f32.mrb[0].mxu1  ;;  %v1384_v45 = vpop.f32.mrb[1].mxu0 }
 0x17b   : > { %v6189_v47 = vadd.f32 %v1671_v44, %v1382_v42  ;;  %v1673_v48 = vpop.f32.mrb[1].mxu1  ;;  %v1385_v49 = vpop.f32.mrb[2].mxu0 }
 0x17c   : > { %v1674_v52 = vpop.f32.mrb[2].mxu1  ;;  %v1387_v53 = vpop.f32.mrb[3].mxu0 }
 0x17d   : > { %v6191_v55 = vadd.f32 %v1674_v52, %v1385_v49  ;;  %v1676_v56 = vpop.f32.mrb[3].mxu1  ;;  %v649_v52 = vunpack.c.l.s8.bf16 %v521_v41 }
 0x17e   : > { %1597 = vmatmul.mubr.bf16.gmra.mrb[108].mxu0 %v860_v46  ;;  %v892_v46 = vunpack.c.h.s8.bf16 %v636_v26  ;;  %v651_v56 = vunpack.c.l.s8.bf16 %v523_v43 }
 0x17f   : > { %1886 = vmatmul.mubr.bf16.gmra.mrb[108].mxu1 %v862_v50  ;;  %1604 = vmatprep.mubr.bf16.mxu0 %v869_v51  ;;  %v894_v51 = vunpack.c.h.s8.bf16 %v638_v27 }
 0x180   : > { %1893 = vmatprep.mubr.bf16.mxu1 %v871_v54 }
 0x181   : > { %v1390_v59 = vpop.f32.mrb[4].mxu0 }
 0x182   : > { %v1679_v60 = vpop.f32.mrb[4].mxu1  ;;  %v1392_v61 = vpop.f32.mrb[5].mxu0 }
 0x183   : > { %v6195_v63 = vadd.f32 %v1679_v60, %v1390_v59  ;;  %v1681_v0 = vpop.f32.mrb[5].mxu1  ;;  %v1393_v1 = vpop.f32.mrb[6].mxu0  ;;  %v520_v59 = vld [vmem:[%s5907_s13 + $0x20] sm:$0xff]  ;;  %v522_v60 = vld [vmem:[%s5907_s13 + $0x30] sm:$0xff] }
 0x184   : > { %v1682_v5 = vpop.f32.mrb[6].mxu1  ;;  %v1395_v6 = vpop.f32.mrb[7].mxu0 }
 0x185   : > { %v6197_v8 = vadd.f32 %v1682_v5, %v1393_v1  ;;  %v1684_v9 = vpop.f32.mrb[7].mxu1  ;;  %v648_v1 = vunpack.c.l.s8.bf16 %v520_v59  ;;  %v650_v6 = vunpack.c.l.s8.bf16 %v522_v60 }
 0x186   : > { %1605 = vmatmul.mubr.bf16.gmra.mrb[112].mxu0 %v868_v62 }
 0x187   : > { %1894 = vmatmul.mubr.bf16.gmra.mrb[112].mxu1 %v870_v2  ;;  %1612 = vmatprep.mubr.bf16.mxu0 %v877_v4 }
 0x188   : > { %1901 = vmatprep.mubr.bf16.mxu1 %v879_v7  ;;  %v657_v7 = vunpack.c.h.s8.bf16 %v521_v41 }
 0x189   : > { %v1398_v11 = vpop.f32.mrb[8].mxu0 }
 0x18a   : > { %v1687_v13 = vpop.f32.mrb[8].mxu1  ;;  %v1400_v14 = vpop.f32.mrb[9].mxu0 }
 0x18b   : > { %v6201_v16 = vadd.f32 %v1687_v13, %v1398_v11  ;;  %v1689_v17 = vpop.f32.mrb[9].mxu1  ;;  %v1401_v18 = vpop.f32.mrb[10].mxu0  ;;  %v659_v11 = vunpack.c.h.s8.bf16 %v523_v43  ;;  %v529_v14 = vld [vmem:[%s5907_s13 + $0x68] sm:$0xff] }
 0x18c   : > { %v1690_v21 = vpop.f32.mrb[10].mxu1  ;;  %v1403_v22 = vpop.f32.mrb[11].mxu0  ;;  %v531_v17 = vld [vmem:[%s5907_s13 + $0x78] sm:$0xff]  ;;  %v665_v26 = vunpack.c.l.s8.bf16 %v529_v14  ;;  %v673_v43 = vunpack.c.h.s8.bf16 %v529_v14 }
 0x18d   : > { %v6203_v24 = vadd.f32 %v1690_v21, %v1401_v18  ;;  %v1692_v25 = vpop.f32.mrb[11].mxu1 }
 0x18e   : > { %1613 = vmatmul.mubr.bf16.gmra.mrb[116].mxu0 %v876_v15  ;;  %v658_v25 = vunpack.c.h.s8.bf16 %v522_v60 }
 0x18f   : > { %1902 = vmatmul.mubr.bf16.gmra.mrb[116].mxu1 %v878_v19  ;;  %1620 = vmatprep.mubr.bf16.mxu0 %v885_v20  ;;  %v656_v20 = vunpack.c.h.s8.bf16 %v520_v59 }
 0x190   : > { %1909 = vmatprep.mubr.bf16.mxu1 %v887_v23 }
 0x191   : > { %v1406_v28 = vpop.f32.mrb[12].mxu0 }
 0x192   : > { %v1695_v29 = vpop.f32.mrb[12].mxu1  ;;  %v1408_v30 = vpop.f32.mrb[13].mxu0 }
 0x193   : > { %v6207_v32 = vadd.f32 %v1695_v29, %v1406_v28  ;;  %v1697_v33 = vpop.f32.mrb[13].mxu1  ;;  %v1409_v3 = vpop.f32.mrb[14].mxu0  ;;  %v667_v29 = vunpack.c.l.s8.bf16 %v531_v17 }
 0x194   : > { %v1698_v36 = vpop.f32.mrb[14].mxu1  ;;  %v1411_v37 = vpop.f32.mrb[15].mxu0  ;;  %v528_v33 = vld [vmem:[%s5907_s13 + $0x60] sm:$0xff] }
 0x195   : > { %v6209_v39 = vadd.f32 %v1698_v36, %v1409_v3  ;;  %v1700_v40 = vpop.f32.mrb[15].mxu1  ;;  %v530_v3 = vld [vmem:[%s5907_s13 + $0x70] sm:$0xff]  ;;  %v664_v37 = vunpack.c.l.s8.bf16 %v528_v33 }
 0x196   : > { %1621 = vmatmul.mubr.bf16.gmra.mrb[120].mxu0 %v884_v31 }
 0x197   : > { %1910 = vmatmul.mubr.bf16.gmra.mrb[120].mxu1 %v886_v34  ;;  %1628 = vmatprep.mubr.bf16.mxu0 %v893_v35 }
 0x198   : > { %1917 = vmatprep.mubr.bf16.mxu1 %v895_v38 }
 0x199   : > { %v1414_v42 = vpop.f32.mrb[16].mxu0 }
 0x19a   : > { %v1703_v44 = vpop.f32.mrb[16].mxu1  ;;  %v1416_v45 = vpop.f32.mrb[17].mxu0 }
 0x19b   : > { %v6213_v48 = vadd.f32 %v1703_v44, %v1414_v42  ;;  %v1705_v49 = vpop.f32.mrb[17].mxu1  ;;  %v1417_v50 = vpop.f32.mrb[18].mxu0  ;;  %v666_v42 = vunpack.c.l.s8.bf16 %v530_v3 }
 0x19c   : > { %v1706_v53 = vpop.f32.mrb[18].mxu1  ;;  %v1419_v54 = vpop.f32.mrb[19].mxu0 }
 0x19d   : > { %v6215_v57 = vadd.f32 %v1706_v53, %v1417_v50  ;;  %v1708_v58 = vpop.f32.mrb[19].mxu1  ;;  %v539_v53 = vld [vmem:[%s5907_s13 + $0xb8] sm:$0xff] }
 0x19e   : > { %1629 = vmatmul.mubr.bf16.gmra.mrb[124].mxu0 %v892_v46  ;;  %v675_v46 = vunpack.c.h.s8.bf16 %v531_v17  ;;  %v672_v58 = vunpack.c.h.s8.bf16 %v528_v33  ;;  %v547_v33 = vld [vmem:[%s5907_s13 + $0xf8] sm:$0xff] }
 0x19f   : > { %1918 = vmatmul.mubr.bf16.gmra.mrb[124].mxu1 %v894_v51  ;;  %1958 = vmatprep.mubr.bf16.mxu0 %v649_v52  ;;  %v537_v51 = vld [vmem:[%s5907_s13 + $0xa8] sm:$0xff] }
 0x1a0   : > { %2247 = vmatprep.mubr.bf16.mxu1 %v651_v56 }
 0x1a1   : > { %v1422_v61 = vpop.f32.mrb[20].mxu0 }
 0x1a2   : > { %v1711_v62 = vpop.f32.mrb[20].mxu1  ;;  %v1424_v0 = vpop.f32.mrb[21].mxu0 }
 0x1a3   : > { %v6219_v2 = vadd.f32 %v1711_v62, %v1422_v61  ;;  %v1713_v4 = vpop.f32.mrb[21].mxu1  ;;  %v1425_v5 = vpop.f32.mrb[22].mxu0  ;;  %v674_v62 = vunpack.c.h.s8.bf16 %v530_v3  ;;  %v681_v0 = vunpack.c.l.s8.bf16 %v537_v51 }
 0x1a4   : > { %v1714_v9 = vpop.f32.mrb[22].mxu1  ;;  %v1427_v10 = vpop.f32.mrb[23].mxu0 }
 0x1a5   : > { %v6221_v12 = vadd.f32 %v1714_v9, %v1425_v5  ;;  %v1716_v13 = vpop.f32.mrb[23].mxu1  ;;  %v683_v5 = vunpack.c.l.s8.bf16 %v539_v53  ;;  %v536_v9 = vld [vmem:[%s5907_s13 + $0xa0] sm:$0xff]  ;;  %v538_v10 = vld [vmem:[%s5907_s13 + $0xb0] sm:$0xff] }
 0x1a6   : > { %1959 = vmatmul.mubr.bf16.vlgmr.msra.gmra.mrb[128].mxu0 %v648_v1 }
 0x1a7   : > { %2248 = vmatmul.mubr.bf16.vlgmr.msra.gmra.mrb[128].mxu1 %v650_v6  ;;  %1966 = vmatprep.mubr.bf16.mxu0 %v657_v7 }
 0x1a8   : > { %2255 = vmatprep.mubr.bf16.mxu1 %v659_v11 }
 0x1a9   : > { %v1430_v15 = vpop.f32.mrb[24].mxu0 }
 0x1aa   : > { %v1719_v18 = vpop.f32.mrb[24].mxu1  ;;  %v1432_v19 = vpop.f32.mrb[25].mxu0 }
 0x1ab   : > { %v6225_v21 = vadd.f32 %v1719_v18, %v1430_v15  ;;  %v1721_v22 = vpop.f32.mrb[25].mxu1  ;;  %v1433_v23 = vpop.f32.mrb[26].mxu0  ;;  %v680_v15 = vunpack.c.l.s8.bf16 %v536_v9 }
 0x1ac   : > { %v1722_v27 = vpop.f32.mrb[26].mxu1  ;;  %v1435_v28 = vpop.f32.mrb[27].mxu0  ;;  %v689_v22 = vunpack.c.h.s8.bf16 %v537_v51  ;;  %v544_v51 = vld [vmem:[%s5907_s13 + $0xe0] sm:$0xff] }
 0x1ad   : > { %v6227_v30 = vadd.f32 %v1722_v27, %v1433_v23  ;;  %v1724_v31 = vpop.f32.mrb[27].mxu1 }
 0x1ae   : > { %1967 = vmatmul.mubr.bf16.gmra.mrb[132].mxu0 %v656_v20  ;;  %v682_v20 = vunpack.c.l.s8.bf16 %v538_v10 }
 0x1af   : > { %2256 = vmatmul.mubr.bf16.gmra.mrb[132].mxu1 %v658_v25  ;;  %1974 = vmatprep.mubr.bf16.mxu0 %v665_v26  ;;  %v691_v26 = vunpack.c.h.s8.bf16 %v539_v53 }
 0x1b0   : > { %2263 = vmatprep.mubr.bf16.mxu1 %v667_v29  ;;  %v545_v29 = vld [vmem:[%s5907_s13 + $0xe8] sm:$0xff] }
 0x1b1   : > { %v1438_v34 = vpop.f32.mrb[28].mxu0 }
 0x1b2   : > { %v1727_v35 = vpop.f32.mrb[28].mxu1  ;;  %v1440_v36 = vpop.f32.mrb[29].mxu0 }
 0x1b3   : > { %v6231_v38 = vadd.f32 %v1727_v35, %v1438_v34  ;;  %v1729_v40 = vpop.f32.mrb[29].mxu1  ;;  %v1441_v41 = vpop.f32.mrb[30].mxu0  ;;  %v688_v35 = vunpack.c.h.s8.bf16 %v536_v9 }
 0x1b4   : > { %v1730_v44 = vpop.f32.mrb[30].mxu1  ;;  %v1443_v45 = vpop.f32.mrb[31].mxu0 }
 0x1b5   : > { %v6233_v49 = vadd.f32 %v1730_v44, %v1441_v41  ;;  %v1732_v50 = vpop.f32.mrb[31].mxu1  ;;  %v690_v41 = vunpack.c.h.s8.bf16 %v538_v10  ;;  %v699_v45 = vunpack.c.l.s8.bf16 %v547_v33 }
 0x1b6   : > { %1975 = vmatmul.mubr.bf16.gmra.mrb[136].mxu0 %v664_v37 }
 0x1b7   : > { %2264 = vmatmul.mubr.bf16.gmra.mrb[136].mxu1 %v666_v42  ;;  %1982 = vmatprep.mubr.bf16.mxu0 %v673_v43  ;;  %v697_v42 = vunpack.c.l.s8.bf16 %v545_v29 }
 0x1b8   : > { %2271 = vmatprep.mubr.bf16.mxu1 %v675_v46 }
 0x1b9   : > { %v1446_v52 = vpop.f32.mrb[32].mxu0 }
 0x1ba   : > { %v1735_v54 = vpop.f32.mrb[32].mxu1  ;;  %v1448_v56 = vpop.f32.mrb[33].mxu0 }
 0x1bb   : > { %v6237_v59 = vadd.f32 %v1735_v54, %v1446_v52  ;;  %v1737_v60 = vpop.f32.mrb[33].mxu1  ;;  %v1449_v61 = vpop.f32.mrb[34].mxu0  ;;  %v546_v52 = vld [vmem:[%s5907_s13 + $0xf0] sm:$0xff] }
 0x1bc   : > { %v1738_v1 = vpop.f32.mrb[34].mxu1  ;;  %v1451_v4 = vpop.f32.mrb[35].mxu0 }
 0x1bd   : > { %v6239_v6 = vadd.f32 %v1738_v1, %v1449_v61  ;;  %v1740_v7 = vpop.f32.mrb[35].mxu1  ;;  %v705_v1 = vunpack.c.h.s8.bf16 %v545_v29 }
 0x1be   : > { %1983 = vmatmul.mubr.bf16.gmra.mrb[140].mxu0 %v672_v58  ;;  %v696_v58 = vunpack.c.l.s8.bf16 %v544_v51  ;;  %v707_v7 = vunpack.c.h.s8.bf16 %v547_v33 }
 0x1bf   : > { %2272 = vmatmul.mubr.bf16.gmra.mrb[140].mxu1 %v674_v62  ;;  %1990 = vmatprep.mubr.bf16.mxu0 %v681_v0  ;;  %v698_v0 = vunpack.c.l.s8.bf16 %v546_v52 }
 0x1c0   : > { %2279 = vmatprep.mubr.bf16.mxu1 %v683_v5 }
 0x1c1   : > { %v1454_v11 = vpop.f32.mrb[36].mxu0 }
 0x1c2   : > { %v1743_v13 = vpop.f32.mrb[36].mxu1  ;;  %v1456_v14 = vpop.f32.mrb[37].mxu0 }
 0x1c3   : > { %v6243_v17 = vadd.f32 %v1743_v13, %v1454_v11  ;;  %v1745_v18 = vpop.f32.mrb[37].mxu1  ;;  %v1457_v19 = vpop.f32.mrb[38].mxu0  ;;  %v553_v11 = vld [vmem:[%s5907_s13 + $0x128] sm:$0xff]  ;;  %v555_v14 = vld [vmem:[%s5907_s13 + $0x138] sm:$0xff] }
 0x1c4   : > { %v1746_v23 = vpop.f32.mrb[38].mxu1  ;;  %v1459_v25 = vpop.f32.mrb[39].mxu0 }
 0x1c5   : > { %v6245_v27 = vadd.f32 %v1746_v23, %v1457_v19  ;;  %v1748_v28 = vpop.f32.mrb[39].mxu1  ;;  %v704_v19 = vunpack.c.h.s8.bf16 %v544_v51  ;;  %v706_v25 = vunpack.c.h.s8.bf16 %v546_v52  ;;  %v721_v51 = vunpack.c.h.s8.bf16 %v553_v11 }
 0x1c6   : > { %1991 = vmatmul.mubr.bf16.gmra.mrb[144].mxu0 %v680_v15 }
 0x1c7   : > { %2280 = vmatmul.mubr.bf16.gmra.mrb[144].mxu1 %v682_v20  ;;  %1998 = vmatprep.mubr.bf16.mxu0 %v689_v22 }
 0x1c8   : > { %2287 = vmatprep.mubr.bf16.mxu1 %v691_v26  ;;  %v713_v26 = vunpack.c.l.s8.bf16 %v553_v11 }
 0x1c9   : > { %v1462_v31 = vpop.f32.mrb[40].mxu0 }
 0x1ca   : > { %v1751_v3 = vpop.f32.mrb[40].mxu1  ;;  %v1464_v34 = vpop.f32.mrb[41].mxu0 }
 0x1cb   : > { %v6249_v36 = vadd.f32 %v1751_v3, %v1462_v31  ;;  %v1753_v37 = vpop.f32.mrb[41].mxu1  ;;  %v1465_v40 = vpop.f32.mrb[42].mxu0  ;;  %v715_v31 = vunpack.c.l.s8.bf16 %v555_v14  ;;  %v552_v34 = vld [vmem:[%s5907_s13 + $0x120] sm:$0xff] }
 0x1cc   : > { %v1754_v43 = vpop.f32.mrb[42].mxu1  ;;  %v1467_v44 = vpop.f32.mrb[43].mxu0 }
 0x1cd   : > { %v6251_v46 = vadd.f32 %v1754_v43, %v1465_v40  ;;  %v1756_v50 = vpop.f32.mrb[43].mxu1 }
 0x1ce   : > { %1999 = vmatmul.mubr.bf16.gmra.mrb[148].mxu0 %v688_v35  ;;  %v554_v35 = vld [vmem:[%s5907_s13 + $0x130] sm:$0xff] }
 0x1cf   : > { %2288 = vmatmul.mubr.bf16.gmra.mrb[148].mxu1 %v690_v41  ;;  %2006 = vmatprep.mubr.bf16.mxu0 %v697_v42  ;;  %v712_v42 = vunpack.c.l.s8.bf16 %v552_v34  ;;  %v714_v50 = vunpack.c.l.s8.bf16 %v554_v35 }
 0x1d0   : > { %2295 = vmatprep.mubr.bf16.mxu1 %v699_v45 }
 0x1d1   : > { %v1470_v53 = vpop.f32.mrb[44].mxu0 }
 0x1d2   : > { %v1759_v54 = vpop.f32.mrb[44].mxu1  ;;  %v1472_v56 = vpop.f32.mrb[45].mxu0 }
 0x1d3   : > { %v6255_v60 = vadd.f32 %v1759_v54, %v1470_v53  ;;  %v1761_v61 = vpop.f32.mrb[45].mxu1  ;;  %v1473_v62 = vpop.f32.mrb[46].mxu0  ;;  %v723_v54 = vunpack.c.h.s8.bf16 %v555_v14 }
 0x1d4   : > { %v1762_v4 = vpop.f32.mrb[46].mxu1  ;;  %v1475_v5 = vpop.f32.mrb[47].mxu0  ;;  %v561_v61 = vld [vmem:[%s5907_s13 + $0x168] sm:$0xff] }
 0x1d5   : > { %v6257_v9 = vadd.f32 %v1762_v4, %v1473_v62  ;;  %v1764_v10 = vpop.f32.mrb[47].mxu1  ;;  %v720_v5 = vunpack.c.h.s8.bf16 %v552_v34  ;;  %v729_v14 = vunpack.c.l.s8.bf16 %v561_v61 }
 0x1d6   : > { %2007 = vmatmul.mubr.bf16.gmra.mrb[152].mxu0 %v696_v58 }
 0x1d7   : > { %2296 = vmatmul.mubr.bf16.gmra.mrb[152].mxu1 %v698_v0  ;;  %2014 = vmatprep.mubr.bf16.mxu0 %v705_v1  ;;  %v563_v0 = vld [vmem:[%s5907_s13 + $0x178] sm:$0xff] }
 0x1d8   : > { %2303 = vmatprep.mubr.bf16.mxu1 %v707_v7 }
 0x1d9   : > { %v1478_v13 = vpop.f32.mrb[48].mxu0 }
 0x1da   : > { %v1767_v15 = vpop.f32.mrb[48].mxu1  ;;  %v1480_v18 = vpop.f32.mrb[49].mxu0 }
 0x1db   : > { %v6261_v20 = vadd.f32 %v1767_v15, %v1478_v13  ;;  %v1769_v22 = vpop.f32.mrb[49].mxu1  ;;  %v1481_v23 = vpop.f32.mrb[50].mxu0  ;;  %v722_v13 = vunpack.c.h.s8.bf16 %v554_v35 }
 0x1dc   : > { %v1770_v28 = vpop.f32.mrb[50].mxu1  ;;  %v1483_v29 = vpop.f32.mrb[51].mxu0 }
 0x1dd   : > { %v6263_v33 = vadd.f32 %v1770_v28, %v1481_v23  ;;  %v1772_v3 = vpop.f32.mrb[51].mxu1 }
 0x1de   : > { %2015 = vmatmul.mubr.bf16.gmra.mrb[156].mxu0 %v704_v19  ;;  %v731_v19 = vunpack.c.l.s8.bf16 %v563_v0 }
 0x1df   : > { %2304 = vmatmul.mubr.bf16.gmra.mrb[156].mxu1 %v706_v25  ;;  %2022 = vmatprep.mubr.bf16.mxu0 %v713_v26  ;;  %v560_v25 = vld [vmem:[%s5907_s13 + $0x160] sm:$0xff]  ;;  %v562_v26 = vld [vmem:[%s5907_s13 + $0x170] sm:$0xff] }
 0x1e0   : > { %2311 = vmatprep.mubr.bf16.mxu1 %v715_v31  ;;  %v728_v3 = vunpack.c.l.s8.bf16 %v560_v25 }
 0x1e1   : > { %v1486_v37 = vpop.f32.mrb[52].mxu0 }
 0x1e2   : > { %v1775_v40 = vpop.f32.mrb[52].mxu1  ;;  %v1488_v41 = vpop.f32.mrb[53].mxu0 }
 0x1e3   : > { %v6267_v43 = vadd.f32 %v1775_v40, %v1486_v37  ;;  %v1777_v44 = vpop.f32.mrb[53].mxu1  ;;  %v1489_v45 = vpop.f32.mrb[54].mxu0  ;;  %v730_v40 = vunpack.c.l.s8.bf16 %v562_v26  ;;  %v737_v41 = vunpack.c.h.s8.bf16 %v561_v61 }
 0x1e4   : > { %v1778_v52 = vpop.f32.mrb[54].mxu1  ;;  %v1491_v53 = vpop.f32.mrb[55].mxu0 }
 0x1e5   : > { %v6269_v56 = vadd.f32 %v1778_v52, %v1489_v45  ;;  %v1780_v58 = vpop.f32.mrb[55].mxu1  ;;  %v739_v45 = vunpack.c.h.s8.bf16 %v563_v0  ;;  %v569_v52 = vld [vmem:[%s5907_s13 + $0x1a8] sm:$0xff]  ;;  %v738_v0 = vunpack.c.h.s8.bf16 %v562_v26 }
 0x1e6   : > { %2023 = vmatmul.mubr.bf16.gmra.mrb[160].mxu0 %v712_v42 }
 0x1e7   : > { %2312 = vmatmul.mubr.bf16.gmra.mrb[160].mxu1 %v714_v50  ;;  %2030 = vmatprep.mubr.bf16.mxu0 %v721_v51 }
 0x1e8   : > { %2319 = vmatprep.mubr.bf16.mxu1 %v723_v54  ;;  %v571_v54 = vld [vmem:[%s5907_s13 + $0x1b8] sm:$0xff] }
 0x1e9   : > { %v1494_v62 = vpop.f32.mrb[56].mxu0 }
 0x1ea   : > { %v1783_v1 = vpop.f32.mrb[56].mxu1  ;;  %v1496_v4 = vpop.f32.mrb[57].mxu0 }
 0x1eb   : > { %v6273_v7 = vadd.f32 %v1783_v1, %v1494_v62  ;;  %v1785_v10 = vpop.f32.mrb[57].mxu1  ;;  %v1497_v11 = vpop.f32.mrb[58].mxu0  ;;  %v736_v1 = vunpack.c.h.s8.bf16 %v560_v25 }
 0x1ec   : > { %v1786_v15 = vpop.f32.mrb[58].mxu1  ;;  %v1499_v18 = vpop.f32.mrb[59].mxu0  ;;  %v745_v10 = vunpack.c.l.s8.bf16 %v569_v52 }
 0x1ed   : > { %v6275_v22 = vadd.f32 %v1786_v15, %v1497_v11  ;;  %v1788_v23 = vpop.f32.mrb[59].mxu1 }
 0x1ee   : > { %2031 = vmatmul.mubr.bf16.gmra.mrb[164].mxu0 %v720_v5  ;;  %v570_v23 = vld [vmem:[%s5907_s13 + $0x1b0] sm:$0xff] }
 0x1ef   : > { %2320 = vmatmul.mubr.bf16.gmra.mrb[164].mxu1 %v722_v13  ;;  %2038 = vmatprep.mubr.bf16.mxu0 %v729_v14  ;;  %v747_v14 = vunpack.c.l.s8.bf16 %v571_v54 }
 0x1f0   : > { %2327 = vmatprep.mubr.bf16.mxu1 %v731_v19  ;;  %v568_v19 = vld [vmem:[%s5907_s13 + $0x1a0] sm:$0xff] }
 0x1f1   : > { %v1502_v28 = vpop.f32.mrb[60].mxu0 }
 0x1f2   : > { %v1791_v29 = vpop.f32.mrb[60].mxu1  ;;  %v1504_v31 = vpop.f32.mrb[61].mxu0 }
 0x1f3   : > { %v6279_v34 = vadd.f32 %v1791_v29, %v1502_v28  ;;  %v1793_v35 = vpop.f32.mrb[61].mxu1  ;;  %v1505_v37 = vpop.f32.mrb[62].mxu0  ;;  %v744_v31 = vunpack.c.l.s8.bf16 %v568_v19 }
 0x1f4   : > { %v1794_v42 = vpop.f32.mrb[62].mxu1  ;;  %v1507_v44 = vpop.f32.mrb[63].mxu0 }
 0x1f5   : > { %v6281_v50 = vadd.f32 %v1794_v42, %v1505_v37  ;;  %v1796_v51 = vpop.f32.mrb[63].mxu1  ;;  %v746_v37 = vunpack.c.l.s8.bf16 %v570_v23  ;;  %v755_v44 = vunpack.c.h.s8.bf16 %v571_v54  ;;  %v754_v54 = vunpack.c.h.s8.bf16 %v570_v23 }
 0x1f6   : > { %2039 = vmatmul.mubr.bf16.gmra.mrb[168].mxu0 %v728_v3 }
 0x1f7   : > { %2328 = vmatmul.mubr.bf16.gmra.mrb[168].mxu1 %v730_v40  ;;  %2046 = vmatprep.mubr.bf16.mxu0 %v737_v41  ;;  %v753_v40 = vunpack.c.h.s8.bf16 %v569_v52 }
 0x1f8   : > { %2335 = vmatprep.mubr.bf16.mxu1 %v739_v45 }
 0x1f9   : > { %v1510_v53 = vpop.f32.mrb[64].mxu0 }
 0x1fa   : > { %v1799_v58 = vpop.f32.mrb[64].mxu1  ;;  %v1512_v62 = vpop.f32.mrb[65].mxu0 }
 0x1fb   : > { %v6285_v4 = vadd.f32 %v1799_v58, %v1510_v53  ;;  %v1801_v61 = vpop.f32.mrb[65].mxu1  ;;  %v1513_v5 = vpop.f32.mrb[66].mxu0  ;;  %v577_v53 = vld [vmem:[%s5907_s13 + $0x1e8] sm:$0xff]  ;;  %v579_v62 = vld [vmem:[%s5907_s13 + $0x1f8] sm:$0xff] }
 0x1fc   : > { %v1802_v11 = vpop.f32.mrb[66].mxu1  ;;  %v1515_v13 = vpop.f32.mrb[67].mxu0 }
 0x1fd   : > { %v6287_v15 = vadd.f32 %v1802_v11, %v1513_v5  ;;  %v1804_v18 = vpop.f32.mrb[67].mxu1  ;;  %v752_v5 = vunpack.c.h.s8.bf16 %v568_v19  ;;  %v761_v11 = vunpack.c.l.s8.bf16 %v577_v53 }
 0x1fe   : > { %2047 = vmatmul.mubr.bf16.gmra.mrb[172].mxu0 %v736_v1  ;;  %v763_v18 = vunpack.c.l.s8.bf16 %v579_v62 }
 0x1ff   : > { %2336 = vmatmul.mubr.bf16.gmra.mrb[172].mxu1 %v738_v0  ;;  %2054 = vmatprep.mubr.bf16.mxu0 %v745_v10 }
 0x200   : > { %2343 = vmatprep.mubr.bf16.mxu1 %v747_v14 }
 0x201   : > { %v1518_v25 = vpop.f32.mrb[68].mxu0 }
 0x202   : > { %v1807_v28 = vpop.f32.mrb[68].mxu1  ;;  %v1520_v29 = vpop.f32.mrb[69].mxu0 }
 0x203   : > { %v6291_v3 = vadd.f32 %v1807_v28, %v1518_v25  ;;  %v1809_v26 = vpop.f32.mrb[69].mxu1  ;;  %v1521_v35 = vpop.f32.mrb[70].mxu0  ;;  %v576_v29 = vld [vmem:[%s5907_s13 + $0x1e0] sm:$0xff] }
 0x204   : > { %v1810_v41 = vpop.f32.mrb[70].mxu1  ;;  %v1523_v42 = vpop.f32.mrb[71].mxu0 }
 0x205   : > { %v6293_v45 = vadd.f32 %v1810_v41, %v1521_v35  ;;  %v1812_v51 = vpop.f32.mrb[71].mxu1 }
 0x206   : > { %2055 = vmatmul.mubr.bf16.gmra.mrb[176].mxu0 %v744_v31  ;;  %v578_v31 = vld [vmem:[%s5907_s13 + $0x1f0] sm:$0xff] }
 0x207   : > { %2344 = vmatmul.mubr.bf16.gmra.mrb[176].mxu1 %v746_v37  ;;  %2062 = vmatprep.mubr.bf16.mxu0 %v753_v40  ;;  %v760_v37 = vunpack.c.l.s8.bf16 %v576_v29  ;;  %v762_v42 = vunpack.c.l.s8.bf16 %v578_v31 }
 0x208   : > { %2351 = vmatprep.mubr.bf16.mxu1 %v755_v44  ;;  %v769_v44 = vunpack.c.h.s8.bf16 %v577_v53 }
 0x209   : > { %v1526_v58 = vpop.f32.mrb[72].mxu0 }
 0x20a   : > { %v1815_v1 = vpop.f32.mrb[72].mxu1  ;;  %v1528_v61 = vpop.f32.mrb[73].mxu0 }
 0x20b   : > { %v6297_v0 = vadd.f32 %v1815_v1, %v1526_v58  ;;  %v1817_v52 = vpop.f32.mrb[73].mxu1  ;;  %v1529_v10 = vpop.f32.mrb[74].mxu0  ;;  %v771_v1 = vunpack.c.h.s8.bf16 %v579_v62  ;;  %v770_v62 = vunpack.c.h.s8.bf16 %v578_v31 }
 0x20c   : > { %v1818_v13 = vpop.f32.mrb[74].mxu1  ;;  %v1531_v14 = vpop.f32.mrb[75].mxu0  ;;  %v585_v52 = vld [vmem:[%s5907_s13 + $0x228] sm:$0xff] }
 0x20d   : > { %v6299_v25 = vadd.f32 %v1818_v13, %v1529_v10  ;;  %v1820_v28 = vpop.f32.mrb[75].mxu1  ;;  %v768_v14 = vunpack.c.h.s8.bf16 %v576_v29 }
 0x20e   : > { %2063 = vmatmul.mubr.bf16.gmra.mrb[180].mxu0 %v752_v5 }
 0x20f   : > { %2352 = vmatmul.mubr.bf16.gmra.mrb[180].mxu1 %v754_v54  ;;  %2070 = vmatprep.mubr.bf16.mxu0 %v761_v11  ;;  %v587_v54 = vld [vmem:[%s5907_s13 + $0x238] sm:$0xff] }
 0x210   : > { %2359 = vmatprep.mubr.bf16.mxu1 %v763_v18 }
 0x211   : > { %v1534_v19 = vpop.f32.mrb[76].mxu0 }
 0x212   : > { %v1823_v26 = vpop.f32.mrb[76].mxu1  ;;  %v1536_v35 = vpop.f32.mrb[77].mxu0 }
 0x213   : > { %v6303_v40 = vadd.f32 %v1823_v26, %v1534_v19  ;;  %v1825_v23 = vpop.f32.mrb[77].mxu1  ;;  %v1537_v41 = vpop.f32.mrb[78].mxu0  ;;  %v777_v19 = vunpack.c.l.s8.bf16 %v585_v52 }
 0x214   : > { %v1826_v51 = vpop.f32.mrb[78].mxu1  ;;  %v1539_v58 = vpop.f32.mrb[79].mxu0 }
 0x215   : > { %v6305_v61 = vadd.f32 %v1826_v51, %v1537_v41  ;;  %v1828_v5 = vpop.f32.mrb[79].mxu1 }
 0x216   : > { %2071 = vmatmul.mubr.bf16.gmra.mrb[184].mxu0 %v760_v37  ;;  %v779_v37 = vunpack.c.l.s8.bf16 %v587_v54 }
 0x217   : > { %2360 = vmatmul.mubr.bf16.gmra.mrb[184].mxu1 %v762_v42  ;;  %2078 = vmatprep.mubr.bf16.mxu0 %v769_v44  ;;  %v584_v42 = vld [vmem:[%s5907_s13 + $0x220] sm:$0xff]  ;;  %v586_v44 = vld [vmem:[%s5907_s13 + $0x230] sm:$0xff] }
 0x218   : > { %2367 = vmatprep.mubr.bf16.mxu1 %v771_v1  ;;  %v776_v1 = vunpack.c.l.s8.bf16 %v584_v42 }
 0x219   : > { %v1542_v10 = vpop.f32.mrb[80].mxu0 }
 0x21a   : > { %v1831_v11 = vpop.f32.mrb[80].mxu1  ;;  %v1544_v13 = vpop.f32.mrb[81].mxu0 }
 0x21b   : > { %v6309_v18 = vadd.f32 %v1831_v11, %v1542_v10  ;;  %v1833_v53 = vpop.f32.mrb[81].mxu1  ;;  %v1545_v28 = vpop.f32.mrb[82].mxu0  ;;  %v778_v11 = vunpack.c.l.s8.bf16 %v586_v44  ;;  %v785_v13 = vunpack.c.h.s8.bf16 %v585_v52 }
 0x21c   : > { %v1834_v26 = vpop.f32.mrb[82].mxu1  ;;  %v1547_v35 = vpop.f32.mrb[83].mxu0 }
 0x21d   : > { %v6311_v23 = vadd.f32 %v1834_v26, %v1545_v28  ;;  %v1836_v41 = vpop.f32.mrb[83].mxu1  ;;  %v593_v26 = vld [vmem:[%s5907_s13 + $0x268] sm:$0xff] }
 0x21e   : > { %2079 = vmatmul.mubr.bf16.gmra.mrb[188].mxu0 %v768_v14  ;;  %v787_v14 = vunpack.c.h.s8.bf16 %v587_v54  ;;  %v786_v54 = vunpack.c.h.s8.bf16 %v586_v44 }
 0x21f   : > { %2368 = vmatmul.mubr.bf16.gmra.mrb[188].mxu1 %v770_v62  ;;  %2086 = vmatprep.mubr.bf16.mxu0 %v777_v19 }
 0x220   : > { %2375 = vmatprep.mubr.bf16.mxu1 %v779_v37  ;;  %v595_v37 = vld [vmem:[%s5907_s13 + $0x278] sm:$0xff] }
 0x221   : > { %v1550_v29 = vpop.f32.mrb[84].mxu0 }
 0x222   : > { %v1839_v51 = vpop.f32.mrb[84].mxu1  ;;  %v1552_v58 = vpop.f32.mrb[85].mxu0 }
 0x223   : > { %v6315_v5 = vadd.f32 %v1839_v51, %v1550_v29  ;;  %v1841_v31 = vpop.f32.mrb[85].mxu1  ;;  %v1553_v10 = vpop.f32.mrb[86].mxu0  ;;  %v784_v51 = vunpack.c.h.s8.bf16 %v584_v42 }
 0x224   : > { %v1842_v53 = vpop.f32.mrb[86].mxu1  ;;  %v1555_v28 = vpop.f32.mrb[87].mxu0 }
 0x225   : > { %6922 = vst [vmem:[#allocation7_spill] sm:$0xff] %v6315_v5  ;;  %v6317_v62 = vadd.f32 %v1842_v53, %v1553_v10  ;;  %v1844_v19 = vpop.f32.mrb[87].mxu1  ;;  %v793_v10 = vunpack.c.l.s8.bf16 %v593_v26 }
 0x226   : > { %2087 = vmatmul.mubr.bf16.gmra.mrb[192].mxu0 %v776_v1  ;;  %v795_v1 = vunpack.c.l.s8.bf16 %v595_v37  ;;  %v594_v19 = vld [vmem:[%s5907_s13 + $0x270] sm:$0xff] }
 0x227   : > { %6923 = vst [vmem:[#allocation8_spill] sm:$0xff] %v6317_v62  ;;  %2376 = vmatmul.mubr.bf16.gmra.mrb[192].mxu1 %v778_v11  ;;  %2094 = vmatprep.mubr.bf16.mxu0 %v785_v13  ;;  %v900_v62 = vld [vmem:[#allocation2] sm:$0xff] }
 0x228   : > { %2383 = vmatprep.mubr.bf16.mxu1 %v787_v14  ;;  %v592_v14 = vld [vmem:[%s5907_s13 + $0x260] sm:$0xff] }
 0x229   : > { %v1558_v35 = vpop.f32.mrb[88].mxu0 }
 0x22a   : > { %v1847_v41 = vpop.f32.mrb[88].mxu1  ;;  %v1560_v29 = vpop.f32.mrb[89].mxu0 }
 0x22b   : > { %v6321_v58 = vadd.f32 %v1847_v41, %v1558_v35  ;;  %v1849_v52 = vpop.f32.mrb[89].mxu1  ;;  %v1561_v31 = vpop.f32.mrb[90].mxu0  ;;  %v792_v41 = vunpack.c.l.s8.bf16 %v592_v14 }
 0x22c   : > { %v1850_v53 = vpop.f32.mrb[90].mxu1  ;;  %v1563_v28 = vpop.f32.mrb[91].mxu0 }
 0x22d   : > { %6924 = vst [vmem:[#allocation9_spill] sm:$0xff] %v6321_v58  ;;  %v6323_v11 = vadd.f32 %v1850_v53, %v1561_v31  ;;  %v1852_v13 = vpop.f32.mrb[91].mxu1  ;;  %v794_v58 = vunpack.c.l.s8.bf16 %v594_v19  ;;  %v801_v31 = vunpack.c.h.s8.bf16 %v593_v26 }
 0x22e   : > { %2095 = vmatmul.mubr.bf16.gmra.mrb[196].mxu0 %v784_v51  ;;  %v803_v51 = vunpack.c.h.s8.bf16 %v595_v37  ;;  %v802_v37 = vunpack.c.h.s8.bf16 %v594_v19 }
 0x22f   : > { %6925 = vst [vmem:[#allocation10_spill] sm:$0xff] %v6323_v11  ;;  %2384 = vmatmul.mubr.bf16.gmra.mrb[196].mxu1 %v786_v54  ;;  %2102 = vmatprep.mubr.bf16.mxu0 %v793_v10  ;;  %v603_v11 = vld [vmem:[%s5907_s13 + $0x2b8] sm:$0xff] }
 0x230   : > { %2391 = vmatprep.mubr.bf16.mxu1 %v795_v1  ;;  %v601_v1 = vld [vmem:[%s5907_s13 + $0x2a8] sm:$0xff] }
 0x231   : > { %v1566_v42 = vpop.f32.mrb[92].mxu0 }
 0x232   : > { %v1855_v29 = vpop.f32.mrb[92].mxu1  ;;  %v1568_v35 = vpop.f32.mrb[93].mxu0 }
 0x233   : > { %v6327_v52 = vadd.f32 %v1855_v29, %v1566_v42  ;;  %v1857_v44 = vpop.f32.mrb[93].mxu1  ;;  %v1569_v28 = vpop.f32.mrb[94].mxu0 }
 0x234   : > { %v1858_v53 = vpop.f32.mrb[94].mxu1  ;;  %v1571_v13 = vpop.f32.mrb[95].mxu0  ;;  %v800_v44 = vunpack.c.h.s8.bf16 %v592_v14 }
 0x235   : > { %6926 = vst [vmem:[#allocation11_spill] sm:$0xff] %v6327_v52  ;;  %v6329_v54 = vadd.f32 %v1858_v53, %v1569_v28  ;;  %v1860_v10 = vpop.f32.mrb[95].mxu1  ;;  %v809_v28 = vunpack.c.l.s8.bf16 %v601_v1 }
 0x236   : > { %2103 = vmatmul.mubr.bf16.gmra.mrb[200].mxu0 %v792_v41  ;;  %v811_v41 = vunpack.c.l.s8.bf16 %v603_v11 }
 0x237   : > { %6927 = vst [vmem:[#allocation12_spill] sm:$0xff] %v6329_v54  ;;  %2392 = vmatmul.mubr.bf16.gmra.mrb[200].mxu1 %v794_v58  ;;  %2110 = vmatprep.mubr.bf16.mxu0 %v801_v31 }
 0x238   : > { %2399 = vmatprep.mubr.bf16.mxu1 %v803_v51  ;;  %v600_v51 = vld [vmem:[%s5907_s13 + $0x2a0] sm:$0xff] }
 0x239   : > { %v1574_v35 = vpop.f32.mrb[96].mxu0 }
 0x23a   : > { %v1863_v42 = vpop.f32.mrb[96].mxu1  ;;  %v1576_v29 = vpop.f32.mrb[97].mxu0 }
 0x23b   : > { %v6333_v52 = vadd.f32 %v1863_v42, %v1574_v35  ;;  %v1865_v26 = vpop.f32.mrb[97].mxu1  ;;  %v1577_v13 = vpop.f32.mrb[98].mxu0  ;;  %v602_v29 = vld [vmem:[%s5907_s13 + $0x2b0] sm:$0xff]  ;;  %v808_v42 = vunpack.c.l.s8.bf16 %v600_v51 }
 0x23c   : > { %v1866_v53 = vpop.f32.mrb[98].mxu1  ;;  %v1579_v10 = vpop.f32.mrb[99].mxu0 }
 0x23d   : > { %6928 = vst [vmem:[#allocation13_spill] sm:$0xff] %v6333_v52  ;;  %v6335_v58 = vadd.f32 %v1866_v53, %v1577_v13  ;;  %v1868_v31 = vpop.f32.mrb[99].mxu1  ;;  %v810_v52 = vunpack.c.l.s8.bf16 %v602_v29  ;;  %v817_v13 = vunpack.c.h.s8.bf16 %v601_v1 }
 0x23e   : > { %2111 = vmatmul.mubr.bf16.gmra.mrb[204].mxu0 %v800_v44  ;;  %v819_v44 = vunpack.c.h.s8.bf16 %v603_v11  ;;  %v818_v11 = vunpack.c.h.s8.bf16 %v602_v29 }
 0x23f   : > { %6929 = vst [vmem:[#allocation14_spill] sm:$0xff] %v6335_v58  ;;  %2400 = vmatmul.mubr.bf16.gmra.mrb[204].mxu1 %v802_v37  ;;  %2118 = vmatprep.mubr.bf16.mxu0 %v809_v28  ;;  %v611_v58 = vld [vmem:[%s5907_s13 + $0x2f8] sm:$0xff] }
 0x240   : > { %2407 = vmatprep.mubr.bf16.mxu1 %v811_v41  ;;  %v609_v41 = vld [vmem:[%s5907_s13 + $0x2e8] sm:$0xff] }
 0x241   : > { %v1582_v14 = vpop.f32.mrb[100].mxu0 }
 0x242   : > { %v1871_v54 = vpop.f32.mrb[100].mxu1  ;;  %v1584_v35 = vpop.f32.mrb[101].mxu0 }
 0x243   : > { %v6339_v26 = vadd.f32 %v1871_v54, %v1582_v14  ;;  %v1873_v19 = vpop.f32.mrb[101].mxu1  ;;  %v1585_v10 = vpop.f32.mrb[102].mxu0 }
 0x244   : > { %v1874_v53 = vpop.f32.mrb[102].mxu1  ;;  %v1587_v31 = vpop.f32.mrb[103].mxu0  ;;  %v816_v19 = vunpack.c.h.s8.bf16 %v600_v51 }
 0x245   : > { %6930 = vst [vmem:[#allocation15_spill] sm:$0xff] %v6339_v26  ;;  %v6341_v37 = vadd.f32 %v1874_v53, %v1585_v10  ;;  %v1876_v28 = vpop.f32.mrb[103].mxu1  ;;  %v825_v10 = vunpack.c.l.s8.bf16 %v609_v41 }
 0x246   : > { %2119 = vmatmul.mubr.bf16.gmra.mrb[208].mxu0 %v808_v42  ;;  %v827_v42 = vunpack.c.l.s8.bf16 %v611_v58 }
 0x247   : > { %6931 = vst [vmem:[#allocation16_spill] sm:$0xff] %v6341_v37  ;;  %2408 = vmatmul.mubr.bf16.gmra.mrb[208].mxu1 %v810_v52  ;;  %2126 = vmatprep.mubr.bf16.mxu0 %v817_v13 }
 0x248   : > { %2415 = vmatprep.mubr.bf16.mxu1 %v819_v44  ;;  %v608_v44 = vld [vmem:[%s5907_s13 + $0x2e0] sm:$0xff] }
 0x249   : > { %v1590_v35 = vpop.f32.mrb[104].mxu0 }
 0x24a   : > { %v1879_v54 = vpop.f32.mrb[104].mxu1  ;;  %v1592_v14 = vpop.f32.mrb[105].mxu0 }
 0x24b   : > { %v6345_v26 = vadd.f32 %v1879_v54, %v1590_v35  ;;  %v1881_v1 = vpop.f32.mrb[105].mxu1  ;;  %v1593_v31 = vpop.f32.mrb[106].mxu0  ;;  %v610_v14 = vld [vmem:[%s5907_s13 + $0x2f0] sm:$0xff]  ;;  %v824_v54 = vunpack.c.l.s8.bf16 %v608_v44 }
 0x24c   : > { %v1882_v53 = vpop.f32.mrb[106].mxu1  ;;  %v1595_v28 = vpop.f32.mrb[107].mxu0 }
 0x24d   : > { %6932 = vst [vmem:[#allocation17_spill] sm:$0xff] %v6345_v26  ;;  %v6347_v52 = vadd.f32 %v1882_v53, %v1593_v31  ;;  %v1884_v13 = vpop.f32.mrb[107].mxu1  ;;  %v826_v26 = vunpack.c.l.s8.bf16 %v610_v14  ;;  %v833_v31 = vunpack.c.h.s8.bf16 %v609_v41 }
 0x24e   : > { %2127 = vmatmul.mubr.bf16.gmra.mrb[212].mxu0 %v816_v19  ;;  %v835_v19 = vunpack.c.h.s8.bf16 %v611_v58  ;;  %v834_v58 = vunpack.c.h.s8.bf16 %v610_v14 }
 0x24f   : > { %6933 = vst [vmem:[#allocation18_spill] sm:$0xff] %v6347_v52  ;;  %2416 = vmatmul.mubr.bf16.gmra.mrb[212].mxu1 %v818_v11  ;;  %2134 = vmatprep.mubr.bf16.mxu0 %v825_v10  ;;  %v619_v52 = vld [vmem:[%s5907_s13 + $0x338] sm:$0xff] }
 0x250   : > { %2423 = vmatprep.mubr.bf16.mxu1 %v827_v42  ;;  %v617_v42 = vld [vmem:[%s5907_s13 + $0x328] sm:$0xff] }
 0x251   : > { %v1598_v51 = vpop.f32.mrb[108].mxu0 }
 0x252   : > { %v1887_v37 = vpop.f32.mrb[108].mxu1  ;;  %v1600_v35 = vpop.f32.mrb[109].mxu0 }
 0x253   : > { %v6351_v1 = vadd.f32 %v1887_v37, %v1598_v51  ;;  %v1889_v29 = vpop.f32.mrb[109].mxu1  ;;  %v1601_v28 = vpop.f32.mrb[110].mxu0 }
 0x254   : > { %v1890_v53 = vpop.f32.mrb[110].mxu1  ;;  %v1603_v13 = vpop.f32.mrb[111].mxu0  ;;  %v832_v29 = vunpack.c.h.s8.bf16 %v608_v44 }
 0x255   : > { %6934 = vst [vmem:[#allocation19_spill] sm:$0xff] %v6351_v1  ;;  %v6353_v11 = vadd.f32 %v1890_v53, %v1601_v28  ;;  %v1892_v10 = vpop.f32.mrb[111].mxu1  ;;  %v841_v28 = vunpack.c.l.s8.bf16 %v617_v42 }
 0x256   : > { %2135 = vmatmul.mubr.bf16.gmra.mrb[216].mxu0 %v824_v54  ;;  %v843_v54 = vunpack.c.l.s8.bf16 %v619_v52 }
 0x257   : > { %6935 = vst [vmem:[#allocation20_spill] sm:$0xff] %v6353_v11  ;;  %2424 = vmatmul.mubr.bf16.gmra.mrb[216].mxu1 %v826_v26  ;;  %2142 = vmatprep.mubr.bf16.mxu0 %v833_v31 }
 0x258   : > { %2431 = vmatprep.mubr.bf16.mxu1 %v835_v19  ;;  %v616_v19 = vld [vmem:[%s5907_s13 + $0x320] sm:$0xff] }
 0x259   : > { %v1606_v35 = vpop.f32.mrb[112].mxu0 }
 0x25a   : > { %v1895_v37 = vpop.f32.mrb[112].mxu1  ;;  %v1608_v51 = vpop.f32.mrb[113].mxu0 }
 0x25b   : > { %v6357_v1 = vadd.f32 %v1895_v37, %v1606_v35  ;;  %v1897_v41 = vpop.f32.mrb[113].mxu1  ;;  %v1609_v13 = vpop.f32.mrb[114].mxu0  ;;  %v618_v51 = vld [vmem:[%s5907_s13 + $0x330] sm:$0xff]  ;;  %v840_v37 = vunpack.c.l.s8.bf16 %v616_v19 }
 0x25c   : > { %v1898_v53 = vpop.f32.mrb[114].mxu1  ;;  %v1611_v10 = vpop.f32.mrb[115].mxu0 }
 0x25d   : > { %6936 = vst [vmem:[#allocation21_spill] sm:$0xff] %v6357_v1  ;;  %v6359_v26 = vadd.f32 %v1898_v53, %v1609_v13  ;;  %v1900_v31 = vpop.f32.mrb[115].mxu1  ;;  %v842_v1 = vunpack.c.l.s8.bf16 %v618_v51  ;;  %v849_v13 = vunpack.c.h.s8.bf16 %v617_v42 }
 0x25e   : > { %2143 = vmatmul.mubr.bf16.gmra.mrb[220].mxu0 %v832_v29  ;;  %v851_v29 = vunpack.c.h.s8.bf16 %v619_v52  ;;  %v850_v52 = vunpack.c.h.s8.bf16 %v618_v51 }
 0x25f   : > { %6937 = vst [vmem:[#allocation22_spill] sm:$0xff] %v6359_v26  ;;  %2432 = vmatmul.mubr.bf16.gmra.mrb[220].mxu1 %v834_v58  ;;  %2150 = vmatprep.mubr.bf16.mxu0 %v841_v28  ;;  %v627_v26 = vld [vmem:[%s5907_s13 + $0x378] sm:$0xff] }
 0x260   : > { %2439 = vmatprep.mubr.bf16.mxu1 %v843_v54  ;;  %v625_v54 = vld [vmem:[%s5907_s13 + $0x368] sm:$0xff] }
 0x261   : > { %v1614_v44 = vpop.f32.mrb[116].mxu0 }
 0x262   : > { %v1903_v11 = vpop.f32.mrb[116].mxu1  ;;  %v1616_v35 = vpop.f32.mrb[117].mxu0 }
 0x263   : > { %v6363_v41 = vadd.f32 %v1903_v11, %v1614_v44  ;;  %v1905_v14 = vpop.f32.mrb[117].mxu1  ;;  %v1617_v10 = vpop.f32.mrb[118].mxu0 }
 0x264   : > { %v1906_v53 = vpop.f32.mrb[118].mxu1  ;;  %v1619_v31 = vpop.f32.mrb[119].mxu0  ;;  %v848_v14 = vunpack.c.h.s8.bf16 %v616_v19 }
 0x265   : > { %6938 = vst [vmem:[#allocation23_spill] sm:$0xff] %v6363_v41  ;;  %v6365_v58 = vadd.f32 %v1906_v53, %v1617_v10  ;;  %v1908_v28 = vpop.f32.mrb[119].mxu1  ;;  %v857_v10 = vunpack.c.l.s8.bf16 %v625_v54 }
 0x266   : > { %2151 = vmatmul.mubr.bf16.gmra.mrb[224].mxu0 %v840_v37  ;;  %v859_v37 = vunpack.c.l.s8.bf16 %v627_v26 }
 0x267   : > { %6939 = vst [vmem:[#allocation24_spill] sm:$0xff] %v6365_v58  ;;  %2440 = vmatmul.mubr.bf16.gmra.mrb[224].mxu1 %v842_v1  ;;  %2158 = vmatprep.mubr.bf16.mxu0 %v849_v13 }
 0x268   : > { %2447 = vmatprep.mubr.bf16.mxu1 %v851_v29  ;;  %v624_v29 = vld [vmem:[%s5907_s13 + $0x360] sm:$0xff] }
 0x269   : > { %v1622_v35 = vpop.f32.mrb[120].mxu0 }
 0x26a   : > { %v1911_v11 = vpop.f32.mrb[120].mxu1  ;;  %v1624_v44 = vpop.f32.mrb[121].mxu0 }
 0x26b   : > { %v6369_v41 = vadd.f32 %v1911_v11, %v1622_v35  ;;  %v1913_v42 = vpop.f32.mrb[121].mxu1  ;;  %v1625_v31 = vpop.f32.mrb[122].mxu0  ;;  %v626_v44 = vld [vmem:[%s5907_s13 + $0x370] sm:$0xff]  ;;  %v856_v11 = vunpack.c.l.s8.bf16 %v624_v29 }
 0x26c   : > { %v1914_v53 = vpop.f32.mrb[122].mxu1  ;;  %v1627_v28 = vpop.f32.mrb[123].mxu0 }
 0x26d   : > { %6940 = vst [vmem:[#allocation25_spill] sm:$0xff] %v6369_v41  ;;  %v6371_v1 = vadd.f32 %v1914_v53, %v1625_v31  ;;  %v1916_v13 = vpop.f32.mrb[123].mxu1  ;;  %v858_v41 = vunpack.c.l.s8.bf16 %v626_v44  ;;  %v865_v31 = vunpack.c.h.s8.bf16 %v625_v54 }
 0x26e   : > { %2159 = vmatmul.mubr.bf16.gmra.mrb[228].mxu0 %v848_v14  ;;  %v867_v14 = vunpack.c.h.s8.bf16 %v627_v26  ;;  %v866_v26 = vunpack.c.h.s8.bf16 %v626_v44  ;;  %v634_v44 = vld [vmem:[%s5907_s13 + $0x3b0] sm:$0xff] }
 0x26f   : > { %6941 = vst [vmem:[#allocation26_spill] sm:$0xff] %v6371_v1  ;;  %2448 = vmatmul.mubr.bf16.gmra.mrb[228].mxu1 %v850_v52  ;;  %2166 = vmatprep.mubr.bf16.mxu0 %v857_v10  ;;  %v635_v1 = vld [vmem:[%s5907_s13 + $0x3b8] sm:$0xff] }
 0x270   : > { %2455 = vmatprep.mubr.bf16.mxu1 %v859_v37  ;;  %v633_v37 = vld [vmem:[%s5907_s13 + $0x3a8] sm:$0xff] }
 0x271   : > { %v1630_v19 = vpop.f32.mrb[124].mxu0 }
 0x272   : > { %v1919_v58 = vpop.f32.mrb[124].mxu1  ;;  %v1632_v35 = vpop.f32.mrb[125].mxu0 }
 0x273   : > { %v6375_v42 = vadd.f32 %v1919_v58, %v1630_v19  ;;  %v1921_v51 = vpop.f32.mrb[125].mxu1  ;;  %v1633_v28 = vpop.f32.mrb[126].mxu0 }
 0x274   : > { %v1922_v53 = vpop.f32.mrb[126].mxu1  ;;  %v1635_v13 = vpop.f32.mrb[127].mxu0 }
 0x275   : > { %6942 = vst [vmem:[#allocation27_spill] sm:$0xff] %v6375_v42  ;;  %v6377_v52 = vadd.f32 %v1922_v53, %v1633_v28  ;;  %v1924_v10 = vpop.f32.mrb[127].mxu1  ;;  %v864_v42 = vunpack.c.h.s8.bf16 %v624_v29  ;;  %v873_v28 = vunpack.c.l.s8.bf16 %v633_v37  ;;  %v632_v29 = vld [vmem:[%s5907_s13 + $0x3a0] sm:$0xff] }
 0x276   : > { %2167 = vmatmul.mubr.bf16.gmra.mrb[232].mxu0 %v856_v11  ;;  %v901_v10 = vld [vmem:[#allocation2 + $0x8] sm:$0xff] }
 0x277   : > { %6943 = vst [vmem:[#allocation28_spill] sm:$0xff] %v6377_v52  ;;  %2456 = vmatmul.mubr.bf16.gmra.mrb[232].mxu1 %v858_v41  ;;  %2174 = vmatprep.mubr.bf16.mxu0 %v865_v31 }
 0x278   : > { %2463 = vmatprep.mubr.bf16.mxu1 %v867_v14  ;;  %v875_v14 = vunpack.c.l.s8.bf16 %v635_v1 }
 0x279   : > { %v1960_v35 = vpop.f32.mrb[128].mxu0 }
 0x27a   : > { %v1961_v58 = vadd.f32 %v1960_v35, %v6189_v47  ;;  %v2249_v19 = vpop.f32.mrb[128].mxu1  ;;  %v1962_v51 = vpop.f32.mrb[129].mxu0 }
 0x27b   : > { %v2251_v54 = vpop.f32.mrb[129].mxu1  ;;  %v1963_v13 = vpop.f32.mrb[130].mxu0 }
 0x27c   : > { %v2250_v53 = vadd.f32 %v2249_v19, %v1961_v58  ;;  %v1964_v41 = vadd.f32 %v1963_v13, %v6191_v55  ;;  %v2252_v11 = vpop.f32.mrb[130].mxu1  ;;  %v1965_v31 = vpop.f32.mrb[131].mxu0  ;;  %v872_v54 = vunpack.c.l.s8.bf16 %v632_v29  ;;  %v902_v13 = vld [vmem:[#allocation2 + $0x10] sm:$0xff] }
 0x27d   : > { %v2254_v52 = vpop.f32.mrb[131].mxu1 }
 0x27e   : > { %v2504_v5 = vadd.f32 %v2250_v53, %v900_v62  ;;  %v2253_v47 = vadd.f32 %v2252_v11, %v1964_v41  ;;  %2175 = vmatmul.mubr.bf16.gmra.mrb[236].mxu0 %v864_v42  ;;  %v874_v62 = vunpack.c.l.s8.bf16 %v634_v44  ;;  %v881_v53 = vunpack.c.h.s8.bf16 %v633_v37  ;;  %v903_v11 = vld [vmem:[#allocation2 + $0x18] sm:$0xff] }
 0x27f   : > { %2464 = vmatmul.mubr.bf16.gmra.mrb[236].mxu1 %v866_v26  ;;  %2182 = vmatprep.mubr.bf16.mxu0 %v873_v28  ;;  %v883_v41 = vunpack.c.h.s8.bf16 %v635_v1  ;;  %v904_v1 = vld [vmem:[#allocation2 + $0x20] sm:$0xff] }
 0x280   : > { %2568 = vst [vmem:[#allocation2] sm:$0xff] %v2504_v5  ;;  %v2505_v35 = vadd.f32 %v2253_v47, %v901_v10  ;;  %2471 = vmatprep.mubr.bf16.mxu1 %v875_v14 }
 0x281   : > { %v1968_v51 = vpop.f32.mrb[132].mxu0 }
 0x282   : > { %2569 = vst [vmem:[#allocation2 + $0x8] sm:$0xff] %v2505_v35  ;;  %v1969_v58 = vadd.f32 %v1968_v51, %v6195_v63  ;;  %v2257_v55 = vpop.f32.mrb[132].mxu1  ;;  %v1970_v19 = vpop.f32.mrb[133].mxu0  ;;  %v641_v35 = vld [vmem:[%s5907_s13 + $0x3e8] sm:$0xff]  ;;  %v643_v51 = vld [vmem:[%s5907_s13 + $0x3f8] sm:$0xff] }
 0x283   : > { %v2259_v31 = vpop.f32.mrb[133].mxu1  ;;  %v1971_v52 = vpop.f32.mrb[134].mxu0  ;;  %v880_v19 = vunpack.c.h.s8.bf16 %v632_v29  ;;  %v640_v29 = vld [vmem:[%s5907_s13 + $0x3e0] sm:$0xff] }
 0x284   : > { %v2258_v42 = vadd.f32 %v2257_v55, %v1969_v58  ;;  %v1972_v26 = vadd.f32 %v1971_v52, %v6197_v8  ;;  %v2260_v5 = vpop.f32.mrb[134].mxu1  ;;  %v1973_v28 = vpop.f32.mrb[135].mxu0  ;;  %v882_v52 = vunpack.c.h.s8.bf16 %v634_v44  ;;  %v642_v44 = vld [vmem:[%s5907_s13 + $0x3f0] sm:$0xff]  ;;  %s2637_s13 = sshra.s32 (!%p4782_p7), %s4783_s12, 3 }
 0x285   : > { %v2262_v14 = vpop.f32.mrb[135].mxu1  ;;  %v905_v28 = vld [vmem:[#allocation2 + $0x28] sm:$0xff]  ;;  %s4784_s9 = sshll.u32 (!%p4782_p7), %s2637_s13, 2 }
 0x286   : > { %v2506_v10 = vadd.f32 %v2258_v42, %v902_v13  ;;  %v2261_v63 = vadd.f32 %v2260_v5, %v1972_v26  ;;  %2183 = vmatmul.mubr.bf16.gmra.mrb[240].mxu0 %v872_v54  ;;  %v889_v54 = vunpack.c.l.s8.bf16 %v641_v35  ;;  %v891_v5 = vunpack.c.l.s8.bf16 %v643_v51  ;;  %s6509_s29 = scalar_lea.vmem (!%p4782_p7), %s6908_s1, %s4784_s9 }
 0x287   : > { %2472 = vmatmul.mubr.bf16.gmra.mrb[240].mxu1 %v874_v62  ;;  %2190 = vmatprep.mubr.bf16.mxu0 %v881_v53 }
 0x288   : > { %2570 = vst [vmem:[#allocation2 + $0x10] sm:$0xff] %v2506_v10  ;;  %v2507_v47 = vadd.f32 %v2261_v63, %v903_v11  ;;  %2479 = vmatprep.mubr.bf16.mxu1 %v883_v41 }
 0x289   : > { %v1976_v37 = vpop.f32.mrb[136].mxu0 }
 0x28a   : > { %2571 = vst [vmem:[#allocation2 + $0x18] sm:$0xff] %v2507_v47  ;;  %v1977_v8 = vadd.f32 %v1976_v37, %v6201_v16  ;;  %v2265_v58 = vpop.f32.mrb[136].mxu1  ;;  %v1978_v55 = vpop.f32.mrb[137].mxu0  ;;  %v888_v37 = vunpack.c.l.s8.bf16 %v640_v29 }
 0x28b   : > { %v2267_v31 = vpop.f32.mrb[137].mxu1  ;;  %v1979_v13 = vpop.f32.mrb[138].mxu0 }
 0x28c   : > { %v2266_v62 = vadd.f32 %v2265_v58, %v1977_v8  ;;  %v1980_v53 = vadd.f32 %v1979_v13, %v6203_v24  ;;  %v2268_v42 = vpop.f32.mrb[138].mxu1  ;;  %v1981_v26 = vpop.f32.mrb[139].mxu0  ;;  %v906_v8 = vld [vmem:[#allocation2 + $0x30] sm:$0xff]  ;;  %v897_v31 = vunpack.c.h.s8.bf16 %v641_v35 }
 0x28d   : > { %v2270_v41 = vpop.f32.mrb[139].mxu1 }
 0x28e   : > { %v2508_v11 = vadd.f32 %v2266_v62, %v904_v1  ;;  %v2269_v16 = vadd.f32 %v2268_v42, %v1980_v53  ;;  %2191 = vmatmul.mubr.bf16.gmra.mrb[244].mxu0 %v880_v19  ;;  %v890_v1 = vunpack.c.l.s8.bf16 %v642_v44  ;;  %v899_v62 = vunpack.c.h.s8.bf16 %v643_v51  ;;  %v907_v53 = vld [vmem:[#allocation2 + $0x38] sm:$0xff] }
 0x28f   : > { %2480 = vmatmul.mubr.bf16.gmra.mrb[244].mxu1 %v882_v52  ;;  %2198 = vmatprep.mubr.bf16.mxu0 %v889_v54 }
 0x290   : > { %2572 = vst [vmem:[#allocation2 + $0x20] sm:$0xff] %v2508_v11  ;;  %v2509_v14 = vadd.f32 %v2269_v16, %v905_v28  ;;  %2487 = vmatprep.mubr.bf16.mxu1 %v891_v5  ;;  %v908_v16 = vld [vmem:[#allocation2 + $0x40] sm:$0xff] }
 0x291   : > { %v1984_v10 = vpop.f32.mrb[140].mxu0 }
 0x292   : > { %2573 = vst [vmem:[#allocation2 + $0x28] sm:$0xff] %v2509_v14  ;;  %v1985_v63 = vadd.f32 %v1984_v10, %v6207_v32  ;;  %v2273_v24 = vpop.f32.mrb[140].mxu1  ;;  %v1986_v47 = vpop.f32.mrb[141].mxu0  ;;  %v898_v10 = vunpack.c.h.s8.bf16 %v642_v44  ;;  %v910_v44 = vld [vmem:[#allocation2 + $0x50] sm:$0xff] }
 0x293   : > { %v2275_v58 = vpop.f32.mrb[141].mxu1  ;;  %v1987_v55 = vpop.f32.mrb[142].mxu0 }
 0x294   : > { %v2274_v19 = vadd.f32 %v2273_v24, %v1985_v63  ;;  %v1988_v13 = vadd.f32 %v1987_v55, %v6209_v39  ;;  %v2276_v52 = vpop.f32.mrb[142].mxu1  ;;  %v1989_v54 = vpop.f32.mrb[143].mxu0  ;;  %v896_v39 = vunpack.c.h.s8.bf16 %v640_v29 }
 0x295   : > { %v2278_v42 = vpop.f32.mrb[143].mxu1 }
 0x296   : > { %v2510_v26 = vadd.f32 %v2274_v19, %v906_v8  ;;  %v2277_v5 = vadd.f32 %v2276_v52, %v1988_v13  ;;  %2199 = vmatmul.mubr.bf16.gmra.mrb[248].mxu0 %v888_v37  ;;  %v909_v8 = vld [vmem:[#allocation2 + $0x48] sm:$0xff] }
 0x297   : > { %2488 = vmatmul.mubr.bf16.gmra.mrb[248].mxu1 %v890_v1  ;;  %2206 = vmatprep.mubr.bf16.mxu0 %v897_v31 }
 0x298   : > { %2574 = vst [vmem:[#allocation2 + $0x30] sm:$0xff] %v2510_v26  ;;  %v2511_v32 = vadd.f32 %v2277_v5, %v907_v53  ;;  %2495 = vmatprep.mubr.bf16.mxu1 %v899_v62  ;;  %v911_v26 = vld [vmem:[#allocation2 + $0x58] sm:$0xff] }
 0x299   : > { %v1992_v28 = vpop.f32.mrb[144].mxu0 }
 0x29a   : > { %2575 = vst [vmem:[#allocation2 + $0x38] sm:$0xff] %v2511_v32  ;;  %v1993_v35 = vadd.f32 %v1992_v28, %v6213_v48  ;;  %v2281_v41 = vpop.f32.mrb[144].mxu1  ;;  %v1994_v11 = vpop.f32.mrb[145].mxu0 }
 0x29b   : > { %v2283_v14 = vpop.f32.mrb[145].mxu1  ;;  %v1995_v51 = vpop.f32.mrb[146].mxu0 }
 0x29c   : > { %v2282_v63 = vadd.f32 %v2281_v41, %v1993_v35  ;;  %v1996_v24 = vadd.f32 %v1995_v51, %v6215_v57  ;;  %v2284_v47 = vpop.f32.mrb[146].mxu1  ;;  %v1997_v37 = vpop.f32.mrb[147].mxu0 }
 0x29d   : > { %v2286_v58 = vpop.f32.mrb[147].mxu1 }
 0x29e   : > { %v2512_v55 = vadd.f32 %v2282_v63, %v908_v16  ;;  %v2285_v1 = vadd.f32 %v2284_v47, %v1996_v24  ;;  %2207 = vmatmul.mubr.bf16.gmra.mrb[252].mxu0 %v896_v39  ;;  %v912_v16 = vld [vmem:[#allocation2 + $0x60] sm:$0xff]  ;;  %v913_v47 = vld [vmem:[#allocation2 + $0x68] sm:$0xff] }
 0x29f   : > { %2496 = vmatmul.mubr.bf16.gmra.mrb[252].mxu1 %v898_v10 }
 0x2a0   : > { %2576 = vst [vmem:[#allocation2 + $0x40] sm:$0xff] %v2512_v55  ;;  %v2513_v48 = vadd.f32 %v2285_v1, %v909_v8 }
 0x2a1   : > { %v2000_v31 = vpop.f32.mrb[148].mxu0 }
 0x2a2   : > { %2577 = vst [vmem:[#allocation2 + $0x48] sm:$0xff] %v2513_v48  ;;  %v2001_v29 = vadd.f32 %v2000_v31, %v6219_v2  ;;  %v2289_v19 = vpop.f32.mrb[148].mxu1  ;;  %v2002_v13 = vpop.f32.mrb[149].mxu0 }
 0x2a3   : > { %v2291_v52 = vpop.f32.mrb[149].mxu1  ;;  %v2003_v54 = vpop.f32.mrb[150].mxu0 }
 0x2a4   : > { %v2290_v57 = vadd.f32 %v2289_v19, %v2001_v29  ;;  %v2004_v62 = vadd.f32 %v2003_v54, %v6221_v12  ;;  %v2292_v53 = vpop.f32.mrb[150].mxu1  ;;  %v2005_v42 = vpop.f32.mrb[151].mxu0  ;;  %v914_v29 = vld [vmem:[#allocation2 + $0x70] sm:$0xff] }
 0x2a5   : > { %v2294_v5 = vpop.f32.mrb[151].mxu1 }
 0x2a6   : > { %v2514_v32 = vadd.f32 %v2290_v57, %v910_v44  ;;  %v2293_v28 = vadd.f32 %v2292_v53, %v2004_v62  ;;  %v915_v57 = vld [vmem:[#allocation2 + $0x78] sm:$0xff] }
 0x2a8   : > { %2578 = vst [vmem:[#allocation2 + $0x50] sm:$0xff] %v2514_v32  ;;  %v2515_v35 = vadd.f32 %v2293_v28, %v911_v26 }
 0x2a9   : > { %v2008_v41 = vpop.f32.mrb[152].mxu0 }
 0x2aa   : > { %2579 = vst [vmem:[#allocation2 + $0x58] sm:$0xff] %v2515_v35  ;;  %v2009_v2 = vadd.f32 %v2008_v41, %v6225_v21  ;;  %v2297_v11 = vpop.f32.mrb[152].mxu1  ;;  %v2010_v39 = vpop.f32.mrb[153].mxu0  ;;  %v916_v35 = vld [vmem:[#allocation2 + $0x80] sm:$0xff] }
 0x2ab   : > { %v2299_v14 = vpop.f32.mrb[153].mxu1  ;;  %v2011_v51 = vpop.f32.mrb[154].mxu0 }
 0x2ac   : > { %v2298_v10 = vadd.f32 %v2297_v11, %v2009_v2  ;;  %v2012_v12 = vadd.f32 %v2011_v51, %v6227_v30  ;;  %v2300_v63 = vpop.f32.mrb[154].mxu1  ;;  %v2013_v24 = vpop.f32.mrb[155].mxu0  ;;  %v917_v14 = vld [vmem:[#allocation2 + $0x88] sm:$0xff] }
 0x2ad   : > { %v2302_v37 = vpop.f32.mrb[155].mxu1 }
 0x2ae   : > { %v2516_v8 = vadd.f32 %v2298_v10, %v912_v16  ;;  %v2301_v58 = vadd.f32 %v2300_v63, %v2012_v12 }
 0x2b0   : > { %2580 = vst [vmem:[#allocation2 + $0x60] sm:$0xff] %v2516_v8  ;;  %v2517_v55 = vadd.f32 %v2301_v58, %v913_v47  ;;  %v918_v8 = vld [vmem:[#allocation2 + $0x90] sm:$0xff] }
 0x2b1   : > { %v2016_v1 = vpop.f32.mrb[156].mxu0 }
 0x2b2   : > { %2581 = vst [vmem:[#allocation2 + $0x68] sm:$0xff] %v2517_v55  ;;  %v2017_v21 = vadd.f32 %v2016_v1, %v6231_v38  ;;  %v2305_v48 = vpop.f32.mrb[156].mxu1  ;;  %v2018_v31 = vpop.f32.mrb[157].mxu0 }
 0x2b3   : > { %v2307_v19 = vpop.f32.mrb[157].mxu1  ;;  %v2019_v13 = vpop.f32.mrb[158].mxu0  ;;  %v919_v31 = vld [vmem:[#allocation2 + $0x98] sm:$0xff] }
 0x2b4   : > { %v2306_v44 = vadd.f32 %v2305_v48, %v2017_v21  ;;  %v2020_v30 = vadd.f32 %v2019_v13, %v6233_v49  ;;  %v2308_v52 = vpop.f32.mrb[158].mxu1  ;;  %v2021_v54 = vpop.f32.mrb[159].mxu0 }
 0x2b5   : > { %v2310_v62 = vpop.f32.mrb[159].mxu1 }
 0x2b6   : > { %v2518_v53 = vadd.f32 %v2306_v44, %v914_v29  ;;  %v2309_v42 = vadd.f32 %v2308_v52, %v2020_v30 }
 0x2b8   : > { %2582 = vst [vmem:[#allocation2 + $0x70] sm:$0xff] %v2518_v53  ;;  %v2519_v26 = vadd.f32 %v2309_v42, %v915_v57  ;;  %v920_v57 = vld [vmem:[#allocation2 + $0xa0] sm:$0xff] }
 0x2b9   : > { %v2024_v5 = vpop.f32.mrb[160].mxu0 }
 0x2ba   : > { %2583 = vst [vmem:[#allocation2 + $0x78] sm:$0xff] %v2519_v26  ;;  %v2025_v38 = vadd.f32 %v2024_v5, %v6237_v59  ;;  %v2313_v32 = vpop.f32.mrb[160].mxu1  ;;  %v2026_v28 = vpop.f32.mrb[161].mxu0 }
 0x2bb   : > { %v2315_v41 = vpop.f32.mrb[161].mxu1  ;;  %v2027_v2 = vpop.f32.mrb[162].mxu0 }
 0x2bc   : > { %v2314_v11 = vadd.f32 %v2313_v32, %v2025_v38  ;;  %v2028_v49 = vadd.f32 %v2027_v2, %v6239_v6  ;;  %v2316_v39 = vpop.f32.mrb[162].mxu1  ;;  %v2029_v16 = vpop.f32.mrb[163].mxu0  ;;  %v921_v38 = vld [vmem:[#allocation2 + $0xa8] sm:$0xff] }
 0x2bd   : > { %v2318_v51 = vpop.f32.mrb[163].mxu1 }
 0x2be   : > { %v2520_v10 = vadd.f32 %v2314_v11, %v916_v35  ;;  %v2317_v12 = vadd.f32 %v2316_v39, %v2028_v49  ;;  %v922_v39 = vld [vmem:[#allocation2 + $0xb0] sm:$0xff] }
 0x2c0   : > { %2584 = vst [vmem:[#allocation2 + $0x80] sm:$0xff] %v2520_v10  ;;  %v2521_v63 = vadd.f32 %v2317_v12, %v917_v14 }
 0x2c1   : > { %v2032_v24 = vpop.f32.mrb[164].mxu0 }
 0x2c2   : > { %2585 = vst [vmem:[#allocation2 + $0x88] sm:$0xff] %v2521_v63  ;;  %v2033_v59 = vadd.f32 %v2032_v24, %v6243_v17  ;;  %v2321_v47 = vpop.f32.mrb[164].mxu1  ;;  %v2034_v37 = vpop.f32.mrb[165].mxu0  ;;  %v923_v63 = vld [vmem:[#allocation2 + $0xb8] sm:$0xff] }
 0x2c3   : > { %v2323_v58 = vpop.f32.mrb[165].mxu1  ;;  %v2035_v55 = vpop.f32.mrb[166].mxu0 }
 0x2c4   : > { %v2322_v1 = vadd.f32 %v2321_v47, %v2033_v59  ;;  %v2036_v6 = vadd.f32 %v2035_v55, %v6245_v27  ;;  %v2324_v21 = vpop.f32.mrb[166].mxu1  ;;  %v2037_v48 = vpop.f32.mrb[167].mxu0 }
 0x2c5   : > { %v2326_v29 = vpop.f32.mrb[167].mxu1 }
 0x2c6   : > { %v2522_v19 = vadd.f32 %v2322_v1, %v918_v8  ;;  %v2325_v13 = vadd.f32 %v2324_v21, %v2036_v6  ;;  %v924_v1 = vld [vmem:[#allocation2 + $0xc0] sm:$0xff] }
 0x2c8   : > { %2586 = vst [vmem:[#allocation2 + $0x90] sm:$0xff] %v2522_v19  ;;  %v2523_v44 = vadd.f32 %v2325_v13, %v919_v31  ;;  %v925_v19 = vld [vmem:[#allocation2 + $0xc8] sm:$0xff] }
 0x2c9   : > { %v2040_v30 = vpop.f32.mrb[168].mxu0 }
 0x2ca   : > { %2587 = vst [vmem:[#allocation2 + $0x98] sm:$0xff] %v2523_v44  ;;  %v2041_v17 = vadd.f32 %v2040_v30, %v6249_v36  ;;  %v2329_v52 = vpop.f32.mrb[168].mxu1  ;;  %v2042_v54 = vpop.f32.mrb[169].mxu0 }
 0x2cb   : > { %v2331_v62 = vpop.f32.mrb[169].mxu1  ;;  %v2043_v53 = vpop.f32.mrb[170].mxu0 }
 0x2cc   : > { %v2330_v42 = vadd.f32 %v2329_v52, %v2041_v17  ;;  %v2044_v27 = vadd.f32 %v2043_v53, %v6251_v46  ;;  %v2332_v26 = vpop.f32.mrb[170].mxu1  ;;  %v2045_v5 = vpop.f32.mrb[171].mxu0  ;;  %v926_v62 = vld [vmem:[#allocation2 + $0xd0] sm:$0xff] }
 0x2cd   : > { %v2334_v32 = vpop.f32.mrb[171].mxu1 }
 0x2ce   : > { %v2524_v28 = vadd.f32 %v2330_v42, %v920_v57  ;;  %v2333_v35 = vadd.f32 %v2332_v26, %v2044_v27 }
 0x2d0   : > { %2588 = vst [vmem:[#allocation2 + $0xa0] sm:$0xff] %v2524_v28  ;;  %v2525_v41 = vadd.f32 %v2333_v35, %v921_v38  ;;  %v927_v38 = vld [vmem:[#allocation2 + $0xd8] sm:$0xff] }
 0x2d1   : > { %v2048_v2 = vpop.f32.mrb[172].mxu0 }
 0x2d2   : > { %2589 = vst [vmem:[#allocation2 + $0xa8] sm:$0xff] %v2525_v41  ;;  %v2049_v36 = vadd.f32 %v2048_v2, %v6255_v60  ;;  %v2337_v11 = vpop.f32.mrb[172].mxu1  ;;  %v2050_v49 = vpop.f32.mrb[173].mxu0 }
 0x2d3   : > { %v2339_v16 = vpop.f32.mrb[173].mxu1  ;;  %v2051_v14 = vpop.f32.mrb[174].mxu0  ;;  %v928_v49 = vld [vmem:[#allocation2 + $0xe0] sm:$0xff] }
 0x2d4   : > { %v2338_v51 = vadd.f32 %v2337_v11, %v2049_v36  ;;  %v2052_v46 = vadd.f32 %v2051_v14, %v6257_v9  ;;  %v2340_v10 = vpop.f32.mrb[174].mxu1  ;;  %v2053_v12 = vpop.f32.mrb[175].mxu0 }
 0x2d5   : > { %v2342_v24 = vpop.f32.mrb[175].mxu1 }
 0x2d6   : > { %v2526_v59 = vadd.f32 %v2338_v51, %v922_v39  ;;  %v2341_v47 = vadd.f32 %v2340_v10, %v2052_v46  ;;  %v929_v10 = vld [vmem:[#allocation2 + $0xe8] sm:$0xff] }
 0x2d8   : > { %2590 = vst [vmem:[#allocation2 + $0xb0] sm:$0xff] %v2526_v59  ;;  %v2527_v37 = vadd.f32 %v2341_v47, %v923_v63 }
 0x2d9   : > { %v2056_v8 = vpop.f32.mrb[176].mxu0 }
 0x2da   : > { %2591 = vst [vmem:[#allocation2 + $0xb8] sm:$0xff] %v2527_v37  ;;  %v2057_v60 = vadd.f32 %v2056_v8, %v6261_v20  ;;  %v2345_v58 = vpop.f32.mrb[176].mxu1  ;;  %v2058_v55 = vpop.f32.mrb[177].mxu0 }
 0x2db   : > { %v2347_v6 = vpop.f32.mrb[177].mxu1  ;;  %v2059_v21 = vpop.f32.mrb[178].mxu0 }
 0x2dc   : > { %v2346_v48 = vadd.f32 %v2345_v58, %v2057_v60  ;;  %v2060_v9 = vadd.f32 %v2059_v21, %v6263_v33  ;;  %v2348_v31 = vpop.f32.mrb[178].mxu1  ;;  %v2061_v29 = vpop.f32.mrb[179].mxu0  ;;  %v930_v60 = vld [vmem:[#allocation2 + $0xf0] sm:$0xff] }
 0x2dd   : > { %v2350_v13 = vpop.f32.mrb[179].mxu1 }
 0x2de   : > { %v2528_v44 = vadd.f32 %v2346_v48, %v924_v1  ;;  %v2349_v30 = vadd.f32 %v2348_v31, %v2060_v9  ;;  %v931_v48 = vld [vmem:[#allocation2 + $0xf8] sm:$0xff] }
 0x2e0   : > { %2592 = vst [vmem:[#allocation2 + $0xc0] sm:$0xff] %v2528_v44  ;;  %v2529_v17 = vadd.f32 %v2349_v30, %v925_v19 }
 0x2e1   : > { %v2064_v52 = vpop.f32.mrb[180].mxu0 }
 0x2e2   : > { %2593 = vst [vmem:[#allocation2 + $0xc8] sm:$0xff] %v2529_v17  ;;  %v2065_v20 = vadd.f32 %v2064_v52, %v6267_v43  ;;  %v2353_v54 = vpop.f32.mrb[180].mxu1  ;;  %v2066_v57 = vpop.f32.mrb[181].mxu0  ;;  %v932_v17 = vld [vmem:[#allocation2 + $0x100] sm:$0xff] }
 0x2e3   : > { %v2355_v53 = vpop.f32.mrb[181].mxu1  ;;  %v2067_v42 = vpop.f32.mrb[182].mxu0 }
 0x2e4   : > { %v2354_v27 = vadd.f32 %v2353_v54, %v2065_v20  ;;  %v2068_v33 = vadd.f32 %v2067_v42, %v6269_v56  ;;  %v2356_v26 = vpop.f32.mrb[182].mxu1  ;;  %v2069_v5 = vpop.f32.mrb[183].mxu0  ;;  %v933_v53 = vld [vmem:[#allocation2 + $0x108] sm:$0xff] }
 0x2e5   : > { %v2358_v32 = vpop.f32.mrb[183].mxu1 }
 0x2e6   : > { %v2530_v28 = vadd.f32 %v2354_v27, %v926_v62  ;;  %v2357_v35 = vadd.f32 %v2356_v26, %v2068_v33 }
 0x2e8   : > { %2594 = vst [vmem:[#allocation2 + $0xd0] sm:$0xff] %v2530_v28  ;;  %v2531_v41 = vadd.f32 %v2357_v35, %v927_v38  ;;  %v934_v28 = vld [vmem:[#allocation2 + $0x110] sm:$0xff] }
 0x2e9   : > { %v2072_v2 = vpop.f32.mrb[184].mxu0 }
 0x2ea   : > { %2595 = vst [vmem:[#allocation2 + $0xd8] sm:$0xff] %v2531_v41  ;;  %v2073_v43 = vadd.f32 %v2072_v2, %v6273_v7  ;;  %v2361_v36 = vpop.f32.mrb[184].mxu1  ;;  %v2074_v11 = vpop.f32.mrb[185].mxu0 }
 0x2eb   : > { %v2363_v39 = vpop.f32.mrb[185].mxu1  ;;  %v2075_v16 = vpop.f32.mrb[186].mxu0  ;;  %v935_v11 = vld [vmem:[#allocation2 + $0x118] sm:$0xff] }
 0x2ec   : > { %v2362_v14 = vadd.f32 %v2361_v36, %v2073_v43  ;;  %v2076_v56 = vadd.f32 %v2075_v16, %v6275_v22  ;;  %v2364_v51 = vpop.f32.mrb[186].mxu1  ;;  %v2077_v46 = vpop.f32.mrb[187].mxu0 }
 0x2ed   : > { %v2366_v12 = vpop.f32.mrb[187].mxu1 }
 0x2ee   : > { %v2532_v63 = vadd.f32 %v2362_v14, %v928_v49  ;;  %v2365_v24 = vadd.f32 %v2364_v51, %v2076_v56 }
 0x2f0   : > { %2596 = vst [vmem:[#allocation2 + $0xe0] sm:$0xff] %v2532_v63  ;;  %v2533_v59 = vadd.f32 %v2365_v24, %v929_v10  ;;  %v936_v10 = vld [vmem:[#allocation2 + $0x120] sm:$0xff] }
 0x2f1   : > { %v2080_v47 = vpop.f32.mrb[188].mxu0 }
 0x2f2   : > { %2597 = vst [vmem:[#allocation2 + $0xe8] sm:$0xff] %v2533_v59  ;;  %v2081_v7 = vadd.f32 %v2080_v47, %v6279_v34  ;;  %v2369_v37 = vpop.f32.mrb[188].mxu1  ;;  %v2082_v8 = vpop.f32.mrb[189].mxu0 }
 0x2f3   : > { %v2371_v58 = vpop.f32.mrb[189].mxu1  ;;  %v2083_v55 = vpop.f32.mrb[190].mxu0 }
 0x2f4   : > { %v2370_v1 = vadd.f32 %v2369_v37, %v2081_v7  ;;  %v2084_v22 = vadd.f32 %v2083_v55, %v6281_v50  ;;  %v2372_v6 = vpop.f32.mrb[190].mxu1  ;;  %v2085_v21 = vpop.f32.mrb[191].mxu0  ;;  %v937_v7 = vld [vmem:[#allocation2 + $0x128] sm:$0xff] }
 0x2f5   : > { %v2374_v9 = vpop.f32.mrb[191].mxu1 }
 0x2f6   : > { %v2534_v31 = vadd.f32 %v2370_v1, %v930_v60  ;;  %v2373_v29 = vadd.f32 %v2372_v6, %v2084_v22  ;;  %v938_v6 = vld [vmem:[#allocation2 + $0x130] sm:$0xff] }
 0x2f8   : > { %2598 = vst [vmem:[#allocation2 + $0xf0] sm:$0xff] %v2534_v31  ;;  %v2535_v19 = vadd.f32 %v2373_v29, %v931_v48 }
 0x2f9   : > { %v2088_v13 = vpop.f32.mrb[192].mxu0 }
 0x2fa   : > { %2599 = vst [vmem:[#allocation2 + $0xf8] sm:$0xff] %v2535_v19  ;;  %v2089_v34 = vadd.f32 %v2088_v13, %v6285_v4  ;;  %v2377_v44 = vpop.f32.mrb[192].mxu1  ;;  %v2090_v30 = vpop.f32.mrb[193].mxu0  ;;  %v939_v19 = vld [vmem:[#allocation2 + $0x138] sm:$0xff] }
 0x2fb   : > { %v2379_v52 = vpop.f32.mrb[193].mxu1  ;;  %v2091_v20 = vpop.f32.mrb[194].mxu0 }
 0x2fc   : > { %v2378_v54 = vadd.f32 %v2377_v44, %v2089_v34  ;;  %v2092_v50 = vadd.f32 %v2091_v20, %v6287_v15  ;;  %v2380_v57 = vpop.f32.mrb[194].mxu1  ;;  %v2093_v62 = vpop.f32.mrb[195].mxu0 }
 0x2fd   : > { %v2382_v42 = vpop.f32.mrb[195].mxu1 }
 0x2fe   : > { %v2536_v27 = vadd.f32 %v2378_v54, %v932_v17  ;;  %v2381_v33 = vadd.f32 %v2380_v57, %v2092_v50  ;;  %v940_v54 = vld [vmem:[#allocation2 + $0x140] sm:$0xff] }
 0x300   : > { %2600 = vst [vmem:[#allocation2 + $0x100] sm:$0xff] %v2536_v27  ;;  %v2537_v26 = vadd.f32 %v2381_v33, %v933_v53  ;;  %v941_v27 = vld [vmem:[#allocation2 + $0x148] sm:$0xff] }
 0x301   : > { %v2096_v5 = vpop.f32.mrb[196].mxu0 }
 0x302   : > { %2601 = vst [vmem:[#allocation2 + $0x108] sm:$0xff] %v2537_v26  ;;  %v2097_v4 = vadd.f32 %v2096_v5, %v6291_v3  ;;  %v2385_v38 = vpop.f32.mrb[196].mxu1  ;;  %v2098_v32 = vpop.f32.mrb[197].mxu0 }
 0x303   : > { %v2387_v35 = vpop.f32.mrb[197].mxu1  ;;  %v2099_v41 = vpop.f32.mrb[198].mxu0  ;;  %v6944_v32 = vld [vmem:[#allocation7_spill] sm:$0xff] }
 0x304   : > { %v2386_v2 = vadd.f32 %v2385_v38, %v2097_v4  ;;  %v2100_v15 = vadd.f32 %v2099_v41, %v6293_v45  ;;  %v2388_v43 = vpop.f32.mrb[198].mxu1  ;;  %v2101_v36 = vpop.f32.mrb[199].mxu0  ;;  %v942_v41 = vld [vmem:[#allocation2 + $0x150] sm:$0xff] }
 0x305   : > { %v2390_v49 = vpop.f32.mrb[199].mxu1  ;;  %v6945_v36 = vld [vmem:[#allocation8_spill] sm:$0xff] }
 0x306   : > { %v2538_v39 = vadd.f32 %v2386_v2, %v934_v28  ;;  %v2389_v16 = vadd.f32 %v2388_v43, %v2100_v15 }
 0x308   : > { %2602 = vst [vmem:[#allocation2 + $0x110] sm:$0xff] %v2538_v39  ;;  %v2539_v14 = vadd.f32 %v2389_v16, %v935_v11  ;;  %v943_v39 = vld [vmem:[#allocation2 + $0x158] sm:$0xff] }
 0x309   : > { %v2104_v56 = vpop.f32.mrb[200].mxu0 }
 0x30a   : > { %2603 = vst [vmem:[#allocation2 + $0x118] sm:$0xff] %v2539_v14  ;;  %v2105_v3 = vadd.f32 %v2104_v56, %v6297_v0  ;;  %v2393_v51 = vpop.f32.mrb[200].mxu1  ;;  %v2106_v46 = vpop.f32.mrb[201].mxu0 }
 0x30b   : > { %v2395_v12 = vpop.f32.mrb[201].mxu1  ;;  %v2107_v63 = vpop.f32.mrb[202].mxu0  ;;  %v6946_v46 = vld [vmem:[#allocation9_spill] sm:$0xff] }
 0x30c   : > { %v2394_v24 = vadd.f32 %v2393_v51, %v2105_v3  ;;  %v2108_v45 = vadd.f32 %v2107_v63, %v6299_v25  ;;  %v2396_v59 = vpop.f32.mrb[202].mxu1  ;;  %v2109_v47 = vpop.f32.mrb[203].mxu0 }
 0x30d   : > { %v2398_v37 = vpop.f32.mrb[203].mxu1 }
 0x30e   : > { %v2540_v8 = vadd.f32 %v2394_v24, %v936_v10  ;;  %v2397_v60 = vadd.f32 %v2396_v59, %v2108_v45  ;;  %v944_v24 = vld [vmem:[#allocation2 + $0x160] sm:$0xff] }
 0x310   : > { %2604 = vst [vmem:[#allocation2 + $0x120] sm:$0xff] %v2540_v8  ;;  %v2541_v58 = vadd.f32 %v2397_v60, %v937_v7  ;;  %v6947_v7 = vld [vmem:[#allocation10_spill] sm:$0xff] }
 0x311   : > { %v2112_v55 = vpop.f32.mrb[204].mxu0 }
 0x312   : > { %2605 = vst [vmem:[#allocation2 + $0x128] sm:$0xff] %v2541_v58  ;;  %v2113_v0 = vadd.f32 %v2112_v55, %v6303_v40  ;;  %v2401_v1 = vpop.f32.mrb[204].mxu1  ;;  %v2114_v22 = vpop.f32.mrb[205].mxu0  ;;  %v945_v58 = vld [vmem:[#allocation2 + $0x168] sm:$0xff] }
 0x313   : > { %v2403_v21 = vpop.f32.mrb[205].mxu1  ;;  %v2115_v48 = vpop.f32.mrb[206].mxu0 }
 0x314   : > { %v2402_v9 = vadd.f32 %v2401_v1, %v2113_v0  ;;  %v2116_v25 = vadd.f32 %v2115_v48, %v6305_v61  ;;  %v2404_v31 = vpop.f32.mrb[206].mxu1  ;;  %v2117_v29 = vpop.f32.mrb[207].mxu0  ;;  %v6948_v21 = vld [vmem:[#allocation11_spill] sm:$0xff] }
 0x315   : > { %v2406_v13 = vpop.f32.mrb[207].mxu1 }
 0x316   : > { %v2542_v34 = vadd.f32 %v2402_v9, %v938_v6  ;;  %v2405_v44 = vadd.f32 %v2404_v31, %v2116_v25  ;;  %v946_v31 = vld [vmem:[#allocation2 + $0x170] sm:$0xff] }
 0x318   : > { %2606 = vst [vmem:[#allocation2 + $0x130] sm:$0xff] %v2542_v34  ;;  %v2543_v30 = vadd.f32 %v2405_v44, %v939_v19  ;;  %v6949_v34 = vld [vmem:[#allocation12_spill] sm:$0xff] }
 0x319   : > { %v2120_v17 = vpop.f32.mrb[208].mxu0 }
 0x31a   : > { %2607 = vst [vmem:[#allocation2 + $0x138] sm:$0xff] %v2543_v30  ;;  %v2121_v40 = vadd.f32 %v2120_v17, %v6309_v18  ;;  %v2409_v52 = vpop.f32.mrb[208].mxu1  ;;  %v2122_v20 = vpop.f32.mrb[209].mxu0 }
 0x31b   : > { %v2411_v50 = vpop.f32.mrb[209].mxu1  ;;  %v2123_v57 = vpop.f32.mrb[210].mxu0 }
 0x31c   : > { %v2410_v62 = vadd.f32 %v2409_v52, %v2121_v40  ;;  %v2124_v61 = vadd.f32 %v2123_v57, %v6311_v23  ;;  %v2412_v53 = vpop.f32.mrb[210].mxu1  ;;  %v2125_v42 = vpop.f32.mrb[211].mxu0  ;;  %v947_v40 = vld [vmem:[#allocation2 + $0x178] sm:$0xff] }
 0x31d   : > { %v2414_v33 = vpop.f32.mrb[211].mxu1 }
 0x31e   : > { %v2544_v26 = vadd.f32 %v2410_v62, %v940_v54  ;;  %v2413_v5 = vadd.f32 %v2412_v53, %v2124_v61  ;;  %v6950_v62 = vld [vmem:[#allocation13_spill] sm:$0xff] }
 0x320   : > { %2608 = vst [vmem:[#allocation2 + $0x140] sm:$0xff] %v2544_v26  ;;  %v2545_v4 = vadd.f32 %v2413_v5, %v941_v27  ;;  %v948_v27 = vld [vmem:[#allocation2 + $0x180] sm:$0xff] }
 0x321   : > { %v2128_v38 = vpop.f32.mrb[212].mxu0 }
 0x322   : > { %2609 = vst [vmem:[#allocation2 + $0x148] sm:$0xff] %v2545_v4  ;;  %v2129_v18 = vadd.f32 %v2128_v38, %v6944_v32  ;;  %v2417_v28 = vpop.f32.mrb[212].mxu1  ;;  %v2130_v35 = vpop.f32.mrb[213].mxu0  ;;  %v6951_v4 = vld [vmem:[#allocation14_spill] sm:$0xff] }
 0x323   : > { %v2419_v2 = vpop.f32.mrb[213].mxu1  ;;  %v2131_v15 = vpop.f32.mrb[214].mxu0 }
 0x324   : > { %v2418_v43 = vadd.f32 %v2417_v28, %v2129_v18  ;;  %v2132_v23 = vadd.f32 %v2131_v15, %v6945_v36  ;;  %v2420_v11 = vpop.f32.mrb[214].mxu1  ;;  %v2133_v49 = vpop.f32.mrb[215].mxu0  ;;  %v949_v28 = vld [vmem:[#allocation2 + $0x188] sm:$0xff]  ;;  %v6952_v36 = vld [vmem:[#allocation15_spill] sm:$0xff] }
 0x325   : > { %v2422_v16 = vpop.f32.mrb[215].mxu1 }
 0x326   : > { %v2546_v14 = vadd.f32 %v2418_v43, %v942_v41  ;;  %v2421_v56 = vadd.f32 %v2420_v11, %v2132_v23 }
 0x328   : > { %2610 = vst [vmem:[#allocation2 + $0x150] sm:$0xff] %v2546_v14  ;;  %v2547_v3 = vadd.f32 %v2421_v56, %v943_v39  ;;  %v950_v39 = vld [vmem:[#allocation2 + $0x190] sm:$0xff] }
 0x329   : > { %v2136_v51 = vpop.f32.mrb[216].mxu0 }
 0x32a   : > { %2611 = vst [vmem:[#allocation2 + $0x158] sm:$0xff] %v2547_v3  ;;  %v2137_v10 = vadd.f32 %v2136_v51, %v6946_v46  ;;  %v2425_v12 = vpop.f32.mrb[216].mxu1  ;;  %v2138_v63 = vpop.f32.mrb[217].mxu0  ;;  %v6953_v3 = vld [vmem:[#allocation16_spill] sm:$0xff] }
 0x32b   : > { %v2427_v45 = vpop.f32.mrb[217].mxu1  ;;  %v2139_v59 = vpop.f32.mrb[218].mxu0 }
 0x32c   : > { %v2426_v47 = vadd.f32 %v2425_v12, %v2137_v10  ;;  %v2140_v37 = vadd.f32 %v2139_v59, %v6947_v7  ;;  %v2428_v8 = vpop.f32.mrb[218].mxu1  ;;  %v2141_v60 = vpop.f32.mrb[219].mxu0  ;;  %v951_v12 = vld [vmem:[#allocation2 + $0x198] sm:$0xff]  ;;  %v6954_v7 = vld [vmem:[#allocation17_spill] sm:$0xff] }
 0x32d   : > { %v2430_v55 = vpop.f32.mrb[219].mxu1 }
 0x32e   : > { %v2548_v0 = vadd.f32 %v2426_v47, %v944_v24  ;;  %v2429_v1 = vadd.f32 %v2428_v8, %v2140_v37 }
 0x330   : > { %2612 = vst [vmem:[#allocation2 + $0x160] sm:$0xff] %v2548_v0  ;;  %v2549_v22 = vadd.f32 %v2429_v1, %v945_v58  ;;  %v952_v58 = vld [vmem:[#allocation2 + $0x1a0] sm:$0xff] }
 0x331   : > { %v2144_v6 = vpop.f32.mrb[220].mxu0 }
 0x332   : > { %2613 = vst [vmem:[#allocation2 + $0x168] sm:$0xff] %v2549_v22  ;;  %v2145_v48 = vadd.f32 %v2144_v6, %v6948_v21  ;;  %v2433_v9 = vpop.f32.mrb[220].mxu1  ;;  %v2146_v25 = vpop.f32.mrb[221].mxu0  ;;  %v6955_v22 = vld [vmem:[#allocation18_spill] sm:$0xff] }
 0x333   : > { %v2435_v29 = vpop.f32.mrb[221].mxu1  ;;  %v2147_v19 = vpop.f32.mrb[222].mxu0 }
 0x334   : > { %v2434_v13 = vadd.f32 %v2433_v9, %v2145_v48  ;;  %v2148_v44 = vadd.f32 %v2147_v19, %v6949_v34  ;;  %v2436_v30 = vpop.f32.mrb[222].mxu1  ;;  %v2149_v17 = vpop.f32.mrb[223].mxu0  ;;  %v953_v9 = vld [vmem:[#allocation2 + $0x1a8] sm:$0xff]  ;;  %v6956_v34 = vld [vmem:[#allocation19_spill] sm:$0xff] }
 0x335   : > { %v2438_v52 = vpop.f32.mrb[223].mxu1 }
 0x336   : > { %v2550_v20 = vadd.f32 %v2434_v13, %v946_v31  ;;  %v2437_v54 = vadd.f32 %v2436_v30, %v2148_v44 }
 0x338   : > { %2614 = vst [vmem:[#allocation2 + $0x170] sm:$0xff] %v2550_v20  ;;  %v2551_v50 = vadd.f32 %v2437_v54, %v947_v40  ;;  %v954_v40 = vld [vmem:[#allocation2 + $0x1b0] sm:$0xff] }
 0x339   : > { %v2152_v57 = vpop.f32.mrb[224].mxu0 }
 0x33a   : > { %2615 = vst [vmem:[#allocation2 + $0x178] sm:$0xff] %v2551_v50  ;;  %v2153_v61 = vadd.f32 %v2152_v57, %v6950_v62  ;;  %v2441_v53 = vpop.f32.mrb[224].mxu1  ;;  %v2154_v42 = vpop.f32.mrb[225].mxu0  ;;  %v6957_v50 = vld [vmem:[#allocation20_spill] sm:$0xff] }
 0x33b   : > { %v2443_v33 = vpop.f32.mrb[225].mxu1  ;;  %v2155_v26 = vpop.f32.mrb[226].mxu0 }
 0x33c   : > { %v2442_v5 = vadd.f32 %v2441_v53, %v2153_v61  ;;  %v2156_v38 = vadd.f32 %v2155_v26, %v6951_v4  ;;  %v2444_v32 = vpop.f32.mrb[226].mxu1  ;;  %v2157_v18 = vpop.f32.mrb[227].mxu0  ;;  %v955_v53 = vld [vmem:[#allocation2 + $0x1b8] sm:$0xff]  ;;  %v6958_v4 = vld [vmem:[#allocation21_spill] sm:$0xff] }
 0x33d   : > { %v2446_v35 = vpop.f32.mrb[227].mxu1 }
 0x33e   : > { %v2552_v41 = vadd.f32 %v2442_v5, %v948_v27  ;;  %v2445_v2 = vadd.f32 %v2444_v32, %v2156_v38 }
 0x340   : > { %2616 = vst [vmem:[#allocation2 + $0x180] sm:$0xff] %v2552_v41  ;;  %v2553_v15 = vadd.f32 %v2445_v2, %v949_v28  ;;  %v956_v28 = vld [vmem:[#allocation2 + $0x1c0] sm:$0xff] }
 0x341   : > { %v2160_v43 = vpop.f32.mrb[228].mxu0 }
 0x342   : > { %2617 = vst [vmem:[#allocation2 + $0x188] sm:$0xff] %v2553_v15  ;;  %v2161_v23 = vadd.f32 %v2160_v43, %v6952_v36  ;;  %v2449_v11 = vpop.f32.mrb[228].mxu1  ;;  %v2162_v49 = vpop.f32.mrb[229].mxu0  ;;  %v6959_v15 = vld [vmem:[#allocation22_spill] sm:$0xff] }
 0x343   : > { %v2451_v16 = vpop.f32.mrb[229].mxu1  ;;  %v2163_v14 = vpop.f32.mrb[230].mxu0 }
 0x344   : > { %v2450_v56 = vadd.f32 %v2449_v11, %v2161_v23  ;;  %v2164_v51 = vadd.f32 %v2163_v14, %v6953_v3  ;;  %v2452_v46 = vpop.f32.mrb[230].mxu1  ;;  %v2165_v10 = vpop.f32.mrb[231].mxu0  ;;  %v957_v11 = vld [vmem:[#allocation2 + $0x1c8] sm:$0xff]  ;;  %v6960_v3 = vld [vmem:[#allocation23_spill] sm:$0xff] }
 0x345   : > { %v2454_v63 = vpop.f32.mrb[231].mxu1 }
 0x346   : > { %v2554_v24 = vadd.f32 %v2450_v56, %v950_v39  ;;  %v2453_v45 = vadd.f32 %v2452_v46, %v2164_v51 }
 0x348   : > { %2618 = vst [vmem:[#allocation2 + $0x190] sm:$0xff] %v2554_v24  ;;  %v2555_v59 = vadd.f32 %v2453_v45, %v951_v12  ;;  %v958_v12 = vld [vmem:[#allocation2 + $0x1d0] sm:$0xff] }
 0x349   : > { %v2168_v47 = vpop.f32.mrb[232].mxu0 }
 0x34a   : > { %2619 = vst [vmem:[#allocation2 + $0x198] sm:$0xff] %v2555_v59  ;;  %v2169_v37 = vadd.f32 %v2168_v47, %v6954_v7  ;;  %v2457_v8 = vpop.f32.mrb[232].mxu1  ;;  %v2170_v60 = vpop.f32.mrb[233].mxu0  ;;  %v6961_v59 = vld [vmem:[#allocation24_spill] sm:$0xff] }
 0x34b   : > { %v2459_v55 = vpop.f32.mrb[233].mxu1  ;;  %v2171_v0 = vpop.f32.mrb[234].mxu0 }
 0x34c   : > { %v2458_v1 = vadd.f32 %v2457_v8, %v2169_v37  ;;  %v2172_v6 = vadd.f32 %v2171_v0, %v6955_v22  ;;  %v2460_v21 = vpop.f32.mrb[234].mxu1  ;;  %v2173_v48 = vpop.f32.mrb[235].mxu0  ;;  %v959_v8 = vld [vmem:[#allocation2 + $0x1d8] sm:$0xff]  ;;  %v6962_v22 = vld [vmem:[#allocation25_spill] sm:$0xff] }
 0x34d   : > { %v2462_v25 = vpop.f32.mrb[235].mxu1 }
 0x34e   : > { %v2556_v31 = vadd.f32 %v2458_v1, %v952_v58  ;;  %v2461_v29 = vadd.f32 %v2460_v21, %v2172_v6 }
 0x350   : > { %2620 = vst [vmem:[#allocation2 + $0x1a0] sm:$0xff] %v2556_v31  ;;  %v2557_v19 = vadd.f32 %v2461_v29, %v953_v9  ;;  %v960_v9 = vld [vmem:[#allocation2 + $0x1e0] sm:$0xff] }
 0x351   : > { %v2176_v13 = vpop.f32.mrb[236].mxu0 }
 0x352   : > { %2621 = vst [vmem:[#allocation2 + $0x1a8] sm:$0xff] %v2557_v19  ;;  %v2177_v44 = vadd.f32 %v2176_v13, %v6956_v34  ;;  %v2465_v30 = vpop.f32.mrb[236].mxu1  ;;  %v2178_v17 = vpop.f32.mrb[237].mxu0  ;;  %v6963_v19 = vld [vmem:[#allocation26_spill] sm:$0xff] }
 0x353   : > { %v2467_v52 = vpop.f32.mrb[237].mxu1  ;;  %v2179_v20 = vpop.f32.mrb[238].mxu0 }
 0x354   : > { %v2466_v54 = vadd.f32 %v2465_v30, %v2177_v44  ;;  %v2180_v57 = vadd.f32 %v2179_v20, %v6957_v50  ;;  %v2468_v62 = vpop.f32.mrb[238].mxu1  ;;  %v2181_v61 = vpop.f32.mrb[239].mxu0  ;;  %v961_v30 = vld [vmem:[#allocation2 + $0x1e8] sm:$0xff]  ;;  %v6964_v50 = vld [vmem:[#allocation27_spill] sm:$0xff] }
 0x355   : > { %v2470_v42 = vpop.f32.mrb[239].mxu1 }
 0x356   : > { %v2558_v27 = vadd.f32 %v2466_v54, %v954_v40  ;;  %v2469_v33 = vadd.f32 %v2468_v62, %v2180_v57 }
 0x358   : > { %2622 = vst [vmem:[#allocation2 + $0x1b0] sm:$0xff] %v2558_v27  ;;  %v2559_v26 = vadd.f32 %v2469_v33, %v955_v53  ;;  %v962_v53 = vld [vmem:[#allocation2 + $0x1f0] sm:$0xff] }
 0x359   : > { %v2184_v5 = vpop.f32.mrb[240].mxu0 }
 0x35a   : > { %2623 = vst [vmem:[#allocation2 + $0x1b8] sm:$0xff] %v2559_v26  ;;  %v2185_v38 = vadd.f32 %v2184_v5, %v6958_v4  ;;  %v2473_v32 = vpop.f32.mrb[240].mxu1  ;;  %v2186_v18 = vpop.f32.mrb[241].mxu0  ;;  %v6965_v26 = vld [vmem:[#allocation28_spill] sm:$0xff] }
 0x35b   : > { %v2475_v35 = vpop.f32.mrb[241].mxu1  ;;  %v2187_v41 = vpop.f32.mrb[242].mxu0 }
 0x35c   : > { %v2474_v2 = vadd.f32 %v2473_v32, %v2185_v38  ;;  %v2188_v43 = vadd.f32 %v2187_v41, %v6959_v15  ;;  %v2476_v36 = vpop.f32.mrb[242].mxu1  ;;  %v2189_v23 = vpop.f32.mrb[243].mxu0  ;;  %v963_v32 = vld [vmem:[#allocation2 + $0x1f8] sm:$0xff]  ;;  %v2769_v15 = vld [vmem:[%s5917_s14] sm:$0xff] (!%p4782_p7) }
 0x35d   : > { %v2478_v49 = vpop.f32.mrb[243].mxu1  ;;  %v2770_v23 = vld [vmem:[%s5917_s14 + $0x8] sm:$0xff] (!%p4782_p7) }
 0x35e   : > { %v2560_v39 = vadd.f32 %v2474_v2, %v956_v28  ;;  %v2477_v16 = vadd.f32 %v2476_v36, %v2188_v43  ;;  %v2771_v2 = vld [vmem:[%s5917_s14 + $0x10] sm:$0xff] (!%p4782_p7)  ;;  %v5755_v43 = vmov (!%p4782_p7), 0   ;;  %v2772_v36 = vld [vmem:[%s5917_s14 + $0x18] sm:$0xff] (!%p4782_p7)  ;;  %v2773_v49 = vld [vmem:[%s5917_s14 + $0x20] sm:$0xff] (!%p4782_p7) }
 0x35f   : > { %5602 = vset.pattern.permute.xlu1 (!%p4782_p7), %v5755_v43  ;;  %5601 = vset.pattern.permute.xlu0 (!%p4782_p7), %v5755_v43  ;;  %v2810_v43 = vld [vmem:[%s5917_s14 + $0x148] sm:$0xff] (!%p4782_p7) }
 0x360   : > { %2624 = vst [vmem:[#allocation2 + $0x1c0] sm:$0xff] %v2560_v39  ;;  %v2561_v14 = vadd.f32 %v2477_v16, %v957_v11  ;;  %2845 = vperm.xlu1 (!%p4782_p7), %5602, %v2771_v2   ;;  %2835 = vperm.xlu0 (!%p4782_p7), %5601, %v2769_v15   ;;  %v2774_v11 = vld [vmem:[%s5917_s14 + $0x28] sm:$0xff] (!%p4782_p7)  ;;  %v2776_v39 = vld [vmem:[%s5917_s14 + $0x38] sm:$0xff] (!%p4782_p7)  ;;  %v2775_v16 = vld [vmem:[%s5917_s14 + $0x30] sm:$0xff] (!%p4782_p7) }
 0x361   : > { %v2192_v56 = vpop.f32.mrb[244].mxu0  ;;  %v2807_v2 = vld [vmem:[%s5917_s14 + $0x130] sm:$0xff] (!%p4782_p7)  ;;  %v5627_v15 = vld [vmem:[%s6509_s29 + $0x40] sm:$0xff] (!%p4782_p7)  }
 0x362   : > { %2625 = vst [vmem:[#allocation2 + $0x1c8] sm:$0xff] %v2561_v14  ;;  %v2193_v51 = vadd.f32 %v2192_v56, %v6960_v3  ;;  %v2481_v46 = vpop.f32.mrb[244].mxu1  ;;  %v2194_v10 = vpop.f32.mrb[245].mxu0  ;;  %v2778_v14 = vld [vmem:[%s5917_s14 + $0x48] sm:$0xff] (!%p4782_p7)  ;;  %v2777_v56 = vld [vmem:[%s5917_s14 + $0x40] sm:$0xff] (!%p4782_p7)  ;;  %v2780_v3 = vld [vmem:[%s5917_s14 + $0x58] sm:$0xff] (!%p4782_p7) }
 0x363   : > { %v2483_v63 = vpop.f32.mrb[245].mxu1  ;;  %v2195_v24 = vpop.f32.mrb[246].mxu0  ;;  %v5604_v10 = vld [vmem:[%s6966_s3] sm:$0xff] (!%p4782_p7)  }
 0x364   : > { %v2482_v45 = vadd.f32 %v2481_v46, %v2193_v51  ;;  %v2196_v47 = vadd.f32 %v2195_v24, %v6961_v59  ;;  %v2484_v7 = vpop.f32.mrb[246].mxu1  ;;  %v2197_v37 = vpop.f32.mrb[247].mxu0  ;;  %2850 = vperm.xlu1 (!%p4782_p7), %5602, %v2772_v36   ;;  %2840 = vperm.xlu0 (!%p4782_p7), %5601, %v2770_v23   ;;  %v2779_v51 = vld [vmem:[%s5917_s14 + $0x50] sm:$0xff] (!%p4782_p7)  ;;  %v5603_v46 = vld [vmem:[%s6911_s4] sm:$0xff] (!%p4782_p7)   ;;  %v2782_v63 = vld [vmem:[%s5917_s14 + $0x68] sm:$0xff] (!%p4782_p7) }
 0x365   : > { %v2486_v60 = vpop.f32.mrb[247].mxu1  ;;  %5236 = vmatprep.subr.bf16.mxu1 (!%p4782_p7), %v5603_v46  ;;  %5316 = vmatprep.subr.bf16.mxu0 (!%p4782_p7), %v5604_v10  ;;  %v5606_v24 = vld [vmem:[%s6966_s3 + $0x8] sm:$0xff] (!%p4782_p7)   ;;  %v5607_v59 = vld [vmem:[%s6911_s4 + $0x10] sm:$0xff] (!%p4782_p7)   ;;  %v2809_v36 = vld [vmem:[%s5917_s14 + $0x140] sm:$0xff] (!%p4782_p7) }
 0x366   : > { %v2562_v58 = vadd.f32 %v2482_v45, %v958_v12  ;;  %v2485_v55 = vadd.f32 %v2484_v7, %v2196_v47  ;;  %v5605_v12 = vld [vmem:[%s6911_s4 + $0x8] sm:$0xff] (!%p4782_p7)   ;;  %5237 = vmatpush3.bf16.msra.mxu1 (!%p4782_p7), %v5603_v46  ;;  %v2781_v45 = vld [vmem:[%s5917_s14 + $0x60] sm:$0xff] (!%p4782_p7)  ;;  %5317 = vmatpush3.bf16.msra.mxu0 (!%p4782_p7), %v5604_v10  ;;  %v5608_v47 = vld [vmem:[%s6966_s3 + $0x10] sm:$0xff] (!%p4782_p7)  }
 0x367   : > { %5238 = vmatprep.subr.bf16.mxu1 (!%p4782_p7), %v5605_v12  ;;  %5318 = vmatprep.subr.bf16.mxu0 (!%p4782_p7), %v5606_v24  ;;  %v2784_v7 = vld [vmem:[%s5917_s14 + $0x78] sm:$0xff] (!%p4782_p7)  ;;  %v2783_v37 = vld [vmem:[%s5917_s14 + $0x70] sm:$0xff] (!%p4782_p7)  ;;  %v5628_v23 = vld [vmem:[%s6509_s29 + $0x48] sm:$0xff] (!%p4782_p7)  }
 0x368   : > { %2626 = vst [vmem:[#allocation2 + $0x1d0] sm:$0xff] %v2562_v58  ;;  %v2563_v0 = vadd.f32 %v2485_v55, %v959_v8  ;;  %2860 = vperm.xlu1 (!%p4782_p7), %5602, %v2774_v11   ;;  %2855 = vperm.xlu0 (!%p4782_p7), %5601, %v2773_v49   ;;  %v5609_v8 = vld [vmem:[%s6911_s4 + $0x18] sm:$0xff] (!%p4782_p7)   ;;  %v2786_v58 = vld [vmem:[%s5917_s14 + $0x88] sm:$0xff] (!%p4782_p7)  ;;  %v2785_v55 = vld [vmem:[%s5917_s14 + $0x80] sm:$0xff] (!%p4782_p7) }
 0x369   : > { %v2200_v1 = vpop.f32.mrb[248].mxu0  ;;  %v5610_v60 = vld [vmem:[%s6966_s3 + $0x18] sm:$0xff] (!%p4782_p7)   ;;  %v5629_v11 = vld [vmem:[%s6509_s29 + $0x50] sm:$0xff] (!%p4782_p7)   ;;  %v2818_v10 = vld [vmem:[%s5917_s14 + $0x188] sm:$0xff] (!%p4782_p7) }
 0x36a   : > { %2627 = vst [vmem:[#allocation2 + $0x1d8] sm:$0xff] %v2563_v0  ;;  %v2201_v6 = vadd.f32 %v2200_v1, %v6962_v22  ;;  %v2489_v21 = vpop.f32.mrb[248].mxu1  ;;  %v2202_v48 = vpop.f32.mrb[249].mxu0  ;;  %5239 = vmatpush3.bf16.msra.mxu1 (!%p4782_p7), %v5605_v12  ;;  %5319 = vmatpush3.bf16.msra.mxu0 (!%p4782_p7), %v5606_v24  ;;  %v5611_v0 = vld [vmem:[%s6911_s4 + $0x20] sm:$0xff] (!%p4782_p7)   ;;  %v2788_v22 = vld [vmem:[%s5917_s14 + $0x98] sm:$0xff] (!%p4782_p7)  ;;  %v2815_v46 = vld [vmem:[%s5917_s14 + $0x170] sm:$0xff] (!%p4782_p7) }
 0x36b   : > { %v2491_v25 = vpop.f32.mrb[249].mxu1  ;;  %v2203_v31 = vpop.f32.mrb[250].mxu0  ;;  %5240 = vmatprep.subr.bf16.mxu1 (!%p4782_p7), %v5607_v59  ;;  %5320 = vmatprep.subr.bf16.mxu0 (!%p4782_p7), %v5608_v47  ;;  %v5612_v1 = vld [vmem:[%s6966_s3 + $0x20] sm:$0xff] (!%p4782_p7)   ;;  %v5614_v48 = vld [vmem:[%s6966_s3 + $0x28] sm:$0xff] (!%p4782_p7)   ;;  %v2812_v49 = vld [vmem:[%s5917_s14 + $0x158] sm:$0xff] (!%p4782_p7) }
 0x36c   : > { %v2490_v29 = vadd.f32 %v2489_v21, %v2201_v6  ;;  %v2204_v13 = vadd.f32 %v2203_v31, %v6963_v19  ;;  %v2492_v34 = vpop.f32.mrb[250].mxu1  ;;  %v2205_v44 = vpop.f32.mrb[251].mxu0  ;;  %2870 = vperm.xlu1 (!%p4782_p7), %5602, %v2776_v39   ;;  %2865 = vperm.xlu0 (!%p4782_p7), %5601, %v2775_v16   ;;  %v2787_v6 = vld [vmem:[%s5917_s14 + $0x90] sm:$0xff] (!%p4782_p7)  ;;  %v5613_v21 = vld [vmem:[%s6911_s4 + $0x28] sm:$0xff] (!%p4782_p7)   ;;  %v2789_v25 = vld [vmem:[%s5917_s14 + $0xa0] sm:$0xff] (!%p4782_p7) }
 0x36d   : > { %v2494_v17 = vpop.f32.mrb[251].mxu1  ;;  %v5618_v31 = vld [vmem:[%s6509_s29] sm:$0xff] (!%p4782_p7)   ;;  %v5616_v19 = vld [vmem:[%s6966_s3 + $0x30] sm:$0xff] (!%p4782_p7)   ;;  %v5617_v44 = vld [vmem:[%s6911_s4 + $0x38] sm:$0xff] (!%p4782_p7)  }
 0x36e   : > { %v2564_v40 = vadd.f32 %v2490_v29, %v960_v9  ;;  %v2493_v52 = vadd.f32 %v2492_v34, %v2204_v13  ;;  %5241 = vmatpush3.bf16.msra.mxu1 (!%p4782_p7), %v5607_v59  ;;  %5321 = vmatpush3.bf16.msra.mxu0 (!%p4782_p7), %v5608_v47  ;;  %v2790_v9 = vld [vmem:[%s5917_s14 + $0xa8] sm:$0xff] (!%p4782_p7)  ;;  %v5615_v29 = vld [vmem:[%s6911_s4 + $0x30] sm:$0xff] (!%p4782_p7)   ;;  %v2792_v13 = vld [vmem:[%s5917_s14 + $0xb8] sm:$0xff] (!%p4782_p7) }
 0x36f   : > { %5242 = vmatprep.subr.bf16.mxu1 (!%p4782_p7), %v5609_v8  ;;  %5322 = vmatprep.subr.bf16.mxu0 (!%p4782_p7), %v5610_v60  ;;  %v2791_v34 = vld [vmem:[%s5917_s14 + $0xb0] sm:$0xff] (!%p4782_p7)  ;;  %v2794_v17 = vld [vmem:[%s5917_s14 + $0xc8] sm:$0xff] (!%p4782_p7)  ;;  %v2817_v12 = vld [vmem:[%s5917_s14 + $0x180] sm:$0xff] (!%p4782_p7) }
 0x370   : > { %2628 = vst [vmem:[#allocation2 + $0x1e0] sm:$0xff] %v2564_v40  ;;  %v2565_v20 = vadd.f32 %v2493_v52, %v961_v30  ;;  %2880 = vperm.xlu1 (!%p4782_p7), %5602, %v2778_v14   ;;  %2875 = vperm.xlu0 (!%p4782_p7), %5601, %v2777_v56   ;;  %v5619_v30 = vld [vmem:[%s6966_s3 + $0x38] sm:$0xff] (!%p4782_p7)   ;;  %v2793_v40 = vld [vmem:[%s5917_s14 + $0xc0] sm:$0xff] (!%p4782_p7)  ;;  %v5620_v52 = vld [vmem:[%s6509_s29 + $0x8] sm:$0xff] (!%p4782_p7)  }
 0x371   : > { %v2208_v54 = vpop.f32.mrb[252].mxu0  ;;  %5252 = vmatprep.mubr.bf16.mxu1 (!%p4782_p7), %v5618_v31  ;;  %v2811_v39 = vld [vmem:[%s5917_s14 + $0x150] sm:$0xff] (!%p4782_p7)  ;;  %v2814_v16 = vld [vmem:[%s5917_s14 + $0x168] sm:$0xff] (!%p4782_p7)  ;;  %v2813_v14 = vld [vmem:[%s5917_s14 + $0x160] sm:$0xff] (!%p4782_p7) }
 0x372   : > { %2629 = vst [vmem:[#allocation2 + $0x1e8] sm:$0xff] %v2565_v20  ;;  %v2209_v57 = vadd.f32 %v2208_v54, %v6964_v50  ;;  %v2497_v62 = vpop.f32.mrb[252].mxu1  ;;  %v2210_v61 = vpop.f32.mrb[253].mxu0  ;;  %5243 = vmatpush3.bf16.msra.mxu1 (!%p4782_p7), %v5609_v8  ;;  %5323 = vmatpush3.bf16.msra.mxu0 (!%p4782_p7), %v5610_v60  ;;  %v5621_v20 = vld [vmem:[%s6509_s29 + $0x10] sm:$0xff] (!%p4782_p7)   ;;  %v2796_v54 = vld [vmem:[%s5917_s14 + $0xd8] sm:$0xff] (!%p4782_p7)  ;;  %v2822_v47 = vld [vmem:[%s5917_s14 + $0x1a8] sm:$0xff] (!%p4782_p7) }
 0x373   : > { %v2499_v42 = vpop.f32.mrb[253].mxu1  ;;  %v2211_v27 = vpop.f32.mrb[254].mxu0  ;;  %5244 = vmatprep.subr.bf16.mxu1 (!%p4782_p7), %v5611_v0  ;;  %5324 = vmatprep.subr.bf16.mxu0 (!%p4782_p7), %v5612_v1  ;;  %v2795_v50 = vld [vmem:[%s5917_s14 + $0xd0] sm:$0xff] (!%p4782_p7)  ;;  %v5622_v61 = vld [vmem:[%s6509_s29 + $0x18] sm:$0xff] (!%p4782_p7)   ;;  %v5635_v8 = vld [vmem:[%s6509_s29 + $0x80] sm:$0xff] (!%p4782_p7)  }
 0x374   : > { %v2498_v33 = vadd.f32 %v2497_v62, %v2209_v57  ;;  %v2212_v5 = vadd.f32 %v2211_v27, %v6965_v26  ;;  %v2500_v4 = vpop.f32.mrb[254].mxu1  ;;  %v2213_v38 = vpop.f32.mrb[255].mxu0  ;;  %2635 = sbr.rel (%p4782_p7) target bundleno = 1345 (0x541), region = 56  ;;  %2890 = vperm.xlu1 (!%p4782_p7), %5602, %v2780_v3   ;;  %2885 = vperm.xlu0 (!%p4782_p7), %5601, %v2779_v51   ;;  %v2798_v57 = vld [vmem:[%s5917_s14 + $0xe8] sm:$0xff] (!%p4782_p7)  ;;  %v2797_v62 = vld [vmem:[%s5917_s14 + $0xe0] sm:$0xff] (!%p4782_p7)  ;;  %v2800_v42 = vld [vmem:[%s5917_s14 + $0xf8] sm:$0xff] (!%p4782_p7) }
 0x375   : > { %v2502_v18 = vpop.f32.mrb[255].mxu1  ;;  %v2799_v27 = vld [vmem:[%s5917_s14 + $0xf0] sm:$0xff] (!%p4782_p7)  ;;  %v2801_v26 = vld [vmem:[%s5917_s14 + $0x100] sm:$0xff] (!%p4782_p7)  ;;  %v5630_v56 = vld [vmem:[%s6509_s29 + $0x58] sm:$0xff] (!%p4782_p7)  }
 0x376   : > { %v2566_v28 = vadd.f32 %v2498_v33, %v962_v53  ;;  %v2501_v35 = vadd.f32 %v2500_v4, %v2212_v5  ;;  %5245 = vmatpush3.bf16.msra.mxu1 (!%p4782_p7), %v5611_v0  ;;  %5325 = vmatpush3.bf16.msra.mxu0 (!%p4782_p7), %v5612_v1  ;;  %v5623_v53 = vld [vmem:[%s6509_s29 + $0x20] sm:$0xff] (!%p4782_p7)   ;;  %v2802_v33 = vld [vmem:[%s5917_s14 + $0x108] sm:$0xff] (!%p4782_p7)  ;;  %v2804_v4 = vld [vmem:[%s5917_s14 + $0x118] sm:$0xff] (!%p4782_p7) }
 0x377   : > { %5246 = vmatprep.subr.bf16.mxu1 (!%p4782_p7), %v5613_v21  ;;  %5326 = vmatprep.subr.bf16.mxu0 (!%p4782_p7), %v5614_v48  ;;  %v5624_v5 = vld [vmem:[%s6509_s29 + $0x28] sm:$0xff] (!%p4782_p7)   ;;  %v2803_v38 = vld [vmem:[%s5917_s14 + $0x110] sm:$0xff] (!%p4782_p7)  ;;  %v5631_v3 = vld [vmem:[%s6509_s29 + $0x60] sm:$0xff] (!%p4782_p7)  }
 0x378   : > { %2630 = vst [vmem:[#allocation2 + $0x1f0] sm:$0xff] %v2566_v28  ;;  %v2567_v41 = vadd.f32 %v2501_v35, %v963_v32  ;;  %2900 = vperm.xlu1 (!%p4782_p7), %5602, %v2782_v63   ;;  %2895 = vperm.xlu0 (!%p4782_p7), %5601, %v2781_v45   ;;  %v5625_v32 = vld [vmem:[%s6509_s29 + $0x30] sm:$0xff] (!%p4782_p7)   ;;  %v2806_v18 = vld [vmem:[%s5917_s14 + $0x128] sm:$0xff] (!%p4782_p7)  ;;  %v2805_v28 = vld [vmem:[%s5917_s14 + $0x120] sm:$0xff] (!%p4782_p7) }
 0x379   : > { %v5626_v35 = vld [vmem:[%s6509_s29 + $0x38] sm:$0xff] (!%p4782_p7)   ;;  %v5632_v63 = vld [vmem:[%s6509_s29 + $0x68] sm:$0xff] (!%p4782_p7)   ;;  %v5633_v24 = vld [vmem:[%s6509_s29 + $0x70] sm:$0xff] (!%p4782_p7)  }
 0x37a   : > { %2631 = vst [vmem:[#allocation2 + $0x1f8] sm:$0xff] %v2567_v41  ;;  %5247 = vmatpush3.bf16.msra.mxu1 (!%p4782_p7), %v5613_v21  ;;  %5327 = vmatpush3.bf16.msra.mxu0 (!%p4782_p7), %v5614_v48  ;;  %v2808_v41 = vld [vmem:[%s5917_s14 + $0x138] sm:$0xff] (!%p4782_p7)  ;;  %v2819_v59 = vld [vmem:[%s5917_s14 + $0x190] sm:$0xff] (!%p4782_p7)  ;;  %v2825_v0 = vld [vmem:[%s5917_s14 + $0x1c0] sm:$0xff] (!%p4782_p7) }
 0x37b   : > { %5248 = vmatprep.subr.bf16.mxu1 %v5615_v29  ;;  %5328 = vmatprep.subr.bf16.mxu0 %v5616_v19  ;;  %v2816_v51 = vld [vmem:[%s5917_s14 + $0x178] sm:$0xff]  ;;  %v5636_v1 = vld [vmem:[%s6509_s29 + $0x88] sm:$0xff]   ;;  %v2827_v21 = vld [vmem:[%s5917_s14 + $0x1d0] sm:$0xff] }
 0x37c   : > { %2910 = vperm.xlu1 %5602, %v2784_v7   ;;  %2905 = vperm.xlu0 %5601, %v2783_v37   ;;  %v2820_v45 = vld [vmem:[%s5917_s14 + $0x198] sm:$0xff]  ;;  %v2821_v7 = vld [vmem:[%s5917_s14 + $0x1a0] sm:$0xff]  ;;  %v2830_v48 = vld [vmem:[%s5917_s14 + $0x1e8] sm:$0xff] }
 0x37d   : > { %v5634_v37 = vld [vmem:[%s6509_s29 + $0x78] sm:$0xff]   ;;  %v5639_v31 = vld [vmem:[%s6509_s29 + $0xa0] sm:$0xff]  }
 0x37e   : > { %5249 = vmatpush3.bf16.msra.mxu1 %v5615_v29  ;;  %5329 = vmatpush3.bf16.msra.mxu0 %v5616_v19  ;;  %v2824_v60 = vld [vmem:[%s5917_s14 + $0x1b8] sm:$0xff]  ;;  %v2831_v19 = vld [vmem:[%s5917_s14 + $0x1f0] sm:$0xff] }
 0x37f   : > { %5250 = vmatprep.subr.bf16.mxu1 %v5617_v44  ;;  %5330 = vmatprep.subr.bf16.mxu0 %v5619_v30  ;;  %v2832_v29 = vld [vmem:[%s5917_s14 + $0x1f8] sm:$0xff] }
 0x380   : > { %2920 = vperm.xlu1 %5602, %v2786_v58   ;;  %2915 = vperm.xlu0 %5601, %v2785_v55   ;;  %v2823_v58 = vld [vmem:[%s5917_s14 + $0x1b0] sm:$0xff]  ;;  %v2826_v55 = vld [vmem:[%s5917_s14 + $0x1c8] sm:$0xff] }
 0x382   : > { %5251 = vmatpush3.bf16.msra.mxu1 %v5617_v44  ;;  %5331 = vmatpush3.bf16.msra.mxu0 %v5619_v30  ;;  %v5641_v30 = vld [vmem:[%s6509_s29 + $0xb0] sm:$0xff]  }
 0x384   : > { %2930 = vperm.xlu1 %5602, %v2788_v22   ;;  %2925 = vperm.xlu0 %5601, %v2787_v6   ;;  %v5637_v22 = vld [vmem:[%s6509_s29 + $0x90] sm:$0xff]   ;;  %v2828_v6 = vld [vmem:[%s5917_s14 + $0x1d8] sm:$0xff] }
 0x385   : > { %5253 = vmatmul.mubr.bf16.vlgmr.msra.gmra.mrb[0].mxu1 %v5620_v52  ;;  %v2708_v52 = vld [vmem:[#allocation2 + $0x18] sm:$0xff] }
 0x386   : > { %5256 = vmatprep.mubr.bf16.mxu1 %v5621_v20  ;;  %v2706_v20 = vld [vmem:[#allocation2 + $0x8] sm:$0xff] }
 0x388   : > { %2940 = vperm.xlu1 %5602, %v2790_v9   ;;  %2935 = vperm.xlu0 %5601, %v2789_v25   ;;  %v2829_v9 = vld [vmem:[%s5917_s14 + $0x1e0] sm:$0xff]  ;;  %v5638_v25 = vld [vmem:[%s6509_s29 + $0x98] sm:$0xff]  }
 0x38c   : > { %2950 = vperm.xlu1 %5602, %v2792_v13   ;;  %2945 = vperm.xlu0 %5601, %v2791_v34   ;;  %v5640_v13 = vld [vmem:[%s6509_s29 + $0xa8] sm:$0xff]  }
 0x38d   : > { %5257 = vmatmul.mubr.bf16.gmra.mrb[4].mxu1 %v5622_v61 }
 0x38e   : > { %5260 = vmatprep.mubr.bf16.mxu1 %v5623_v53 }
 0x390   : > { %2960 = vperm.xlu1 %5602, %v2794_v17   ;;  %2955 = vperm.xlu0 %5601, %v2793_v40   ;;  %v2707_v17 = vld [vmem:[#allocation2 + $0x10] sm:$0xff]  ;;  %v2705_v40 = vld [vmem:[#allocation2] sm:$0xff] }
 0x394   : > { %2970 = vperm.xlu1 %5602, %v2796_v54   ;;  %2965 = vperm.xlu0 %5601, %v2795_v50  }
 0x395   : > { %5261 = vmatmul.mubr.bf16.gmra.mrb[8].mxu1 %v5624_v5  ;;  %v5642_v5 = vld [vmem:[%s6509_s29 + $0xb8] sm:$0xff]  }
 0x396   : > { %5264 = vmatprep.mubr.bf16.mxu1 %v5625_v32  ;;  %v5643_v32 = vld [vmem:[%s6509_s29 + $0xc0] sm:$0xff]  }
 0x398   : > { %2980 = vperm.xlu1 %5602, %v2798_v57   ;;  %2975 = vperm.xlu0 %5601, %v2797_v62  }
 0x39c   : > { %2990 = vperm.xlu1 %5602, %v2800_v42   ;;  %2985 = vperm.xlu0 %5601, %v2799_v27   ;;  %v2710_v42 = vld [vmem:[#allocation2 + $0x28] sm:$0xff]  ;;  %v2709_v27 = vld [vmem:[#allocation2 + $0x20] sm:$0xff] }
 0x39d   : > { %5265 = vmatmul.mubr.bf16.gmra.mrb[12].mxu1 %v5626_v35  ;;  %v2712_v35 = vld [vmem:[#allocation2 + $0x38] sm:$0xff] }
 0x39e   : > { %5268 = vmatprep.mubr.bf16.mxu1 %v5627_v15 }
 0x3a0   : > { %3000 = vperm.xlu1 %5602, %v2802_v33   ;;  %2995 = vperm.xlu0 %5601, %v2801_v26  }
 0x3a4   : > { %3010 = vperm.xlu1 %5602, %v2804_v4   ;;  %3005 = vperm.xlu0 %5601, %v2803_v38  }
 0x3a5   : > { %5269 = vmatmul.mubr.bf16.gmra.mrb[16].mxu1 %v5628_v23 }
 0x3a6   : > { %5272 = vmatprep.mubr.bf16.mxu1 %v5629_v11  ;;  %v2714_v11 = vld [vmem:[#allocation2 + $0x48] sm:$0xff] }
 0x3a8   : > { %3020 = vperm.xlu1 %5602, %v2806_v18   ;;  %3015 = vperm.xlu0 %5601, %v2805_v28  }
 0x3ac   : > { %3030 = vperm.xlu1 %5602, %v2808_v41   ;;  %3025 = vperm.xlu0 %5601, %v2807_v2   ;;  %v2711_v41 = vld [vmem:[#allocation2 + $0x30] sm:$0xff] }
 0x3ad   : > { %5273 = vmatmul.mubr.bf16.gmra.mrb[20].mxu1 %v5630_v56 }
 0x3ae   : > { %5276 = vmatprep.mubr.bf16.mxu1 %v5631_v3  ;;  %v5645_v3 = vld [vmem:[%s6509_s29 + $0xd0] sm:$0xff]  }
 0x3b0   : > { %3040 = vperm.xlu1 %5602, %v2810_v43   ;;  %3035 = vperm.xlu0 %5601, %v2809_v36  }
 0x3b4   : > { %3050 = vperm.xlu1 %5602, %v2812_v49   ;;  %3045 = vperm.xlu0 %5601, %v2811_v39   ;;  %v2713_v49 = vld [vmem:[#allocation2 + $0x40] sm:$0xff] }
 0x3b5   : > { %5277 = vmatmul.mubr.bf16.gmra.mrb[24].mxu1 %v5632_v63 }
 0x3b6   : > { %5280 = vmatprep.mubr.bf16.mxu1 %v5633_v24 }
 0x3b8   : > { %3060 = vperm.xlu1 %5602, %v2814_v16   ;;  %3055 = vperm.xlu0 %5601, %v2813_v14   ;;  %v5644_v16 = vld [vmem:[%s6509_s29 + $0xc8] sm:$0xff]  }
 0x3bc   : > { %3070 = vperm.xlu1 %5602, %v2816_v51   ;;  %3065 = vperm.xlu0 %5601, %v2815_v46  }
 0x3bd   : > { %5281 = vmatmul.mubr.bf16.gmra.mrb[28].mxu1 %v5634_v37  ;;  %v2717_v37 = vld [vmem:[#allocation2 + $0x60] sm:$0xff] }
 0x3be   : > { %5284 = vmatprep.mubr.bf16.mxu1 %v5635_v8 }
 0x3c0   : > { %3080 = vperm.xlu1 %5602, %v2818_v10   ;;  %3075 = vperm.xlu0 %5601, %v2817_v12   ;;  %v2716_v10 = vld [vmem:[#allocation2 + $0x58] sm:$0xff]  ;;  %v2715_v12 = vld [vmem:[#allocation2 + $0x50] sm:$0xff] }
 0x3c4   : > { %3090 = vperm.xlu1 %5602, %v2820_v45   ;;  %3085 = vperm.xlu0 %5601, %v2819_v59  }
 0x3c5   : > { %5285 = vmatmul.mubr.bf16.gmra.mrb[32].mxu1 %v5636_v1 }
 0x3c6   : > { %5288 = vmatprep.mubr.bf16.mxu1 %v5637_v22 }
 0x3c8   : > { %3100 = vperm.xlu1 %5602, %v2822_v47   ;;  %3095 = vperm.xlu0 %5601, %v2821_v7   ;;  %v2718_v7 = vld [vmem:[#allocation2 + $0x68] sm:$0xff] }
 0x3cc   : > { %3110 = vperm.xlu1 %5602, %v2824_v60   ;;  %3105 = vperm.xlu0 %5601, %v2823_v58   ;;  %v5646_v60 = vld [vmem:[%s6509_s29 + $0xd8] sm:$0xff]  }
 0x3cd   : > { %5289 = vmatmul.mubr.bf16.gmra.mrb[36].mxu1 %v5638_v25 }
 0x3ce   : > { %5292 = vmatprep.mubr.bf16.mxu1 %v5639_v31 }
 0x3d0   : > { %3120 = vperm.xlu1 %5602, %v2826_v55   ;;  %3115 = vperm.xlu0 %5601, %v2825_v0   ;;  %v5647_v0 = vld [vmem:[%s6509_s29 + $0xe0] sm:$0xff]  }
 0x3d4   : > { %3130 = vperm.xlu1 %5602, %v2828_v6   ;;  %3125 = vperm.xlu0 %5601, %v2827_v21   ;;  %v2720_v6 = vld [vmem:[#allocation2 + $0x78] sm:$0xff]  ;;  %v2719_v21 = vld [vmem:[#allocation2 + $0x70] sm:$0xff] }
 0x3d5   : > { %5293 = vmatmul.mubr.bf16.gmra.mrb[40].mxu1 %v5640_v13  ;;  %v2721_v13 = vld [vmem:[#allocation2 + $0x80] sm:$0xff] }
 0x3d6   : > { %5296 = vmatprep.mubr.bf16.mxu1 %v5641_v30 }
 0x3d8   : > { %3140 = vperm.xlu1 %5602, %v2830_v48   ;;  %3135 = vperm.xlu0 %5601, %v2829_v9  }
 0x3dc   : > { %3150 = vperm.xlu1 %5602, %v2832_v29   ;;  %3145 = vperm.xlu0 %5601, %v2831_v19   ;;  %v2722_v19 = vld [vmem:[#allocation2 + $0x88] sm:$0xff] }
 0x3dd   : > { %5297 = vmatmul.mubr.bf16.gmra.mrb[44].mxu1 %v5642_v5  ;;  %v5650_v5 = vld [vmem:[%s6509_s29 + $0xf8] sm:$0xff]  }
 0x3de   : > { %5300 = vmatprep.mubr.bf16.mxu1 %v5643_v32 }
 0x3df   : > { %v2846_v34 = vpop.permute.xlu1 %2845  ;;  %v2836_v44 = vpop.permute.xlu0 %2835 }
 0x3e0   : > { %v3155_v57 = vmul.f32 %v2846_v34, %v2707_v17  ;;  %v3153_v62 = vmul.f32 %v2836_v44, %v2705_v40  ;;  %v5648_v44 = vld [vmem:[%s6509_s29 + $0xe8] sm:$0xff]   ;;  %v5649_v40 = vld [vmem:[%s6509_s29 + $0xf0] sm:$0xff]  }
 0x3e3   : > { %v2851_v54 = vpop.permute.xlu1 %2850  ;;  %v2841_v50 = vpop.permute.xlu0 %2840 }
 0x3e4   : > { %v3156_v61 = vmul.f32 %v2851_v54, %v2708_v52  ;;  %v3154_v53 = vmul.f32 %v2841_v50, %v2706_v20  ;;  %v2724_v54 = vld [vmem:[#allocation2 + $0x98] sm:$0xff]  ;;  %v2723_v50 = vld [vmem:[#allocation2 + $0x90] sm:$0xff] }
 0x3e5   : > { %5301 = vmatmul.mubr.bf16.gmra.mrb[48].mxu1 %v5644_v16 }
 0x3e6   : > { %v3218_v33 = vpack.c.bf16 %v3156_v61, %v3155_v57  ;;  %v3217_v26 = vpack.c.bf16 %v3154_v53, %v3153_v62  ;;  %5304 = vmatprep.mubr.bf16.mxu1 %v5645_v3  ;;  %v2732_v3 = vld [vmem:[#allocation2 + $0xd8] sm:$0xff] }
 0x3e7   : > { %v2861_v4 = vpop.permute.xlu1 %2860  ;;  %v2856_v38 = vpop.permute.xlu0 %2855 }
 0x3e8   : > { %v3158_v18 = vmul.f32 %v2861_v4, %v2710_v42  ;;  %v3157_v28 = vmul.f32 %v2856_v38, %v2709_v27  ;;  %5332 = vmatprep.mubr.bf16.mxu0 %v3217_v26  ;;  %v2726_v27 = vld [vmem:[#allocation2 + $0xa8] sm:$0xff] }
 0x3e9   : > { %5333 = vmatmul.mubr.bf16.vlgmr.msra.gmra.mrb[0].mxu0 %v3218_v33  ;;  %v2725_v33 = vld [vmem:[#allocation2 + $0xa0] sm:$0xff] }
 0x3ea   : > { %v3219_v2 = vpack.c.bf16 %v3158_v18, %v3157_v28  ;;  %v2728_v28 = vld [vmem:[#allocation2 + $0xb8] sm:$0xff] }
 0x3eb   : > { %v2871_v15 = vpop.permute.xlu1 %2870  ;;  %v2866_v43 = vpop.permute.xlu0 %2865 }
 0x3ec   : > { %v3160_v36 = vmul.f32 %v2871_v15, %v2712_v35  ;;  %v3159_v23 = vmul.f32 %v2866_v43, %v2711_v41  ;;  %5336 = vmatprep.mubr.bf16.mxu0 %v3219_v2  ;;  %v2727_v35 = vld [vmem:[#allocation2 + $0xb0] sm:$0xff] }
 0x3ed   : > { %5305 = vmatmul.mubr.bf16.gmra.mrb[52].mxu1 %v5646_v60 }
 0x3ee   : > { %v3220_v39 = vpack.c.bf16 %v3160_v36, %v3159_v23  ;;  %5308 = vmatprep.mubr.bf16.mxu1 %v5647_v0  ;;  %v2730_v23 = vld [vmem:[#allocation2 + $0xc8] sm:$0xff] }
 0x3ef   : > { %v2881_v14 = vpop.permute.xlu1 %2880  ;;  %v2876_v56 = vpop.permute.xlu0 %2875 }
 0x3f0   : > { %v3162_v51 = vmul.f32 %v2881_v14, %v2714_v11  ;;  %v3161_v46 = vmul.f32 %v2876_v56, %v2713_v49  ;;  %v2729_v11 = vld [vmem:[#allocation2 + $0xc0] sm:$0xff] }
 0x3f1   : > { %5337 = vmatmul.mubr.bf16.gmra.mrb[4].mxu0 %v3220_v39 }
 0x3f2   : > { %v3221_v63 = vpack.c.bf16 %v3162_v51, %v3161_v46  ;;  %v2731_v51 = vld [vmem:[#allocation2 + $0xd0] sm:$0xff] }
 0x3f3   : > { %v2891_v24 = vpop.permute.xlu1 %2890  ;;  %v2886_v45 = vpop.permute.xlu0 %2885 }
 0x3f4   : > { %v3164_v59 = vmul.f32 %v2891_v24, %v2716_v10  ;;  %v3163_v47 = vmul.f32 %v2886_v45, %v2715_v12  ;;  %5340 = vmatprep.mubr.bf16.mxu0 %v3221_v63  ;;  %v2734_v45 = vld [vmem:[#allocation2 + $0xe8] sm:$0xff] }
 0x3f5   : > { %5309 = vmatmul.mubr.bf16.gmra.mrb[56].mxu1 %v5648_v44  ;;  %v2739_v44 = vld [vmem:[#allocation2 + $0x110] sm:$0xff] }
 0x3f6   : > { %v3222_v8 = vpack.c.bf16 %v3164_v59, %v3163_v47  ;;  %5312 = vmatprep.mubr.bf16.mxu1 %v5649_v40  ;;  %v2733_v59 = vld [vmem:[#allocation2 + $0xe0] sm:$0xff] }
 0x3f7   : > { %v2901_v58 = vpop.permute.xlu1 %2900  ;;  %v2896_v55 = vpop.permute.xlu0 %2895 }
 0x3f8   : > { %v3166_v1 = vmul.f32 %v2901_v58, %v2718_v7  ;;  %v3165_v22 = vmul.f32 %v2896_v55, %v2717_v37  ;;  %v2736_v58 = vld [vmem:[#allocation2 + $0xf8] sm:$0xff]  ;;  %v2735_v55 = vld [vmem:[#allocation2 + $0xf0] sm:$0xff] }
 0x3f9   : > { %5341 = vmatmul.mubr.bf16.gmra.mrb[8].mxu0 %v3222_v8 }
 0x3fa   : > { %v3223_v48 = vpack.c.bf16 %v3166_v1, %v3165_v22 }
 0x3fb   : > { %v2911_v9 = vpop.permute.xlu1 %2910  ;;  %v2906_v25 = vpop.permute.xlu0 %2905 }
 0x3fc   : > { %v3168_v31 = vmul.f32 %v2911_v9, %v2720_v6  ;;  %v3167_v29 = vmul.f32 %v2906_v25, %v2719_v21  ;;  %5344 = vmatprep.mubr.bf16.mxu0 %v3223_v48  ;;  %v2738_v48 = vld [vmem:[#allocation2 + $0x108] sm:$0xff]  ;;  %v2737_v9 = vld [vmem:[#allocation2 + $0x100] sm:$0xff] }
 0x3fd   : > { %5313 = vmatmul.mubr.bf16.gmra.mrb[60].mxu1 %v5650_v5 }
 0x3fe   : > { %v3224_v34 = vpack.c.bf16 %v3168_v31, %v3167_v29 }
 0x3ff   : > { %v2921_v30 = vpop.permute.xlu1 %2920  ;;  %v2916_v17 = vpop.permute.xlu0 %2915 }
 0x400   : > { %v3170_v52 = vmul.f32 %v2921_v30, %v2722_v19  ;;  %v3169_v20 = vmul.f32 %v2916_v17, %v2721_v13 }
 0x401   : > { %5345 = vmatmul.mubr.bf16.gmra.mrb[12].mxu0 %v3224_v34  ;;  %v2740_v34 = vld [vmem:[#allocation2 + $0x118] sm:$0xff] }
 0x402   : > { %v3225_v57 = vpack.c.bf16 %v3170_v52, %v3169_v20 }
 0x403   : > { %v2931_v62 = vpop.permute.xlu1 %2930  ;;  %v2926_v61 = vpop.permute.xlu0 %2925 }
 0x404   : > { %v3172_v53 = vmul.f32 %v2931_v62, %v2724_v54  ;;  %v3171_v42 = vmul.f32 %v2926_v61, %v2723_v50  ;;  %5348 = vmatprep.mubr.bf16.mxu0 %v3225_v57  ;;  %v2742_v54 = vld [vmem:[#allocation2 + $0x128] sm:$0xff]  ;;  %v2741_v50 = vld [vmem:[#allocation2 + $0x120] sm:$0xff] }
 0x406   : > { %v3226_v26 = vpack.c.bf16 %v3172_v53, %v3171_v42 }
 0x407   : > { %v2941_v4 = vpop.permute.xlu1 %2940  ;;  %v2936_v38 = vpop.permute.xlu0 %2935 }
 0x408   : > { %v3174_v32 = vmul.f32 %v2941_v4, %v2726_v27  ;;  %v3173_v18 = vmul.f32 %v2936_v38, %v2725_v33  ;;  %v2744_v27 = vld [vmem:[#allocation2 + $0x138] sm:$0xff]  ;;  %v2743_v33 = vld [vmem:[#allocation2 + $0x130] sm:$0xff] }
 0x409   : > { %5349 = vmatmul.mubr.bf16.gmra.mrb[16].mxu0 %v3226_v26 }
 0x40a   : > { %v3227_v41 = vpack.c.bf16 %v3174_v32, %v3173_v18  ;;  %v2746_v18 = vld [vmem:[#allocation2 + $0x148] sm:$0xff] }
 0x40b   : > { %v2951_v2 = vpop.permute.xlu1 %2950  ;;  %v2946_v15 = vpop.permute.xlu0 %2945 }
 0x40c   : > { %v3176_v43 = vmul.f32 %v2951_v2, %v2728_v28  ;;  %v3175_v36 = vmul.f32 %v2946_v15, %v2727_v35  ;;  %5352 = vmatprep.mubr.bf16.mxu0 %v3227_v41  ;;  %v2745_v28 = vld [vmem:[#allocation2 + $0x140] sm:$0xff] }
 0x40e   : > { %v3228_v49 = vpack.c.bf16 %v3176_v43, %v3175_v36  ;;  %v2748_v36 = vld [vmem:[#allocation2 + $0x158] sm:$0xff] }
 0x40f   : > { %v2961_v39 = vpop.permute.xlu1 %2960  ;;  %v2956_v16 = vpop.permute.xlu0 %2955 }
 0x410   : > { %v3178_v14 = vmul.f32 %v2961_v39, %v2730_v23  ;;  %v3177_v56 = vmul.f32 %v2956_v16, %v2729_v11  ;;  %v2747_v23 = vld [vmem:[#allocation2 + $0x150] sm:$0xff] }
 0x411   : > { %5353 = vmatmul.mubr.bf16.gmra.mrb[20].mxu0 %v3228_v49 }
 0x412   : > { %v3229_v46 = vpack.c.bf16 %v3178_v14, %v3177_v56  ;;  %v2750_v56 = vld [vmem:[#allocation2 + $0x168] sm:$0xff] }
 0x413   : > { %v2971_v10 = vpop.permute.xlu1 %2970  ;;  %v2966_v12 = vpop.permute.xlu0 %2965 }
 0x414   : > { %v3180_v63 = vmul.f32 %v2971_v10, %v2732_v3  ;;  %v3179_v24 = vmul.f32 %v2966_v12, %v2731_v51  ;;  %5356 = vmatprep.mubr.bf16.mxu0 %v3229_v46  ;;  %v2749_v3 = vld [vmem:[#allocation2 + $0x160] sm:$0xff] }
 0x416   : > { %v3230_v47 = vpack.c.bf16 %v3180_v63, %v3179_v24  ;;  %v2752_v24 = vld [vmem:[#allocation2 + $0x178] sm:$0xff] }
 0x417   : > { %v2981_v7 = vpop.permute.xlu1 %2980  ;;  %v2976_v37 = vpop.permute.xlu0 %2975 }
 0x418   : > { %v3182_v8 = vmul.f32 %v2981_v7, %v2734_v45  ;;  %v3181_v60 = vmul.f32 %v2976_v37, %v2733_v59  ;;  %v2751_v45 = vld [vmem:[#allocation2 + $0x170] sm:$0xff] }
 0x419   : > { %5357 = vmatmul.mubr.bf16.gmra.mrb[24].mxu0 %v3230_v47 }
 0x41a   : > { %v3231_v0 = vpack.c.bf16 %v3182_v8, %v3181_v60  ;;  %v2754_v60 = vld [vmem:[#allocation2 + $0x188] sm:$0xff] }
 0x41b   : > { %v2991_v1 = vpop.permute.xlu1 %2990  ;;  %v2986_v22 = vpop.permute.xlu0 %2985 }
 0x41c   : > { %v3184_v6 = vmul.f32 %v2991_v1, %v2736_v58  ;;  %v3183_v21 = vmul.f32 %v2986_v22, %v2735_v55  ;;  %5360 = vmatprep.mubr.bf16.mxu0 %v3231_v0  ;;  %v2753_v58 = vld [vmem:[#allocation2 + $0x180] sm:$0xff] }
 0x41e   : > { %v3232_v25 = vpack.c.bf16 %v3184_v6, %v3183_v21  ;;  %v2756_v21 = vld [vmem:[#allocation2 + $0x198] sm:$0xff] }
 0x41f   : > { %v3001_v31 = vpop.permute.xlu1 %3000  ;;  %v2996_v29 = vpop.permute.xlu0 %2995 }
 0x420   : > { %v3186_v19 = vmul.f32 %v3001_v31, %v2738_v48  ;;  %v3185_v13 = vmul.f32 %v2996_v29, %v2737_v9  ;;  %v2755_v48 = vld [vmem:[#allocation2 + $0x190] sm:$0xff] }
 0x421   : > { %5361 = vmatmul.mubr.bf16.gmra.mrb[28].mxu0 %v3232_v25 }
 0x422   : > { %v3233_v30 = vpack.c.bf16 %v3186_v19, %v3185_v13  ;;  %v2758_v13 = vld [vmem:[#allocation2 + $0x1a8] sm:$0xff] }
 0x423   : > { %v3011_v17 = vpop.permute.xlu1 %3010  ;;  %v3006_v40 = vpop.permute.xlu0 %3005 }
 0x424   : > { %v3188_v52 = vmul.f32 %v3011_v17, %v2740_v34  ;;  %v3187_v20 = vmul.f32 %v3006_v40, %v2739_v44  ;;  %5364 = vmatprep.mubr.bf16.mxu0 %v3233_v30  ;;  %v2757_v34 = vld [vmem:[#allocation2 + $0x1a0] sm:$0xff] }
 0x426   : > { %v3234_v57 = vpack.c.bf16 %v3188_v52, %v3187_v20  ;;  %v2760_v20 = vld [vmem:[#allocation2 + $0x1b8] sm:$0xff] }
 0x427   : > { %v3021_v62 = vpop.permute.xlu1 %3020  ;;  %v3016_v61 = vpop.permute.xlu0 %3015 }
 0x428   : > { %v3190_v53 = vmul.f32 %v3021_v62, %v2742_v54  ;;  %v3189_v42 = vmul.f32 %v3016_v61, %v2741_v50  ;;  %v2759_v54 = vld [vmem:[#allocation2 + $0x1b0] sm:$0xff] }
 0x429   : > { %5365 = vmatmul.mubr.bf16.gmra.mrb[32].mxu0 %v3234_v57 }
 0x42a   : > { %v3235_v26 = vpack.c.bf16 %v3190_v53, %v3189_v42  ;;  %v2762_v42 = vld [vmem:[#allocation2 + $0x1c8] sm:$0xff] }
 0x42b   : > { %v3031_v5 = vpop.permute.xlu1 %3030  ;;  %v3026_v4 = vpop.permute.xlu0 %3025 }
 0x42c   : > { %v3192_v38 = vmul.f32 %v3031_v5, %v2744_v27  ;;  %v3191_v32 = vmul.f32 %v3026_v4, %v2743_v33  ;;  %5368 = vmatprep.mubr.bf16.mxu0 %v3235_v26  ;;  %v2761_v27 = vld [vmem:[#allocation2 + $0x1c0] sm:$0xff] }
 0x42e   : > { %v3236_v35 = vpack.c.bf16 %v3192_v38, %v3191_v32  ;;  %v2764_v32 = vld [vmem:[#allocation2 + $0x1d8] sm:$0xff] }
 0x42f   : > { %v3041_v41 = vpop.permute.xlu1 %3040  ;;  %v3036_v2 = vpop.permute.xlu0 %3035 }
 0x430   : > { %v3194_v15 = vmul.f32 %v3041_v41, %v2746_v18  ;;  %v3193_v43 = vmul.f32 %v3036_v2, %v2745_v28  ;;  %v2763_v18 = vld [vmem:[#allocation2 + $0x1d0] sm:$0xff] }
 0x431   : > { %5369 = vmatmul.mubr.bf16.gmra.mrb[36].mxu0 %v3236_v35 }
 0x432   : > { %v3237_v11 = vpack.c.bf16 %v3194_v15, %v3193_v43  ;;  %v2766_v43 = vld [vmem:[#allocation2 + $0x1e8] sm:$0xff] }
 0x433   : > { %v3051_v49 = vpop.permute.xlu1 %3050  ;;  %v3046_v39 = vpop.permute.xlu0 %3045 }
 0x434   : > { %v3196_v16 = vmul.f32 %v3051_v49, %v2748_v36  ;;  %v3195_v14 = vmul.f32 %v3046_v39, %v2747_v23  ;;  %5372 = vmatprep.mubr.bf16.mxu0 %v3237_v11  ;;  %v2765_v36 = vld [vmem:[#allocation2 + $0x1e0] sm:$0xff] }
 0x436   : > { %v3238_v51 = vpack.c.bf16 %v3196_v16, %v3195_v14  ;;  %v2768_v14 = vld [vmem:[#allocation2 + $0x1f8] sm:$0xff] }
 0x437   : > { %v3061_v46 = vpop.permute.xlu1 %3060  ;;  %v3056_v10 = vpop.permute.xlu0 %3055 }
 0x438   : > { %v3198_v12 = vmul.f32 %v3061_v46, %v2750_v56  ;;  %v3197_v63 = vmul.f32 %v3056_v10, %v2749_v3  ;;  %v2767_v56 = vld [vmem:[#allocation2 + $0x1f0] sm:$0xff] }
 0x439   : > { %5373 = vmatmul.mubr.bf16.gmra.mrb[40].mxu0 %v3238_v51 }
 0x43a   : > { %v3239_v59 = vpack.c.bf16 %v3198_v12, %v3197_v63 }
 0x43b   : > { %v3071_v47 = vpop.permute.xlu1 %3070  ;;  %v3066_v7 = vpop.permute.xlu0 %3065 }
 0x43c   : > { %v3200_v37 = vmul.f32 %v3071_v47, %v2752_v24  ;;  %v3199_v8 = vmul.f32 %v3066_v7, %v2751_v45  ;;  %5376 = vmatprep.mubr.bf16.mxu0 %v3239_v59 }
 0x43e   : > { %v3240_v55 = vpack.c.bf16 %v3200_v37, %v3199_v8 }
 0x43f   : > { %v3081_v0 = vpop.permute.xlu1 %3080  ;;  %v3076_v1 = vpop.permute.xlu0 %3075 }
 0x440   : > { %v3202_v22 = vmul.f32 %v3081_v0, %v2754_v60  ;;  %v3201_v6 = vmul.f32 %v3076_v1, %v2753_v58 }
 0x441   : > { %5377 = vmatmul.mubr.bf16.gmra.mrb[44].mxu0 %v3240_v55 }
 0x442   : > { %v3241_v9 = vpack.c.bf16 %v3202_v22, %v3201_v6 }
 0x443   : > { %v3091_v25 = vpop.permute.xlu1 %3090  ;;  %v3086_v31 = vpop.permute.xlu0 %3085 }
 0x444   : > { %v3204_v29 = vmul.f32 %v3091_v25, %v2756_v21  ;;  %v3203_v19 = vmul.f32 %v3086_v31, %v2755_v48  ;;  %5380 = vmatprep.mubr.bf16.mxu0 %v3241_v9 }
 0x446   : > { %v3242_v44 = vpack.c.bf16 %v3204_v29, %v3203_v19 }
 0x447   : > { %v3101_v30 = vpop.permute.xlu1 %3100  ;;  %v3096_v17 = vpop.permute.xlu0 %3095 }
 0x448   : > { %v3206_v40 = vmul.f32 %v3101_v30, %v2758_v13  ;;  %v3205_v52 = vmul.f32 %v3096_v17, %v2757_v34 }
 0x449   : > { %5381 = vmatmul.mubr.bf16.gmra.mrb[48].mxu0 %v3242_v44 }
 0x44a   : > { %v3243_v50 = vpack.c.bf16 %v3206_v40, %v3205_v52 }
 0x44b   : > { %v3111_v57 = vpop.permute.xlu1 %3110  ;;  %v3106_v62 = vpop.permute.xlu0 %3105 }
 0x44c   : > { %v3208_v61 = vmul.f32 %v3111_v57, %v2760_v20  ;;  %v3207_v53 = vmul.f32 %v3106_v62, %v2759_v54  ;;  %5384 = vmatprep.mubr.bf16.mxu0 %v3243_v50 }
 0x44e   : > { %v3244_v33 = vpack.c.bf16 %v3208_v61, %v3207_v53 }
 0x44f   : > { %v3121_v26 = vpop.permute.xlu1 %3120  ;;  %v3116_v5 = vpop.permute.xlu0 %3115 }
 0x450   : > { %v3210_v4 = vmul.f32 %v3121_v26, %v2762_v42  ;;  %v3209_v38 = vmul.f32 %v3116_v5, %v2761_v27 }
 0x451   : > { %5385 = vmatmul.mubr.bf16.gmra.mrb[52].mxu0 %v3244_v33 }
 0x452   : > { %v3245_v28 = vpack.c.bf16 %v3210_v4, %v3209_v38 }
 0x453   : > { %v3131_v35 = vpop.permute.xlu1 %3130  ;;  %v3126_v41 = vpop.permute.xlu0 %3125 }
 0x454   : > { %v3212_v2 = vmul.f32 %v3131_v35, %v2764_v32  ;;  %v3211_v15 = vmul.f32 %v3126_v41, %v2763_v18  ;;  %5388 = vmatprep.mubr.bf16.mxu0 %v3245_v28  ;;  %v6685_v35 = vld [vmem:[%s6967_s16] ss:$0 sm:$0xff] }
 0x456   : > { %v3246_v23 = vpack.c.bf16 %v3212_v2, %v3211_v15 }
 0x457   : > { %v3141_v11 = vpop.permute.xlu1 %3140  ;;  %v3136_v49 = vpop.permute.xlu0 %3135 }
 0x458   : > { %v3214_v39 = vmul.f32 %v3141_v11, %v2766_v43  ;;  %v3213_v16 = vmul.f32 %v3136_v49, %v2765_v36  ;;  %v5254_v24 = vpop.f32.mrb[0].mxu1 }
 0x459   : > { %5389 = vmatmul.mubr.bf16.gmra.mrb[56].mxu0 %v3246_v23  ;;  %v3555_v45 = vpop.f32.mrb[1].mxu1 }
 0x45a   : > { %v3247_v3 = vpack.c.bf16 %v3214_v39, %v3213_v16  ;;  %v5255_v59 = vpop.f32.mrb[2].mxu1 }
 0x45b   : > { %v3151_v51 = vpop.permute.xlu1 %3150  ;;  %v3146_v46 = vpop.permute.xlu0 %3145 }
 0x45c   : > { %v3216_v10 = vmul.f32 %v3151_v51, %v2768_v14  ;;  %v3215_v12 = vmul.f32 %v3146_v46, %v2767_v56  ;;  %5392 = vmatprep.mubr.bf16.mxu0 %v3247_v3  ;;  %v3558_v47 = vpop.f32.mrb[3].mxu1 }
 0x45e   : > { %v3248_v63 = vpack.c.bf16 %v3216_v10, %v3215_v12 }
 0x460   : > { %v6602_v7 = vpop.f32.mrb[4].mxu1 }
 0x461   : > { %5393 = vmatmul.mubr.bf16.gmra.mrb[60].mxu0 %v3248_v63  ;;  %v6604_v37 = vpop.f32.mrb[5].mxu1 }
 0x462   : > { %v6606_v8 = vpop.f32.mrb[6].mxu1 }
 0x463   : > { %v6608_v60 = vpop.f32.mrb[7].mxu1 }
 0x468   : > { %v6610_v58 = vpop.f32.mrb[8].mxu1 }
 0x469   : > { %v6612_v55 = vpop.f32.mrb[9].mxu1 }
 0x46a   : > { %v6614_v0 = vpop.f32.mrb[10].mxu1 }
 0x46b   : > { %v6616_v1 = vpop.f32.mrb[11].mxu1 }
 0x470   : > { %v6618_v22 = vpop.f32.mrb[12].mxu1 }
 0x471   : > { %v6620_v6 = vpop.f32.mrb[13].mxu1 }
 0x472   : > { %v6622_v21 = vpop.f32.mrb[14].mxu1 }
 0x473   : > { %v6624_v48 = vpop.f32.mrb[15].mxu1 }
 0x478   : > { %v6626_v9 = vpop.f32.mrb[16].mxu1 }
 0x479   : > { %v6628_v25 = vpop.f32.mrb[17].mxu1 }
 0x47a   : > { %v6630_v31 = vpop.f32.mrb[18].mxu1 }
 0x47b   : > { %v6632_v29 = vpop.f32.mrb[19].mxu1 }
 0x480   : > { %v6634_v19 = vpop.f32.mrb[20].mxu1 }
 0x481   : > { %v6636_v13 = vpop.f32.mrb[21].mxu1 }
 0x482   : > { %v6638_v34 = vpop.f32.mrb[22].mxu1 }
 0x483   : > { %v6640_v44 = vpop.f32.mrb[23].mxu1 }
 0x488   : > { %v6642_v30 = vpop.f32.mrb[24].mxu1 }
 0x489   : > { %v6644_v17 = vpop.f32.mrb[25].mxu1 }
 0x48a   : > { %v6646_v40 = vpop.f32.mrb[26].mxu1 }
 0x48b   : > { %v6648_v52 = vpop.f32.mrb[27].mxu1 }
 0x490   : > { %v6650_v20 = vpop.f32.mrb[28].mxu1 }
 0x491   : > { %v6652_v54 = vpop.f32.mrb[29].mxu1 }
 0x492   : > { %v6654_v50 = vpop.f32.mrb[30].mxu1 }
 0x493   : > { %v6656_v57 = vpop.f32.mrb[31].mxu1 }
 0x498   : > { %v6658_v62 = vpop.f32.mrb[32].mxu1 }
 0x499   : > { %v6660_v61 = vpop.f32.mrb[33].mxu1 }
 0x49a   : > { %v6662_v53 = vpop.f32.mrb[34].mxu1 }
 0x49b   : > { %v6664_v42 = vpop.f32.mrb[35].mxu1 }
 0x4a0   : > { %v6666_v27 = vpop.f32.mrb[36].mxu1 }
 0x4a1   : > { %v6668_v33 = vpop.f32.mrb[37].mxu1 }
 0x4a2   : > { %v6670_v26 = vpop.f32.mrb[38].mxu1 }
 0x4a3   : > { %v6672_v5 = vpop.f32.mrb[39].mxu1 }
 0x4a8   : > { %v6674_v4 = vpop.f32.mrb[40].mxu1 }
 0x4a9   : > { %v6676_v38 = vpop.f32.mrb[41].mxu1 }
 0x4aa   : > { %v6678_v32 = vpop.f32.mrb[42].mxu1 }
 0x4ab   : > { %v6680_v18 = vpop.f32.mrb[43].mxu1 }
 0x4b0   : > { %v6687_v15 = vpop.f32.mrb[44].mxu1 }
 0x4b1   : > { %v6689_v23 = vpop.f32.mrb[45].mxu1 }
 0x4b2   : > { %v6692_v16 = vpop.f32.mrb[46].mxu1 }
 0x4b3   : > { %v6695_v3 = vpop.f32.mrb[47].mxu1 }
 0x4bc   : > { %v5334_v28 = vpop.f32.mrb[0].mxu0 }
 0x4bd   : > { %v3901_v41 = vadd.f32 %v5334_v28, %v5254_v24  ;;  %v3892_v2 = vpop.f32.mrb[1].mxu0 }
 0x4be   : > { %v3893_v43 = vadd.f32 %v3892_v2, %v3555_v45  ;;  %v5335_v36 = vpop.f32.mrb[2].mxu0  ;;  %v6700_v2 = vpop.f32.mrb[48].mxu1 }
 0x4bf   : > { %v4156_v11 = vadd.f32 %v6685_v35, %v3901_v41  ;;  %v3904_v49 = vadd.f32 %v5335_v36, %v5255_v59  ;;  %v3895_v39 = vpop.f32.mrb[3].mxu0 }
 0x4c0   : > { %v4154_v14 = vadd.f32 %v6685_v35, %v3893_v43  ;;  %v3896_v56 = vadd.f32 %v3895_v39, %v3558_v47  ;;  %v6703_v39 = vpop.f32.mrb[49].mxu1 }
 0x4c1   : > { %v4157_v51 = vadd.f32 %v6685_v35, %v3904_v49  ;;  %v4220_v10 = vmax.f32 %v4156_v11, 0.0 }
 0x4c2   : > { %v4155_v46 = vadd.f32 %v6685_v35, %v3896_v56  ;;  %v4218_v63 = vmax.f32 %v4154_v14, 0.0  ;;  %v6708_v56 = vpop.f32.mrb[50].mxu1 }
 0x4c3   : > { %v4221_v12 = vmax.f32 %v4157_v51, 0.0 }
 0x4c4   : > { %v4219_v24 = vmax.f32 %v4155_v46, 0.0  ;;  %v5338_v45 = vpop.f32.mrb[4].mxu0  ;;  %v6713_v46 = vpop.f32.mrb[51].mxu1 }
 0x4c5   : > { %v4973_v59 = vpack.c.bf16 %v4221_v12, %v4220_v10  ;;  %v3917_v28 = vadd.f32 %v5338_v45, %v6602_v7  ;;  %v3908_v41 = vpop.f32.mrb[5].mxu0 }
 0x4c6   : > { %v4968_v47 = vpack.c.bf16 %v4219_v24, %v4218_v63  ;;  %v3909_v43 = vadd.f32 %v3908_v41, %v6604_v37  ;;  %v5339_v36 = vpop.f32.mrb[6].mxu0 }
 0x4c7   : > { %5125 = vst [vmem:[%s5922_s19 + $0x8] sm:$0xff] %v4973_v59   ;;  %v4160_v11 = vadd.f32 %v6685_v35, %v3917_v28  ;;  %v3920_v49 = vadd.f32 %v5339_v36, %v6606_v8  ;;  %v3911_v14 = vpop.f32.mrb[7].mxu0 }
 0x4c8   : > { %4969 = vst [vmem:[%s5922_s19] sm:$0xff] %v4968_v47   ;;  %v4158_v7 = vadd.f32 %v6685_v35, %v3909_v43  ;;  %v3912_v51 = vadd.f32 %v3911_v14, %v6608_v60  ;;  %v6718_v47 = vpop.f32.mrb[52].mxu1 }
 0x4c9   : > { %v4161_v37 = vadd.f32 %v6685_v35, %v3920_v49  ;;  %v4224_v12 = vmax.f32 %v4160_v11, 0.0  ;;  %v6721_v14 = vpop.f32.mrb[53].mxu1 }
 0x4ca   : > { %v4159_v10 = vadd.f32 %v6685_v35, %v3912_v51  ;;  %v4222_v24 = vmax.f32 %v4158_v7, 0.0  ;;  %v6726_v51 = vpop.f32.mrb[54].mxu1 }
 0x4cb   : > { %v4225_v63 = vmax.f32 %v4161_v37, 0.0 }
 0x4cc   : > { %v4223_v8 = vmax.f32 %v4159_v10, 0.0  ;;  %v5342_v45 = vpop.f32.mrb[8].mxu0  ;;  %v6731_v10 = vpop.f32.mrb[55].mxu1 }
 0x4cd   : > { %v4983_v59 = vpack.c.bf16 %v4225_v63, %v4224_v12  ;;  %v3933_v28 = vadd.f32 %v5342_v45, %v6610_v58  ;;  %v3924_v41 = vpop.f32.mrb[9].mxu0 }
 0x4ce   : > { %v4978_v60 = vpack.c.bf16 %v4223_v8, %v4222_v24  ;;  %v3925_v43 = vadd.f32 %v3924_v41, %v6612_v55  ;;  %v5343_v36 = vpop.f32.mrb[10].mxu0 }
 0x4cf   : > { %5127 = vst [vmem:[%s5922_s19 + $0x18] sm:$0xff] %v4983_v59   ;;  %v4164_v11 = vadd.f32 %v6685_v35, %v3933_v28  ;;  %v3936_v49 = vadd.f32 %v5343_v36, %v6614_v0  ;;  %v3927_v7 = vpop.f32.mrb[11].mxu0 }
 0x4d0   : > { %5126 = vst [vmem:[%s5922_s19 + $0x10] sm:$0xff] %v4978_v60   ;;  %v4162_v58 = vadd.f32 %v6685_v35, %v3925_v43  ;;  %v3928_v37 = vadd.f32 %v3927_v7, %v6616_v1  ;;  %v6736_v60 = vpop.f32.mrb[56].mxu1 }
 0x4d1   : > { %v4165_v55 = vadd.f32 %v6685_v35, %v3936_v49  ;;  %v4228_v63 = vmax.f32 %v4164_v11, 0.0  ;;  %v6739_v7 = vpop.f32.mrb[57].mxu1 }
 0x4d2   : > { %v4163_v12 = vadd.f32 %v6685_v35, %v3928_v37  ;;  %v4226_v8 = vmax.f32 %v4162_v58, 0.0  ;;  %v6744_v37 = vpop.f32.mrb[58].mxu1 }
 0x4d3   : > { %v4229_v24 = vmax.f32 %v4165_v55, 0.0 }
 0x4d4   : > { %v4227_v0 = vmax.f32 %v4163_v12, 0.0  ;;  %v5346_v45 = vpop.f32.mrb[12].mxu0  ;;  %v6749_v12 = vpop.f32.mrb[59].mxu1 }
 0x4d5   : > { %v4993_v59 = vpack.c.bf16 %v4229_v24, %v4228_v63  ;;  %v3949_v28 = vadd.f32 %v5346_v45, %v6618_v22  ;;  %v3940_v41 = vpop.f32.mrb[13].mxu0 }
 0x4d6   : > { %v4988_v1 = vpack.c.bf16 %v4227_v0, %v4226_v8  ;;  %v3941_v43 = vadd.f32 %v3940_v41, %v6620_v6  ;;  %v5347_v36 = vpop.f32.mrb[14].mxu0 }
 0x4d7   : > { %5129 = vst [vmem:[%s5922_s19 + $0x28] sm:$0xff] %v4993_v59   ;;  %v4168_v11 = vadd.f32 %v6685_v35, %v3949_v28  ;;  %v3952_v49 = vadd.f32 %v5347_v36, %v6622_v21  ;;  %v3943_v58 = vpop.f32.mrb[15].mxu0 }
 0x4d8   : > { %5128 = vst [vmem:[%s5922_s19 + $0x20] sm:$0xff] %v4988_v1   ;;  %v4166_v22 = vadd.f32 %v6685_v35, %v3941_v43  ;;  %v3944_v55 = vadd.f32 %v3943_v58, %v6624_v48  ;;  %v6754_v1 = vpop.f32.mrb[60].mxu1 }
 0x4d9   : > { %v4169_v6 = vadd.f32 %v6685_v35, %v3952_v49  ;;  %v4232_v24 = vmax.f32 %v4168_v11, 0.0  ;;  %v6757_v58 = vpop.f32.mrb[61].mxu1 }
 0x4da   : > { %v4167_v63 = vadd.f32 %v6685_v35, %v3944_v55  ;;  %v4230_v0 = vmax.f32 %v4166_v22, 0.0  ;;  %v6762_v55 = vpop.f32.mrb[62].mxu1 }
 0x4db   : > { %v4233_v8 = vmax.f32 %v4169_v6, 0.0 }
 0x4dc   : > { %v4231_v21 = vmax.f32 %v4167_v63, 0.0  ;;  %v5350_v45 = vpop.f32.mrb[16].mxu0  ;;  %v6767_v63 = vpop.f32.mrb[63].mxu1 }
 0x4dd   : > { %v5003_v59 = vpack.c.bf16 %v4233_v8, %v4232_v24  ;;  %v3965_v28 = vadd.f32 %v5350_v45, %v6626_v9  ;;  %v3956_v41 = vpop.f32.mrb[17].mxu0 }
 0x4de   : > { %v4998_v48 = vpack.c.bf16 %v4231_v21, %v4230_v0  ;;  %v3957_v43 = vadd.f32 %v3956_v41, %v6628_v25  ;;  %v5351_v36 = vpop.f32.mrb[18].mxu0 }
 0x4df   : > { %5131 = vst [vmem:[%s5922_s19 + $0x38] sm:$0xff] %v5003_v59   ;;  %v4172_v11 = vadd.f32 %v6685_v35, %v3965_v28  ;;  %v3968_v49 = vadd.f32 %v5351_v36, %v6630_v31  ;;  %v3959_v22 = vpop.f32.mrb[19].mxu0 }
 0x4e0   : > { %5130 = vst [vmem:[%s5922_s19 + $0x30] sm:$0xff] %v4998_v48   ;;  %v4170_v9 = vadd.f32 %v6685_v35, %v3957_v43  ;;  %v3960_v6 = vadd.f32 %v3959_v22, %v6632_v29 }
 0x4e1   : > { %v4173_v25 = vadd.f32 %v6685_v35, %v3968_v49  ;;  %v4236_v8 = vmax.f32 %v4172_v11, 0.0 }
 0x4e2   : > { %v4171_v24 = vadd.f32 %v6685_v35, %v3960_v6  ;;  %v4234_v21 = vmax.f32 %v4170_v9, 0.0 }
 0x4e3   : > { %v4237_v0 = vmax.f32 %v4173_v25, 0.0 }
 0x4e4   : > { %v4235_v31 = vmax.f32 %v4171_v24, 0.0  ;;  %v5354_v45 = vpop.f32.mrb[20].mxu0 }
 0x4e5   : > { %v5013_v59 = vpack.c.bf16 %v4237_v0, %v4236_v8  ;;  %v3981_v28 = vadd.f32 %v5354_v45, %v6634_v19  ;;  %v3972_v41 = vpop.f32.mrb[21].mxu0 }
 0x4e6   : > { %v5008_v48 = vpack.c.bf16 %v4235_v31, %v4234_v21  ;;  %v3973_v43 = vadd.f32 %v3972_v41, %v6636_v13  ;;  %v5355_v29 = vpop.f32.mrb[22].mxu0 }
 0x4e7   : > { %5133 = vst [vmem:[%s5922_s19 + $0x48] sm:$0xff] %v5013_v59   ;;  %v4176_v36 = vadd.f32 %v6685_v35, %v3981_v28  ;;  %v3984_v49 = vadd.f32 %v5355_v29, %v6638_v34  ;;  %v3975_v22 = vpop.f32.mrb[23].mxu0 }
 0x4e8   : > { %5132 = vst [vmem:[%s5922_s19 + $0x40] sm:$0xff] %v5008_v48   ;;  %v4174_v11 = vadd.f32 %v6685_v35, %v3973_v43  ;;  %v3976_v9 = vadd.f32 %v3975_v22, %v6640_v44 }
 0x4e9   : > { %v4177_v6 = vadd.f32 %v6685_v35, %v3984_v49  ;;  %v4240_v25 = vmax.f32 %v4176_v36, 0.0 }
 0x4ea   : > { %v4175_v19 = vadd.f32 %v6685_v35, %v3976_v9  ;;  %v4238_v24 = vmax.f32 %v4174_v11, 0.0 }
 0x4eb   : > { %v4241_v13 = vmax.f32 %v4177_v6, 0.0 }
 0x4ec   : > { %v4239_v8 = vmax.f32 %v4175_v19, 0.0  ;;  %v5358_v0 = vpop.f32.mrb[24].mxu0 }
 0x4ed   : > { %v5023_v21 = vpack.c.bf16 %v4241_v13, %v4240_v25  ;;  %v3997_v34 = vadd.f32 %v5358_v0, %v6642_v30  ;;  %v3988_v31 = vpop.f32.mrb[25].mxu0 }
 0x4ee   : > { %v5018_v45 = vpack.c.bf16 %v4239_v8, %v4238_v24  ;;  %v3989_v59 = vadd.f32 %v3988_v31, %v6644_v17  ;;  %v5359_v28 = vpop.f32.mrb[26].mxu0 }
 0x4ef   : > { %5135 = vst [vmem:[%s5922_s19 + $0x58] sm:$0xff] %v5023_v21   ;;  %v4180_v44 = vadd.f32 %v6685_v35, %v3997_v34  ;;  %v4000_v41 = vadd.f32 %v5359_v28, %v6646_v40  ;;  %v3991_v48 = vpop.f32.mrb[27].mxu0 }
 0x4f0   : > { %5134 = vst [vmem:[%s5922_s19 + $0x50] sm:$0xff] %v5018_v45   ;;  %v4178_v43 = vadd.f32 %v6685_v35, %v3989_v59  ;;  %v3992_v29 = vadd.f32 %v3991_v48, %v6648_v52 }
 0x4f1   : > { %v4181_v36 = vadd.f32 %v6685_v35, %v4000_v41  ;;  %v4244_v49 = vmax.f32 %v4180_v44, 0.0 }
 0x4f2   : > { %v4179_v30 = vadd.f32 %v6685_v35, %v3992_v29  ;;  %v4242_v22 = vmax.f32 %v4178_v43, 0.0 }
 0x4f3   : > { %v4245_v17 = vmax.f32 %v4181_v36, 0.0 }
 0x4f4   : > { %v4243_v11 = vmax.f32 %v4179_v30, 0.0  ;;  %v5362_v9 = vpop.f32.mrb[28].mxu0 }
 0x4f5   : > { %v5033_v6 = vpack.c.bf16 %v4245_v17, %v4244_v49  ;;  %v4013_v40 = vadd.f32 %v5362_v9, %v6650_v20  ;;  %v4004_v19 = vpop.f32.mrb[29].mxu0 }
 0x4f6   : > { %v5028_v25 = vpack.c.bf16 %v4243_v11, %v4242_v22  ;;  %v4005_v13 = vadd.f32 %v4004_v19, %v6652_v54  ;;  %v5363_v24 = vpop.f32.mrb[30].mxu0 }
 0x4f7   : > { %5137 = vst [vmem:[%s5922_s19 + $0x68] sm:$0xff] %v5033_v6   ;;  %v4184_v52 = vadd.f32 %v6685_v35, %v4013_v40  ;;  %v4016_v8 = vadd.f32 %v5363_v24, %v6654_v50  ;;  %v4007_v0 = vpop.f32.mrb[31].mxu0 }
 0x4f8   : > { %5136 = vst [vmem:[%s5922_s19 + $0x60] sm:$0xff] %v5028_v25   ;;  %v4182_v21 = vadd.f32 %v6685_v35, %v4005_v13  ;;  %v4008_v34 = vadd.f32 %v4007_v0, %v6656_v57 }
 0x4f9   : > { %v4185_v31 = vadd.f32 %v6685_v35, %v4016_v8  ;;  %v4248_v45 = vmax.f32 %v4184_v52, 0.0 }
 0x4fa   : > { %v4183_v20 = vadd.f32 %v6685_v35, %v4008_v34  ;;  %v4246_v59 = vmax.f32 %v4182_v21, 0.0 }
 0x4fb   : > { %v4249_v54 = vmax.f32 %v4185_v31, 0.0 }
 0x4fc   : > { %v4247_v28 = vmax.f32 %v4183_v20, 0.0  ;;  %v5366_v44 = vpop.f32.mrb[32].mxu0 }
 0x4fd   : > { %v5043_v41 = vpack.c.bf16 %v4249_v54, %v4248_v45  ;;  %v4029_v50 = vadd.f32 %v5366_v44, %v6658_v62  ;;  %v4020_v48 = vpop.f32.mrb[33].mxu0 }
 0x4fe   : > { %v5038_v43 = vpack.c.bf16 %v4247_v28, %v4246_v59  ;;  %v4021_v29 = vadd.f32 %v4020_v48, %v6660_v61  ;;  %v5367_v36 = vpop.f32.mrb[34].mxu0 }
 0x4ff   : > { %5139 = vst [vmem:[%s5922_s19 + $0x78] sm:$0xff] %v5043_v41   ;;  %v4188_v57 = vadd.f32 %v6685_v35, %v4029_v50  ;;  %v4032_v30 = vadd.f32 %v5367_v36, %v6662_v53  ;;  %v4023_v49 = vpop.f32.mrb[35].mxu0 }
 0x500   : > { %5138 = vst [vmem:[%s5922_s19 + $0x70] sm:$0xff] %v5038_v43   ;;  %v4186_v17 = vadd.f32 %v6685_v35, %v4021_v29  ;;  %v4024_v22 = vadd.f32 %v4023_v49, %v6664_v42 }
 0x501   : > { %v4189_v11 = vadd.f32 %v6685_v35, %v4032_v30  ;;  %v4252_v9 = vmax.f32 %v4188_v57, 0.0 }
 0x502   : > { %v4187_v62 = vadd.f32 %v6685_v35, %v4024_v22  ;;  %v4250_v6 = vmax.f32 %v4186_v17, 0.0 }
 0x503   : > { %v4253_v61 = vmax.f32 %v4189_v11, 0.0 }
 0x504   : > { %v4251_v40 = vmax.f32 %v4187_v62, 0.0  ;;  %v5370_v19 = vpop.f32.mrb[36].mxu0 }
 0x505   : > { %v5053_v25 = vpack.c.bf16 %v4253_v61, %v4252_v9  ;;  %v4045_v53 = vadd.f32 %v5370_v19, %v6666_v27  ;;  %v4036_v13 = vpop.f32.mrb[37].mxu0 }
 0x506   : > { %v5048_v24 = vpack.c.bf16 %v4251_v40, %v4250_v6  ;;  %v4037_v52 = vadd.f32 %v4036_v13, %v6668_v33  ;;  %v5371_v8 = vpop.f32.mrb[38].mxu0 }
 0x507   : > { %5141 = vst [vmem:[%s5922_s19 + $0x88] sm:$0xff] %v5053_v25   ;;  %v4192_v42 = vadd.f32 %v6685_v35, %v4045_v53  ;;  %v4048_v0 = vadd.f32 %v5371_v8, %v6670_v26  ;;  %v4039_v21 = vpop.f32.mrb[39].mxu0 }
 0x508   : > { %5140 = vst [vmem:[%s5922_s19 + $0x80] sm:$0xff] %v5048_v24   ;;  %v4190_v34 = vadd.f32 %v6685_v35, %v4037_v52  ;;  %v4040_v31 = vadd.f32 %v4039_v21, %v6672_v5 }
 0x509   : > { %v4193_v20 = vadd.f32 %v6685_v35, %v4048_v0  ;;  %v4256_v45 = vmax.f32 %v4192_v42, 0.0 }
 0x50a   : > { %v4191_v27 = vadd.f32 %v6685_v35, %v4040_v31  ;;  %v4254_v54 = vmax.f32 %v4190_v34, 0.0 }
 0x50b   : > { %v4257_v33 = vmax.f32 %v4193_v20, 0.0 }
 0x50c   : > { %v4255_v59 = vmax.f32 %v4191_v27, 0.0  ;;  %v5374_v28 = vpop.f32.mrb[40].mxu0 }
 0x50d   : > { %v5063_v44 = vpack.c.bf16 %v4257_v33, %v4256_v45  ;;  %v4061_v26 = vadd.f32 %v5374_v28, %v6674_v4  ;;  %v4052_v41 = vpop.f32.mrb[41].mxu0 }
 0x50e   : > { %v5058_v50 = vpack.c.bf16 %v4255_v59, %v4254_v54  ;;  %v4053_v48 = vadd.f32 %v4052_v41, %v6676_v38  ;;  %v5375_v43 = vpop.f32.mrb[42].mxu0 }
 0x50f   : > { %5143 = vst [vmem:[%s5922_s19 + $0x98] sm:$0xff] %v5063_v44   ;;  %v4196_v5 = vadd.f32 %v6685_v35, %v4061_v26  ;;  %v4064_v29 = vadd.f32 %v5375_v43, %v6678_v32  ;;  %v4055_v36 = vpop.f32.mrb[43].mxu0 }
 0x510   : > { %5142 = vst [vmem:[%s5922_s19 + $0x90] sm:$0xff] %v5058_v50   ;;  %v4194_v57 = vadd.f32 %v6685_v35, %v4053_v48  ;;  %v4056_v30 = vadd.f32 %v4055_v36, %v6680_v18 }
 0x511   : > { %v4197_v49 = vadd.f32 %v6685_v35, %v4064_v29  ;;  %v4260_v17 = vmax.f32 %v4196_v5, 0.0 }
 0x512   : > { %v4195_v4 = vadd.f32 %v6685_v35, %v4056_v30  ;;  %v4258_v22 = vmax.f32 %v4194_v57, 0.0 }
 0x513   : > { %v4261_v38 = vmax.f32 %v4197_v49, 0.0 }
 0x514   : > { %v4259_v11 = vmax.f32 %v4195_v4, 0.0  ;;  %v5378_v62 = vpop.f32.mrb[44].mxu0 }
 0x515   : > { %v5073_v9 = vpack.c.bf16 %v4261_v38, %v4260_v17  ;;  %v4077_v32 = vadd.f32 %v5378_v62, %v6687_v15  ;;  %v4068_v61 = vpop.f32.mrb[45].mxu0 }
 0x516   : > { %v5068_v6 = vpack.c.bf16 %v4259_v11, %v4258_v22  ;;  %v4069_v40 = vadd.f32 %v4068_v61, %v6689_v23  ;;  %v5379_v19 = vpop.f32.mrb[46].mxu0 }
 0x517   : > { %5145 = vst [vmem:[%s5922_s19 + $0xa8] sm:$0xff] %v5073_v9   ;;  %v4200_v18 = vadd.f32 %v6685_v35, %v4077_v32  ;;  %v4080_v25 = vadd.f32 %v5379_v19, %v6692_v16  ;;  %v4071_v53 = vpop.f32.mrb[47].mxu0 }
 0x518   : > { %5144 = vst [vmem:[%s5922_s19 + $0xa0] sm:$0xff] %v5068_v6   ;;  %v4198_v13 = vadd.f32 %v6685_v35, %v4069_v40  ;;  %v4072_v24 = vadd.f32 %v4071_v53, %v6695_v3 }
 0x519   : > { %v4201_v52 = vadd.f32 %v6685_v35, %v4080_v25  ;;  %v4264_v8 = vmax.f32 %v4200_v18, 0.0 }
 0x51a   : > { %v4199_v15 = vadd.f32 %v6685_v35, %v4072_v24  ;;  %v4262_v42 = vmax.f32 %v4198_v13, 0.0 }
 0x51b   : > { %v4265_v23 = vmax.f32 %v4201_v52, 0.0 }
 0x51c   : > { %v4263_v0 = vmax.f32 %v4199_v15, 0.0  ;;  %v5382_v21 = vpop.f32.mrb[48].mxu0 }
 0x51d   : > { %v5083_v34 = vpack.c.bf16 %v4265_v23, %v4264_v8  ;;  %v4093_v16 = vadd.f32 %v5382_v21, %v6700_v2  ;;  %v4084_v31 = vpop.f32.mrb[49].mxu0 }
 0x51e   : > { %v5078_v20 = vpack.c.bf16 %v4263_v0, %v4262_v42  ;;  %v4085_v27 = vadd.f32 %v4084_v31, %v6703_v39  ;;  %v5383_v45 = vpop.f32.mrb[50].mxu0 }
 0x51f   : > { %5147 = vst [vmem:[%s5922_s19 + $0xb8] sm:$0xff] %v5083_v34   ;;  %v4204_v3 = vadd.f32 %v6685_v35, %v4093_v16  ;;  %v4096_v33 = vadd.f32 %v5383_v45, %v6708_v56  ;;  %v4087_v54 = vpop.f32.mrb[51].mxu0 }
 0x520   : > { %5146 = vst [vmem:[%s5922_s19 + $0xb0] sm:$0xff] %v5078_v20   ;;  %v4202_v59 = vadd.f32 %v6685_v35, %v4085_v27  ;;  %v4088_v28 = vadd.f32 %v4087_v54, %v6713_v46 }
 0x521   : > { %v4205_v44 = vadd.f32 %v6685_v35, %v4096_v33  ;;  %v4268_v26 = vmax.f32 %v4204_v3, 0.0 }
 0x522   : > { %v4203_v2 = vadd.f32 %v6685_v35, %v4088_v28  ;;  %v4266_v41 = vmax.f32 %v4202_v59, 0.0 }
 0x523   : > { %v4269_v39 = vmax.f32 %v4205_v44, 0.0 }
 0x524   : > { %v4267_v50 = vmax.f32 %v4203_v2, 0.0  ;;  %v5386_v48 = vpop.f32.mrb[52].mxu0 }
 0x525   : > { %v5093_v43 = vpack.c.bf16 %v4269_v39, %v4268_v26  ;;  %v4109_v56 = vadd.f32 %v5386_v48, %v6718_v47  ;;  %v4100_v5 = vpop.f32.mrb[53].mxu0 }
 0x526   : > { %v5088_v29 = vpack.c.bf16 %v4267_v50, %v4266_v41  ;;  %v4101_v36 = vadd.f32 %v4100_v5, %v6721_v14  ;;  %v5387_v57 = vpop.f32.mrb[54].mxu0 }
 0x527   : > { %5149 = vst [vmem:[%s5922_s19 + $0xc8] sm:$0xff] %v5093_v43   ;;  %v4208_v46 = vadd.f32 %v6685_v35, %v4109_v56  ;;  %v4112_v30 = vadd.f32 %v5387_v57, %v6726_v51  ;;  %v4103_v49 = vpop.f32.mrb[55].mxu0 }
 0x528   : > { %5148 = vst [vmem:[%s5922_s19 + $0xc0] sm:$0xff] %v5088_v29   ;;  %v4206_v4 = vadd.f32 %v6685_v35, %v4101_v36  ;;  %v4104_v17 = vadd.f32 %v4103_v49, %v6731_v10 }
 0x529   : > { %v4209_v38 = vadd.f32 %v6685_v35, %v4112_v30  ;;  %v4272_v22 = vmax.f32 %v4208_v46, 0.0 }
 0x52a   : > { %v4207_v47 = vadd.f32 %v6685_v35, %v4104_v17  ;;  %v4270_v11 = vmax.f32 %v4206_v4, 0.0 }
 0x52b   : > { %v4273_v14 = vmax.f32 %v4209_v38, 0.0 }
 0x52c   : > { %v4271_v62 = vmax.f32 %v4207_v47, 0.0  ;;  %v5390_v9 = vpop.f32.mrb[56].mxu0 }
 0x52d   : > { %v5103_v32 = vpack.c.bf16 %v4273_v14, %v4272_v22  ;;  %v4125_v51 = vadd.f32 %v5390_v9, %v6736_v60  ;;  %v4116_v61 = vpop.f32.mrb[57].mxu0 }
 0x52e   : > { %v5098_v6 = vpack.c.bf16 %v4271_v62, %v4270_v11  ;;  %v4117_v40 = vadd.f32 %v4116_v61, %v6739_v7  ;;  %v5391_v19 = vpop.f32.mrb[58].mxu0 }
 0x52f   : > { %5151 = vst [vmem:[%s5922_s19 + $0xd8] sm:$0xff] %v5103_v32   ;;  %v4212_v10 = vadd.f32 %v6685_v35, %v4125_v51  ;;  %v4128_v18 = vadd.f32 %v5391_v19, %v6744_v37  ;;  %v4119_v25 = vpop.f32.mrb[59].mxu0 }
 0x530   : > { %5150 = vst [vmem:[%s5922_s19 + $0xd0] sm:$0xff] %v5098_v6   ;;  %v4210_v53 = vadd.f32 %v6685_v35, %v4117_v40  ;;  %v4120_v13 = vadd.f32 %v4119_v25, %v6749_v12 }
 0x531   : > { %v4213_v24 = vadd.f32 %v6685_v35, %v4128_v18  ;;  %v4276_v52 = vmax.f32 %v4212_v10, 0.0 }
 0x532   : > { %v4211_v60 = vadd.f32 %v6685_v35, %v4120_v13  ;;  %v4274_v15 = vmax.f32 %v4210_v53, 0.0 }
 0x533   : > { %v4277_v7 = vmax.f32 %v4213_v24, 0.0 }
 0x534   : > { %v4275_v8 = vmax.f32 %v4211_v60, 0.0  ;;  %v5394_v23 = vpop.f32.mrb[60].mxu0 }
 0x535   : > { %v5113_v42 = vpack.c.bf16 %v4277_v7, %v4276_v52  ;;  %v4141_v37 = vadd.f32 %v5394_v23, %v6754_v1  ;;  %v4132_v0 = vpop.f32.mrb[61].mxu0 }
 0x536   : > { %v5108_v21 = vpack.c.bf16 %v4275_v8, %v4274_v15  ;;  %v4133_v34 = vadd.f32 %v4132_v0, %v6757_v58  ;;  %v5395_v16 = vpop.f32.mrb[62].mxu0 }
 0x537   : > { %5153 = vst [vmem:[%s5922_s19 + $0xe8] sm:$0xff] %v5113_v42   ;;  %v4216_v12 = vadd.f32 %v6685_v35, %v4141_v37  ;;  %v4144_v31 = vadd.f32 %v5395_v16, %v6762_v55  ;;  %v4135_v20 = vpop.f32.mrb[63].mxu0 }
 0x538   : > { %5152 = vst [vmem:[%s5922_s19 + $0xe0] sm:$0xff] %v5108_v21   ;;  %v4214_v27 = vadd.f32 %v6685_v35, %v4133_v34  ;;  %v4136_v45 = vadd.f32 %v4135_v20, %v6767_v63 }
 0x539   : > { %v4217_v1 = vadd.f32 %v6685_v35, %v4144_v31  ;;  %v4280_v33 = vmax.f32 %v4216_v12, 0.0 }
 0x53a   : > { %v4215_v3 = vadd.f32 %v6685_v35, %v4136_v45  ;;  %v4278_v54 = vmax.f32 %v4214_v27, 0.0 }
 0x53b   : > { %v4281_v58 = vmax.f32 %v4217_v1, 0.0 }
 0x53c   : > { %v4279_v59 = vmax.f32 %v4215_v3, 0.0 }
 0x53d   : > { %v5123_v28 = vpack.c.bf16 %v4281_v58, %v4280_v33 }
 0x53e   : > { %v5118_v44 = vpack.c.bf16 %v4279_v59, %v4278_v54 }
 0x53f   : > { %5155 = vst [vmem:[%s5922_s19 + $0xf8] sm:$0xff] %v5123_v28  }
 0x540   : > { %5154 = vst [vmem:[%s5922_s19 + $0xf0] sm:$0xff] %v5118_v44  }
 0x541 PF: > { %s19_s28 = sadd.s32 1, %s5747_s28   ;;  %s6968_s18 = sld [smem:[#allocation6_spill]] }
 0x542   : > { %p16_p6 = scmp.ge.s32.totalorder %s19_s28, 8   ;;  %s6969_s21 = smov %s5723_s22 }
 0x543   : > { %s6970_s22 = smov %s5727_s23  ;;  %s6971_s23 = smov %s5858_s17 }
 0x544   : > { %s6972_s24 = smov %s5739_s26  ;;  %s6973_s25 = smov %s5743_s27 }
 0x545   : > { %s6975_s27 = smov %s6981_s7  ;;  %18 = sbr.rel (!%p16_p6) target bundleno = 8 (0x8), region = 97 }
 0x547   : > { %s6974_s26 = smov %s6968_s18 }
 0x54c   :  { %4624 = vsyncpa [#allocation4], 1 }
 0x54d   :  { %4626 = vsyncpa [#allocation4 + $0x1], 1 }

</bundles_post_ra>
